<compile_context>
chip_gen: v7x
topology: tpu7x:2x2x1
jax: 0.10.0
libtpu: 0.0.40
codegen_flags: <defaults>
</compile_context>

<pallas_src>
import functools

import jax
import jax.numpy as jnp
from jax.experimental import pallas as pl
from jax.experimental.pallas import tpu as pltpu

EPS = 1e-5

# (cin, cout, K) for the 8 conv blocks + the 1x1 "spatial" conv block.
_CONV_CFG = [
    (12, 16, 7), (16, 16, 5), (16, 32, 5), (32, 32, 5),
    (32, 64, 5), (64, 64, 3), (64, 64, 3), (64, 64, 3),
    (64, 128, 1),
]
# (din, dout, has_bn) for the FC head.
_FC_CFG = [(128, 64, True), (64, 32, True), (32, 1, False)]

_L0 = 512          # input length required so that 9 maxpools reach L == 1
_C_IN = 12
_MAX_CIN = 64      # largest conv-input channel count (rows of the pad scratch)
_PAD_BASE = 128    # 128-aligned lane offset of the staged activation
_PAD_LANES = 768   # left guard + 512 + right guard, multiple of 128


# ----------------------------------------------------------------------------
# Fused whole-network kernel.  One grid step = Bt batch samples.
# refs: [x, sel_even, sel_odd, (w,scale,shift)*9 conv, (w,scale,shift)*3 fc,
#        out, pad_scratch]
# ----------------------------------------------------------------------------
def _fused_kernel(*refs, conv_cfg, fc_cfg, l0, bt):
    n_conv = len(conv_cfg)
    n_fc = len(fc_cfg)
    x_ref = refs[0]
    sel_e_ref = refs[1]                 # (512, 256): sel_e[i, j] = (i == 2j)
    sel_o_ref = refs[2]                 # (512, 256): sel_o[i, j] = (i == 2j+1)
    conv_refs = refs[3:3 + 3 * n_conv]
    fc_refs = refs[3 + 3 * n_conv:3 + 3 * n_conv + 3 * n_fc]
    o_ref = refs[3 + 3 * n_conv + 3 * n_fc]
    pad_ref = refs[3 + 3 * n_conv + 3 * n_fc + 1]   # (64, 768) f32 scratch

    # Left 'same'-padding guard lanes: zero once (hoisted); nothing ever
    # overwrites lanes [BASE-8, BASE) afterwards.
    pad_ref[:, _PAD_BASE - 8:_PAD_BASE] = jnp.zeros((_MAX_CIN, 8), jnp.float32)

    feats = []
    for s in range(bt):
        h = x_ref[s]                                   # (12, 512): (C, L)
        L = l0
        for i, (cin, cout, K) in enumerate(conv_cfg):
            w_ref, sc_ref, sh_ref = conv_refs[3 * i:3 * i + 3]
            pad_l = (K - 1) // 2

            if K == 1:
                acc = jnp.dot(w_ref[0], h, preferred_element_type=jnp.float32)
            else:
                # Stage the (cin, L) activation behind a lane-aligned base with
                # zero guards so every tap is a plain windowed read giving
                # exact zero 'same' padding (no per-tap masks / selects).
                pad_ref[:, _PAD_BASE + L:_PAD_BASE + L + 8] = jnp.zeros(
                    (_MAX_CIN, 8), jnp.float32)
                pad_ref[0:cin, _PAD_BASE:_PAD_BASE + L] = h
                acc = None
                for k in range(K):
                    d = k - pad_l
                    xs = pad_ref[0:cin, _PAD_BASE + d:_PAD_BASE + d + L]
                    p = jnp.dot(w_ref[k], xs,
                                preferred_element_type=jnp.float32)
                    acc = p if acc is None else acc + p

            # Conv bias + eval-mode BatchNorm folded into scale/shift, ReLU.
            y = jnp.maximum(acc * sc_ref[...] + sh_ref[...], 0.0)   # (cout, L)

            # MaxPool1d(2), value-level: even/odd lane down-selects are two
            # constant-0/1 matmuls on the (idle) MXU, max on the VPU.
            lh = L // 2
            p_even = jnp.dot(y, sel_e_ref[0:L, 0:lh],
                             preferred_element_type=jnp.float32)
            p_odd = jnp.dot(y, sel_o_ref[0:L, 0:lh],
                            preferred_element_type=jnp.float32)
            h = jnp.maximum(p_even, p_odd)             # (cout, L // 2)
            L = lh
        feats.append(h)                                # (128, 1) per sample

    # FC head on the whole sub-batch at once: (dout, din) x (din, Bt).
    hb = feats[0] if bt == 1 else jnp.concatenate(feats, axis=1)    # (128, Bt)
    for j in range(n_fc):
        w_ref, sc_ref, sh_ref = fc_refs[3 * j:3 * j + 3]
        hb = jnp.dot(w_ref[...], hb, preferred_element_type=jnp.float32)
        hb = hb * sc_ref[...] + sh_ref[...]
        if j < n_fc - 1:
            hb = jnp.maximum(hb, 0.0)                  # Dropout = identity
    o_ref[...] = hb.reshape(1, 1, bt)                  # lane-dense (1, Bt) slab


# ----------------------------------------------------------------------------
# Wrapper: one pallas_call for the whole forward pass.
# ----------------------------------------------------------------------------
def my_network2_forward(x_ncw, params):
    # x_ncw: (B, 12, 512) — PyTorch NCW convention (channels already on the
    # sublane-friendly axis, so no wrapper transpose is needed).
    B, C, L = x_ncw.shape
    assert (C, L) == (_C_IN, _L0), (C, L)
    x = x_ncw.astype(jnp.float32)

    # Batch tile: largest divisor of B (<= 8) that still leaves >= 2 grid
    # steps, so both v7x TensorCores are used via dimension_semantics.
    bt = 1
    for cand in (8, 4, 2):
        if B % cand == 0 and B // cand >= 2:
            bt = cand
            break
    grid = B // bt

    # Constant 0/1 selection matrices for the even/odd maxpool down-selects.
    idx = jnp.arange(_L0, dtype=jnp.int32)[:, None]
    jdx = jnp.arange(_L0 // 2, dtype=jnp.int32)[None, :]
    sel_even = (idx == 2 * jdx).astype(jnp.float32)            # (512, 256)
    sel_odd = (idx == 2 * jdx + 1).astype(jnp.float32)         # (512, 256)

    flat_inputs = [x, sel_even, sel_odd]
    in_specs = [
        pl.BlockSpec((bt, _C_IN, _L0), lambda b: (b, 0, 0)),
        pl.BlockSpec((_L0, _L0 // 2), lambda b: (0, 0)),
        pl.BlockSpec((_L0, _L0 // 2), lambda b: (0, 0)),
    ]
    for (w, scale, shift) in params["conv"]:
        K, co, ci = w.shape
        flat_inputs += [w, scale, shift]
        in_specs += [
            pl.BlockSpec((K, co, ci), lambda b: (0, 0, 0)),
            pl.BlockSpec((co, 1), lambda b: (0, 0)),
            pl.BlockSpec((co, 1), lambda b: (0, 0)),
        ]
    for (w, scale, shift) in params["fc"]:
        do, di = w.shape
        flat_inputs += [w, scale, shift]
        in_specs += [
            pl.BlockSpec((do, di), lambda b: (0, 0)),
            pl.BlockSpec((do, 1), lambda b: (0, 0)),
            pl.BlockSpec((do, 1), lambda b: (0, 0)),
        ]

    kern = functools.partial(_fused_kernel, conv_cfg=tuple(_CONV_CFG),
                             fc_cfg=tuple(_FC_CFG), l0=_L0, bt=bt)
    out = pl.pallas_call(
        kern,
        out_shape=jax.ShapeDtypeStruct((grid, 1, bt), jnp.float32),
        grid_spec=pltpu.PrefetchScalarGridSpec(
            num_scalar_prefetch=0,
            grid=(grid,),
            in_specs=in_specs,
            out_specs=pl.BlockSpec((1, 1, bt), lambda b: (b, 0, 0)),
            scratch_shapes=[pltpu.VMEM((_MAX_CIN, _PAD_LANES), jnp.float32)],
        ),
        compiler_params=pltpu.CompilerParams(
            dimension_semantics=("parallel",)),
    )(*flat_inputs)

    return out.reshape(-1)          # (B,); torch.squeeze gives (B,) for B > 1


# ----------------------------------------------------------------------------
# Deterministic synthetic parameters (PyTorch layouts) and the eval-mode
# BatchNorm fold used by the kernel.
# ----------------------------------------------------------------------------
def init_raw_params(key):
    conv = []
    for (ci, co, K) in _CONV_CFG:
        key, k1, k2, k3, k4, k5, k6 = jax.random.split(key, 7)
        w = jax.random.normal(k1, (co, ci, K), jnp.float32) / jnp.sqrt(ci * K)
        b = 0.05 * jax.random.normal(k2, (co,), jnp.float32)
        gamma = 1.0 + 0.1 * jax.random.normal(k3, (co,), jnp.float32)
        beta = 0.1 * jax.random.normal(k4, (co,), jnp.float32)
        mean = 0.1 * jax.random.normal(k5, (co,), jnp.float32)
        var = 1.0 + 0.1 * jax.random.uniform(k6, (co,), jnp.float32)
        conv.append((w, b, gamma, beta, mean, var))
    fc = []
    for (di, do, has_bn) in _FC_CFG:
        key, k1, k2, k3, k4, k5, k6 = jax.random.split(key, 7)
        w = jax.random.normal(k1, (do, di), jnp.float32) / jnp.sqrt(di)
        b = 0.05 * jax.random.normal(k2, (do,), jnp.float32)
        if has_bn:
            gamma = 1.0 + 0.1 * jax.random.normal(k3, (do,), jnp.float32)
            beta = 0.1 * jax.random.normal(k4, (do,), jnp.float32)
            mean = 0.1 * jax.random.normal(k5, (do,), jnp.float32)
            var = 1.0 + 0.1 * jax.random.uniform(k6, (do,), jnp.float32)
        else:
            gamma = beta = mean = var = None
        fc.append((w, b, gamma, beta, mean, var))
    return {"conv": conv, "fc": fc}


def fold_params(raw_params):
    # General eval-mode fold: scale = gamma/sqrt(var+eps),
    #                         shift = beta + scale * (bias - running_mean).
    conv = []
    for (w, b, gamma, beta, mean, var) in raw_params["conv"]:
        co = w.shape[0]
        scale = gamma / jnp.sqrt(var + EPS)
        shift = beta + scale * (b - mean)
        conv.append((jnp.transpose(w, (2, 0, 1)),           # (K, cout, cin)
                     scale.reshape(co, 1), shift.reshape(co, 1)))
    fc = []
    for (w, b, gamma, beta, mean, var) in raw_params["fc"]:
        do = w.shape[0]
        if gamma is None:
            scale = jnp.ones((do,), jnp.float32)
            shift = b
        else:
            scale = gamma / jnp.sqrt(var + EPS)
            shift = beta + scale * (b - mean)
        fc.append((w, scale.reshape(do, 1), shift.reshape(do, 1)))
    return {"conv": conv, "fc": fc}


# ----------------------------------------------------------------------------
# Pure-JAX reference (un-folded BN, explicit padding) for validation.
# ----------------------------------------------------------------------------
def _reference_forward(x, raw_params):
    hp_prec = jax.lax.Precision.HIGHEST
    h = x.astype(jnp.float32)                                  # (B, 12, 512)
    for (w, b, gamma, beta, mean, var) in raw_params["conv"]:
        co, _, K = w.shape
        pad = (K - 1) // 2
        L = h.shape[-1]
        hp = jnp.pad(h, ((0, 0), (0, 0), (pad, pad)))
        y = jnp.zeros((h.shape[0], co, L), jnp.float32)
        for k in range(K):
            y = y + jnp.einsum("oc,bcl->bol", w[:, :, k], hp[:, :, k:k + L],
                               precision=hp_prec)
        y = y + b[None, :, None]
        y = gamma[None, :, None] * (y - mean[None, :, None]) \
            / jnp.sqrt(var[None, :, None] + EPS) + beta[None, :, None]
        y = jnp.maximum(y, 0.0)
        h = jnp.max(y.reshape(y.shape[0], co, L // 2, 2), axis=-1)
    h = h.reshape(h.shape[0], -1)                              # (B, 128)
    for j, (w, b, gamma, beta, mean, var) in enumerate(raw_params["fc"]):
        h = jnp.einsum("oi,bi->bo", w, h, precision=hp_prec) + b[None, :]
        if gamma is not None:
            h = gamma[None, :] * (h - mean[None, :]) \
                / jnp.sqrt(var[None, :] + EPS) + beta[None, :]
        if j < len(raw_params["fc"]) - 1:
            h = jnp.maximum(h, 0.0)
    return h[:, 0]


if __name__ == "__main__":
    key = jax.random.PRNGKey(0)
    key_x, key_p = jax.random.split(key)

    B = 2
    x = jax.random.normal(key_x, (B, _C_IN, _L0), jnp.float32)
    raw = init_raw_params(key_p)
    params = fold_params(raw)

    fwd = jax.jit(my_network2_forward)
    out = fwd(x, params)
    jax.block_until_ready(out)

    assert out.shape == (B,), out.shape
    assert bool(jnp.all(jnp.isfinite(out)))

    ref = _reference_forward(x, raw)
    assert bool(jnp.allclose(out, ref, rtol=1e-2, atol=1e-2)), (out, ref)
    print("KERNEL_OK")
</pallas_src>

<mosaic_0001>
module attributes {stable_mosaic.version = 11 : i64} {
  func.func @_fused_kernel(%arg0: i32, %arg1: memref<1x12x512xf32, #tpu.memory_space<vmem>>, %arg2: memref<512x256xf32, #tpu.memory_space<vmem>>, %arg3: memref<512x256xf32, #tpu.memory_space<vmem>>, %arg4: memref<7x16x12xf32, #tpu.memory_space<vmem>>, %arg5: memref<16x1xf32, #tpu.memory_space<vmem>>, %arg6: memref<16x1xf32, #tpu.memory_space<vmem>>, %arg7: memref<5x16x16xf32, #tpu.memory_space<vmem>>, %arg8: memref<16x1xf32, #tpu.memory_space<vmem>>, %arg9: memref<16x1xf32, #tpu.memory_space<vmem>>, %arg10: memref<5x32x16xf32, #tpu.memory_space<vmem>>, %arg11: memref<32x1xf32, #tpu.memory_space<vmem>>, %arg12: memref<32x1xf32, #tpu.memory_space<vmem>>, %arg13: memref<5x32x32xf32, #tpu.memory_space<vmem>>, %arg14: memref<32x1xf32, #tpu.memory_space<vmem>>, %arg15: memref<32x1xf32, #tpu.memory_space<vmem>>, %arg16: memref<5x64x32xf32, #tpu.memory_space<vmem>>, %arg17: memref<64x1xf32, #tpu.memory_space<vmem>>, %arg18: memref<64x1xf32, #tpu.memory_space<vmem>>, %arg19: memref<3x64x64xf32, #tpu.memory_space<vmem>>, %arg20: memref<64x1xf32, #tpu.memory_space<vmem>>, %arg21: memref<64x1xf32, #tpu.memory_space<vmem>>, %arg22: memref<3x64x64xf32, #tpu.memory_space<vmem>>, %arg23: memref<64x1xf32, #tpu.memory_space<vmem>>, %arg24: memref<64x1xf32, #tpu.memory_space<vmem>>, %arg25: memref<3x64x64xf32, #tpu.memory_space<vmem>>, %arg26: memref<64x1xf32, #tpu.memory_space<vmem>>, %arg27: memref<64x1xf32, #tpu.memory_space<vmem>>, %arg28: memref<1x128x64xf32, #tpu.memory_space<vmem>>, %arg29: memref<128x1xf32, #tpu.memory_space<vmem>>, %arg30: memref<128x1xf32, #tpu.memory_space<vmem>>, %arg31: memref<64x128xf32, #tpu.memory_space<vmem>>, %arg32: memref<64x1xf32, #tpu.memory_space<vmem>>, %arg33: memref<64x1xf32, #tpu.memory_space<vmem>>, %arg34: memref<32x64xf32, #tpu.memory_space<vmem>>, %arg35: memref<32x1xf32, #tpu.memory_space<vmem>>, %arg36: memref<32x1xf32, #tpu.memory_space<vmem>>, %arg37: memref<1x32xf32, #tpu.memory_space<vmem>>, %arg38: memref<1x1xf32, #tpu.memory_space<vmem>>, %arg39: memref<1x1xf32, #tpu.memory_space<vmem>>, %arg40: memref<1x1x1xf32, #tpu.memory_space<vmem>>, %arg41: memref<64x768xf32, #tpu.memory_space<vmem>>) attributes {dimension_semantics = [#tpu.dimension_semantics<parallel>], iteration_bounds = array<i64: 2>, scalar_prefetch = 0 : i64, scratch_operands = 1 : i64, tpu.core_type = #tpu.core_type<tc>, window_params = [{transform_indices = @transform_0, window_bounds = array<i64: 1, 12, 512>}, {pipeline_mode = #tpu.pipeline_mode<synchronous>, transform_indices = @transform_1, window_bounds = array<i64: 512, 256>}, {pipeline_mode = #tpu.pipeline_mode<synchronous>, transform_indices = @transform_2, window_bounds = array<i64: 512, 256>}, {pipeline_mode = #tpu.pipeline_mode<synchronous>, transform_indices = @transform_3, window_bounds = array<i64: 7, 16, 12>}, {pipeline_mode = #tpu.pipeline_mode<synchronous>, transform_indices = @transform_4, window_bounds = array<i64: 16, 1>}, {pipeline_mode = #tpu.pipeline_mode<synchronous>, transform_indices = @transform_5, window_bounds = array<i64: 16, 1>}, {pipeline_mode = #tpu.pipeline_mode<synchronous>, transform_indices = @transform_6, window_bounds = array<i64: 5, 16, 16>}, {pipeline_mode = #tpu.pipeline_mode<synchronous>, transform_indices = @transform_7, window_bounds = array<i64: 16, 1>}, {pipeline_mode = #tpu.pipeline_mode<synchronous>, transform_indices = @transform_8, window_bounds = array<i64: 16, 1>}, {pipeline_mode = #tpu.pipeline_mode<synchronous>, transform_indices = @transform_9, window_bounds = array<i64: 5, 32, 16>}, {pipeline_mode = #tpu.pipeline_mode<synchronous>, transform_indices = @transform_10, window_bounds = array<i64: 32, 1>}, {pipeline_mode = #tpu.pipeline_mode<synchronous>, transform_indices = @transform_11, window_bounds = array<i64: 32, 1>}, {pipeline_mode = #tpu.pipeline_mode<synchronous>, transform_indices = @transform_12, window_bounds = array<i64: 5, 32, 32>}, {pipeline_mode = #tpu.pipeline_mode<synchronous>, transform_indices = @transform_13, window_bounds = array<i64: 32, 1>}, {pipeline_mode = #tpu.pipeline_mode<synchronous>, transform_indices = @transform_14, window_bounds = array<i64: 32, 1>}, {pipeline_mode = #tpu.pipeline_mode<synchronous>, transform_indices = @transform_15, window_bounds = array<i64: 5, 64, 32>}, {pipeline_mode = #tpu.pipeline_mode<synchronous>, transform_indices = @transform_16, window_bounds = array<i64: 64, 1>}, {pipeline_mode = #tpu.pipeline_mode<synchronous>, transform_indices = @transform_17, window_bounds = array<i64: 64, 1>}, {pipeline_mode = #tpu.pipeline_mode<synchronous>, transform_indices = @transform_18, window_bounds = array<i64: 3, 64, 64>}, {pipeline_mode = #tpu.pipeline_mode<synchronous>, transform_indices = @transform_19, window_bounds = array<i64: 64, 1>}, {pipeline_mode = #tpu.pipeline_mode<synchronous>, transform_indices = @transform_20, window_bounds = array<i64: 64, 1>}, {pipeline_mode = #tpu.pipeline_mode<synchronous>, transform_indices = @transform_21, window_bounds = array<i64: 3, 64, 64>}, {pipeline_mode = #tpu.pipeline_mode<synchronous>, transform_indices = @transform_22, window_bounds = array<i64: 64, 1>}, {pipeline_mode = #tpu.pipeline_mode<synchronous>, transform_indices = @transform_23, window_bounds = array<i64: 64, 1>}, {pipeline_mode = #tpu.pipeline_mode<synchronous>, transform_indices = @transform_24, window_bounds = array<i64: 3, 64, 64>}, {pipeline_mode = #tpu.pipeline_mode<synchronous>, transform_indices = @transform_25, window_bounds = array<i64: 64, 1>}, {pipeline_mode = #tpu.pipeline_mode<synchronous>, transform_indices = @transform_26, window_bounds = array<i64: 64, 1>}, {pipeline_mode = #tpu.pipeline_mode<synchronous>, transform_indices = @transform_27, window_bounds = array<i64: 1, 128, 64>}, {pipeline_mode = #tpu.pipeline_mode<synchronous>, transform_indices = @transform_28, window_bounds = array<i64: 128, 1>}, {pipeline_mode = #tpu.pipeline_mode<synchronous>, transform_indices = @transform_29, window_bounds = array<i64: 128, 1>}, {pipeline_mode = #tpu.pipeline_mode<synchronous>, transform_indices = @transform_30, window_bounds = array<i64: 64, 128>}, {pipeline_mode = #tpu.pipeline_mode<synchronous>, transform_indices = @transform_31, window_bounds = array<i64: 64, 1>}, {pipeline_mode = #tpu.pipeline_mode<synchronous>, transform_indices = @transform_32, window_bounds = array<i64: 64, 1>}, {pipeline_mode = #tpu.pipeline_mode<synchronous>, transform_indices = @transform_33, window_bounds = array<i64: 32, 64>}, {pipeline_mode = #tpu.pipeline_mode<synchronous>, transform_indices = @transform_34, window_bounds = array<i64: 32, 1>}, {pipeline_mode = #tpu.pipeline_mode<synchronous>, transform_indices = @transform_35, window_bounds = array<i64: 32, 1>}, {pipeline_mode = #tpu.pipeline_mode<synchronous>, transform_indices = @transform_36, window_bounds = array<i64: 1, 32>}, {pipeline_mode = #tpu.pipeline_mode<synchronous>, transform_indices = @transform_37, window_bounds = array<i64: 1, 1>}, {pipeline_mode = #tpu.pipeline_mode<synchronous>, transform_indices = @transform_38, window_bounds = array<i64: 1, 1>}, {transform_indices = @transform_39, window_bounds = array<i64: 1, 1, 1>}]} {
    %cst = arith.constant 0.000000e+00 : f32
    %0 = vector.broadcast %cst : f32 to vector<64x8xf32>
    %c0 = arith.constant 0 : index
    %c120 = arith.constant 120 : index
    %1 = vector.load %arg41[%c0, %c120] : memref<64x768xf32, #tpu.memory_space<vmem>>, vector<64x8xf32>
    tpu.vector_store %arg41[%c0, %c120], %0 {strides = array<i32>} : memref<64x768xf32, #tpu.memory_space<vmem>>, vector<64x8xf32>,
    %c0_0 = arith.constant 0 : index
    %c0_1 = arith.constant 0 : index
    %c0_2 = arith.constant 0 : index
    %2 = vector.load %arg1[%c0_0, %c0_1, %c0_2] : memref<1x12x512xf32, #tpu.memory_space<vmem>>, vector<1x12x512xf32>
    %3 = vector.shape_cast %2 : vector<1x12x512xf32> to vector<12x512xf32>
    %cst_3 = arith.constant 0.000000e+00 : f32
    %4 = vector.broadcast %cst_3 : f32 to vector<64x8xf32>
    %c0_4 = arith.constant 0 : index
    %c640 = arith.constant 640 : index
    %5 = vector.load %arg41[%c0_4, %c640] : memref<64x768xf32, #tpu.memory_space<vmem>>, vector<64x8xf32>
    tpu.vector_store %arg41[%c0_4, %c640], %4 {strides = array<i32>} : memref<64x768xf32, #tpu.memory_space<vmem>>, vector<64x8xf32>,
    %c0_5 = arith.constant 0 : index
    %c128 = arith.constant 128 : index
    %6 = vector.load %arg41[%c0_5, %c128] : memref<64x768xf32, #tpu.memory_space<vmem>>, vector<12x512xf32>
    tpu.vector_store %arg41[%c0_5, %c128], %3 {strides = array<i32>} : memref<64x768xf32, #tpu.memory_space<vmem>>, vector<12x512xf32>,
    %c0_6 = arith.constant 0 : index
    %c125 = arith.constant 125 : index
    %7 = vector.load %arg41[%c0_6, %c125] : memref<64x768xf32, #tpu.memory_space<vmem>>, vector<12x512xf32>
    %c0_7 = arith.constant 0 : index
    %c0_8 = arith.constant 0 : index
    %c0_9 = arith.constant 0 : index
    %8 = vector.load %arg4[%c0_7, %c0_8, %c0_9] : memref<7x16x12xf32, #tpu.memory_space<vmem>>, vector<1x16x12xf32>
    %9 = vector.shape_cast %8 : vector<1x16x12xf32> to vector<16x12xf32>
    %cst_10 = arith.constant dense<0.000000e+00> : vector<16x512xf32>
    %10 = tpu.matmul %9, %7, %cst_10 {dimension_numbers = #tpu.dot_dimension_numbers<[1], [0], [0], [1], [0, 0, 1, 1], [], []>} : vector<16x12xf32>, vector<12x512xf32>, vector<16x512xf32> -> vector<16x512xf32>
    %c0_11 = arith.constant 0 : index
    %c126 = arith.constant 126 : index
    %11 = vector.load %arg41[%c0_11, %c126] : memref<64x768xf32, #tpu.memory_space<vmem>>, vector<12x512xf32>
    %c1 = arith.constant 1 : index
    %c0_12 = arith.constant 0 : index
    %c0_13 = arith.constant 0 : index
    %12 = vector.load %arg4[%c1, %c0_12, %c0_13] : memref<7x16x12xf32, #tpu.memory_space<vmem>>, vector<1x16x12xf32>
    %13 = vector.shape_cast %12 : vector<1x16x12xf32> to vector<16x12xf32>
    %cst_14 = arith.constant dense<0.000000e+00> : vector<16x512xf32>
    %14 = tpu.matmul %13, %11, %cst_14 {dimension_numbers = #tpu.dot_dimension_numbers<[1], [0], [0], [1], [0, 0, 1, 1], [], []>} : vector<16x12xf32>, vector<12x512xf32>, vector<16x512xf32> -> vector<16x512xf32>
    %15 = arith.addf %10, %14 : vector<16x512xf32>
    %c0_15 = arith.constant 0 : index
    %c127 = arith.constant 127 : index
    %16 = vector.load %arg41[%c0_15, %c127] : memref<64x768xf32, #tpu.memory_space<vmem>>, vector<12x512xf32>
    %c2 = arith.constant 2 : index
    %c0_16 = arith.constant 0 : index
    %c0_17 = arith.constant 0 : index
    %17 = vector.load %arg4[%c2, %c0_16, %c0_17] : memref<7x16x12xf32, #tpu.memory_space<vmem>>, vector<1x16x12xf32>
    %18 = vector.shape_cast %17 : vector<1x16x12xf32> to vector<16x12xf32>
    %cst_18 = arith.constant dense<0.000000e+00> : vector<16x512xf32>
    %19 = tpu.matmul %18, %16, %cst_18 {dimension_numbers = #tpu.dot_dimension_numbers<[1], [0], [0], [1], [0, 0, 1, 1], [], []>} : vector<16x12xf32>, vector<12x512xf32>, vector<16x512xf32> -> vector<16x512xf32>
    %20 = arith.addf %15, %19 : vector<16x512xf32>
    %c0_19 = arith.constant 0 : index
    %c128_20 = arith.constant 128 : index
    %21 = vector.load %arg41[%c0_19, %c128_20] : memref<64x768xf32, #tpu.memory_space<vmem>>, vector<12x512xf32>
    %c3 = arith.constant 3 : index
    %c0_21 = arith.constant 0 : index
    %c0_22 = arith.constant 0 : index
    %22 = vector.load %arg4[%c3, %c0_21, %c0_22] : memref<7x16x12xf32, #tpu.memory_space<vmem>>, vector<1x16x12xf32>
    %23 = vector.shape_cast %22 : vector<1x16x12xf32> to vector<16x12xf32>
    %cst_23 = arith.constant dense<0.000000e+00> : vector<16x512xf32>
    %24 = tpu.matmul %23, %21, %cst_23 {dimension_numbers = #tpu.dot_dimension_numbers<[1], [0], [0], [1], [0, 0, 1, 1], [], []>} : vector<16x12xf32>, vector<12x512xf32>, vector<16x512xf32> -> vector<16x512xf32>
    %25 = arith.addf %20, %24 : vector<16x512xf32>
    %c0_24 = arith.constant 0 : index
    %c129 = arith.constant 129 : index
    %26 = vector.load %arg41[%c0_24, %c129] : memref<64x768xf32, #tpu.memory_space<vmem>>, vector<12x512xf32>
    %c4 = arith.constant 4 : index
    %c0_25 = arith.constant 0 : index
    %c0_26 = arith.constant 0 : index
    %27 = vector.load %arg4[%c4, %c0_25, %c0_26] : memref<7x16x12xf32, #tpu.memory_space<vmem>>, vector<1x16x12xf32>
    %28 = vector.shape_cast %27 : vector<1x16x12xf32> to vector<16x12xf32>
    %cst_27 = arith.constant dense<0.000000e+00> : vector<16x512xf32>
    %29 = tpu.matmul %28, %26, %cst_27 {dimension_numbers = #tpu.dot_dimension_numbers<[1], [0], [0], [1], [0, 0, 1, 1], [], []>} : vector<16x12xf32>, vector<12x512xf32>, vector<16x512xf32> -> vector<16x512xf32>
    %30 = arith.addf %25, %29 : vector<16x512xf32>
    %c0_28 = arith.constant 0 : index
    %c130 = arith.constant 130 : index
    %31 = vector.load %arg41[%c0_28, %c130] : memref<64x768xf32, #tpu.memory_space<vmem>>, vector<12x512xf32>
    %c5 = arith.constant 5 : index
    %c0_29 = arith.constant 0 : index
    %c0_30 = arith.constant 0 : index
    %32 = vector.load %arg4[%c5, %c0_29, %c0_30] : memref<7x16x12xf32, #tpu.memory_space<vmem>>, vector<1x16x12xf32>
    %33 = vector.shape_cast %32 : vector<1x16x12xf32> to vector<16x12xf32>
    %cst_31 = arith.constant dense<0.000000e+00> : vector<16x512xf32>
    %34 = tpu.matmul %33, %31, %cst_31 {dimension_numbers = #tpu.dot_dimension_numbers<[1], [0], [0], [1], [0, 0, 1, 1], [], []>} : vector<16x12xf32>, vector<12x512xf32>, vector<16x512xf32> -> vector<16x512xf32>
    %35 = arith.addf %30, %34 : vector<16x512xf32>
    %c0_32 = arith.constant 0 : index
    %c131 = arith.constant 131 : index
    %36 = vector.load %arg41[%c0_32, %c131] : memref<64x768xf32, #tpu.memory_space<vmem>>, vector<12x512xf32>
    %c6 = arith.constant 6 : index
    %c0_33 = arith.constant 0 : index
    %c0_34 = arith.constant 0 : index
    %37 = vector.load %arg4[%c6, %c0_33, %c0_34] : memref<7x16x12xf32, #tpu.memory_space<vmem>>, vector<1x16x12xf32>
    %38 = vector.shape_cast %37 : vector<1x16x12xf32> to vector<16x12xf32>
    %cst_35 = arith.constant dense<0.000000e+00> : vector<16x512xf32>
    %39 = tpu.matmul %38, %36, %cst_35 {dimension_numbers = #tpu.dot_dimension_numbers<[1], [0], [0], [1], [0, 0, 1, 1], [], []>} : vector<16x12xf32>, vector<12x512xf32>, vector<16x512xf32> -> vector<16x512xf32>
    %40 = arith.addf %35, %39 : vector<16x512xf32>
    %c0_36 = arith.constant 0 : index
    %c0_37 = arith.constant 0 : index
    %41 = vector.load %arg5[%c0_36, %c0_37] : memref<16x1xf32, #tpu.memory_space<vmem>>, vector<16x1xf32>
    %42 = vector.broadcast %41 : vector<16x1xf32> to vector<16x512xf32>
    %43 = arith.mulf %40, %42 : vector<16x512xf32>
    %c0_38 = arith.constant 0 : index
    %c0_39 = arith.constant 0 : index
    %44 = vector.load %arg6[%c0_38, %c0_39] : memref<16x1xf32, #tpu.memory_space<vmem>>, vector<16x1xf32>
    %45 = vector.broadcast %44 : vector<16x1xf32> to vector<16x512xf32>
    %46 = arith.addf %43, %45 : vector<16x512xf32>
    %cst_40 = arith.constant 0.000000e+00 : f32
    %47 = vector.broadcast %cst_40 : f32 to vector<16x512xf32>
    %48 = arith.maximumf %46, %47 : vector<16x512xf32>
    %c0_41 = arith.constant 0 : index
    %c0_42 = arith.constant 0 : index
    %49 = vector.load %arg2[%c0_41, %c0_42] : memref<512x256xf32, #tpu.memory_space<vmem>>, vector<512x256xf32>
    %cst_43 = arith.constant dense<0.000000e+00> : vector<16x256xf32>
    %50 = tpu.matmul %48, %49, %cst_43 {dimension_numbers = #tpu.dot_dimension_numbers<[1], [0], [0], [1], [0, 0, 1, 1], [], []>} : vector<16x512xf32>, vector<512x256xf32>, vector<16x256xf32> -> vector<16x256xf32>
    %c0_44 = arith.constant 0 : index
    %c0_45 = arith.constant 0 : index
    %51 = vector.load %arg3[%c0_44, %c0_45] : memref<512x256xf32, #tpu.memory_space<vmem>>, vector<512x256xf32>
    %cst_46 = arith.constant dense<0.000000e+00> : vector<16x256xf32>
    %52 = tpu.matmul %48, %51, %cst_46 {dimension_numbers = #tpu.dot_dimension_numbers<[1], [0], [0], [1], [0, 0, 1, 1], [], []>} : vector<16x512xf32>, vector<512x256xf32>, vector<16x256xf32> -> vector<16x256xf32>
    %53 = arith.maximumf %50, %52 : vector<16x256xf32>
    %cst_47 = arith.constant 0.000000e+00 : f32
    %54 = vector.broadcast %cst_47 : f32 to vector<64x8xf32>
    %c0_48 = arith.constant 0 : index
    %c384 = arith.constant 384 : index
    %55 = vector.load %arg41[%c0_48, %c384] : memref<64x768xf32, #tpu.memory_space<vmem>>, vector<64x8xf32>
    tpu.vector_store %arg41[%c0_48, %c384], %54 {strides = array<i32>} : memref<64x768xf32, #tpu.memory_space<vmem>>, vector<64x8xf32>,
    %c0_49 = arith.constant 0 : index
    %c128_50 = arith.constant 128 : index
    %56 = vector.load %arg41[%c0_49, %c128_50] : memref<64x768xf32, #tpu.memory_space<vmem>>, vector<16x256xf32>
    tpu.vector_store %arg41[%c0_49, %c128_50], %53 {strides = array<i32>} : memref<64x768xf32, #tpu.memory_space<vmem>>, vector<16x256xf32>,
    %c0_51 = arith.constant 0 : index
    %c126_52 = arith.constant 126 : index
    %57 = vector.load %arg41[%c0_51, %c126_52] : memref<64x768xf32, #tpu.memory_space<vmem>>, vector<16x256xf32>
    %c0_53 = arith.constant 0 : index
    %c0_54 = arith.constant 0 : index
    %c0_55 = arith.constant 0 : index
    %58 = vector.load %arg7[%c0_53, %c0_54, %c0_55] : memref<5x16x16xf32, #tpu.memory_space<vmem>>, vector<1x16x16xf32>
    %59 = vector.shape_cast %58 : vector<1x16x16xf32> to vector<16x16xf32>
    %cst_56 = arith.constant dense<0.000000e+00> : vector<16x256xf32>
    %60 = tpu.matmul %59, %57, %cst_56 {dimension_numbers = #tpu.dot_dimension_numbers<[1], [0], [0], [1], [0, 0, 1, 1], [], []>} : vector<16x16xf32>, vector<16x256xf32>, vector<16x256xf32> -> vector<16x256xf32>
    %c0_57 = arith.constant 0 : index
    %c127_58 = arith.constant 127 : index
    %61 = vector.load %arg41[%c0_57, %c127_58] : memref<64x768xf32, #tpu.memory_space<vmem>>, vector<16x256xf32>
    %c1_59 = arith.constant 1 : index
    %c0_60 = arith.constant 0 : index
    %c0_61 = arith.constant 0 : index
    %62 = vector.load %arg7[%c1_59, %c0_60, %c0_61] : memref<5x16x16xf32, #tpu.memory_space<vmem>>, vector<1x16x16xf32>
    %63 = vector.shape_cast %62 : vector<1x16x16xf32> to vector<16x16xf32>
    %cst_62 = arith.constant dense<0.000000e+00> : vector<16x256xf32>
    %64 = tpu.matmul %63, %61, %cst_62 {dimension_numbers = #tpu.dot_dimension_numbers<[1], [0], [0], [1], [0, 0, 1, 1], [], []>} : vector<16x16xf32>, vector<16x256xf32>, vector<16x256xf32> -> vector<16x256xf32>
    %65 = arith.addf %60, %64 : vector<16x256xf32>
    %c0_63 = arith.constant 0 : index
    %c128_64 = arith.constant 128 : index
    %66 = vector.load %arg41[%c0_63, %c128_64] : memref<64x768xf32, #tpu.memory_space<vmem>>, vector<16x256xf32>
    %c2_65 = arith.constant 2 : index
    %c0_66 = arith.constant 0 : index
    %c0_67 = arith.constant 0 : index
    %67 = vector.load %arg7[%c2_65, %c0_66, %c0_67] : memref<5x16x16xf32, #tpu.memory_space<vmem>>, vector<1x16x16xf32>
    %68 = vector.shape_cast %67 : vector<1x16x16xf32> to vector<16x16xf32>
    %cst_68 = arith.constant dense<0.000000e+00> : vector<16x256xf32>
    %69 = tpu.matmul %68, %66, %cst_68 {dimension_numbers = #tpu.dot_dimension_numbers<[1], [0], [0], [1], [0, 0, 1, 1], [], []>} : vector<16x16xf32>, vector<16x256xf32>, vector<16x256xf32> -> vector<16x256xf32>
    %70 = arith.addf %65, %69 : vector<16x256xf32>
    %c0_69 = arith.constant 0 : index
    %c129_70 = arith.constant 129 : index
    %71 = vector.load %arg41[%c0_69, %c129_70] : memref<64x768xf32, #tpu.memory_space<vmem>>, vector<16x256xf32>
    %c3_71 = arith.constant 3 : index
    %c0_72 = arith.constant 0 : index
    %c0_73 = arith.constant 0 : index
    %72 = vector.load %arg7[%c3_71, %c0_72, %c0_73] : memref<5x16x16xf32, #tpu.memory_space<vmem>>, vector<1x16x16xf32>
    %73 = vector.shape_cast %72 : vector<1x16x16xf32> to vector<16x16xf32>
    %cst_74 = arith.constant dense<0.000000e+00> : vector<16x256xf32>
    %74 = tpu.matmul %73, %71, %cst_74 {dimension_numbers = #tpu.dot_dimension_numbers<[1], [0], [0], [1], [0, 0, 1, 1], [], []>} : vector<16x16xf32>, vector<16x256xf32>, vector<16x256xf32> -> vector<16x256xf32>
    %75 = arith.addf %70, %74 : vector<16x256xf32>
    %c0_75 = arith.constant 0 : index
    %c130_76 = arith.constant 130 : index
    %76 = vector.load %arg41[%c0_75, %c130_76] : memref<64x768xf32, #tpu.memory_space<vmem>>, vector<16x256xf32>
    %c4_77 = arith.constant 4 : index
    %c0_78 = arith.constant 0 : index
    %c0_79 = arith.constant 0 : index
    %77 = vector.load %arg7[%c4_77, %c0_78, %c0_79] : memref<5x16x16xf32, #tpu.memory_space<vmem>>, vector<1x16x16xf32>
    %78 = vector.shape_cast %77 : vector<1x16x16xf32> to vector<16x16xf32>
    %cst_80 = arith.constant dense<0.000000e+00> : vector<16x256xf32>
    %79 = tpu.matmul %78, %76, %cst_80 {dimension_numbers = #tpu.dot_dimension_numbers<[1], [0], [0], [1], [0, 0, 1, 1], [], []>} : vector<16x16xf32>, vector<16x256xf32>, vector<16x256xf32> -> vector<16x256xf32>
    %80 = arith.addf %75, %79 : vector<16x256xf32>
    %c0_81 = arith.constant 0 : index
    %c0_82 = arith.constant 0 : index
    %81 = vector.load %arg8[%c0_81, %c0_82] : memref<16x1xf32, #tpu.memory_space<vmem>>, vector<16x1xf32>
    %82 = vector.broadcast %81 : vector<16x1xf32> to vector<16x256xf32>
    %83 = arith.mulf %80, %82 : vector<16x256xf32>
    %c0_83 = arith.constant 0 : index
    %c0_84 = arith.constant 0 : index
    %84 = vector.load %arg9[%c0_83, %c0_84] : memref<16x1xf32, #tpu.memory_space<vmem>>, vector<16x1xf32>
    %85 = vector.broadcast %84 : vector<16x1xf32> to vector<16x256xf32>
    %86 = arith.addf %83, %85 : vector<16x256xf32>
    %cst_85 = arith.constant 0.000000e+00 : f32
    %87 = vector.broadcast %cst_85 : f32 to vector<16x256xf32>
    %88 = arith.maximumf %86, %87 : vector<16x256xf32>
    %c0_86 = arith.constant 0 : index
    %c0_87 = arith.constant 0 : index
    %89 = vector.load %arg2[%c0_86, %c0_87] : memref<512x256xf32, #tpu.memory_space<vmem>>, vector<256x128xf32>
    %cst_88 = arith.constant dense<0.000000e+00> : vector<16x128xf32>
    %90 = tpu.matmul %88, %89, %cst_88 {dimension_numbers = #tpu.dot_dimension_numbers<[1], [0], [0], [1], [0, 0, 1, 1], [], []>} : vector<16x256xf32>, vector<256x128xf32>, vector<16x128xf32> -> vector<16x128xf32>
    %c0_89 = arith.constant 0 : index
    %c0_90 = arith.constant 0 : index
    %91 = vector.load %arg3[%c0_89, %c0_90] : memref<512x256xf32, #tpu.memory_space<vmem>>, vector<256x128xf32>
    %cst_91 = arith.constant dense<0.000000e+00> : vector<16x128xf32>
    %92 = tpu.matmul %88, %91, %cst_91 {dimension_numbers = #tpu.dot_dimension_numbers<[1], [0], [0], [1], [0, 0, 1, 1], [], []>} : vector<16x256xf32>, vector<256x128xf32>, vector<16x128xf32> -> vector<16x128xf32>
    %93 = arith.maximumf %90, %92 : vector<16x128xf32>
    %cst_92 = arith.constant 0.000000e+00 : f32
    %94 = vector.broadcast %cst_92 : f32 to vector<64x8xf32>
    %c0_93 = arith.constant 0 : index
    %c256 = arith.constant 256 : index
    %95 = vector.load %arg41[%c0_93, %c256] : memref<64x768xf32, #tpu.memory_space<vmem>>, vector<64x8xf32>
    tpu.vector_store %arg41[%c0_93, %c256], %94 {strides = array<i32>} : memref<64x768xf32, #tpu.memory_space<vmem>>, vector<64x8xf32>,
    %c0_94 = arith.constant 0 : index
    %c128_95 = arith.constant 128 : index
    %96 = vector.load %arg41[%c0_94, %c128_95] : memref<64x768xf32, #tpu.memory_space<vmem>>, vector<16x128xf32>
    tpu.vector_store %arg41[%c0_94, %c128_95], %93 {strides = array<i32>} : memref<64x768xf32, #tpu.memory_space<vmem>>, vector<16x128xf32>,
    %c0_96 = arith.constant 0 : index
    %c126_97 = arith.constant 126 : index
    %97 = vector.load %arg41[%c0_96, %c126_97] : memref<64x768xf32, #tpu.memory_space<vmem>>, vector<16x128xf32>
    %c0_98 = arith.constant 0 : index
    %c0_99 = arith.constant 0 : index
    %c0_100 = arith.constant 0 : index
    %98 = vector.load %arg10[%c0_98, %c0_99, %c0_100] : memref<5x32x16xf32, #tpu.memory_space<vmem>>, vector<1x32x16xf32>
    %99 = vector.shape_cast %98 : vector<1x32x16xf32> to vector<32x16xf32>
    %cst_101 = arith.constant dense<0.000000e+00> : vector<32x128xf32>
    %100 = tpu.matmul %99, %97, %cst_101 {dimension_numbers = #tpu.dot_dimension_numbers<[1], [0], [0], [1], [0, 0, 1, 1], [], []>} : vector<32x16xf32>, vector<16x128xf32>, vector<32x128xf32> -> vector<32x128xf32>
    %c0_102 = arith.constant 0 : index
    %c127_103 = arith.constant 127 : index
    %101 = vector.load %arg41[%c0_102, %c127_103] : memref<64x768xf32, #tpu.memory_space<vmem>>, vector<16x128xf32>
    %c1_104 = arith.constant 1 : index
    %c0_105 = arith.constant 0 : index
    %c0_106 = arith.constant 0 : index
    %102 = vector.load %arg10[%c1_104, %c0_105, %c0_106] : memref<5x32x16xf32, #tpu.memory_space<vmem>>, vector<1x32x16xf32>
    %103 = vector.shape_cast %102 : vector<1x32x16xf32> to vector<32x16xf32>
    %cst_107 = arith.constant dense<0.000000e+00> : vector<32x128xf32>
    %104 = tpu.matmul %103, %101, %cst_107 {dimension_numbers = #tpu.dot_dimension_numbers<[1], [0], [0], [1], [0, 0, 1, 1], [], []>} : vector<32x16xf32>, vector<16x128xf32>, vector<32x128xf32> -> vector<32x128xf32>
    %105 = arith.addf %100, %104 : vector<32x128xf32>
    %c0_108 = arith.constant 0 : index
    %c128_109 = arith.constant 128 : index
    %106 = vector.load %arg41[%c0_108, %c128_109] : memref<64x768xf32, #tpu.memory_space<vmem>>, vector<16x128xf32>
    %c2_110 = arith.constant 2 : index
    %c0_111 = arith.constant 0 : index
    %c0_112 = arith.constant 0 : index
    %107 = vector.load %arg10[%c2_110, %c0_111, %c0_112] : memref<5x32x16xf32, #tpu.memory_space<vmem>>, vector<1x32x16xf32>
    %108 = vector.shape_cast %107 : vector<1x32x16xf32> to vector<32x16xf32>
    %cst_113 = arith.constant dense<0.000000e+00> : vector<32x128xf32>
    %109 = tpu.matmul %108, %106, %cst_113 {dimension_numbers = #tpu.dot_dimension_numbers<[1], [0], [0], [1], [0, 0, 1, 1], [], []>} : vector<32x16xf32>, vector<16x128xf32>, vector<32x128xf32> -> vector<32x128xf32>
    %110 = arith.addf %105, %109 : vector<32x128xf32>
    %c0_114 = arith.constant 0 : index
    %c129_115 = arith.constant 129 : index
    %111 = vector.load %arg41[%c0_114, %c129_115] : memref<64x768xf32, #tpu.memory_space<vmem>>, vector<16x128xf32>
    %c3_116 = arith.constant 3 : index
    %c0_117 = arith.constant 0 : index
    %c0_118 = arith.constant 0 : index
    %112 = vector.load %arg10[%c3_116, %c0_117, %c0_118] : memref<5x32x16xf32, #tpu.memory_space<vmem>>, vector<1x32x16xf32>
    %113 = vector.shape_cast %112 : vector<1x32x16xf32> to vector<32x16xf32>
    %cst_119 = arith.constant dense<0.000000e+00> : vector<32x128xf32>
    %114 = tpu.matmul %113, %111, %cst_119 {dimension_numbers = #tpu.dot_dimension_numbers<[1], [0], [0], [1], [0, 0, 1, 1], [], []>} : vector<32x16xf32>, vector<16x128xf32>, vector<32x128xf32> -> vector<32x128xf32>
    %115 = arith.addf %110, %114 : vector<32x128xf32>
    %c0_120 = arith.constant 0 : index
    %c130_121 = arith.constant 130 : index
    %116 = vector.load %arg41[%c0_120, %c130_121] : memref<64x768xf32, #tpu.memory_space<vmem>>, vector<16x128xf32>
    %c4_122 = arith.constant 4 : index
    %c0_123 = arith.constant 0 : index
    %c0_124 = arith.constant 0 : index
    %117 = vector.load %arg10[%c4_122, %c0_123, %c0_124] : memref<5x32x16xf32, #tpu.memory_space<vmem>>, vector<1x32x16xf32>
    %118 = vector.shape_cast %117 : vector<1x32x16xf32> to vector<32x16xf32>
    %cst_125 = arith.constant dense<0.000000e+00> : vector<32x128xf32>
    %119 = tpu.matmul %118, %116, %cst_125 {dimension_numbers = #tpu.dot_dimension_numbers<[1], [0], [0], [1], [0, 0, 1, 1], [], []>} : vector<32x16xf32>, vector<16x128xf32>, vector<32x128xf32> -> vector<32x128xf32>
    %120 = arith.addf %115, %119 : vector<32x128xf32>
    %c0_126 = arith.constant 0 : index
    %c0_127 = arith.constant 0 : index
    %121 = vector.load %arg11[%c0_126, %c0_127] : memref<32x1xf32, #tpu.memory_space<vmem>>, vector<32x1xf32>
    %122 = vector.broadcast %121 : vector<32x1xf32> to vector<32x128xf32>
    %123 = arith.mulf %120, %122 : vector<32x128xf32>
    %c0_128 = arith.constant 0 : index
    %c0_129 = arith.constant 0 : index
    %124 = vector.load %arg12[%c0_128, %c0_129] : memref<32x1xf32, #tpu.memory_space<vmem>>, vector<32x1xf32>
    %125 = vector.broadcast %124 : vector<32x1xf32> to vector<32x128xf32>
    %126 = arith.addf %123, %125 : vector<32x128xf32>
    %cst_130 = arith.constant 0.000000e+00 : f32
    %127 = vector.broadcast %cst_130 : f32 to vector<32x128xf32>
    %128 = arith.maximumf %126, %127 : vector<32x128xf32>
    %c0_131 = arith.constant 0 : index
    %c0_132 = arith.constant 0 : index
    %129 = vector.load %arg2[%c0_131, %c0_132] : memref<512x256xf32, #tpu.memory_space<vmem>>, vector<128x64xf32>
    %cst_133 = arith.constant dense<0.000000e+00> : vector<32x64xf32>
    %130 = tpu.matmul %128, %129, %cst_133 {dimension_numbers = #tpu.dot_dimension_numbers<[1], [0], [0], [1], [0, 0, 1, 1], [], []>} : vector<32x128xf32>, vector<128x64xf32>, vector<32x64xf32> -> vector<32x64xf32>
    %c0_134 = arith.constant 0 : index
    %c0_135 = arith.constant 0 : index
    %131 = vector.load %arg3[%c0_134, %c0_135] : memref<512x256xf32, #tpu.memory_space<vmem>>, vector<128x64xf32>
    %cst_136 = arith.constant dense<0.000000e+00> : vector<32x64xf32>
    %132 = tpu.matmul %128, %131, %cst_136 {dimension_numbers = #tpu.dot_dimension_numbers<[1], [0], [0], [1], [0, 0, 1, 1], [], []>} : vector<32x128xf32>, vector<128x64xf32>, vector<32x64xf32> -> vector<32x64xf32>
    %133 = arith.maximumf %130, %132 : vector<32x64xf32>
    %cst_137 = arith.constant 0.000000e+00 : f32
    %134 = vector.broadcast %cst_137 : f32 to vector<64x8xf32>
    %c0_138 = arith.constant 0 : index
    %c192 = arith.constant 192 : index
    %135 = vector.load %arg41[%c0_138, %c192] : memref<64x768xf32, #tpu.memory_space<vmem>>, vector<64x8xf32>
    tpu.vector_store %arg41[%c0_138, %c192], %134 {strides = array<i32>} : memref<64x768xf32, #tpu.memory_space<vmem>>, vector<64x8xf32>,
    %c0_139 = arith.constant 0 : index
    %c128_140 = arith.constant 128 : index
    %136 = vector.load %arg41[%c0_139, %c128_140] : memref<64x768xf32, #tpu.memory_space<vmem>>, vector<32x64xf32>
    tpu.vector_store %arg41[%c0_139, %c128_140], %133 {strides = array<i32>} : memref<64x768xf32, #tpu.memory_space<vmem>>, vector<32x64xf32>,
    %c0_141 = arith.constant 0 : index
    %c126_142 = arith.constant 126 : index
    %137 = vector.load %arg41[%c0_141, %c126_142] : memref<64x768xf32, #tpu.memory_space<vmem>>, vector<32x64xf32>
    %c0_143 = arith.constant 0 : index
    %c0_144 = arith.constant 0 : index
    %c0_145 = arith.constant 0 : index
    %138 = vector.load %arg13[%c0_143, %c0_144, %c0_145] : memref<5x32x32xf32, #tpu.memory_space<vmem>>, vector<1x32x32xf32>
    %139 = vector.shape_cast %138 : vector<1x32x32xf32> to vector<32x32xf32>
    %cst_146 = arith.constant dense<0.000000e+00> : vector<32x64xf32>
    %140 = tpu.matmul %139, %137, %cst_146 {dimension_numbers = #tpu.dot_dimension_numbers<[1], [0], [0], [1], [0, 0, 1, 1], [], []>} : vector<32x32xf32>, vector<32x64xf32>, vector<32x64xf32> -> vector<32x64xf32>
    %c0_147 = arith.constant 0 : index
    %c127_148 = arith.constant 127 : index
    %141 = vector.load %arg41[%c0_147, %c127_148] : memref<64x768xf32, #tpu.memory_space<vmem>>, vector<32x64xf32>
    %c1_149 = arith.constant 1 : index
    %c0_150 = arith.constant 0 : index
    %c0_151 = arith.constant 0 : index
    %142 = vector.load %arg13[%c1_149, %c0_150, %c0_151] : memref<5x32x32xf32, #tpu.memory_space<vmem>>, vector<1x32x32xf32>
    %143 = vector.shape_cast %142 : vector<1x32x32xf32> to vector<32x32xf32>
    %cst_152 = arith.constant dense<0.000000e+00> : vector<32x64xf32>
    %144 = tpu.matmul %143, %141, %cst_152 {dimension_numbers = #tpu.dot_dimension_numbers<[1], [0], [0], [1], [0, 0, 1, 1], [], []>} : vector<32x32xf32>, vector<32x64xf32>, vector<32x64xf32> -> vector<32x64xf32>
    %145 = arith.addf %140, %144 : vector<32x64xf32>
    %c0_153 = arith.constant 0 : index
    %c128_154 = arith.constant 128 : index
    %146 = vector.load %arg41[%c0_153, %c128_154] : memref<64x768xf32, #tpu.memory_space<vmem>>, vector<32x64xf32>
    %c2_155 = arith.constant 2 : index
    %c0_156 = arith.constant 0 : index
    %c0_157 = arith.constant 0 : index
    %147 = vector.load %arg13[%c2_155, %c0_156, %c0_157] : memref<5x32x32xf32, #tpu.memory_space<vmem>>, vector<1x32x32xf32>
    %148 = vector.shape_cast %147 : vector<1x32x32xf32> to vector<32x32xf32>
    %cst_158 = arith.constant dense<0.000000e+00> : vector<32x64xf32>
    %149 = tpu.matmul %148, %146, %cst_158 {dimension_numbers = #tpu.dot_dimension_numbers<[1], [0], [0], [1], [0, 0, 1, 1], [], []>} : vector<32x32xf32>, vector<32x64xf32>, vector<32x64xf32> -> vector<32x64xf32>
    %150 = arith.addf %145, %149 : vector<32x64xf32>
    %c0_159 = arith.constant 0 : index
    %c129_160 = arith.constant 129 : index
    %151 = vector.load %arg41[%c0_159, %c129_160] : memref<64x768xf32, #tpu.memory_space<vmem>>, vector<32x64xf32>
    %c3_161 = arith.constant 3 : index
    %c0_162 = arith.constant 0 : index
    %c0_163 = arith.constant 0 : index
    %152 = vector.load %arg13[%c3_161, %c0_162, %c0_163] : memref<5x32x32xf32, #tpu.memory_space<vmem>>, vector<1x32x32xf32>
    %153 = vector.shape_cast %152 : vector<1x32x32xf32> to vector<32x32xf32>
    %cst_164 = arith.constant dense<0.000000e+00> : vector<32x64xf32>
    %154 = tpu.matmul %153, %151, %cst_164 {dimension_numbers = #tpu.dot_dimension_numbers<[1], [0], [0], [1], [0, 0, 1, 1], [], []>} : vector<32x32xf32>, vector<32x64xf32>, vector<32x64xf32> -> vector<32x64xf32>
    %155 = arith.addf %150, %154 : vector<32x64xf32>
    %c0_165 = arith.constant 0 : index
    %c130_166 = arith.constant 130 : index
    %156 = vector.load %arg41[%c0_165, %c130_166] : memref<64x768xf32, #tpu.memory_space<vmem>>, vector<32x64xf32>
    %c4_167 = arith.constant 4 : index
    %c0_168 = arith.constant 0 : index
    %c0_169 = arith.constant 0 : index
    %157 = vector.load %arg13[%c4_167, %c0_168, %c0_169] : memref<5x32x32xf32, #tpu.memory_space<vmem>>, vector<1x32x32xf32>
    %158 = vector.shape_cast %157 : vector<1x32x32xf32> to vector<32x32xf32>
    %cst_170 = arith.constant dense<0.000000e+00> : vector<32x64xf32>
    %159 = tpu.matmul %158, %156, %cst_170 {dimension_numbers = #tpu.dot_dimension_numbers<[1], [0], [0], [1], [0, 0, 1, 1], [], []>} : vector<32x32xf32>, vector<32x64xf32>, vector<32x64xf32> -> vector<32x64xf32>
    %160 = arith.addf %155, %159 : vector<32x64xf32>
    %c0_171 = arith.constant 0 : index
    %c0_172 = arith.constant 0 : index
    %161 = vector.load %arg14[%c0_171, %c0_172] : memref<32x1xf32, #tpu.memory_space<vmem>>, vector<32x1xf32>
    %162 = vector.broadcast %161 : vector<32x1xf32> to vector<32x64xf32>
    %163 = arith.mulf %160, %162 : vector<32x64xf32>
    %c0_173 = arith.constant 0 : index
    %c0_174 = arith.constant 0 : index
    %164 = vector.load %arg15[%c0_173, %c0_174] : memref<32x1xf32, #tpu.memory_space<vmem>>, vector<32x1xf32>
    %165 = vector.broadcast %164 : vector<32x1xf32> to vector<32x64xf32>
    %166 = arith.addf %163, %165 : vector<32x64xf32>
    %cst_175 = arith.constant 0.000000e+00 : f32
    %167 = vector.broadcast %cst_175 : f32 to vector<32x64xf32>
    %168 = arith.maximumf %166, %167 : vector<32x64xf32>
    %c0_176 = arith.constant 0 : index
    %c0_177 = arith.constant 0 : index
    %169 = vector.load %arg2[%c0_176, %c0_177] : memref<512x256xf32, #tpu.memory_space<vmem>>, vector<64x32xf32>
    %cst_178 = arith.constant dense<0.000000e+00> : vector<32x32xf32>
    %170 = tpu.matmul %168, %169, %cst_178 {dimension_numbers = #tpu.dot_dimension_numbers<[1], [0], [0], [1], [0, 0, 1, 1], [], []>} : vector<32x64xf32>, vector<64x32xf32>, vector<32x32xf32> -> vector<32x32xf32>
    %c0_179 = arith.constant 0 : index
    %c0_180 = arith.constant 0 : index
    %171 = vector.load %arg3[%c0_179, %c0_180] : memref<512x256xf32, #tpu.memory_space<vmem>>, vector<64x32xf32>
    %cst_181 = arith.constant dense<0.000000e+00> : vector<32x32xf32>
    %172 = tpu.matmul %168, %171, %cst_181 {dimension_numbers = #tpu.dot_dimension_numbers<[1], [0], [0], [1], [0, 0, 1, 1], [], []>} : vector<32x64xf32>, vector<64x32xf32>, vector<32x32xf32> -> vector<32x32xf32>
    %173 = arith.maximumf %170, %172 : vector<32x32xf32>
    %cst_182 = arith.constant 0.000000e+00 : f32
    %174 = vector.broadcast %cst_182 : f32 to vector<64x8xf32>
    %c0_183 = arith.constant 0 : index
    %c160 = arith.constant 160 : index
    %175 = vector.load %arg41[%c0_183, %c160] : memref<64x768xf32, #tpu.memory_space<vmem>>, vector<64x8xf32>
    tpu.vector_store %arg41[%c0_183, %c160], %174 {strides = array<i32>} : memref<64x768xf32, #tpu.memory_space<vmem>>, vector<64x8xf32>,
    %c0_184 = arith.constant 0 : index
    %c128_185 = arith.constant 128 : index
    %176 = vector.load %arg41[%c0_184, %c128_185] : memref<64x768xf32, #tpu.memory_space<vmem>>, vector<32x32xf32>
    tpu.vector_store %arg41[%c0_184, %c128_185], %173 {strides = array<i32>} : memref<64x768xf32, #tpu.memory_space<vmem>>, vector<32x32xf32>,
    %c0_186 = arith.constant 0 : index
    %c126_187 = arith.constant 126 : index
    %177 = vector.load %arg41[%c0_186, %c126_187] : memref<64x768xf32, #tpu.memory_space<vmem>>, vector<32x32xf32>
    %c0_188 = arith.constant 0 : index
    %c0_189 = arith.constant 0 : index
    %c0_190 = arith.constant 0 : index
    %178 = vector.load %arg16[%c0_188, %c0_189, %c0_190] : memref<5x64x32xf32, #tpu.memory_space<vmem>>, vector<1x64x32xf32>
    %179 = vector.shape_cast %178 : vector<1x64x32xf32> to vector<64x32xf32>
    %cst_191 = arith.constant dense<0.000000e+00> : vector<64x32xf32>
    %180 = tpu.matmul %179, %177, %cst_191 {dimension_numbers = #tpu.dot_dimension_numbers<[1], [0], [0], [1], [0, 0, 1, 1], [], []>} : vector<64x32xf32>, vector<32x32xf32>, vector<64x32xf32> -> vector<64x32xf32>
    %c0_192 = arith.constant 0 : index
    %c127_193 = arith.constant 127 : index
    %181 = vector.load %arg41[%c0_192, %c127_193] : memref<64x768xf32, #tpu.memory_space<vmem>>, vector<32x32xf32>
    %c1_194 = arith.constant 1 : index
    %c0_195 = arith.constant 0 : index
    %c0_196 = arith.constant 0 : index
    %182 = vector.load %arg16[%c1_194, %c0_195, %c0_196] : memref<5x64x32xf32, #tpu.memory_space<vmem>>, vector<1x64x32xf32>
    %183 = vector.shape_cast %182 : vector<1x64x32xf32> to vector<64x32xf32>
    %cst_197 = arith.constant dense<0.000000e+00> : vector<64x32xf32>
    %184 = tpu.matmul %183, %181, %cst_197 {dimension_numbers = #tpu.dot_dimension_numbers<[1], [0], [0], [1], [0, 0, 1, 1], [], []>} : vector<64x32xf32>, vector<32x32xf32>, vector<64x32xf32> -> vector<64x32xf32>
    %185 = arith.addf %180, %184 : vector<64x32xf32>
    %c0_198 = arith.constant 0 : index
    %c128_199 = arith.constant 128 : index
    %186 = vector.load %arg41[%c0_198, %c128_199] : memref<64x768xf32, #tpu.memory_space<vmem>>, vector<32x32xf32>
    %c2_200 = arith.constant 2 : index
    %c0_201 = arith.constant 0 : index
    %c0_202 = arith.constant 0 : index
    %187 = vector.load %arg16[%c2_200, %c0_201, %c0_202] : memref<5x64x32xf32, #tpu.memory_space<vmem>>, vector<1x64x32xf32>
    %188 = vector.shape_cast %187 : vector<1x64x32xf32> to vector<64x32xf32>
    %cst_203 = arith.constant dense<0.000000e+00> : vector<64x32xf32>
    %189 = tpu.matmul %188, %186, %cst_203 {dimension_numbers = #tpu.dot_dimension_numbers<[1], [0], [0], [1], [0, 0, 1, 1], [], []>} : vector<64x32xf32>, vector<32x32xf32>, vector<64x32xf32> -> vector<64x32xf32>
    %190 = arith.addf %185, %189 : vector<64x32xf32>
    %c0_204 = arith.constant 0 : index
    %c129_205 = arith.constant 129 : index
    %191 = vector.load %arg41[%c0_204, %c129_205] : memref<64x768xf32, #tpu.memory_space<vmem>>, vector<32x32xf32>
    %c3_206 = arith.constant 3 : index
    %c0_207 = arith.constant 0 : index
    %c0_208 = arith.constant 0 : index
    %192 = vector.load %arg16[%c3_206, %c0_207, %c0_208] : memref<5x64x32xf32, #tpu.memory_space<vmem>>, vector<1x64x32xf32>
    %193 = vector.shape_cast %192 : vector<1x64x32xf32> to vector<64x32xf32>
    %cst_209 = arith.constant dense<0.000000e+00> : vector<64x32xf32>
    %194 = tpu.matmul %193, %191, %cst_209 {dimension_numbers = #tpu.dot_dimension_numbers<[1], [0], [0], [1], [0, 0, 1, 1], [], []>} : vector<64x32xf32>, vector<32x32xf32>, vector<64x32xf32> -> vector<64x32xf32>
    %195 = arith.addf %190, %194 : vector<64x32xf32>
    %c0_210 = arith.constant 0 : index
    %c130_211 = arith.constant 130 : index
    %196 = vector.load %arg41[%c0_210, %c130_211] : memref<64x768xf32, #tpu.memory_space<vmem>>, vector<32x32xf32>
    %c4_212 = arith.constant 4 : index
    %c0_213 = arith.constant 0 : index
    %c0_214 = arith.constant 0 : index
    %197 = vector.load %arg16[%c4_212, %c0_213, %c0_214] : memref<5x64x32xf32, #tpu.memory_space<vmem>>, vector<1x64x32xf32>
    %198 = vector.shape_cast %197 : vector<1x64x32xf32> to vector<64x32xf32>
    %cst_215 = arith.constant dense<0.000000e+00> : vector<64x32xf32>
    %199 = tpu.matmul %198, %196, %cst_215 {dimension_numbers = #tpu.dot_dimension_numbers<[1], [0], [0], [1], [0, 0, 1, 1], [], []>} : vector<64x32xf32>, vector<32x32xf32>, vector<64x32xf32> -> vector<64x32xf32>
    %200 = arith.addf %195, %199 : vector<64x32xf32>
    %c0_216 = arith.constant 0 : index
    %c0_217 = arith.constant 0 : index
    %201 = vector.load %arg17[%c0_216, %c0_217] : memref<64x1xf32, #tpu.memory_space<vmem>>, vector<64x1xf32>
    %202 = vector.broadcast %201 : vector<64x1xf32> to vector<64x32xf32>
    %203 = arith.mulf %200, %202 : vector<64x32xf32>
    %c0_218 = arith.constant 0 : index
    %c0_219 = arith.constant 0 : index
    %204 = vector.load %arg18[%c0_218, %c0_219] : memref<64x1xf32, #tpu.memory_space<vmem>>, vector<64x1xf32>
    %205 = vector.broadcast %204 : vector<64x1xf32> to vector<64x32xf32>
    %206 = arith.addf %203, %205 : vector<64x32xf32>
    %cst_220 = arith.constant 0.000000e+00 : f32
    %207 = vector.broadcast %cst_220 : f32 to vector<64x32xf32>
    %208 = arith.maximumf %206, %207 : vector<64x32xf32>
    %c0_221 = arith.constant 0 : index
    %c0_222 = arith.constant 0 : index
    %209 = vector.load %arg2[%c0_221, %c0_222] : memref<512x256xf32, #tpu.memory_space<vmem>>, vector<32x16xf32>
    %cst_223 = arith.constant dense<0.000000e+00> : vector<64x16xf32>
    %210 = tpu.matmul %208, %209, %cst_223 {dimension_numbers = #tpu.dot_dimension_numbers<[1], [0], [0], [1], [0, 0, 1, 1], [], []>} : vector<64x32xf32>, vector<32x16xf32>, vector<64x16xf32> -> vector<64x16xf32>
    %c0_224 = arith.constant 0 : index
    %c0_225 = arith.constant 0 : index
    %211 = vector.load %arg3[%c0_224, %c0_225] : memref<512x256xf32, #tpu.memory_space<vmem>>, vector<32x16xf32>
    %cst_226 = arith.constant dense<0.000000e+00> : vector<64x16xf32>
    %212 = tpu.matmul %208, %211, %cst_226 {dimension_numbers = #tpu.dot_dimension_numbers<[1], [0], [0], [1], [0, 0, 1, 1], [], []>} : vector<64x32xf32>, vector<32x16xf32>, vector<64x16xf32> -> vector<64x16xf32>
    %213 = arith.maximumf %210, %212 : vector<64x16xf32>
    %cst_227 = arith.constant 0.000000e+00 : f32
    %214 = vector.broadcast %cst_227 : f32 to vector<64x8xf32>
    %c0_228 = arith.constant 0 : index
    %c144 = arith.constant 144 : index
    %215 = vector.load %arg41[%c0_228, %c144] : memref<64x768xf32, #tpu.memory_space<vmem>>, vector<64x8xf32>
    tpu.vector_store %arg41[%c0_228, %c144], %214 {strides = array<i32>} : memref<64x768xf32, #tpu.memory_space<vmem>>, vector<64x8xf32>,
    %c0_229 = arith.constant 0 : index
    %c128_230 = arith.constant 128 : index
    %216 = vector.load %arg41[%c0_229, %c128_230] : memref<64x768xf32, #tpu.memory_space<vmem>>, vector<64x16xf32>
    tpu.vector_store %arg41[%c0_229, %c128_230], %213 {strides = array<i32>} : memref<64x768xf32, #tpu.memory_space<vmem>>, vector<64x16xf32>,
    %c0_231 = arith.constant 0 : index
    %c127_232 = arith.constant 127 : index
    %217 = vector.load %arg41[%c0_231, %c127_232] : memref<64x768xf32, #tpu.memory_space<vmem>>, vector<64x16xf32>
    %c0_233 = arith.constant 0 : index
    %c0_234 = arith.constant 0 : index
    %c0_235 = arith.constant 0 : index
    %218 = vector.load %arg19[%c0_233, %c0_234, %c0_235] : memref<3x64x64xf32, #tpu.memory_space<vmem>>, vector<1x64x64xf32>
    %219 = vector.shape_cast %218 : vector<1x64x64xf32> to vector<64x64xf32>
    %cst_236 = arith.constant dense<0.000000e+00> : vector<64x16xf32>
    %220 = tpu.matmul %219, %217, %cst_236 {dimension_numbers = #tpu.dot_dimension_numbers<[1], [0], [0], [1], [0, 0, 1, 1], [], []>} : vector<64x64xf32>, vector<64x16xf32>, vector<64x16xf32> -> vector<64x16xf32>
    %c0_237 = arith.constant 0 : index
    %c128_238 = arith.constant 128 : index
    %221 = vector.load %arg41[%c0_237, %c128_238] : memref<64x768xf32, #tpu.memory_space<vmem>>, vector<64x16xf32>
    %c1_239 = arith.constant 1 : index
    %c0_240 = arith.constant 0 : index
    %c0_241 = arith.constant 0 : index
    %222 = vector.load %arg19[%c1_239, %c0_240, %c0_241] : memref<3x64x64xf32, #tpu.memory_space<vmem>>, vector<1x64x64xf32>
    %223 = vector.shape_cast %222 : vector<1x64x64xf32> to vector<64x64xf32>
    %cst_242 = arith.constant dense<0.000000e+00> : vector<64x16xf32>
    %224 = tpu.matmul %223, %221, %cst_242 {dimension_numbers = #tpu.dot_dimension_numbers<[1], [0], [0], [1], [0, 0, 1, 1], [], []>} : vector<64x64xf32>, vector<64x16xf32>, vector<64x16xf32> -> vector<64x16xf32>
    %225 = arith.addf %220, %224 : vector<64x16xf32>
    %c0_243 = arith.constant 0 : index
    %c129_244 = arith.constant 129 : index
    %226 = vector.load %arg41[%c0_243, %c129_244] : memref<64x768xf32, #tpu.memory_space<vmem>>, vector<64x16xf32>
    %c2_245 = arith.constant 2 : index
    %c0_246 = arith.constant 0 : index
    %c0_247 = arith.constant 0 : index
    %227 = vector.load %arg19[%c2_245, %c0_246, %c0_247] : memref<3x64x64xf32, #tpu.memory_space<vmem>>, vector<1x64x64xf32>
    %228 = vector.shape_cast %227 : vector<1x64x64xf32> to vector<64x64xf32>
    %cst_248 = arith.constant dense<0.000000e+00> : vector<64x16xf32>
    %229 = tpu.matmul %228, %226, %cst_248 {dimension_numbers = #tpu.dot_dimension_numbers<[1], [0], [0], [1], [0, 0, 1, 1], [], []>} : vector<64x64xf32>, vector<64x16xf32>, vector<64x16xf32> -> vector<64x16xf32>
    %230 = arith.addf %225, %229 : vector<64x16xf32>
    %c0_249 = arith.constant 0 : index
    %c0_250 = arith.constant 0 : index
    %231 = vector.load %arg20[%c0_249, %c0_250] : memref<64x1xf32, #tpu.memory_space<vmem>>, vector<64x1xf32>
    %232 = vector.broadcast %231 : vector<64x1xf32> to vector<64x16xf32>
    %233 = arith.mulf %230, %232 : vector<64x16xf32>
    %c0_251 = arith.constant 0 : index
    %c0_252 = arith.constant 0 : index
    %234 = vector.load %arg21[%c0_251, %c0_252] : memref<64x1xf32, #tpu.memory_space<vmem>>, vector<64x1xf32>
    %235 = vector.broadcast %234 : vector<64x1xf32> to vector<64x16xf32>
    %236 = arith.addf %233, %235 : vector<64x16xf32>
    %cst_253 = arith.constant 0.000000e+00 : f32
    %237 = vector.broadcast %cst_253 : f32 to vector<64x16xf32>
    %238 = arith.maximumf %236, %237 : vector<64x16xf32>
    %c0_254 = arith.constant 0 : index
    %c0_255 = arith.constant 0 : index
    %239 = vector.load %arg2[%c0_254, %c0_255] : memref<512x256xf32, #tpu.memory_space<vmem>>, vector<16x8xf32>
    %cst_256 = arith.constant dense<0.000000e+00> : vector<64x8xf32>
    %240 = tpu.matmul %238, %239, %cst_256 {dimension_numbers = #tpu.dot_dimension_numbers<[1], [0], [0], [1], [0, 0, 1, 1], [], []>} : vector<64x16xf32>, vector<16x8xf32>, vector<64x8xf32> -> vector<64x8xf32>
    %c0_257 = arith.constant 0 : index
    %c0_258 = arith.constant 0 : index
    %241 = vector.load %arg3[%c0_257, %c0_258] : memref<512x256xf32, #tpu.memory_space<vmem>>, vector<16x8xf32>
    %cst_259 = arith.constant dense<0.000000e+00> : vector<64x8xf32>
    %242 = tpu.matmul %238, %241, %cst_259 {dimension_numbers = #tpu.dot_dimension_numbers<[1], [0], [0], [1], [0, 0, 1, 1], [], []>} : vector<64x16xf32>, vector<16x8xf32>, vector<64x8xf32> -> vector<64x8xf32>
    %243 = arith.maximumf %240, %242 : vector<64x8xf32>
    %cst_260 = arith.constant 0.000000e+00 : f32
    %244 = vector.broadcast %cst_260 : f32 to vector<64x8xf32>
    %c0_261 = arith.constant 0 : index
    %c136 = arith.constant 136 : index
    %245 = vector.load %arg41[%c0_261, %c136] : memref<64x768xf32, #tpu.memory_space<vmem>>, vector<64x8xf32>
    tpu.vector_store %arg41[%c0_261, %c136], %244 {strides = array<i32>} : memref<64x768xf32, #tpu.memory_space<vmem>>, vector<64x8xf32>,
    %c0_262 = arith.constant 0 : index
    %c128_263 = arith.constant 128 : index
    %246 = vector.load %arg41[%c0_262, %c128_263] : memref<64x768xf32, #tpu.memory_space<vmem>>, vector<64x8xf32>
    tpu.vector_store %arg41[%c0_262, %c128_263], %243 {strides = array<i32>} : memref<64x768xf32, #tpu.memory_space<vmem>>, vector<64x8xf32>,
    %c0_264 = arith.constant 0 : index
    %c127_265 = arith.constant 127 : index
    %247 = vector.load %arg41[%c0_264, %c127_265] : memref<64x768xf32, #tpu.memory_space<vmem>>, vector<64x8xf32>
    %c0_266 = arith.constant 0 : index
    %c0_267 = arith.constant 0 : index
    %c0_268 = arith.constant 0 : index
    %248 = vector.load %arg22[%c0_266, %c0_267, %c0_268] : memref<3x64x64xf32, #tpu.memory_space<vmem>>, vector<1x64x64xf32>
    %249 = vector.shape_cast %248 : vector<1x64x64xf32> to vector<64x64xf32>
    %cst_269 = arith.constant dense<0.000000e+00> : vector<64x8xf32>
    %250 = tpu.matmul %249, %247, %cst_269 {dimension_numbers = #tpu.dot_dimension_numbers<[1], [0], [0], [1], [0, 0, 1, 1], [], []>} : vector<64x64xf32>, vector<64x8xf32>, vector<64x8xf32> -> vector<64x8xf32>
    %c0_270 = arith.constant 0 : index
    %c128_271 = arith.constant 128 : index
    %251 = vector.load %arg41[%c0_270, %c128_271] : memref<64x768xf32, #tpu.memory_space<vmem>>, vector<64x8xf32>
    %c1_272 = arith.constant 1 : index
    %c0_273 = arith.constant 0 : index
    %c0_274 = arith.constant 0 : index
    %252 = vector.load %arg22[%c1_272, %c0_273, %c0_274] : memref<3x64x64xf32, #tpu.memory_space<vmem>>, vector<1x64x64xf32>
    %253 = vector.shape_cast %252 : vector<1x64x64xf32> to vector<64x64xf32>
    %cst_275 = arith.constant dense<0.000000e+00> : vector<64x8xf32>
    %254 = tpu.matmul %253, %251, %cst_275 {dimension_numbers = #tpu.dot_dimension_numbers<[1], [0], [0], [1], [0, 0, 1, 1], [], []>} : vector<64x64xf32>, vector<64x8xf32>, vector<64x8xf32> -> vector<64x8xf32>
    %255 = arith.addf %250, %254 : vector<64x8xf32>
    %c0_276 = arith.constant 0 : index
    %c129_277 = arith.constant 129 : index
    %256 = vector.load %arg41[%c0_276, %c129_277] : memref<64x768xf32, #tpu.memory_space<vmem>>, vector<64x8xf32>
    %c2_278 = arith.constant 2 : index
    %c0_279 = arith.constant 0 : index
    %c0_280 = arith.constant 0 : index
    %257 = vector.load %arg22[%c2_278, %c0_279, %c0_280] : memref<3x64x64xf32, #tpu.memory_space<vmem>>, vector<1x64x64xf32>
    %258 = vector.shape_cast %257 : vector<1x64x64xf32> to vector<64x64xf32>
    %cst_281 = arith.constant dense<0.000000e+00> : vector<64x8xf32>
    %259 = tpu.matmul %258, %256, %cst_281 {dimension_numbers = #tpu.dot_dimension_numbers<[1], [0], [0], [1], [0, 0, 1, 1], [], []>} : vector<64x64xf32>, vector<64x8xf32>, vector<64x8xf32> -> vector<64x8xf32>
    %260 = arith.addf %255, %259 : vector<64x8xf32>
    %c0_282 = arith.constant 0 : index
    %c0_283 = arith.constant 0 : index
    %261 = vector.load %arg23[%c0_282, %c0_283] : memref<64x1xf32, #tpu.memory_space<vmem>>, vector<64x1xf32>
    %262 = vector.broadcast %261 : vector<64x1xf32> to vector<64x8xf32>
    %263 = arith.mulf %260, %262 : vector<64x8xf32>
    %c0_284 = arith.constant 0 : index
    %c0_285 = arith.constant 0 : index
    %264 = vector.load %arg24[%c0_284, %c0_285] : memref<64x1xf32, #tpu.memory_space<vmem>>, vector<64x1xf32>
    %265 = vector.broadcast %264 : vector<64x1xf32> to vector<64x8xf32>
    %266 = arith.addf %263, %265 : vector<64x8xf32>
    %cst_286 = arith.constant 0.000000e+00 : f32
    %267 = vector.broadcast %cst_286 : f32 to vector<64x8xf32>
    %268 = arith.maximumf %266, %267 : vector<64x8xf32>
    %c0_287 = arith.constant 0 : index
    %c0_288 = arith.constant 0 : index
    %269 = vector.load %arg2[%c0_287, %c0_288] : memref<512x256xf32, #tpu.memory_space<vmem>>, vector<8x4xf32>
    %cst_289 = arith.constant dense<0.000000e+00> : vector<64x4xf32>
    %270 = tpu.matmul %268, %269, %cst_289 {dimension_numbers = #tpu.dot_dimension_numbers<[1], [0], [0], [1], [0, 0, 1, 1], [], []>} : vector<64x8xf32>, vector<8x4xf32>, vector<64x4xf32> -> vector<64x4xf32>
    %c0_290 = arith.constant 0 : index
    %c0_291 = arith.constant 0 : index
    %271 = vector.load %arg3[%c0_290, %c0_291] : memref<512x256xf32, #tpu.memory_space<vmem>>, vector<8x4xf32>
    %cst_292 = arith.constant dense<0.000000e+00> : vector<64x4xf32>
    %272 = tpu.matmul %268, %271, %cst_292 {dimension_numbers = #tpu.dot_dimension_numbers<[1], [0], [0], [1], [0, 0, 1, 1], [], []>} : vector<64x8xf32>, vector<8x4xf32>, vector<64x4xf32> -> vector<64x4xf32>
    %273 = arith.maximumf %270, %272 : vector<64x4xf32>
    %cst_293 = arith.constant 0.000000e+00 : f32
    %274 = vector.broadcast %cst_293 : f32 to vector<64x8xf32>
    %c0_294 = arith.constant 0 : index
    %c132 = arith.constant 132 : index
    %275 = vector.load %arg41[%c0_294, %c132] : memref<64x768xf32, #tpu.memory_space<vmem>>, vector<64x8xf32>
    tpu.vector_store %arg41[%c0_294, %c132], %274 {strides = array<i32>} : memref<64x768xf32, #tpu.memory_space<vmem>>, vector<64x8xf32>,
    %c0_295 = arith.constant 0 : index
    %c128_296 = arith.constant 128 : index
    %276 = vector.load %arg41[%c0_295, %c128_296] : memref<64x768xf32, #tpu.memory_space<vmem>>, vector<64x4xf32>
    tpu.vector_store %arg41[%c0_295, %c128_296], %273 {strides = array<i32>} : memref<64x768xf32, #tpu.memory_space<vmem>>, vector<64x4xf32>,
    %c0_297 = arith.constant 0 : index
    %c127_298 = arith.constant 127 : index
    %277 = vector.load %arg41[%c0_297, %c127_298] : memref<64x768xf32, #tpu.memory_space<vmem>>, vector<64x4xf32>
    %c0_299 = arith.constant 0 : index
    %c0_300 = arith.constant 0 : index
    %c0_301 = arith.constant 0 : index
    %278 = vector.load %arg25[%c0_299, %c0_300, %c0_301] : memref<3x64x64xf32, #tpu.memory_space<vmem>>, vector<1x64x64xf32>
    %279 = vector.shape_cast %278 : vector<1x64x64xf32> to vector<64x64xf32>
    %cst_302 = arith.constant dense<0.000000e+00> : vector<64x4xf32>
    %280 = tpu.matmul %279, %277, %cst_302 {dimension_numbers = #tpu.dot_dimension_numbers<[1], [0], [0], [1], [0, 0, 1, 1], [], []>} : vector<64x64xf32>, vector<64x4xf32>, vector<64x4xf32> -> vector<64x4xf32>
    %c0_303 = arith.constant 0 : index
    %c128_304 = arith.constant 128 : index
    %281 = vector.load %arg41[%c0_303, %c128_304] : memref<64x768xf32, #tpu.memory_space<vmem>>, vector<64x4xf32>
    %c1_305 = arith.constant 1 : index
    %c0_306 = arith.constant 0 : index
    %c0_307 = arith.constant 0 : index
    %282 = vector.load %arg25[%c1_305, %c0_306, %c0_307] : memref<3x64x64xf32, #tpu.memory_space<vmem>>, vector<1x64x64xf32>
    %283 = vector.shape_cast %282 : vector<1x64x64xf32> to vector<64x64xf32>
    %cst_308 = arith.constant dense<0.000000e+00> : vector<64x4xf32>
    %284 = tpu.matmul %283, %281, %cst_308 {dimension_numbers = #tpu.dot_dimension_numbers<[1], [0], [0], [1], [0, 0, 1, 1], [], []>} : vector<64x64xf32>, vector<64x4xf32>, vector<64x4xf32> -> vector<64x4xf32>
    %285 = arith.addf %280, %284 : vector<64x4xf32>
    %c0_309 = arith.constant 0 : index
    %c129_310 = arith.constant 129 : index
    %286 = vector.load %arg41[%c0_309, %c129_310] : memref<64x768xf32, #tpu.memory_space<vmem>>, vector<64x4xf32>
    %c2_311 = arith.constant 2 : index
    %c0_312 = arith.constant 0 : index
    %c0_313 = arith.constant 0 : index
    %287 = vector.load %arg25[%c2_311, %c0_312, %c0_313] : memref<3x64x64xf32, #tpu.memory_space<vmem>>, vector<1x64x64xf32>
    %288 = vector.shape_cast %287 : vector<1x64x64xf32> to vector<64x64xf32>
    %cst_314 = arith.constant dense<0.000000e+00> : vector<64x4xf32>
    %289 = tpu.matmul %288, %286, %cst_314 {dimension_numbers = #tpu.dot_dimension_numbers<[1], [0], [0], [1], [0, 0, 1, 1], [], []>} : vector<64x64xf32>, vector<64x4xf32>, vector<64x4xf32> -> vector<64x4xf32>
    %290 = arith.addf %285, %289 : vector<64x4xf32>
    %c0_315 = arith.constant 0 : index
    %c0_316 = arith.constant 0 : index
    %291 = vector.load %arg26[%c0_315, %c0_316] : memref<64x1xf32, #tpu.memory_space<vmem>>, vector<64x1xf32>
    %292 = vector.broadcast %291 : vector<64x1xf32> to vector<64x4xf32>
    %293 = arith.mulf %290, %292 : vector<64x4xf32>
    %c0_317 = arith.constant 0 : index
    %c0_318 = arith.constant 0 : index
    %294 = vector.load %arg27[%c0_317, %c0_318] : memref<64x1xf32, #tpu.memory_space<vmem>>, vector<64x1xf32>
    %295 = vector.broadcast %294 : vector<64x1xf32> to vector<64x4xf32>
    %296 = arith.addf %293, %295 : vector<64x4xf32>
    %cst_319 = arith.constant 0.000000e+00 : f32
    %297 = vector.broadcast %cst_319 : f32 to vector<64x4xf32>
    %298 = arith.maximumf %296, %297 : vector<64x4xf32>
    %c0_320 = arith.constant 0 : index
    %c0_321 = arith.constant 0 : index
    %299 = vector.load %arg2[%c0_320, %c0_321] : memref<512x256xf32, #tpu.memory_space<vmem>>, vector<4x2xf32>
    %cst_322 = arith.constant dense<0.000000e+00> : vector<64x2xf32>
    %300 = tpu.matmul %298, %299, %cst_322 {dimension_numbers = #tpu.dot_dimension_numbers<[1], [0], [0], [1], [0, 0, 1, 1], [], []>} : vector<64x4xf32>, vector<4x2xf32>, vector<64x2xf32> -> vector<64x2xf32>
    %c0_323 = arith.constant 0 : index
    %c0_324 = arith.constant 0 : index
    %301 = vector.load %arg3[%c0_323, %c0_324] : memref<512x256xf32, #tpu.memory_space<vmem>>, vector<4x2xf32>
    %cst_325 = arith.constant dense<0.000000e+00> : vector<64x2xf32>
    %302 = tpu.matmul %298, %301, %cst_325 {dimension_numbers = #tpu.dot_dimension_numbers<[1], [0], [0], [1], [0, 0, 1, 1], [], []>} : vector<64x4xf32>, vector<4x2xf32>, vector<64x2xf32> -> vector<64x2xf32>
    %303 = arith.maximumf %300, %302 : vector<64x2xf32>
    %c0_326 = arith.constant 0 : index
    %c0_327 = arith.constant 0 : index
    %c0_328 = arith.constant 0 : index
    %304 = vector.load %arg28[%c0_326, %c0_327, %c0_328] : memref<1x128x64xf32, #tpu.memory_space<vmem>>, vector<1x128x64xf32>
    %305 = vector.shape_cast %304 : vector<1x128x64xf32> to vector<128x64xf32>
    %cst_329 = arith.constant dense<0.000000e+00> : vector<128x2xf32>
    %306 = tpu.matmul %305, %303, %cst_329 {dimension_numbers = #tpu.dot_dimension_numbers<[1], [0], [0], [1], [0, 0, 1, 1], [], []>} : vector<128x64xf32>, vector<64x2xf32>, vector<128x2xf32> -> vector<128x2xf32>
    %c0_330 = arith.constant 0 : index
    %c0_331 = arith.constant 0 : index
    %307 = vector.load %arg29[%c0_330, %c0_331] : memref<128x1xf32, #tpu.memory_space<vmem>>, vector<128x1xf32>
    %308 = vector.broadcast %307 : vector<128x1xf32> to vector<128x2xf32>
    %309 = arith.mulf %306, %308 : vector<128x2xf32>
    %c0_332 = arith.constant 0 : index
    %c0_333 = arith.constant 0 : index
    %310 = vector.load %arg30[%c0_332, %c0_333] : memref<128x1xf32, #tpu.memory_space<vmem>>, vector<128x1xf32>
    %311 = vector.broadcast %310 : vector<128x1xf32> to vector<128x2xf32>
    %312 = arith.addf %309, %311 : vector<128x2xf32>
    %cst_334 = arith.constant 0.000000e+00 : f32
    %313 = vector.broadcast %cst_334 : f32 to vector<128x2xf32>
    %314 = arith.maximumf %312, %313 : vector<128x2xf32>
    %c0_335 = arith.constant 0 : index
    %c0_336 = arith.constant 0 : index
    %315 = vector.load %arg2[%c0_335, %c0_336] : memref<512x256xf32, #tpu.memory_space<vmem>>, vector<2x1xf32>
    %cst_337 = arith.constant dense<0.000000e+00> : vector<128x1xf32>
    %316 = tpu.matmul %314, %315, %cst_337 {dimension_numbers = #tpu.dot_dimension_numbers<[1], [0], [0], [1], [0, 0, 1, 1], [], []>} : vector<128x2xf32>, vector<2x1xf32>, vector<128x1xf32> -> vector<128x1xf32>
    %c0_338 = arith.constant 0 : index
    %c0_339 = arith.constant 0 : index
    %317 = vector.load %arg3[%c0_338, %c0_339] : memref<512x256xf32, #tpu.memory_space<vmem>>, vector<2x1xf32>
    %cst_340 = arith.constant dense<0.000000e+00> : vector<128x1xf32>
    %318 = tpu.matmul %314, %317, %cst_340 {dimension_numbers = #tpu.dot_dimension_numbers<[1], [0], [0], [1], [0, 0, 1, 1], [], []>} : vector<128x2xf32>, vector<2x1xf32>, vector<128x1xf32> -> vector<128x1xf32>
    %319 = arith.maximumf %316, %318 : vector<128x1xf32>
    %c0_341 = arith.constant 0 : index
    %c0_342 = arith.constant 0 : index
    %320 = vector.load %arg31[%c0_341, %c0_342] : memref<64x128xf32, #tpu.memory_space<vmem>>, vector<64x128xf32>
    %cst_343 = arith.constant dense<0.000000e+00> : vector<64x1xf32>
    %321 = tpu.matmul %320, %319, %cst_343 {dimension_numbers = #tpu.dot_dimension_numbers<[1], [0], [0], [1], [0, 0, 1, 1], [], []>} : vector<64x128xf32>, vector<128x1xf32>, vector<64x1xf32> -> vector<64x1xf32>
    %c0_344 = arith.constant 0 : index
    %c0_345 = arith.constant 0 : index
    %322 = vector.load %arg32[%c0_344, %c0_345] : memref<64x1xf32, #tpu.memory_space<vmem>>, vector<64x1xf32>
    %323 = arith.mulf %321, %322 : vector<64x1xf32>
    %c0_346 = arith.constant 0 : index
    %c0_347 = arith.constant 0 : index
    %324 = vector.load %arg33[%c0_346, %c0_347] : memref<64x1xf32, #tpu.memory_space<vmem>>, vector<64x1xf32>
    %325 = arith.addf %323, %324 : vector<64x1xf32>
    %cst_348 = arith.constant 0.000000e+00 : f32
    %326 = vector.broadcast %cst_348 : f32 to vector<64x1xf32>
    %327 = arith.maximumf %325, %326 : vector<64x1xf32>
    %c0_349 = arith.constant 0 : index
    %c0_350 = arith.constant 0 : index
    %328 = vector.load %arg34[%c0_349, %c0_350] : memref<32x64xf32, #tpu.memory_space<vmem>>, vector<32x64xf32>
    %cst_351 = arith.constant dense<0.000000e+00> : vector<32x1xf32>
    %329 = tpu.matmul %328, %327, %cst_351 {dimension_numbers = #tpu.dot_dimension_numbers<[1], [0], [0], [1], [0, 0, 1, 1], [], []>} : vector<32x64xf32>, vector<64x1xf32>, vector<32x1xf32> -> vector<32x1xf32>
    %c0_352 = arith.constant 0 : index
    %c0_353 = arith.constant 0 : index
    %330 = vector.load %arg35[%c0_352, %c0_353] : memref<32x1xf32, #tpu.memory_space<vmem>>, vector<32x1xf32>
    %331 = arith.mulf %329, %330 : vector<32x1xf32>
    %c0_354 = arith.constant 0 : index
    %c0_355 = arith.constant 0 : index
    %332 = vector.load %arg36[%c0_354, %c0_355] : memref<32x1xf32, #tpu.memory_space<vmem>>, vector<32x1xf32>
    %333 = arith.addf %331, %332 : vector<32x1xf32>
    %cst_356 = arith.constant 0.000000e+00 : f32
    %334 = vector.broadcast %cst_356 : f32 to vector<32x1xf32>
    %335 = arith.maximumf %333, %334 : vector<32x1xf32>
    %c0_357 = arith.constant 0 : index
    %c0_358 = arith.constant 0 : index
    %336 = vector.load %arg37[%c0_357, %c0_358] : memref<1x32xf32, #tpu.memory_space<vmem>>, vector<1x32xf32>
    %cst_359 = arith.constant dense<0.000000e+00> : vector<1x1xf32>
    %337 = tpu.matmul %336, %335, %cst_359 {dimension_numbers = #tpu.dot_dimension_numbers<[1], [0], [0], [1], [0, 0, 1, 1], [], []>} : vector<1x32xf32>, vector<32x1xf32>, vector<1x1xf32> -> vector<1x1xf32>
    %c0_360 = arith.constant 0 : index
    %c0_361 = arith.constant 0 : index
    %338 = vector.load %arg38[%c0_360, %c0_361] : memref<1x1xf32, #tpu.memory_space<vmem>>, vector<1x1xf32>
    %339 = arith.mulf %337, %338 : vector<1x1xf32>
    %c0_362 = arith.constant 0 : index
    %c0_363 = arith.constant 0 : index
    %340 = vector.load %arg39[%c0_362, %c0_363] : memref<1x1xf32, #tpu.memory_space<vmem>>, vector<1x1xf32>
    %341 = arith.addf %339, %340 : vector<1x1xf32>
    %342 = vector.shape_cast %341 : vector<1x1xf32> to vector<1x1x1xf32>
    %c0_364 = arith.constant 0 : index
    %c0_365 = arith.constant 0 : index
    %c0_366 = arith.constant 0 : index
    %343 = vector.load %arg40[%c0_364, %c0_365, %c0_366] : memref<1x1x1xf32, #tpu.memory_space<vmem>>, vector<1x1x1xf32>
    tpu.vector_store %arg40[%c0_364, %c0_365, %c0_366], %342 {strides = array<i32>} : memref<1x1x1xf32, #tpu.memory_space<vmem>>, vector<1x1x1xf32>,
    return
  }
  func.func @transform_0(%arg0: i32) -> (i32, i32, i32) {
    %c0_i32 = arith.constant 0 : i32
    %c0_i32_0 = arith.constant 0 : i32
    %c0_i32_1 = arith.constant 0 : i32
    return %arg0, %c0_i32, %c0_i32_0 : i32, i32, i32
  }
  func.func @transform_1(%arg0: i32) -> (i32, i32) {
    %c0_i32 = arith.constant 0 : i32
    %c0_i32_0 = arith.constant 0 : i32
    %c0_i32_1 = arith.constant 0 : i32
    return %c0_i32, %c0_i32_0 : i32, i32
  }
  func.func @transform_2(%arg0: i32) -> (i32, i32) {
    %c0_i32 = arith.constant 0 : i32
    %c0_i32_0 = arith.constant 0 : i32
    %c0_i32_1 = arith.constant 0 : i32
    return %c0_i32, %c0_i32_0 : i32, i32
  }
  func.func @transform_3(%arg0: i32) -> (i32, i32, i32) {
    %c0_i32 = arith.constant 0 : i32
    %c0_i32_0 = arith.constant 0 : i32
    %c0_i32_1 = arith.constant 0 : i32
    %c0_i32_2 = arith.constant 0 : i32
    return %c0_i32, %c0_i32_0, %c0_i32_1 : i32, i32, i32
  }
  func.func @transform_4(%arg0: i32) -> (i32, i32) {
    %c0_i32 = arith.constant 0 : i32
    %c0_i32_0 = arith.constant 0 : i32
    %c0_i32_1 = arith.constant 0 : i32
    return %c0_i32, %c0_i32_0 : i32, i32
  }
  func.func @transform_5(%arg0: i32) -> (i32, i32) {
    %c0_i32 = arith.constant 0 : i32
    %c0_i32_0 = arith.constant 0 : i32
    %c0_i32_1 = arith.constant 0 : i32
    return %c0_i32, %c0_i32_0 : i32, i32
  }
  func.func @transform_6(%arg0: i32) -> (i32, i32, i32) {
    %c0_i32 = arith.constant 0 : i32
    %c0_i32_0 = arith.constant 0 : i32
    %c0_i32_1 = arith.constant 0 : i32
    %c0_i32_2 = arith.constant 0 : i32
    return %c0_i32, %c0_i32_0, %c0_i32_1 : i32, i32, i32
  }
  func.func @transform_7(%arg0: i32) -> (i32, i32) {
    %c0_i32 = arith.constant 0 : i32
    %c0_i32_0 = arith.constant 0 : i32
    %c0_i32_1 = arith.constant 0 : i32
    return %c0_i32, %c0_i32_0 : i32, i32
  }
  func.func @transform_8(%arg0: i32) -> (i32, i32) {
    %c0_i32 = arith.constant 0 : i32
    %c0_i32_0 = arith.constant 0 : i32
    %c0_i32_1 = arith.constant 0 : i32
    return %c0_i32, %c0_i32_0 : i32, i32
  }
  func.func @transform_9(%arg0: i32) -> (i32, i32, i32) {
    %c0_i32 = arith.constant 0 : i32
    %c0_i32_0 = arith.constant 0 : i32
    %c0_i32_1 = arith.constant 0 : i32
    %c0_i32_2 = arith.constant 0 : i32
    return %c0_i32, %c0_i32_0, %c0_i32_1 : i32, i32, i32
  }
  func.func @transform_10(%arg0: i32) -> (i32, i32) {
    %c0_i32 = arith.constant 0 : i32
    %c0_i32_0 = arith.constant 0 : i32
    %c0_i32_1 = arith.constant 0 : i32
    return %c0_i32, %c0_i32_0 : i32, i32
  }
  func.func @transform_11(%arg0: i32) -> (i32, i32) {
    %c0_i32 = arith.constant 0 : i32
    %c0_i32_0 = arith.constant 0 : i32
    %c0_i32_1 = arith.constant 0 : i32
    return %c0_i32, %c0_i32_0 : i32, i32
  }
  func.func @transform_12(%arg0: i32) -> (i32, i32, i32) {
    %c0_i32 = arith.constant 0 : i32
    %c0_i32_0 = arith.constant 0 : i32
    %c0_i32_1 = arith.constant 0 : i32
    %c0_i32_2 = arith.constant 0 : i32
    return %c0_i32, %c0_i32_0, %c0_i32_1 : i32, i32, i32
  }
  func.func @transform_13(%arg0: i32) -> (i32, i32) {
    %c0_i32 = arith.constant 0 : i32
    %c0_i32_0 = arith.constant 0 : i32
    %c0_i32_1 = arith.constant 0 : i32
    return %c0_i32, %c0_i32_0 : i32, i32
  }
  func.func @transform_14(%arg0: i32) -> (i32, i32) {
    %c0_i32 = arith.constant 0 : i32
    %c0_i32_0 = arith.constant 0 : i32
    %c0_i32_1 = arith.constant 0 : i32
    return %c0_i32, %c0_i32_0 : i32, i32
  }
  func.func @transform_15(%arg0: i32) -> (i32, i32, i32) {
    %c0_i32 = arith.constant 0 : i32
    %c0_i32_0 = arith.constant 0 : i32
    %c0_i32_1 = arith.constant 0 : i32
    %c0_i32_2 = arith.constant 0 : i32
    return %c0_i32, %c0_i32_0, %c0_i32_1 : i32, i32, i32
  }
  func.func @transform_16(%arg0: i32) -> (i32, i32) {
    %c0_i32 = arith.constant 0 : i32
    %c0_i32_0 = arith.constant 0 : i32
    %c0_i32_1 = arith.constant 0 : i32
    return %c0_i32, %c0_i32_0 : i32, i32
  }
  func.func @transform_17(%arg0: i32) -> (i32, i32) {
    %c0_i32 = arith.constant 0 : i32
    %c0_i32_0 = arith.constant 0 : i32
    %c0_i32_1 = arith.constant 0 : i32
    return %c0_i32, %c0_i32_0 : i32, i32
  }
  func.func @transform_18(%arg0: i32) -> (i32, i32, i32) {
    %c0_i32 = arith.constant 0 : i32
    %c0_i32_0 = arith.constant 0 : i32
    %c0_i32_1 = arith.constant 0 : i32
    %c0_i32_2 = arith.constant 0 : i32
    return %c0_i32, %c0_i32_0, %c0_i32_1 : i32, i32, i32
  }
  func.func @transform_19(%arg0: i32) -> (i32, i32) {
    %c0_i32 = arith.constant 0 : i32
    %c0_i32_0 = arith.constant 0 : i32
    %c0_i32_1 = arith.constant 0 : i32
    return %c0_i32, %c0_i32_0 : i32, i32
  }
  func.func @transform_20(%arg0: i32) -> (i32, i32) {
    %c0_i32 = arith.constant 0 : i32
    %c0_i32_0 = arith.constant 0 : i32
    %c0_i32_1 = arith.constant 0 : i32
    return %c0_i32, %c0_i32_0 : i32, i32
  }
  func.func @transform_21(%arg0: i32) -> (i32, i32, i32) {
    %c0_i32 = arith.constant 0 : i32
    %c0_i32_0 = arith.constant 0 : i32
    %c0_i32_1 = arith.constant 0 : i32
    %c0_i32_2 = arith.constant 0 : i32
    return %c0_i32, %c0_i32_0, %c0_i32_1 : i32, i32, i32
  }
  func.func @transform_22(%arg0: i32) -> (i32, i32) {
    %c0_i32 = arith.constant 0 : i32
    %c0_i32_0 = arith.constant 0 : i32
    %c0_i32_1 = arith.constant 0 : i32
    return %c0_i32, %c0_i32_0 : i32, i32
  }
  func.func @transform_23(%arg0: i32) -> (i32, i32) {
    %c0_i32 = arith.constant 0 : i32
    %c0_i32_0 = arith.constant 0 : i32
    %c0_i32_1 = arith.constant 0 : i32
    return %c0_i32, %c0_i32_0 : i32, i32
  }
  func.func @transform_24(%arg0: i32) -> (i32, i32, i32) {
    %c0_i32 = arith.constant 0 : i32
    %c0_i32_0 = arith.constant 0 : i32
    %c0_i32_1 = arith.constant 0 : i32
    %c0_i32_2 = arith.constant 0 : i32
    return %c0_i32, %c0_i32_0, %c0_i32_1 : i32, i32, i32
  }
  func.func @transform_25(%arg0: i32) -> (i32, i32) {
    %c0_i32 = arith.constant 0 : i32
    %c0_i32_0 = arith.constant 0 : i32
    %c0_i32_1 = arith.constant 0 : i32
    return %c0_i32, %c0_i32_0 : i32, i32
  }
  func.func @transform_26(%arg0: i32) -> (i32, i32) {
    %c0_i32 = arith.constant 0 : i32
    %c0_i32_0 = arith.constant 0 : i32
    %c0_i32_1 = arith.constant 0 : i32
    return %c0_i32, %c0_i32_0 : i32, i32
  }
  func.func @transform_27(%arg0: i32) -> (i32, i32, i32) {
    %c0_i32 = arith.constant 0 : i32
    %c0_i32_0 = arith.constant 0 : i32
    %c0_i32_1 = arith.constant 0 : i32
    %c0_i32_2 = arith.constant 0 : i32
    return %c0_i32, %c0_i32_0, %c0_i32_1 : i32, i32, i32
  }
  func.func @transform_28(%arg0: i32) -> (i32, i32) {
    %c0_i32 = arith.constant 0 : i32
    %c0_i32_0 = arith.constant 0 : i32
    %c0_i32_1 = arith.constant 0 : i32
    return %c0_i32, %c0_i32_0 : i32, i32
  }
  func.func @transform_29(%arg0: i32) -> (i32, i32) {
    %c0_i32 = arith.constant 0 : i32
    %c0_i32_0 = arith.constant 0 : i32
    %c0_i32_1 = arith.constant 0 : i32
    return %c0_i32, %c0_i32_0 : i32, i32
  }
  func.func @transform_30(%arg0: i32) -> (i32, i32) {
    %c0_i32 = arith.constant 0 : i32
    %c0_i32_0 = arith.constant 0 : i32
    %c0_i32_1 = arith.constant 0 : i32
    return %c0_i32, %c0_i32_0 : i32, i32
  }
  func.func @transform_31(%arg0: i32) -> (i32, i32) {
    %c0_i32 = arith.constant 0 : i32
    %c0_i32_0 = arith.constant 0 : i32
    %c0_i32_1 = arith.constant 0 : i32
    return %c0_i32, %c0_i32_0 : i32, i32
  }
  func.func @transform_32(%arg0: i32) -> (i32, i32) {
    %c0_i32 = arith.constant 0 : i32
    %c0_i32_0 = arith.constant 0 : i32
    %c0_i32_1 = arith.constant 0 : i32
    return %c0_i32, %c0_i32_0 : i32, i32
  }
  func.func @transform_33(%arg0: i32) -> (i32, i32) {
    %c0_i32 = arith.constant 0 : i32
    %c0_i32_0 = arith.constant 0 : i32
    %c0_i32_1 = arith.constant 0 : i32
    return %c0_i32, %c0_i32_0 : i32, i32
  }
  func.func @transform_34(%arg0: i32) -> (i32, i32) {
    %c0_i32 = arith.constant 0 : i32
    %c0_i32_0 = arith.constant 0 : i32
    %c0_i32_1 = arith.constant 0 : i32
    return %c0_i32, %c0_i32_0 : i32, i32
  }
  func.func @transform_35(%arg0: i32) -> (i32, i32) {
    %c0_i32 = arith.constant 0 : i32
    %c0_i32_0 = arith.constant 0 : i32
    %c0_i32_1 = arith.constant 0 : i32
    return %c0_i32, %c0_i32_0 : i32, i32
  }
  func.func @transform_36(%arg0: i32) -> (i32, i32) {
    %c0_i32 = arith.constant 0 : i32
    %c0_i32_0 = arith.constant 0 : i32
    %c0_i32_1 = arith.constant 0 : i32
    return %c0_i32, %c0_i32_0 : i32, i32
  }
  func.func @transform_37(%arg0: i32) -> (i32, i32) {
    %c0_i32 = arith.constant 0 : i32
    %c0_i32_0 = arith.constant 0 : i32
    %c0_i32_1 = arith.constant 0 : i32
    return %c0_i32, %c0_i32_0 : i32, i32
  }
  func.func @transform_38(%arg0: i32) -> (i32, i32) {
    %c0_i32 = arith.constant 0 : i32
    %c0_i32_0 = arith.constant 0 : i32
    %c0_i32_1 = arith.constant 0 : i32
    return %c0_i32, %c0_i32_0 : i32, i32
  }
  func.func @transform_39(%arg0: i32) -> (i32, i32, i32) {
    %c0_i32 = arith.constant 0 : i32
    %c0_i32_0 = arith.constant 0 : i32
    %c0_i32_1 = arith.constant 0 : i32
    return %arg0, %c0_i32, %c0_i32_0 : i32, i32, i32
  }
}

</mosaic_0001>

<bundles_post_ra>
// kernel: my_network2_forward.1
= control target key start
LH: loop header
LB: loop body
LE: loop exit
PB: predicated region body
PF: predicated region fallthrough
CT: control target
= control target key end

     0   :  { %s14660_s6 = smov 1   ;;  %s14661_s10 = smov 2   ;;  %s16858_s0 = inlined_call_operand.smem [shape: u32[40], index: -1, kind: input, shape index: {}] }
   0x1   :  { %s14718_s5 = sld [smem:[%s16858_s0]]   ;;  %s14662_s14 = smov 3  }
   0x2   :  { %s14723_s9 = sld [smem:[%s16858_s0 + %s14660_s6]]   ;;  %s14663_s18 = smov 4  }
   0x3   :  { %s14728_s13 = sld [smem:[%s16858_s0 + %s14661_s10]]   ;;  %s14664_s22 = smov 5  }
   0x4   :  { %s14733_s17 = sld [smem:[%s16858_s0 + %s14662_s14]]   ;;  %s14665_s26 = smov 6  }
   0x5   :  { %s14738_s21 = sld [smem:[%s16858_s0 + %s14663_s18]]   ;;  %s14666_s30 = smov 7  }
   0x6   :  { %s14743_s25 = sld [smem:[%s16858_s0 + %s14664_s22]]   ;;  %s14667_s4 = smov 8  }
   0x7   :  { %s14748_s29 = sld [smem:[%s16858_s0 + %s14665_s26]]   ;;  %s14668_s10 = smov 9  }
   0x8   :  { %s14753_s3 = sld [smem:[%s16858_s0 + %s14666_s30]]   ;;  %s14669_s15 = smov 10  }
   0x9   :  { %s14758_s8 = sld [smem:[%s16858_s0 + %s14667_s4]]   ;;  %s14670_s20 = smov 11  }
   0xa   :  { %s14763_s14 = sld [smem:[%s16858_s0 + %s14668_s10]]   ;;  %s14671_s26 = smov 12  }
   0xb   :  { %s14768_s19 = sld [smem:[%s16858_s0 + %s14669_s15]]   ;;  %s14672_s1 = smov 13  }
   0xc   :  { %s14773_s24 = sld [smem:[%s16858_s0 + %s14670_s20]]   ;;  %s14673_s7 = smov 14  }
   0xd   :  { %s14778_s30 = sld [smem:[%s16858_s0 + %s14671_s26]]   ;;  %s14674_s15 = smov 15  }
   0xe   :  { %16893 = sst [smem:[#allocation5_spill]] %s14753_s3  ;;  %s14675_s22 = smov 16  }
   0xf   :  { %s14783_s6 = sld [smem:[%s16858_s0 + %s14672_s1]]   ;;  %s14676_s28 = smov 17  }
  0x10   :  { %s14788_s12 = sld [smem:[%s16858_s0 + %s14673_s7]]   ;;  %s14677_s7 = smov 18  }
  0x11   :  { %s14793_s20 = sld [smem:[%s16858_s0 + %s14674_s15]]   ;;  %s14678_s15 = smov 19  }
  0x12   :  { %s14798_s27 = sld [smem:[%s16858_s0 + %s14675_s22]]   ;;  %s14679_s22 = smov 20  }
  0x13   :  { %s14803_s4 = sld [smem:[%s16858_s0 + %s14676_s28]]   ;;  %s14680_s28 = smov 21  }
  0x14   :  { %s14697_s10 = smov 39   ;;  %s14698_s16 = smov 38  }
  0x16   :  { %16894 = sst [smem:[#allocation6_spill]] %s14788_s12 }
  0x17   :  { %16895 = sst [smem:[#allocation7_spill]] %s14793_s20 }
  0x18   :  { %16896 = sst [smem:[#allocation8_spill]] %s14798_s27 }
  0x19   :  { %16897 = sst [smem:[#allocation9_spill]] %s14803_s4 }
  0x1a   :  { %s14808_s12 = sld [smem:[%s16858_s0 + %s14677_s7]]   ;;  %s14681_s7 = smov 22  }
  0x1b   :  { %s14813_s20 = sld [smem:[%s16858_s0 + %s14678_s15]]   ;;  %s14682_s15 = smov 23  }
  0x1c   :  { %s14818_s27 = sld [smem:[%s16858_s0 + %s14679_s22]]   ;;  %s14683_s22 = smov 24  }
  0x1d   :  { %s14823_s4 = sld [smem:[%s16858_s0 + %s14680_s28]]   ;;  %s14684_s28 = smov 25  }
  0x20   :  { %16898 = sst [smem:[#allocation10_spill]] %s14808_s12 }
  0x21   :  { %16899 = sst [smem:[#allocation11_spill]] %s14813_s20 }
  0x22   :  { %16900 = sst [smem:[#allocation12_spill]] %s14818_s27 }
  0x23   :  { %16901 = sst [smem:[#allocation13_spill]] %s14823_s4 }
  0x24   :  { %s14828_s12 = sld [smem:[%s16858_s0 + %s14681_s7]]   ;;  %s14685_s7 = smov 26  }
  0x25   :  { %s14833_s20 = sld [smem:[%s16858_s0 + %s14682_s15]]   ;;  %s14686_s15 = smov 27  }
  0x26   :  { %s14838_s27 = sld [smem:[%s16858_s0 + %s14683_s22]]   ;;  %s14687_s22 = smov 28  }
  0x27   :  { %s14843_s4 = sld [smem:[%s16858_s0 + %s14684_s28]]   ;;  %s14688_s28 = smov 29  }
  0x2a   :  { %16902 = sst [smem:[#allocation14_spill]] %s14828_s12 }
  0x2b   :  { %16903 = sst [smem:[#allocation15_spill]] %s14833_s20 }
  0x2c   :  { %16904 = sst [smem:[#allocation16_spill]] %s14838_s27 }
  0x2d   :  { %16905 = sst [smem:[#allocation17_spill]] %s14843_s4 }
  0x2e   :  { %s14848_s12 = sld [smem:[%s16858_s0 + %s14685_s7]]   ;;  %s14689_s7 = smov 30  }
  0x2f   :  { %s14853_s20 = sld [smem:[%s16858_s0 + %s14686_s15]]   ;;  %s14690_s15 = smov 31  }
  0x30   :  { %s14858_s27 = sld [smem:[%s16858_s0 + %s14687_s22]]   ;;  %s14691_s22 = smov 32  }
  0x31   :  { %s14863_s4 = sld [smem:[%s16858_s0 + %s14688_s28]]   ;;  %s14692_s28 = smov 33  }
  0x34   :  { %16906 = sst [smem:[#allocation18_spill]] %s14848_s12 }
  0x35   :  { %16907 = sst [smem:[#allocation19_spill]] %s14853_s20 }
  0x36   :  { %16908 = sst [smem:[#allocation20_spill]] %s14858_s27 }
  0x37   :  { %16909 = sst [smem:[#allocation21_spill]] %s14863_s4 }
  0x38   :  { %s14868_s12 = sld [smem:[%s16858_s0 + %s14689_s7]]   ;;  %s14693_s7 = smov 34  }
  0x39   :  { %s14873_s20 = sld [smem:[%s16858_s0 + %s14690_s15]]   ;;  %s14694_s15 = smov 35  }
  0x3a   :  { %s14878_s27 = sld [smem:[%s16858_s0 + %s14691_s22]]   ;;  %s14695_s22 = smov 36  }
  0x3b   :  { %s14883_s4 = sld [smem:[%s16858_s0 + %s14692_s28]]   ;;  %s14696_s28 = smov 37  }
  0x3e   :  { %16910 = sst [smem:[#allocation22_spill]] %s14868_s12 }
  0x3f   :  { %16911 = sst [smem:[#allocation23_spill]] %s14873_s20 }
  0x40   :  { %16912 = sst [smem:[#allocation24_spill]] %s14878_s27 }
  0x41   :  { %16913 = sst [smem:[#allocation25_spill]] %s14883_s4 }
  0x42   :  { %s14888_s12 = sld [smem:[%s16858_s0 + %s14693_s7]]  }
  0x43   :  { %s14893_s20 = sld [smem:[%s16858_s0 + %s14694_s15]]  }
  0x44   :  { %s14898_s27 = sld [smem:[%s16858_s0 + %s14695_s22]]   ;;  %s14911_s22 = smov 0  }
  0x45   :  { %s11026_s4 = sld [smem:[%s16858_s0 + %s14696_s28]]  }
  0x48   :  { %16914 = sst [smem:[#allocation26_spill]] %s14888_s12 }
  0x49   :  { %16915 = sst [smem:[#allocation27_spill]] %s14893_s20 }
  0x4a   :  { %s14906_s12 = sld [smem:[%s16858_s0 + %s14697_s10]]  }
  0x4b   :  { %s11027_s20 = sld [smem:[%s16858_s0 + %s14698_s16]]   ;;  %v84_v0 = vstv %s11026_s4 }
  0x4c   :  { %85 = vst [vmem:[#allocation3] sm:$0x1] %v84_v0 }
  0x51   :  { %v86_v1 = vstv %s11027_s20 }
  0x52   :  { %87 = vst [vmem:[#allocation4] sm:$0x1] %v86_v1 }
  0x53 LB: > { %s16916_s3 = sld [smem:[#allocation5_spill]]  ;;  %s11029_s23 = sadd.s32 4294967295, %s14658_s22   ;;  %s14658_s22 = sphi %s14911_s22, %s93_s22  }
  0x54   : > { %p11033_p0 = scmp.ge.s32.totalorder %s14658_s22, 1  ;;  %p1081_p1 = scmp.lt.s32.totalorder %s14658_s22, 3 }
  0x56   : > { %p1082_p2 = pnand %p11033_p0, %p1081_p1 }
  0x57   : > { %vm1183_vm0 = vcmask (!%p1082_p2), 1048512   ;;  %p14919_p3 = scmp.lt.s32.totalorder (!%p1082_p2), %s11029_s23, 1  ;;  %vm1200_vm1 = vcmask (!%p1082_p2), 64512   ;;  %v14699_v2 = vmov (!%p1082_p2), 0.0   ;;  %s14700_s26 = smov (!%p1082_p2), 2   ;;  %v2693_v35 = vld [vmem:[%s14738_s21] sm:$0xff] (!%p1082_p2) }
  0x58   : > { %1085 = sbr.rel (%p1082_p2) target bundleno = 6276 (0x1884), region = 176  ;;  %1184 = vst.msk [vmem:[#allocation2] sm:$0xff] (!%p1082_p2), %vm1183_vm0, %v14699_v2  ;;  %1185 = vst.msk [vmem:[#allocation2 + $0x30] sm:$0xff] (!%p1082_p2), %vm1183_vm0, %v14699_v2  ;;  %1355 = vmatprep.mubr.f32.mxu0 (!%p1082_p2), %v14699_v2  ;;  %1432 = vmatprep.mubr.f32.mxu1 (!%p1082_p2), %v14699_v2  ;;  %s14701_s28 = smov (!%p1082_p2), 3   ;;  %v2713_v36 = vld [vmem:[%s14743_s25] sm:$0xff] (!%p1082_p2)  ;;  %v14706_v37 = vmov (!%p1082_p2), 0  }
  0x59   : > { %1186 = vst.msk [vmem:[#allocation2 + $0x60] sm:$0xff] (!%p1082_p2), %vm1183_vm0, %v14699_v2  ;;  %1187 = vst.msk [vmem:[#allocation2 + $0x90] sm:$0xff] (!%p1082_p2), %vm1183_vm0, %v14699_v2  ;;  %s14702_s1 = smov (!%p1082_p2), 1   ;;  %s16881_s2 = smov (!%p1082_p2), 127   ;;  %14250 = vset.pattern.permute.xlu0 (!%p1082_p2), %v14706_v37  ;;  %14251 = vset.pattern.permute.xlu1 (!%p1082_p2), %v14706_v37  ;;  %v2714_v38 = vld [vmem:[%s14743_s25 + $0x8] sm:$0xff] (!%p1082_p2)  ;;  %vm1262_vm2 = vcmask (!%p1082_p2), 15360  }
  0x5a   : > { %1188 = vst.msk [vmem:[#allocation2 + $0xc0] sm:$0xff] (!%p1082_p2), %vm1183_vm0, %v14699_v2  ;;  %1189 = vst.msk [vmem:[#allocation2 + $0xf0] sm:$0xff] (!%p1082_p2), %vm1183_vm0, %v14699_v2  ;;  %s14704_s10 = smov (!%p1082_p2), 126   ;;  %s14705_s7 = smov (!%p1082_p2), 125   ;;  %v2694_v39 = vld [vmem:[%s14738_s21 + $0x8] sm:$0xff] (!%p1082_p2)  ;;  %vm1282_vm3 = vcmask (!%p1082_p2), 1043456  }
  0x5b   : > { %1190 = vst.msk [vmem:[#allocation2 + $0x120] sm:$0xff] (!%p1082_p2), %vm1183_vm0, %v14699_v2  ;;  %1191 = vst.msk [vmem:[#allocation2 + $0x150] sm:$0xff] (!%p1082_p2), %vm1183_vm0, %v14699_v2  ;;  %vm1465_vm4 = vcmask (!%p1082_p2), 23552   ;;  %vm14707_vm5 = vmmov (!%p1082_p2), 1   ;;  %vm1669_vm7 = vcmask (!%p1082_p2), 7168   ;;  %vm1275_vm8 = vcmask (!%p1082_p2), 97280  }
  0x5c   : > { %1201 = vst.msk [vmem:[#allocation2 + $0x28] sm:$0xff] (!%p1082_p2), %vm1200_vm1, %v14699_v2  ;;  %1202 = vst.msk [vmem:[#allocation2 + $0x58] sm:$0xff] (!%p1082_p2), %vm1200_vm1, %v14699_v2  ;;  %vm2080_vm9 = vcmask (!%p1082_p2), 1039360   ;;  %vm2292_vm10 = vcmask (!%p1082_p2), 1031168   ;;  %vm2504_vm11 = vcmask (!%p1082_p2), 1022976   ;;  %vm3358_vm12 = vcmask (!%p1082_p2), 130048  }
  0x5d   : > { %vm15028_vm6 = vmpackc.low (!%p1082_p2), %vm1282_vm3, %vm14707_vm5  ;;  %vm4980_vm13 = vcmask (!%p1082_p2), 589312   ;;  %vm4989_vm14 = vcmask (!%p1082_p2), 523264   ;;  %vm5043_vm15 = vcmask (!%p1082_p2), 261120   ;;  %s16920_s11 = sld [smem:[#allocation6_spill]] (!%p1082_p2)  ;;  %vm5866_vm0 = vcmask (!%p1082_p2), 326912   ;;  %s16921_s16 = sld [smem:[#allocation7_spill]] (!%p1082_p2) }
  0x5e   : > { %4983 = vst.msk [vmem:[#allocation2 + $0x68] sm:$0xff] (!%p1082_p2), %vm4980_vm13, %v14699_v2  ;;  %4984 = vst.msk [vmem:[#allocation2 + $0x98] sm:$0xff] (!%p1082_p2), %vm4980_vm13, %v14699_v2  ;;  %s16922_s15 = sld [smem:[#allocation8_spill]] (!%p1082_p2)  ;;  %s16923_s18 = sld [smem:[#allocation9_spill]] (!%p1082_p2)  ;;  %vm7958_vm5 = vcmask (!%p1082_p2), 130112  }
  0x5f   : > { %s16944_s23 = smov (!%p14919_p3, %s11029_s23), 1  ;;  %v1217_v10 = vld [vmem:[#allocation2] sm:$0xff]  ;;  %v1222_v11 = vld [vmem:[#allocation2 + $0x30] sm:$0xf]  ;;  %4985 = vst.msk [vmem:[#allocation2 + $0xc8] sm:$0xff] %vm4980_vm13, %v14699_v2  ;;  %4986 = vst.msk [vmem:[#allocation2 + $0xf8] sm:$0xff] %vm4980_vm13, %v14699_v2 }
  0x60   : > { %s11517_s20 = sshll.u32 %s16944_s23, 6  ;;  %v14110_v13 = vpack.i.bf16 %v1222_v11, %v1217_v10  ;;  %4987 = vst.msk [vmem:[#allocation2 + $0x128] sm:$0xff] %vm4980_vm13, %v14699_v2  ;;  %4988 = vst.msk [vmem:[#allocation2 + $0x158] sm:$0xff] %vm4980_vm13, %v14699_v2  ;;  %s16924_s0 = sld [smem:[#allocation10_spill]] }
  0x61   : > { %s1179_s4 = scalar_lea.vmem %s14718_s5, %s11517_s20  ;;  %5871 = vst.msk [vmem:[#allocation2 + $0xc8] sm:$0xff] %vm5866_vm0, %v14699_v2  ;;  %5872 = vst.msk [vmem:[#allocation2 + $0xf8] sm:$0xff] %vm5866_vm0, %v14699_v2  ;;  %s16925_s20 = sld [smem:[#allocation11_spill]] }
  0x62   : > { %v14943_v3 = vld [vmem:[%s1179_s4] sm:$0xff]  ;;  %v14945_v4 = vld [vmem:[%s1179_s4 + $0x8] sm:$0xff]  ;;  %v14949_v8 = vld [vmem:[%s1179_s4 + $0x10] sm:$0xff]  ;;  %14111 = vrot.lane.b32.xlu1 %v14110_v13, %s14700_s26  ;;  %5873 = vst.msk [vmem:[#allocation2 + $0x128] sm:$0xff] %vm5866_vm0, %v14699_v2 }
  0x63   : > { %v1196_v5 = vld [vmem:[%s1179_s4 + $0x20] sm:$0xf]  ;;  %v14115_v6 = vpack.i.bf16 %v14945_v4, %v14943_v3  ;;  %v1197_v7 = vld [vmem:[%s1179_s4 + $0x28] sm:$0xf]  ;;  %v1198_v9 = vld [vmem:[%s1179_s4 + $0x30] sm:$0xf]  ;;  %v14145_v20 = vpack.i.bf16 %v14949_v8, %v14945_v4 }
  0x64   : > { %1213 = vst [vmem:[#allocation2 + $0x38] sm:$0xf] %v1196_v5  ;;  %1214 = vst [vmem:[#allocation2 + $0x40] sm:$0xf] %v1197_v7  ;;  %v1199_v12 = vld [vmem:[%s1179_s4 + $0x38] sm:$0xf] }
  0x65   : > { %1211 = vst [vmem:[#allocation2 + $0x18] sm:$0xff] %v14949_v8  ;;  %1215 = vst [vmem:[#allocation2 + $0x48] sm:$0xf] %v1198_v9  ;;  %14101 = vrot.lane.b32.xlu0 %v14115_v6, %s14700_s26  ;;  %v14953_v14 = vld [vmem:[%s1179_s4 + $0x18] sm:$0xff]  ;;  %v2041_v31 = vld [vmem:[#allocation2 + $0x28] sm:$0xff]  ;;  %s16926_s4 = sld [smem:[#allocation12_spill]] }
  0x66   : > { %1216 = vst [vmem:[#allocation2 + $0x50] sm:$0xf] %v1199_v12  ;;  %3309 = vst.msk [vmem:[#allocation2 + $0x18] sm:$0xff] %vm1200_vm1, %v14699_v2  ;;  %14116 = vrot.lane.b32.xlu1 %v14115_v6, %s14701_s28  ;;  %v14190_v27 = vpack.i.bf16 %v14953_v14, %v14949_v8  ;;  %v2046_v29 = vld [vmem:[#allocation2 + $0x58] sm:$0xf]  ;;  %v14220_v32 = vpack.i.bf16 %v2041_v31, %v14953_v14  ;;  %v15055_v12 = vld [vmem:[%s14733_s17 + $0x10] sm:$0xff] }
  0x67   : > { %5874 = vst.msk [vmem:[#allocation2 + $0x158] sm:$0xff] %vm5866_vm0, %v14699_v2 }
  0x6a   : > { %14126 = vrot.lane.b32.xlu1 %v14110_v13, %s14701_s28 }
  0x6b   : > { %v14958_v15 = vld [vmem:[#allocation2 + $0x38] sm:$0xf]  ;;  %v14961_v16 = vld [vmem:[#allocation2 + $0x40] sm:$0xf] }
  0x6c   : > { %v14105_v17 = vpack.i.bf16 %v14961_v16, %v14958_v15  ;;  %v2044_v18 = vld [vmem:[#allocation2 + $0x48] sm:$0xf]  ;;  %v2042_v21 = vld [vmem:[#allocation2 + $0x38] sm:$0xf]  ;;  %v2043_v23 = vld [vmem:[#allocation2 + $0x40] sm:$0xf] }
  0x6d   : > { %v14965_v19 = vld [vmem:[#allocation2 + $0x48] sm:$0xf]  ;;  %v14155_v22 = vpack.i.bf16 %v2042_v21, %v14943_v3  ;;  %v14150_v24 = vpack.i.bf16 %v2044_v18, %v2043_v23  ;;  %v14983_v25 = vld [vmem:[#allocation2 + $0x50] sm:$0xf] }
  0x6e   : > { %3310 = vst.msk [vmem:[#allocation2 + $0x48] sm:$0xff] %vm1200_vm1, %v14699_v2  ;;  %14106 = vrot.lane.b32.xlu0 %v14105_v17, %s14700_s26  ;;  %14136 = vrot.lane.b32.xlu1 %v14105_v17, %s14702_s1  ;;  %v14195_v26 = vpack.i.bf16 %v14983_v25, %v14965_v19  ;;  %v2045_v28 = vld [vmem:[#allocation2 + $0x50] sm:$0xf]  ;;  %v13042_v33 = vpack.c.bf16 %v14983_v25, %v14953_v14  ;;  %v2746_v14 = vld [vmem:[%s14723_s9 + $0x28] sm:$0xff]  ;;  %v2748_v25 = vld [vmem:[%s14723_s9 + $0x38] sm:$0xff] }
  0x6f   : > { %v14225_v30 = vpack.i.bf16 %v2046_v29, %v2045_v28  ;;  %v13045_v34 = vpack.c.bf16 %v14965_v19, %v14949_v8 }
  0x72   : > { %14121 = vrot.lane.b32.xlu0 %v14105_v17, %s14701_s28  ;;  %14146 = vrot.lane.b32.xlu1 %v14145_v20, %s16881_s2 }
  0x76   : > { %14131 = vrot.lane.b32.xlu0 %v14115_v6, %s14702_s1  ;;  %14156 = vrot.lane.b32.xlu1 %v14155_v22, %s16881_s2 }
  0x7a   : > { %14141 = vrot.lane.b32.xlu0 %v14110_v13, %s14702_s1  ;;  %14166 = vrot.lane.b32.xlu1 %v14150_v24, %s14704_s10 }
  0x7e   : > { %14151 = vrot.lane.b32.xlu0 %v14150_v24, %s16881_s2  ;;  %14176 = vrot.lane.b32.xlu1 %v14145_v20, %s14705_s7 }
  0x82   : > { %14161 = vrot.lane.b32.xlu0 %v14145_v20, %s14704_s10  ;;  %14186 = vrot.lane.b32.xlu1 %v14155_v22, %s14705_s7 }
  0x86   : > { %14171 = vrot.lane.b32.xlu0 %v14155_v22, %s14704_s10  ;;  %14196 = vrot.lane.b32.xlu1 %v14195_v26, %s14700_s26 }
  0x8a   : > { %14181 = vrot.lane.b32.xlu0 %v14150_v24, %s14705_s7  ;;  %14206 = vrot.lane.b32.xlu1 %v14195_v26, %s14701_s28 }
  0x8e   : > { %14191 = vrot.lane.b32.xlu0 %v14190_v27, %s14700_s26  ;;  %14216 = vrot.lane.b32.xlu1 %v14195_v26, %s14702_s1  ;;  %v15077_v26 = vld [vmem:[%s14733_s17 + $0x18] sm:$0xff] }
  0x92   : > { %14201 = vrot.lane.b32.xlu0 %v14190_v27, %s14701_s28  ;;  %14226 = vrot.lane.b32.xlu1 %v14225_v30, %s16881_s2  ;;  %s16928_s28 = sld [smem:[#allocation14_spill]] }
  0x96   : > { %14211 = vrot.lane.b32.xlu0 %v14190_v27, %s14702_s1  ;;  %14236 = vrot.lane.b32.xlu1 %v14225_v30, %s14704_s10 }
  0x9a   : > { %14221 = vrot.lane.b32.xlu0 %v14220_v32, %s16881_s2  ;;  %14246 = vrot.lane.b32.xlu1 %v14225_v30, %s14705_s7 }
  0x9e   : > { %14231 = vrot.lane.b32.xlu0 %v14220_v32, %s14704_s10  ;;  %2717 = vperm.xlu1 %14251, %v2713_v36   ;;  %v15087_v36 = vld [vmem:[%s14733_s17] sm:$0xff] }
  0xa2   : > { %14241 = vrot.lane.b32.xlu0 %v14220_v32, %s14705_s7  ;;  %2702 = vperm.xlu1 %14251, %v2694_v39   ;;  %v13036_v39 = vpack.c.bf16 %v14961_v16, %v14945_v4  ;;  %v15105_v4 = vld [vmem:[%s14733_s17 + $0x8] sm:$0xff]  ;;  %s16930_s7 = sld [smem:[#allocation16_spill]] }
  0xa6   : > { %2697 = vperm.xlu0 %14250, %v2693_v35  }
  0xaa   : > { %2722 = vperm.xlu0 %14250, %v2714_v38  }
  0xd4   : > { %v14112_v40 = vpop.permute.xlu1 %14111 }
  0xd5   : > { %v14114_v45 = vunpack.i.h.bf16 %v14112_v40  ;;  %v14113_v46 = vunpack.i.l.bf16 %v14112_v40 }
  0xd7   : > { %v15009_v41 = vpop.permute.xlu0 %14101 }
  0xd8   : > { %v15011_v42 = vpop.permute.xlu1 %14116  ;;  %v14104_v43 = vunpack.i.h.bf16 %v15009_v41  ;;  %v14103_v44 = vunpack.i.l.bf16 %v15009_v41 }
  0xd9   : > { %v14119_v48 = vunpack.i.h.bf16 %v15011_v42  ;;  %v14118_v49 = vunpack.i.l.bf16 %v15011_v42 }
  0xda   : > { %v1264_v54 = vsel %vm1262_vm2, %v14103_v44, %v14104_v43  ;;  %v1263_v58 = vsel %vm1262_vm2, %v14113_v46, %v14103_v44 }
  0xdb   : > { %v1467_v63 = vsel %vm1465_vm4, %v14118_v49, %v14119_v48 }
  0xdc   : > { %v14127_v50 = vpop.permute.xlu1 %14126 }
  0xdd   : > { %v14128_v53 = vunpack.i.l.bf16 %v14127_v50  ;;  %v14129_v55 = vunpack.i.h.bf16 %v14127_v50 }
  0xdf   : > { %v1466_v0 = vsel %vm1465_vm4, %v14128_v53, %v14118_v49 }
  0xe0   : > { %v15015_v47 = vpop.permute.xlu0 %14106  ;;  %v15040_v1 = vpop.permute.xlu1 %14136 }
  0xe1   : > { %v14109_v51 = vunpack.i.h.bf16 %v15015_v47  ;;  %v14108_v52 = vunpack.i.l.bf16 %v15015_v47  ;;  %v14139_v7 = vunpack.i.h.bf16 %v15040_v1  ;;  %v14138_v9 = vunpack.i.l.bf16 %v15040_v1 }
  0xe3   : > { %v1268_v56 = vsel %vm1262_vm2, %v14108_v52, %v14109_v51  ;;  %v1267_v59 = vsel %vm1262_vm2, %v14114_v45, %v14108_v52  ;;  %v1675_v20 = vsel %vm1669_vm7, %v14138_v9, %v14139_v7 }
  0xe4   : > { %v15034_v60 = vpop.permute.xlu0 %14121  ;;  %v13000_v61 = vpack.c.bf16 %v1268_v56, %v1264_v54  ;;  %v13003_v62 = vpack.c.bf16 %v1267_v59, %v1263_v58  ;;  %v15062_v21 = vpop.permute.xlu1 %14146  ;;  %v15123_v54 = vld [vmem:[%s14733_s17 + $0x20] sm:$0xff] }
  0xe5   : > { %v14124_v5 = vunpack.i.h.bf16 %v15034_v60  ;;  %v14123_v6 = vunpack.i.l.bf16 %v15034_v60  ;;  %v14149_v40 = vunpack.i.h.bf16 %v15062_v21  ;;  %v14148_v44 = vunpack.i.l.bf16 %v15062_v21  ;;  %v15206_v60 = vld [vmem:[%s14733_s17 + $0x40] sm:$0xff] }
  0xe6   : > { %13002 = vmatprep.subr.msk.bf16.mxu0 %vm15028_vm6, %v13000_v61 }
  0xe7   : > { %v1470_v10 = vsel %vm1465_vm4, %v14129_v55, %v14123_v6  ;;  %v1471_v11 = vsel %vm1465_vm4, %v14123_v6, %v14124_v5  ;;  %13005 = vmatpush1.bf16.msk.msra.mxu0 %vm15028_vm6, %v13003_v62  ;;  %v2082_v50 = vsel %vm2080_vm9, %v14148_v44, %v14149_v40  ;;  %v13039_v55 = vpack.c.bf16 %v14958_v15, %v14943_v3  ;;  %v15137_v3 = vld [vmem:[%s14733_s17 + $0x28] sm:$0xff] }
  0xe8   : > { %v13015_v13 = vpack.c.bf16 %v1470_v10, %v1466_v0  ;;  %v15057_v17 = vpop.permute.xlu0 %14131  ;;  %v13012_v18 = vpack.c.bf16 %v1471_v11, %v1467_v63  ;;  %v14157_v29 = vpop.permute.xlu1 %14156 }
  0xe9   : > { %v14134_v22 = vunpack.i.h.bf16 %v15057_v17  ;;  %v14133_v23 = vunpack.i.l.bf16 %v15057_v17  ;;  %v14159_v56 = vunpack.i.h.bf16 %v14157_v29  ;;  %v14158_v58 = vunpack.i.l.bf16 %v14157_v29  ;;  %v15247_v17 = vld [vmem:[%s14733_s17 + $0x50] sm:$0xff] }
  0xea   : > { %11040 = vmatmul.mubr.msk.f32.vlgmr.msra.gmra.mrb[0].mxu0 %vm1275_vm8, %v15055_v12  ;;  %13014 = vmatprep.subr.msk.bf16.mxu0 %vm15028_vm6, %v13012_v18 }
  0xeb   : > { %v1671_v24 = vsel %vm1669_vm7, %v14133_v23, %v14134_v22  ;;  %13017 = vmatpush1.bf16.msk.msra.mxu0 %vm15028_vm6, %v13015_v13  ;;  %1361 = vmatprep.mubr.f32.mxu0 %v14699_v2  ;;  %v2081_v15 = vsel %vm2080_vm9, %v14158_v58, %v14148_v44 }
  0xec   : > { %v14142_v27 = vpop.permute.xlu0 %14141  ;;  %v13024_v28 = vpack.c.bf16 %v1675_v20, %v1671_v24  ;;  %v15095_v45 = vpop.permute.xlu1 %14166 }
  0xed   : > { %v14144_v30 = vunpack.i.h.bf16 %v14142_v27  ;;  %v14143_v31 = vunpack.i.l.bf16 %v14142_v27  ;;  %v14169_v62 = vunpack.i.h.bf16 %v15095_v45  ;;  %v14168_v63 = vunpack.i.l.bf16 %v15095_v45  ;;  %v2766_v45 = vld [vmem:[%s14723_s9 + $0xc8] sm:$0xff] }
  0xee   : > { %11041 = vmatmul.mubr.msk.f32.gmra.mrb[2].mxu0 %vm1275_vm8, %v15077_v26  ;;  %13026 = vmatprep.subr.msk.bf16.mxu0 %vm15028_vm6, %v13024_v28  ;;  %v15157_v28 = vld [vmem:[%s14733_s17 + $0x30] sm:$0xff] }
  0xef   : > { %v1674_v32 = vsel %vm1669_vm7, %v14144_v30, %v14138_v9  ;;  %v1670_v35 = vsel %vm1669_vm7, %v14143_v31, %v14133_v23  ;;  %1556 = vmatprep.mubr.f32.mxu0 %v14699_v2  ;;  %v2298_v13 = vsel %vm2292_vm10, %v14168_v63, %v14169_v62 }
  0xf0   : > { %v13027_v37 = vpack.c.bf16 %v1674_v32, %v1670_v35  ;;  %v15089_v38 = vpop.permute.xlu0 %14151  ;;  %v15117_v53 = vpop.permute.xlu1 %14176 }
  0xf1   : > { %v14154_v46 = vunpack.i.h.bf16 %v15089_v38  ;;  %v14153_v49 = vunpack.i.l.bf16 %v15089_v38  ;;  %v14179_v29 = vunpack.i.h.bf16 %v15117_v53  ;;  %v2753_v38 = vld [vmem:[%s14723_s9 + $0x60] sm:$0xff] }
  0xf2   : > { %11048 = vmatmul.mubr.msk.f32.vlgmr.msra.gmra.mrb[0].mxu0 %vm1275_vm8, %v15087_v36 }
  0xf3   : > { %13029 = vmatpush1.bf16.msk.msra.mxu0 %vm15028_vm6, %v13027_v37  ;;  %1562 = vmatprep.mubr.f32.mxu0 %v14699_v2  ;;  %v2086_v52 = vsel %vm2080_vm9, %v14153_v49, %v14154_v46  ;;  %v2085_v10 = vsel %vm2080_vm9, %v14159_v56, %v14153_v49 }
  0xf4   : > { %v15107_v16 = vpop.permute.xlu0 %14161  ;;  %13038 = vmatprep.subr.msk.bf16.mxu0 %vm15028_vm6, %v13036_v39  ;;  %v13048_v61 = vpack.c.bf16 %v2086_v52, %v2082_v50  ;;  %v15131_v9 = vpop.permute.xlu1 %14186  ;;  %v13051_v24 = vpack.c.bf16 %v2085_v10, %v2081_v15  ;;  %v14178_v50 = vunpack.i.l.bf16 %v15117_v53 }
  0xf5   : > { %v14164_v0 = vunpack.i.h.bf16 %v15107_v16  ;;  %v14163_v6 = vunpack.i.l.bf16 %v15107_v16 }
  0xf6   : > { %11049 = vmatmul.mubr.msk.f32.gmra.mrb[2].mxu0 %vm1275_vm8, %v15105_v4 }
  0xf7   : > { %1760 = vmatprep.mubr.f32.mxu0 %v14699_v2  ;;  %v2294_v18 = vsel %vm2292_vm10, %v14163_v6, %v14164_v0 }
  0xf8   : > { %v14172_v59 = vpop.permute.xlu0 %14171  ;;  %v14197_v20 = vpop.permute.xlu1 %14196  ;;  %v13060_v32 = vpack.c.bf16 %v2298_v13, %v2294_v18 }
  0xf9   : > { %v14199_v23 = vunpack.i.h.bf16 %v14197_v20  ;;  %v14198_v27 = vunpack.i.l.bf16 %v14197_v20  ;;  %v14174_v30 = vunpack.i.h.bf16 %v14172_v59  ;;  %v14173_v35 = vunpack.i.l.bf16 %v14172_v59 }
  0xfa   : > { %11058 = vmatmul.mubr.msk.f32.vlgmr.msra.gmra.mrb[0].mxu0 %vm1275_vm8, %v15123_v54 }
  0xfb   : > { %1766 = vmatprep.mubr.f32.mxu0 %v14699_v2  ;;  %13041 = vmatpush1.bf16.msk.msra.mxu0 %vm15028_vm6, %v13039_v55  ;;  %v1270_v49 = vsel %vm1262_vm2, %v14198_v27, %v14199_v23  ;;  %v1269_v10 = vsel %vm1262_vm2, %v14109_v51, %v14198_v27  ;;  %v2297_v13 = vsel %vm2292_vm10, %v14174_v30, %v14168_v63  ;;  %v14189_v63 = vunpack.i.h.bf16 %v15131_v9 }
  0xfc   : > { %v15143_v11 = vpop.permute.xlu0 %14181  ;;  %13050 = vmatprep.subr.msk.bf16.mxu0 %vm15028_vm6, %v13048_v61  ;;  %v14207_v37 = vpop.permute.xlu1 %14206  ;;  %v15171_v61 = vld [vmem:[%s14733_s17 + $0x38] sm:$0xff] }
  0xfd   : > { %v14184_v52 = vunpack.i.h.bf16 %v15143_v11  ;;  %v14183_v55 = vunpack.i.l.bf16 %v15143_v11  ;;  %v14209_v56 = vunpack.i.h.bf16 %v14207_v37  ;;  %v14208_v58 = vunpack.i.l.bf16 %v14207_v37  ;;  %v2774_v11 = vld [vmem:[%s14723_s9 + $0x108] sm:$0xff] }
  0xfe   : > { %11059 = vmatmul.mubr.msk.f32.gmra.mrb[2].mxu0 %vm1275_vm8, %v15137_v3 }
  0xff   : > { %1939 = vmatprep.mubr.f32.mxu0 %v14699_v2  ;;  %v2510_v47 = vsel %vm2504_vm11, %v14183_v55, %v14184_v52 }
 0x100   : > { %v14192_v31 = vpop.permute.xlu0 %14191  ;;  %v14217_v37 = vpop.permute.xlu1 %14216 }
 0x101   : > { %v14194_v39 = vunpack.i.h.bf16 %v14192_v31  ;;  %v14193_v44 = vunpack.i.l.bf16 %v14192_v31  ;;  %v1473_v31 = vsel %vm1465_vm4, %v14208_v58, %v14209_v56  ;;  %v14219_v51 = vunpack.i.h.bf16 %v14217_v37 }
 0x102   : > { %11068 = vmatmul.mubr.msk.f32.vlgmr.msra.gmra.mrb[0].mxu0 %vm1275_vm8, %v15157_v28 }
 0x103   : > { %13053 = vmatpush1.bf16.msk.msra.mxu0 %vm15028_vm6, %v13051_v24  ;;  %1945 = vmatprep.mubr.f32.mxu0 %v14699_v2  ;;  %v1266_v59 = vsel %vm1262_vm2, %v14193_v44, %v14194_v39  ;;  %v1265_v15 = vsel %vm1262_vm2, %v14104_v43, %v14193_v44  ;;  %v2293_v24 = vsel %vm2292_vm10, %v14173_v35, %v14163_v6  ;;  %v14218_v35 = vunpack.i.l.bf16 %v14217_v37 }
 0x104   : > { %v14202_v18 = vpop.permute.xlu0 %14201  ;;  %v13006_v20 = vpack.c.bf16 %v1270_v49, %v1266_v59  ;;  %v13009_v23 = vpack.c.bf16 %v1269_v10, %v1265_v15  ;;  %13062 = vmatprep.subr.msk.bf16.mxu0 %vm15028_vm6, %v13060_v32  ;;  %v2506_v43 = vsel %vm2504_vm11, %v14178_v50, %v14179_v29  ;;  %v1472_v6 = vsel %vm1465_vm4, %v14124_v5, %v14208_v58 }
 0x105   : > { %v14204_v41 = vunpack.i.h.bf16 %v14202_v18  ;;  %v14203_v39 = vunpack.i.l.bf16 %v14202_v18  ;;  %v13063_v32 = vpack.c.bf16 %v2297_v13, %v2293_v24  ;;  %v14188_v5 = vunpack.i.l.bf16 %v15131_v9  ;;  %v15223_v9 = vld [vmem:[%s14733_s17 + $0x48] sm:$0xff] }
 0x106   : > { %13008 = vmatprep.subr.msk.bf16.mxu1 %vm15028_vm6, %v13006_v20  ;;  %11069 = vmatmul.mubr.msk.f32.gmra.mrb[2].mxu0 %vm1275_vm8, %v15171_v61  ;;  %v1677_v59 = vsel %vm1669_vm7, %v14218_v35, %v14219_v51  ;;  %v2509_v10 = vsel %vm2504_vm11, %v14189_v63, %v14183_v55  ;;  %v2744_v55 = vld [vmem:[%s14723_s9 + $0x18] sm:$0xff]  ;;  %v2743_v51 = vld [vmem:[%s14723_s9 + $0x10] sm:$0xff] }
 0x107   : > { %v1468_v27 = vsel %vm1465_vm4, %v14119_v48, %v14203_v39  ;;  %v1469_v30 = vsel %vm1465_vm4, %v14203_v39, %v14204_v41  ;;  %13011 = vmatpush1.bf16.msk.msra.mxu1 %vm15028_vm6, %v13009_v23  ;;  %2171 = vmatprep.mubr.f32.mxu0 %v14699_v2  ;;  %v13072_v48 = vpack.c.bf16 %v2510_v47, %v2506_v43  ;;  %v15263_v39 = vld [vmem:[%s14733_s17 + $0x58] sm:$0xff]  ;;  %v2741_v47 = vld [vmem:[%s14723_s9] sm:$0xff]  ;;  %vm7050_vm4 = vcmask 195712  }
 0x108   : > { %v13021_v44 = vpack.c.bf16 %v1472_v6, %v1468_v27  ;;  %v14212_v49 = vpop.permute.xlu0 %14211  ;;  %v13018_v56 = vpack.c.bf16 %v1473_v31, %v1469_v30  ;;  %v1676_v23 = vsel %vm1669_vm7, %v14139_v7, %v14218_v35  ;;  %v13088_v35 = vpack.c.bf16 %v2748_v25, %v2746_v14  ;;  %v2764_v14 = vld [vmem:[%s14723_s9 + $0xb8] sm:$0xff]  ;;  %7055 = vst.msk [vmem:[#allocation2 + $0xc8] sm:$0xff] %vm7050_vm4, %v14699_v2 }
 0x109   : > { %v14214_v42 = vunpack.i.h.bf16 %v14212_v49  ;;  %v14213_v58 = vunpack.i.l.bf16 %v14212_v49  ;;  %v2747_v49 = vld [vmem:[%s14723_s9 + $0x30] sm:$0xff]  ;;  %7056 = vst.msk [vmem:[#allocation2 + $0xf8] sm:$0xff] %vm7050_vm4, %v14699_v2  ;;  %7057 = vst.msk [vmem:[#allocation2 + $0x128] sm:$0xff] %vm7050_vm4, %v14699_v2 }
 0x10a   : > { %11044 = vmatmul.mubr.msk.f32.vlgmr.msra.gmra.mrb[0].mxu1 %vm1275_vm8, %v15055_v12  ;;  %13020 = vmatprep.subr.msk.bf16.mxu1 %vm15028_vm6, %v13018_v56  ;;  %v2505_v12 = vsel %vm2504_vm11, %v14188_v5, %v14178_v50  ;;  %v2742_v50 = vld [vmem:[%s14723_s9 + $0x8] sm:$0xff]  ;;  %7058 = vst.msk [vmem:[#allocation2 + $0x158] sm:$0xff] %vm7050_vm4, %v14699_v2 }
 0x10b   : > { %v1673_v15 = vsel %vm1669_vm7, %v14213_v58, %v14214_v42  ;;  %11078 = vmatmul.mubr.msk.f32.vlgmr.msra.gmra.mrb[0].mxu0 %vm1275_vm8, %v15206_v60  ;;  %13023 = vmatpush1.bf16.msk.msra.mxu1 %vm15028_vm6, %v13021_v44  ;;  %v1672_v18 = vsel %vm1669_vm7, %v14134_v22, %v14213_v58  ;;  %v13075_v20 = vpack.c.bf16 %v2509_v10, %v2505_v12  ;;  %v15249_v22 = vpop.permute.xlu1 %14226  ;;  %v2745_v44 = vld [vmem:[%s14723_s9 + $0x20] sm:$0xff]  ;;  %v2750_v42 = vld [vmem:[%s14723_s9 + $0x48] sm:$0xff]  ;;  %v2752_v58 = vld [vmem:[%s14723_s9 + $0x58] sm:$0xff] }
 0x10c   : > { %13065 = vmatpush1.bf16.msk.msra.mxu0 %vm15028_vm6, %v13063_v32  ;;  %1438 = vmatprep.mubr.f32.mxu1 %v14699_v2  ;;  %v13030_v13 = vpack.c.bf16 %v1677_v59, %v1673_v15  ;;  %v14222_v24 = vpop.permute.xlu0 %14221  ;;  %v14229_v31 = vunpack.i.h.bf16 %v15249_v22  ;;  %v13084_v1 = vpack.c.bf16 %v2744_v55, %v2742_v50  ;;  %v14228_v7 = vunpack.i.l.bf16 %v15249_v22  ;;  %v2751_v12 = vld [vmem:[%s14723_s9 + $0x50] sm:$0xff]  ;;  %v2754_v10 = vld [vmem:[%s14723_s9 + $0x68] sm:$0xff] }
 0x10d   : > { %2177 = vmatprep.mubr.f32.mxu0 %v14699_v2  ;;  %13074 = vmatprep.subr.msk.bf16.mxu0 %vm15028_vm6, %v13072_v48  ;;  %v14224_v37 = vunpack.i.h.bf16 %v14222_v24  ;;  %v14223_v41 = vunpack.i.l.bf16 %v14222_v24  ;;  %v13086_v32 = vpack.c.bf16 %v2743_v51, %v2741_v47  ;;  %v13090_v15 = vpack.c.bf16 %v2747_v49, %v2745_v44  ;;  %v2759_v47 = vld [vmem:[%s14723_s9 + $0x90] sm:$0xff]  ;;  %v2762_v51 = vld [vmem:[%s14723_s9 + $0xa8] sm:$0xff]  ;;  %v2765_v44 = vld [vmem:[%s14723_s9 + $0xc0] sm:$0xff] }
 0x10e   : > { %11045 = vmatmul.mubr.msk.f32.gmra.mrb[2].mxu1 %vm1275_vm8, %v15077_v26  ;;  %13032 = vmatprep.subr.msk.bf16.mxu1 %vm15028_vm6, %v13030_v13  ;;  %v13033_v26 = vpack.c.bf16 %v1676_v23, %v1672_v18  ;;  %v13092_v19 = vpack.c.bf16 %v2752_v58, %v2750_v42  ;;  %v2756_v13 = vld [vmem:[%s14723_s9 + $0x78] sm:$0xff]  ;;  %v2087_v21 = vsel %vm2080_vm9, %v14154_v46, %v14228_v7  ;;  %v2767_v49 = vld [vmem:[%s14723_s9 + $0xd0] sm:$0xff] }
 0x10f   : > { %11079 = vmatmul.mubr.msk.f32.gmra.mrb[2].mxu0 %vm1275_vm8, %v15223_v9  ;;  %1633 = vmatprep.mubr.f32.mxu1 %v14699_v2  ;;  %v2084_v43 = vsel %vm2080_vm9, %v14223_v41, %v14224_v37  ;;  %v2083_v8 = vsel %vm2080_vm9, %v14149_v40, %v14223_v41  ;;  %v13096_v22 = vpack.c.bf16 %v2756_v13, %v2754_v10  ;;  %v2760_v37 = vld [vmem:[%s14723_s9 + $0x98] sm:$0xff]  ;;  %v2775_v10 = vld [vmem:[%s14723_s9 + $0x110] sm:$0xff] }
 0x110   : > { %2383 = vmatprep.mubr.f32.mxu0 %v14699_v2  ;;  %v14232_v63 = vpop.permute.xlu0 %14231  ;;  %v13057_v50 = vpack.c.bf16 %v2087_v21, %v2083_v8  ;;  %v13110_v42 = vpack.c.bf16 %v2767_v49, %v2765_v44  ;;  %v3025_v8 = vld [vmem:[%s14728_s13 + $0x10] sm:$0xff]  ;;  %v2778_v21 = vld [vmem:[%s14723_s9 + $0x128] sm:$0xff]  ;;  %v3046_v49 = vld [vmem:[%s14728_s13 + $0xb8] sm:$0xff] }
 0x111   : > { %v14234_v27 = vunpack.i.h.bf16 %v14232_v63  ;;  %v14233_v5 = vunpack.i.l.bf16 %v14232_v63  ;;  %v2761_v63 = vld [vmem:[%s14723_s9 + $0xa0] sm:$0xff]  ;;  %v3044_v44 = vld [vmem:[%s14728_s13 + $0xa8] sm:$0xff] }
 0x112   : > { %11052 = vmatmul.mubr.msk.f32.vlgmr.msra.gmra.mrb[0].mxu1 %vm1275_vm8, %v15087_v36  ;;  %v2088_v36 = vsel %vm2080_vm9, %v14228_v7, %v14229_v31  ;;  %v2758_v31 = vld [vmem:[%s14723_s9 + $0x88] sm:$0xff] }
 0x113   : > { %13035 = vmatpush1.bf16.msk.msra.mxu1 %vm15028_vm6, %v13033_v26  ;;  %11088 = vmatmul.mubr.msk.f32.vlgmr.msra.gmra.mrb[0].mxu0 %vm1275_vm8, %v15247_v17  ;;  %v13054_v30 = vpack.c.bf16 %v2088_v36, %v2084_v43  ;;  %v2296_v59 = vsel %vm2292_vm10, %v14233_v5, %v14234_v27  ;;  %v2755_v26 = vld [vmem:[%s14723_s9 + $0x70] sm:$0xff]  ;;  %v2295_v41 = vsel %vm2292_vm10, %v14164_v0, %v14233_v5  ;;  %v2757_v43 = vld [vmem:[%s14723_s9 + $0x80] sm:$0xff]  ;;  %v3024_v27 = vld [vmem:[%s14728_s13 + $0x8] sm:$0xff] }
 0x114   : > { %13077 = vmatpush1.bf16.msk.msra.mxu0 %vm15028_vm6, %v13075_v20  ;;  %1639 = vmatprep.mubr.f32.mxu1 %v14699_v2  ;;  %v13098_v7 = vpack.c.bf16 %v2755_v26, %v2753_v38  ;;  %v13100_v36 = vpack.c.bf16 %v2760_v37, %v2758_v31  ;;  %v13102_v25 = vpack.c.bf16 %v2759_v47, %v2757_v43  ;;  %v2772_v5 = vld [vmem:[%s14723_s9 + $0xf8] sm:$0xff]  ;;  %v2779_v38 = vld [vmem:[%s14723_s9 + $0x130] sm:$0xff]  ;;  %v3031_v37 = vld [vmem:[%s14728_s13 + $0x40] sm:$0xff] }
 0x115   : > { %2389 = vmatprep.mubr.f32.mxu0 %v14699_v2  ;;  %13044 = vmatprep.subr.msk.bf16.mxu1 %vm15028_vm6, %v13042_v33  ;;  %v15282_v33 = vpop.permute.xlu1 %14236  ;;  %v2783_v43 = vld [vmem:[%s14723_s9 + $0x150] sm:$0xff] }
 0x116   : > { %11053 = vmatmul.mubr.msk.f32.gmra.mrb[2].mxu1 %vm1275_vm8, %v15105_v4  ;;  %13085 = vmatprep.subr.bf16.mxu0 %v13084_v1  ;;  %v15286_v4 = vld [vmem:[%s14733_s17 + $0x60] sm:$0xff]  ;;  %v14239_v6 = vunpack.i.h.bf16 %v15282_v33  ;;  %v14238_v56 = vunpack.i.l.bf16 %v15282_v33  ;;  %v13104_v33 = vpack.c.bf16 %v2764_v14, %v2762_v51  ;;  %v2786_v51 = vld [vmem:[%s14723_s9 + $0x168] sm:$0xff]  ;;  %v2788_v14 = vld [vmem:[%s14723_s9 + $0x178] sm:$0xff] }
 0x117   : > { %11089 = vmatmul.mubr.msk.f32.gmra.mrb[2].mxu0 %vm1275_vm8, %v15263_v39  ;;  %1837 = vmatprep.mubr.f32.mxu1 %v14699_v2 }
 0x118   : > { %2595 = vmatprep.mubr.f32.mxu0 %v14699_v2  ;;  %v2300_v48 = vsel %vm2292_vm10, %v14238_v56, %v14239_v6  ;;  %v2299_v16 = vsel %vm2292_vm10, %v14169_v62, %v14238_v56  ;;  %v2763_v6 = vld [vmem:[%s14723_s9 + $0xb0] sm:$0xff]  ;;  %v2768_v62 = vld [vmem:[%s14723_s9 + $0xd8] sm:$0xff]  ;;  %v2770_v56 = vld [vmem:[%s14723_s9 + $0xe8] sm:$0xff] }
 0x119   : > { %v15327_v40 = vpop.permute.xlu1 %14246  ;;  %v13066_v18 = vpack.c.bf16 %v2300_v48, %v2296_v59  ;;  %v13112_v58 = vpack.c.bf16 %v2772_v5, %v2770_v56  ;;  %v2769_v48 = vld [vmem:[%s14723_s9 + $0xe0] sm:$0xff]  ;;  %v2771_v59 = vld [vmem:[%s14723_s9 + $0xf0] sm:$0xff] }
 0x11a   : > { %11062 = vmatmul.mubr.msk.f32.vlgmr.msra.gmra.mrb[0].mxu1 %vm1275_vm8, %v15123_v54  ;;  %v15306_v54 = vld [vmem:[%s14733_s17 + $0x68] sm:$0xff]  ;;  %v14249_v55 = vunpack.i.h.bf16 %v15327_v40  ;;  %v14248_v46 = vunpack.i.l.bf16 %v15327_v40  ;;  %v2780_v40 = vld [vmem:[%s14723_s9 + $0x138] sm:$0xff] }
 0x11b   : > { %11098 = vmatmul.mubr.msk.f32.vlgmr.msra.gmra.mrb[0].mxu0 %vm1275_vm8, %v15286_v4  ;;  %1843 = vmatprep.mubr.f32.mxu1 %v14699_v2 }
 0x11c   : > { %2601 = vmatprep.mubr.f32.mxu0 %v14699_v2  ;;  %13047 = vmatpush1.bf16.msk.msra.mxu1 %vm15028_vm6, %v13045_v34  ;;  %v2749_v34 = vld [vmem:[%s14723_s9 + $0x40] sm:$0xff]  ;;  %v2511_v53 = vsel %vm2504_vm11, %v14184_v52, %v14248_v46  ;;  %v2776_v52 = vld [vmem:[%s14723_s9 + $0x118] sm:$0xff] }
 0x11d   : > { %13056 = vmatprep.subr.msk.bf16.mxu1 %vm15028_vm6, %v13054_v30  ;;  %13087 = vmatpush1.bf16.msra.mxu0 %v13086_v32  ;;  %v13094_v23 = vpack.c.bf16 %v2751_v12, %v2749_v34  ;;  %v13106_v30 = vpack.c.bf16 %v2763_v6, %v2761_v63  ;;  %v13114_v34 = vpack.c.bf16 %v2771_v59, %v2769_v48  ;;  %v2773_v12 = vld [vmem:[%s14723_s9 + $0x100] sm:$0xff] }
 0x11e   : > { %11063 = vmatmul.mubr.msk.f32.gmra.mrb[2].mxu1 %vm1275_vm8, %v15137_v3  ;;  %13089 = vmatprep.subr.bf16.mxu0 %v13088_v35  ;;  %v14242_v3 = vpop.permute.xlu0 %14241  ;;  %v13108_v35 = vpack.c.bf16 %v2768_v62, %v2766_v45  ;;  %v13116_v57 = vpack.c.bf16 %v2776_v52, %v2774_v11  ;;  %v13128_v63 = vpack.c.bf16 %v2788_v14, %v2786_v51  ;;  %v2785_v6 = vld [vmem:[%s14723_s9 + $0x160] sm:$0xff]  ;;  %v2787_v45 = vld [vmem:[%s14723_s9 + $0x170] sm:$0xff]  ;;  %v3048_v52 = vld [vmem:[%s14728_s13 + $0xc8] sm:$0xff] }
 0x11f   : > { %11099 = vmatmul.mubr.msk.f32.gmra.mrb[2].mxu0 %vm1275_vm8, %v15306_v54  ;;  %2016 = vmatprep.mubr.f32.mxu1 %v14699_v2  ;;  %v14244_v20 = vunpack.i.h.bf16 %v14242_v3  ;;  %v14243_v24 = vunpack.i.l.bf16 %v14242_v3  ;;  %v13130_v56 = vpack.c.bf16 %v2787_v45, %v2785_v6  ;;  %v13232_v48 = vpack.c.bf16 %v3046_v49, %v3044_v44  ;;  %v3043_v59 = vld [vmem:[%s14728_s13 + $0xa0] sm:$0xff]  ;;  %v3045_v11 = vld [vmem:[%s14728_s13 + $0xb0] sm:$0xff]  ;;  %v3068_v14 = vld [vmem:[%s14728_s13 + $0x168] sm:$0xff] }
 0x120   : > { %v3065_v51 = vld [vmem:[%s14728_s13 + $0x150] sm:$0xff]  ;;  %v3075_v44 = vld [vmem:[%s14728_s13 + $0x1a0] sm:$0xff] }
 0x121   : > { %13091 = vmatpush1.bf16.msra.mxu0 %v13090_v15  ;;  %v2508_v1 = vsel %vm2504_vm11, %v14243_v24, %v14244_v20  ;;  %v2507_v32 = vsel %vm2504_vm11, %v14179_v29, %v14243_v24  ;;  %v3023_v15 = vld [vmem:[%s14728_s13] sm:$0xff]  ;;  %v3034_v20 = vld [vmem:[%s14728_s13 + $0x58] sm:$0xff]  ;;  %v3077_v49 = vld [vmem:[%s14728_s13 + $0x1b0] sm:$0xff] }
 0x122   : > { %11072 = vmatmul.mubr.msk.f32.vlgmr.msra.gmra.mrb[0].mxu1 %vm1275_vm8, %v15157_v28  ;;  %13093 = vmatprep.subr.bf16.mxu0 %v13092_v19  ;;  %v2512_v28 = vsel %vm2504_vm11, %v14248_v46, %v14249_v55  ;;  %v3030_v19 = vld [vmem:[%s14728_s13 + $0x38] sm:$0xff]  ;;  %v13214_v13 = vpack.c.bf16 %v3025_v8, %v3023_v15  ;;  %v3032_v55 = vld [vmem:[%s14728_s13 + $0x48] sm:$0xff] }
 0x123   : > { %13059 = vmatpush1.bf16.msk.msra.mxu1 %vm15028_vm6, %v13057_v50  ;;  %2022 = vmatprep.mubr.f32.mxu1 %v14699_v2  ;;  %v13078_v0 = vpack.c.bf16 %v2512_v28, %v2508_v1  ;;  %v3029_v50 = vld [vmem:[%s14728_s13 + $0x30] sm:$0xff]  ;;  %v2782_v46 = vld [vmem:[%s14723_s9 + $0x148] sm:$0xff]  ;;  %v2784_v24 = vld [vmem:[%s14723_s9 + $0x158] sm:$0xff]  ;;  %v13220_v31 = vpack.c.bf16 %v3034_v20, %v3032_v55 }
 0x124   : > { %13068 = vmatprep.subr.msk.bf16.mxu1 %vm15028_vm6, %v13066_v18  ;;  %v3027_v18 = vld [vmem:[%s14728_s13 + $0x20] sm:$0xff]  ;;  %v3033_v28 = vld [vmem:[%s14728_s13 + $0x50] sm:$0xff]  ;;  %v3038_v1 = vld [vmem:[%s14728_s13 + $0x78] sm:$0xff] }
 0x125   : > { %13095 = vmatpush1.bf16.msra.mxu0 %v13094_v23  ;;  %v13120_v23 = vpack.c.bf16 %v2780_v40, %v2778_v21  ;;  %v13218_v26 = vpack.c.bf16 %v3029_v50, %v3027_v18  ;;  %v13222_v47 = vpack.c.bf16 %v3033_v28, %v3031_v37  ;;  %v3050_v15 = vld [vmem:[%s14728_s13 + $0xd8] sm:$0xff]  ;;  %v3052_v21 = vld [vmem:[%s14728_s13 + $0xe8] sm:$0xff]  ;;  %v3051_v55 = vld [vmem:[%s14728_s13 + $0xe0] sm:$0xff] }
 0x126   : > { %11073 = vmatmul.mubr.msk.f32.gmra.mrb[2].mxu1 %vm1275_vm8, %v15171_v61  ;;  %13097 = vmatprep.subr.bf16.mxu0 %v13096_v22  ;;  %v13069_v61 = vpack.c.bf16 %v2299_v16, %v2295_v41  ;;  %v2777_v22 = vld [vmem:[%s14723_s9 + $0x120] sm:$0xff]  ;;  %v13124_v41 = vpack.c.bf16 %v2784_v24, %v2782_v46  ;;  %v3054_v40 = vld [vmem:[%s14728_s13 + $0xf8] sm:$0xff]  ;;  %v3053_v20 = vld [vmem:[%s14728_s13 + $0xf0] sm:$0xff] }
 0x127   : > { %2248 = vmatprep.mubr.f32.mxu1 %v14699_v2  ;;  %v13240_v50 = vpack.c.bf16 %v3054_v40, %v3052_v21  ;;  %v3057_v46 = vld [vmem:[%s14728_s13 + $0x110] sm:$0xff]  ;;  %v3060_v24 = vld [vmem:[%s14728_s13 + $0x128] sm:$0xff] }
 0x129   : > { %13099 = vmatpush1.bf16.msra.mxu0 %v13098_v7  ;;  %v13122_v7 = vpack.c.bf16 %v2779_v38, %v2777_v22  ;;  %v13242_v22 = vpack.c.bf16 %v3053_v20, %v3051_v55  ;;  %v2806_v55 = vld [vmem:[%s14723_s9 + $0x208] sm:$0xff]  ;;  %v2808_v20 = vld [vmem:[%s14723_s9 + $0x218] sm:$0xff] }
 0x12a   : > { %11082 = vmatmul.mubr.msk.f32.vlgmr.msra.gmra.mrb[0].mxu1 %vm1275_vm8, %v15206_v60  ;;  %13101 = vmatprep.subr.bf16.mxu0 %v13100_v36  ;;  %v3026_v60 = vld [vmem:[%s14728_s13 + $0x18] sm:$0xff]  ;;  %v2781_v36 = vld [vmem:[%s14723_s9 + $0x140] sm:$0xff] }
 0x12b   : > { %13071 = vmatpush1.bf16.msk.msra.mxu1 %vm15028_vm6, %v13069_v61  ;;  %2254 = vmatprep.mubr.f32.mxu1 %v14699_v2  ;;  %v13212_v29 = vpack.c.bf16 %v3026_v60, %v3024_v27  ;;  %v3037_v61 = vld [vmem:[%s14728_s13 + $0x70] sm:$0xff]  ;;  %v2790_v27 = vld [vmem:[%s14723_s9 + $0x188] sm:$0xff]  ;;  %v2792_v60 = vld [vmem:[%s14723_s9 + $0x198] sm:$0xff] }
 0x12c   : > { %13080 = vmatprep.subr.msk.bf16.mxu1 %vm15028_vm6, %v13078_v0  ;;  %v3035_v0 = vld [vmem:[%s14728_s13 + $0x60] sm:$0xff]  ;;  %v13132_v5 = vpack.c.bf16 %v2792_v60, %v2790_v27  ;;  %v3073_v27 = vld [vmem:[%s14728_s13 + $0x190] sm:$0xff]  ;;  %v3076_v60 = vld [vmem:[%s14728_s13 + $0x1a8] sm:$0xff] }
 0x12d   : > { %13103 = vmatpush1.bf16.msra.mxu0 %v13102_v25  ;;  %v3040_v25 = vld [vmem:[%s14728_s13 + $0x88] sm:$0xff]  ;;  %v13226_v62 = vpack.c.bf16 %v3037_v61, %v3035_v0 }
 0x12e   : > { %11083 = vmatmul.mubr.msk.f32.gmra.mrb[2].mxu1 %vm1275_vm8, %v15223_v9  ;;  %13105 = vmatprep.subr.bf16.mxu0 %v13104_v33  ;;  %v13081_v9 = vpack.c.bf16 %v2511_v53, %v2507_v32  ;;  %v13126_v33 = vpack.c.bf16 %v2783_v43, %v2781_v36  ;;  %v3039_v32 = vld [vmem:[%s14728_s13 + $0x80] sm:$0xff] }
 0x12f   : > { %2460 = vmatprep.mubr.f32.mxu1 %v14699_v2  ;;  %v2789_v53 = vld [vmem:[%s14723_s9 + $0x180] sm:$0xff] }
 0x131   : > { %13107 = vmatpush1.bf16.msra.mxu0 %v13106_v30 }
 0x132   : > { %11092 = vmatmul.mubr.msk.f32.vlgmr.msra.gmra.mrb[0].mxu1 %vm1275_vm8, %v15247_v17  ;;  %13109 = vmatprep.subr.bf16.mxu0 %v13108_v35  ;;  %v3028_v17 = vld [vmem:[%s14728_s13 + $0x28] sm:$0xff]  ;;  %v3041_v35 = vld [vmem:[%s14728_s13 + $0x90] sm:$0xff] }
 0x133   : > { %13083 = vmatpush1.bf16.msk.msra.mxu1 %vm15028_vm6, %v13081_v9  ;;  %2466 = vmatprep.mubr.f32.mxu1 %v14699_v2  ;;  %v13216_v3 = vpack.c.bf16 %v3030_v19, %v3028_v17  ;;  %v13230_v9 = vpack.c.bf16 %v3041_v35, %v3039_v32  ;;  %v2793_v19 = vld [vmem:[%s14723_s9 + $0x1a0] sm:$0xff]  ;;  %vm8864_vm6 = vcmask 97312  }
 0x134   : > { %13213 = vmatprep.subr.bf16.mxu1 %v13212_v29  ;;  %v2791_v29 = vld [vmem:[%s14723_s9 + $0x190] sm:$0xff] }
 0x135   : > { %13111 = vmatpush1.bf16.msra.mxu0 %v13110_v42  ;;  %v2794_v42 = vld [vmem:[%s14723_s9 + $0x1a8] sm:$0xff]  ;;  %v13134_v8 = vpack.c.bf16 %v2791_v29, %v2789_v53  ;;  %v2800_v53 = vld [vmem:[%s14723_s9 + $0x1d8] sm:$0xff] }
 0x136   : > { %11093 = vmatmul.mubr.msk.f32.gmra.mrb[2].mxu1 %vm1275_vm8, %v15263_v39  ;;  %13113 = vmatprep.subr.bf16.mxu0 %v13112_v58  ;;  %v13118_v39 = vpack.c.bf16 %v2775_v10, %v2773_v12  ;;  %v2796_v58 = vld [vmem:[%s14723_s9 + $0x1b8] sm:$0xff]  ;;  %v13236_v12 = vpack.c.bf16 %v3050_v15, %v3048_v52  ;;  %v3047_v10 = vld [vmem:[%s14728_s13 + $0xc0] sm:$0xff]  ;;  %v3080_v29 = vld [vmem:[%s14728_s13 + $0x1c8] sm:$0xff] }
 0x137   : > { %2672 = vmatprep.mubr.f32.mxu1 %v14699_v2  ;;  %v13136_v17 = vpack.c.bf16 %v2796_v58, %v2794_v42  ;;  %v3082_v42 = vld [vmem:[%s14728_s13 + $0x1d8] sm:$0xff]  ;;  %v2797_v58 = vld [vmem:[%s14723_s9 + $0x1c0] sm:$0xff]  ;;  %v3081_v15 = vld [vmem:[%s14728_s13 + $0x1d0] sm:$0xff] }
 0x138   : > { %v3079_v52 = vld [vmem:[%s14728_s13 + $0x1c0] sm:$0xff] }
 0x139   : > { %13115 = vmatpush1.bf16.msra.mxu0 %v13114_v34  ;;  %v2795_v34 = vld [vmem:[%s14723_s9 + $0x1b0] sm:$0xff] }
 0x13a   : > { %11102 = vmatmul.mubr.msk.f32.vlgmr.msra.gmra.mrb[0].mxu1 %vm1275_vm8, %v15286_v4  ;;  %13117 = vmatprep.subr.bf16.mxu0 %v13116_v57  ;;  %v3036_v4 = vld [vmem:[%s14728_s13 + $0x68] sm:$0xff]  ;;  %v13234_v57 = vpack.c.bf16 %v3045_v11, %v3043_v59  ;;  %v13268_v59 = vpack.c.bf16 %v3082_v42, %v3080_v29  ;;  %v2816_v29 = vld [vmem:[%s14723_s9 + $0x258] sm:$0xff] }
 0x13b   : > { %2678 = vmatprep.mubr.f32.mxu1 %v14699_v2  ;;  %13215 = vmatpush1.bf16.msra.mxu1 %v13214_v13  ;;  %v13224_v16 = vpack.c.bf16 %v3038_v1, %v3036_v4  ;;  %v3049_v13 = vld [vmem:[%s14728_s13 + $0xd0] sm:$0xff]  ;;  %v3059_v4 = vld [vmem:[%s14728_s13 + $0x120] sm:$0xff]  ;;  %v3098_v42 = vld [vmem:[%s14728_s13 + $0x258] sm:$0xff] }
 0x13c   : > { %13217 = vmatprep.subr.bf16.mxu1 %v13216_v3  ;;  %v13138_v3 = vpack.c.bf16 %v2795_v34, %v2793_v19  ;;  %v13238_v18 = vpack.c.bf16 %v3049_v13, %v3047_v10  ;;  %v3061_v1 = vld [vmem:[%s14728_s13 + $0x130] sm:$0xff]  ;;  %v2804_v19 = vld [vmem:[%s14723_s9 + $0x1f8] sm:$0xff]  ;;  %v3084_v34 = vld [vmem:[%s14728_s13 + $0x1e8] sm:$0xff] }
 0x13d   : > { %13119 = vmatpush1.bf16.msra.mxu0 %v13118_v39  ;;  %v3056_v39 = vld [vmem:[%s14728_s13 + $0x108] sm:$0xff]  ;;  %v13250_v36 = vpack.c.bf16 %v3061_v1, %v3059_v4  ;;  %v2801_v10 = vld [vmem:[%s14723_s9 + $0x1e0] sm:$0xff]  ;;  %v2803_v13 = vld [vmem:[%s14723_s9 + $0x1f0] sm:$0xff] }
 0x13e   : > { %11103 = vmatmul.mubr.msk.f32.gmra.mrb[2].mxu1 %vm1275_vm8, %v15306_v54  ;;  %13121 = vmatprep.subr.bf16.mxu0 %v13120_v23  ;;  %v3042_v54 = vld [vmem:[%s14728_s13 + $0x98] sm:$0xff]  ;;  %v13146_v40 = vpack.c.bf16 %v2803_v13, %v2801_v10  ;;  %v2805_v1 = vld [vmem:[%s14723_s9 + $0x200] sm:$0xff]  ;;  %v3100_v10 = vld [vmem:[%s14728_s13 + $0x268] sm:$0xff] }
 0x13f   : > { %13219 = vmatpush1.bf16.msra.mxu1 %v13218_v26  ;;  %v13228_v30 = vpack.c.bf16 %v3042_v54, %v3040_v25  ;;  %v3058_v23 = vld [vmem:[%s14728_s13 + $0x118] sm:$0xff]  ;;  %v3055_v26 = vld [vmem:[%s14728_s13 + $0x100] sm:$0xff]  ;;  %v3069_v54 = vld [vmem:[%s14728_s13 + $0x170] sm:$0xff] }
 0x140   : > { %13221 = vmatprep.subr.bf16.mxu1 %v13220_v31  ;;  %v13244_v38 = vpack.c.bf16 %v3058_v23, %v3056_v39  ;;  %v3062_v31 = vld [vmem:[%s14728_s13 + $0x138] sm:$0xff]  ;;  %v13246_v37 = vpack.c.bf16 %v3057_v46, %v3055_v26  ;;  %v3067_v25 = vld [vmem:[%s14728_s13 + $0x160] sm:$0xff]  ;;  %v3088_v39 = vld [vmem:[%s14728_s13 + $0x208] sm:$0xff]  ;;  %v13148_v23 = vpack.c.bf16 %v2808_v20, %v2806_v55  ;;  %v15496_v26 = vpop.permute.xlu1 %2717  ;;  %v15498_v46 = vpop.permute.xlu0 %2697 }
 0x141   : > { %13123 = vmatpush1.bf16.msra.mxu0 %v13122_v7  ;;  %v13248_v28 = vpack.c.bf16 %v3062_v31, %v3060_v24  ;;  %v3064_v7 = vld [vmem:[%s14728_s13 + $0x148] sm:$0xff]  ;;  %v13258_v6 = vpack.c.bf16 %v3069_v54, %v3067_v25  ;;  %v3102_v13 = vld [vmem:[%s14728_s13 + $0x278] sm:$0xff]  ;;  %v3099_v20 = vld [vmem:[%s14728_s13 + $0x260] sm:$0xff] }
 0x142   : > { %13125 = vmatprep.subr.bf16.mxu0 %v13124_v41  ;;  %v3066_v41 = vld [vmem:[%s14728_s13 + $0x158] sm:$0xff]  ;;  %v13288_v55 = vpack.c.bf16 %v3102_v13, %v3100_v10  ;;  %v2838_v13 = vld [vmem:[%s14723_s9 + $0x308] sm:$0xff] }
 0x143   : > { %13223 = vmatpush1.bf16.msra.mxu1 %v13222_v47  ;;  %v13252_v43 = vpack.c.bf16 %v3066_v41, %v3064_v7  ;;  %v3063_v47 = vld [vmem:[%s14728_s13 + $0x140] sm:$0xff]  ;;  %v2807_v7 = vld [vmem:[%s14723_s9 + $0x210] sm:$0xff] }
 0x144   : > { %13225 = vmatprep.subr.bf16.mxu1 %v13224_v16  ;;  %v3070_v16 = vld [vmem:[%s14728_s13 + $0x178] sm:$0xff]  ;;  %v13254_v0 = vpack.c.bf16 %v3065_v51, %v3063_v47  ;;  %v15502_v4 = vpop.permute.xlu1 %2702  ;;  %v2810_v47 = vld [vmem:[%s14723_s9 + $0x228] sm:$0xff] }
 0x145   : > { %13127 = vmatpush1.bf16.msra.mxu0 %v13126_v33  ;;  %v13256_v61 = vpack.c.bf16 %v3070_v16, %v3068_v14  ;;  %v3072_v33 = vld [vmem:[%s14728_s13 + $0x188] sm:$0xff]  ;;  %v2812_v16 = vld [vmem:[%s14723_s9 + $0x238] sm:$0xff] }
 0x146   : > { %13129 = vmatprep.subr.bf16.mxu0 %v13128_v63  ;;  %v3074_v63 = vld [vmem:[%s14728_s13 + $0x198] sm:$0xff] }
 0x147   : > { %13227 = vmatpush1.bf16.msra.mxu1 %v13226_v62  ;;  %v13260_v45 = vpack.c.bf16 %v3074_v63, %v3072_v33  ;;  %v3071_v62 = vld [vmem:[%s14728_s13 + $0x180] sm:$0xff]  ;;  %v15515_v33 = vpop.permute.xlu0 %2722 }
 0x148   : > { %13229 = vmatprep.subr.bf16.mxu1 %v13228_v30  ;;  %v3078_v30 = vld [vmem:[%s14728_s13 + $0x1b8] sm:$0xff]  ;;  %v13262_v32 = vpack.c.bf16 %v3073_v27, %v3071_v62  ;;  %v2809_v27 = vld [vmem:[%s14723_s9 + $0x220] sm:$0xff] }
 0x149   : > { %13131 = vmatpush1.bf16.msra.mxu0 %v13130_v56  ;;  %v13264_v35 = vpack.c.bf16 %v3078_v30, %v3076_v60  ;;  %v13266_v56 = vpack.c.bf16 %v3077_v49, %v3075_v44  ;;  %v2811_v60 = vld [vmem:[%s14723_s9 + $0x230] sm:$0xff]  ;;  %v3091_v49 = vld [vmem:[%s14728_s13 + $0x220] sm:$0xff] }
 0x14a   : > { %13133 = vmatprep.subr.bf16.mxu0 %v13132_v5  ;;  %v2798_v5 = vld [vmem:[%s14723_s9 + $0x1c8] sm:$0xff] }
 0x14b   : > { %13231 = vmatpush1.bf16.msra.mxu1 %v13230_v9  ;;  %v13140_v9 = vpack.c.bf16 %v2800_v53, %v2798_v5  ;;  %v2814_v5 = vld [vmem:[%s14723_s9 + $0x248] sm:$0xff] }
 0x14c   : > { %13233 = vmatprep.subr.bf16.mxu1 %v13232_v48  ;;  %v2799_v48 = vld [vmem:[%s14723_s9 + $0x1d0] sm:$0xff] }
 0x14d   : > { %13135 = vmatpush1.bf16.msra.mxu0 %v13134_v8  ;;  %v13142_v11 = vpack.c.bf16 %v2799_v48, %v2797_v58  ;;  %v13270_v8 = vpack.c.bf16 %v3081_v15, %v3079_v52  ;;  %v13154_v48 = vpack.c.bf16 %v2811_v60, %v2809_v27  ;;  %v2815_v52 = vld [vmem:[%s14723_s9 + $0x250] sm:$0xff]  ;;  %v2830_v27 = vld [vmem:[%s14723_s9 + $0x2c8] sm:$0xff]  ;;  %v2832_v60 = vld [vmem:[%s14723_s9 + $0x2d8] sm:$0xff] }
 0x14e   : > { %13137 = vmatprep.subr.bf16.mxu0 %v13136_v17  ;;  %v2802_v17 = vld [vmem:[%s14723_s9 + $0x1e8] sm:$0xff] }
 0x14f   : > { %13235 = vmatpush1.bf16.msra.mxu1 %v13234_v57  ;;  %v13144_v57 = vpack.c.bf16 %v2804_v19, %v2802_v17  ;;  %v3095_v19 = vld [vmem:[%s14728_s13 + $0x240] sm:$0xff] }
 0x150   : > { %13237 = vmatprep.subr.bf16.mxu1 %v13236_v12  ;;  %v3086_v12 = vld [vmem:[%s14728_s13 + $0x1f8] sm:$0xff] }
 0x151   : > { %13139 = vmatpush1.bf16.msra.mxu0 %v13138_v3  ;;  %v13272_v21 = vpack.c.bf16 %v3086_v12, %v3084_v34  ;;  %v3083_v3 = vld [vmem:[%s14728_s13 + $0x1e0] sm:$0xff]  ;;  %v3097_v34 = vld [vmem:[%s14728_s13 + $0x250] sm:$0xff]  ;;  %v2820_v12 = vld [vmem:[%s14723_s9 + $0x278] sm:$0xff] }
 0x152   : > { %13141 = vmatprep.subr.bf16.mxu0 %v13140_v9  ;;  %v3096_v9 = vld [vmem:[%s14728_s13 + $0x248] sm:$0xff] }
 0x153   : > { %13239 = vmatpush1.bf16.msra.mxu1 %v13238_v18  ;;  %v3085_v18 = vld [vmem:[%s14728_s13 + $0x1f0] sm:$0xff]  ;;  %v13284_v17 = vpack.c.bf16 %v3098_v42, %v3096_v9  ;;  %v2834_v42 = vld [vmem:[%s14723_s9 + $0x2e8] sm:$0xff] }
 0x154   : > { %13241 = vmatprep.subr.bf16.mxu1 %v13240_v50  ;;  %v13274_v50 = vpack.c.bf16 %v3085_v18, %v3083_v3  ;;  %v2817_v3 = vld [vmem:[%s14723_s9 + $0x260] sm:$0xff]  ;;  %v2819_v18 = vld [vmem:[%s14723_s9 + $0x270] sm:$0xff] }
 0x155   : > { %13143 = vmatpush1.bf16.msra.mxu0 %v13142_v11  ;;  %v2813_v11 = vld [vmem:[%s14723_s9 + $0x240] sm:$0xff]  ;;  %v3113_v9 = vld [vmem:[%s14728_s13 + $0x2d0] sm:$0xff] }
 0x156   : > { %13145 = vmatprep.subr.bf16.mxu0 %v13144_v57  ;;  %v2818_v57 = vld [vmem:[%s14723_s9 + $0x268] sm:$0xff] }
 0x157   : > { %13243 = vmatpush1.bf16.msra.mxu1 %v13242_v22  ;;  %v3090_v22 = vld [vmem:[%s14728_s13 + $0x218] sm:$0xff] }
 0x158   : > { %13245 = vmatprep.subr.bf16.mxu1 %v13244_v38  ;;  %v13276_v38 = vpack.c.bf16 %v3090_v22, %v3088_v39  ;;  %v3101_v39 = vld [vmem:[%s14728_s13 + $0x270] sm:$0xff]  ;;  %v2824_v22 = vld [vmem:[%s14723_s9 + $0x298] sm:$0xff] }
 0x159   : > { %13147 = vmatpush1.bf16.msra.mxu0 %v13146_v40  ;;  %v13286_v40 = vpack.c.bf16 %v3097_v34, %v3095_v19  ;;  %v2835_v34 = vld [vmem:[%s14723_s9 + $0x2f0] sm:$0xff] }
 0x15a   : > { %13149 = vmatprep.subr.bf16.mxu0 %v13148_v23  ;;  %v2822_v23 = vld [vmem:[%s14723_s9 + $0x288] sm:$0xff] }
 0x15b   : > { %13247 = vmatpush1.bf16.msra.mxu1 %v13246_v37 }
 0x15c   : > { %13249 = vmatprep.subr.bf16.mxu1 %v13248_v28 }
 0x15f   : > { %13251 = vmatpush1.bf16.msra.mxu1 %v13250_v36  ;;  %v3087_v36 = vld [vmem:[%s14728_s13 + $0x200] sm:$0xff] }
 0x160   : > { %13253 = vmatprep.subr.bf16.mxu1 %v13252_v43  ;;  %v3089_v43 = vld [vmem:[%s14728_s13 + $0x210] sm:$0xff] }
 0x161   : > { %v13278_v62 = vpack.c.bf16 %v3089_v43, %v3087_v36  ;;  %v3103_v36 = vld [vmem:[%s14728_s13 + $0x280] sm:$0xff]  ;;  %v3105_v43 = vld [vmem:[%s14728_s13 + $0x290] sm:$0xff] }
 0x163   : > { %13255 = vmatpush1.bf16.msra.mxu1 %v13254_v0  ;;  %v3092_v0 = vld [vmem:[%s14728_s13 + $0x228] sm:$0xff] }
 0x164   : > { %13257 = vmatprep.subr.bf16.mxu1 %v13256_v61  ;;  %v3094_v61 = vld [vmem:[%s14728_s13 + $0x238] sm:$0xff] }
 0x165   : > { %v13280_v44 = vpack.c.bf16 %v3094_v61, %v3092_v0  ;;  %v13294_v61 = vpack.c.bf16 %v3105_v43, %v3103_v36  ;;  %v3126_v36 = vld [vmem:[%s14728_s13 + $0x338] sm:$0xff] }
 0x167   : > { %13259 = vmatpush1.bf16.msra.mxu1 %v13258_v6 }
 0x168   : > { %13261 = vmatprep.subr.bf16.mxu1 %v13260_v45  ;;  %v13150_v45 = vpack.c.bf16 %v2807_v7, %v2805_v1  ;;  %v2823_v1 = vld [vmem:[%s14723_s9 + $0x290] sm:$0xff]  ;;  %v13164_v7 = vpack.c.bf16 %v2824_v22, %v2822_v23 }
 0x16b   : > { %13263 = vmatpush1.bf16.msra.mxu1 %v13262_v32 }
 0x16c   : > { %13265 = vmatprep.subr.bf16.mxu1 %v13264_v35  ;;  %v13152_v35 = vpack.c.bf16 %v2812_v16, %v2810_v47  ;;  %v2826_v47 = vld [vmem:[%s14723_s9 + $0x2a8] sm:$0xff]  ;;  %v3110_v16 = vld [vmem:[%s14728_s13 + $0x2b8] sm:$0xff] }
 0x16f   : > { %13267 = vmatpush1.bf16.msra.mxu1 %v13266_v56  ;;  %v3093_v56 = vld [vmem:[%s14728_s13 + $0x230] sm:$0xff] }
 0x170   : > { %13269 = vmatprep.subr.bf16.mxu1 %v13268_v59  ;;  %v13282_v59 = vpack.c.bf16 %v3093_v56, %v3091_v49  ;;  %v2829_v49 = vld [vmem:[%s14723_s9 + $0x2c0] sm:$0xff]  ;;  %v2831_v56 = vld [vmem:[%s14723_s9 + $0x2d0] sm:$0xff] }
 0x173   : > { %13271 = vmatpush1.bf16.msra.mxu1 %v13270_v8  ;;  %v13156_v8 = vpack.c.bf16 %v2816_v29, %v2814_v5  ;;  %v13172_v5 = vpack.c.bf16 %v2832_v60, %v2830_v27  ;;  %v3111_v29 = vld [vmem:[%s14728_s13 + $0x2c0] sm:$0xff] }
 0x174   : > { %13273 = vmatprep.subr.bf16.mxu1 %v13272_v21  ;;  %v13158_v21 = vpack.c.bf16 %v2815_v52, %v2813_v11  ;;  %v13174_v11 = vpack.c.bf16 %v2831_v56, %v2829_v49  ;;  %v13302_v52 = vpack.c.bf16 %v3113_v9, %v3111_v29  ;;  %v3127_v49 = vld [vmem:[%s14728_s13 + $0x340] sm:$0xff]  ;;  %v3129_v56 = vld [vmem:[%s14728_s13 + $0x350] sm:$0xff]  ;;  %v3132_v29 = vld [vmem:[%s14728_s13 + $0x368] sm:$0xff] }
 0x175   : > { %v3134_v9 = vld [vmem:[%s14728_s13 + $0x378] sm:$0xff] }
 0x177   : > { %13275 = vmatpush1.bf16.msra.mxu1 %v13274_v50  ;;  %v13160_v50 = vpack.c.bf16 %v2820_v12, %v2818_v57  ;;  %v3115_v57 = vld [vmem:[%s14728_s13 + $0x2e0] sm:$0xff]  ;;  %v3117_v12 = vld [vmem:[%s14728_s13 + $0x2f0] sm:$0xff] }
 0x178   : > { %13277 = vmatprep.subr.bf16.mxu1 %v13276_v38  ;;  %v3104_v38 = vld [vmem:[%s14728_s13 + $0x288] sm:$0xff] }
 0x1ee   : > { %v2597_v24 = vpop.f32.mrb[0].mxu0 }
 0x1ef   : > { %v2705_v31 = vmul.f32 %v15498_v46, %v2597_v24  ;;  %v2599_v37 = vpop.f32.mrb[1].mxu0  ;;  %v3106_v24 = vld [vmem:[%s14728_s13 + $0x298] sm:$0xff] }
 0x1f0   : > { %v2706_v28 = vmul.f32 %v15498_v46, %v2599_v37  ;;  %v13290_v37 = vpack.c.bf16 %v3101_v39, %v3099_v20  ;;  %v2837_v20 = vld [vmem:[%s14723_s9 + $0x300] sm:$0xff]  ;;  %v2839_v39 = vld [vmem:[%s14723_s9 + $0x310] sm:$0xff] }
 0x1f1   : > { %v2725_v41 = vadd.f32 %v15496_v26, %v2705_v31  ;;  %v13162_v31 = vpack.c.bf16 %v2819_v18, %v2817_v3  ;;  %v3120_v3 = vld [vmem:[%s14728_s13 + $0x308] sm:$0xff]  ;;  %v3122_v18 = vld [vmem:[%s14728_s13 + $0x318] sm:$0xff] }
 0x1f2   : > { %v2726_v51 = vadd.f32 %v15496_v26, %v2706_v28  ;;  %v2603_v14 = vpop.f32.mrb[2].mxu0  ;;  %v2821_v28 = vld [vmem:[%s14723_s9 + $0x280] sm:$0xff] }
 0x1f3   : > { %v2709_v25 = vmul.f32 %v15502_v4, %v2603_v14  ;;  %v2605_v54 = vpop.f32.mrb[3].mxu0  ;;  %v2733_v30 = vmax.f32 %v2725_v41, 0.0  ;;  %v13292_v41 = vpack.c.bf16 %v3106_v24, %v3104_v38  ;;  %v3108_v14 = vld [vmem:[%s14728_s13 + $0x2a8] sm:$0xff]  ;;  %v13166_v0 = vpack.c.bf16 %v2823_v1, %v2821_v28  ;;  %v3119_v24 = vld [vmem:[%s14728_s13 + $0x300] sm:$0xff] }
 0x1f4   : > { %v2734_v63 = vmax.f32 %v2726_v51, 0.0  ;;  %v2710_v6 = vmul.f32 %v15502_v4, %v2605_v54  ;;  %v2828_v51 = vld [vmem:[%s14723_s9 + $0x2b8] sm:$0xff]  ;;  %v2827_v54 = vld [vmem:[%s14723_s9 + $0x2b0] sm:$0xff]  ;;  %v13308_v1 = vpack.c.bf16 %v3122_v18, %v3120_v3 }
 0x1f5   : > { %v2729_v32 = vadd.f32 %v15515_v33, %v2709_v25  ;;  %v2825_v25 = vld [vmem:[%s14723_s9 + $0x2a0] sm:$0xff] }
 0x1f6   : > { %v2730_v53 = vadd.f32 %v15515_v33, %v2710_v6  ;;  %2933 = vmatprep.mubr.f32.mxu0 %v2734_v63  ;;  %3215 = vmatprep.mubr.f32.mxu1 %v2734_v63  ;;  %v13168_v63 = vpack.c.bf16 %v2828_v51, %v2826_v47  ;;  %v13296_v6 = vpack.c.bf16 %v3110_v16, %v3108_v14  ;;  %v2841_v14 = vld [vmem:[%s14723_s9 + $0x320] sm:$0xff]  ;;  %v2843_v16 = vld [vmem:[%s14723_s9 + $0x330] sm:$0xff] }
 0x1f7   : > { %2934 = vmatmul.mubr.f32.vlgmr.msra.gmra.mrb[4].mxu0 %v2733_v30  ;;  %3216 = vmatmul.mubr.f32.vlgmr.msra.gmra.mrb[4].mxu1 %v2733_v30  ;;  %v2737_v15 = vmax.f32 %v2729_v32, 0.0  ;;  %v3112_v30 = vld [vmem:[%s14728_s13 + $0x2c8] sm:$0xff]  ;;  %v3114_v32 = vld [vmem:[%s14728_s13 + $0x2d8] sm:$0xff]  ;;  %v13182_v47 = vpack.c.bf16 %v2839_v39, %v2837_v20  ;;  %v13186_v27 = vpack.c.bf16 %v2843_v16, %v2841_v14 }
 0x1f8   : > { %v2738_v58 = vmax.f32 %v2730_v53, 0.0  ;;  %13151 = vmatpush1.bf16.msra.mxu0 %v13150_v45  ;;  %13279 = vmatpush1.bf16.msra.mxu1 %v13278_v62  ;;  %v3107_v45 = vld [vmem:[%s14728_s13 + $0x2a0] sm:$0xff]  ;;  %v3109_v62 = vld [vmem:[%s14728_s13 + $0x2b0] sm:$0xff]  ;;  %v13300_v53 = vpack.c.bf16 %v3114_v32, %v3112_v30  ;;  %v2858_v20 = vld [vmem:[%s14723_s9 + $0x3a8] sm:$0xff] }
 0x1f9   : > { %13153 = vmatprep.subr.bf16.mxu0 %v13152_v35  ;;  %13281 = vmatprep.subr.bf16.mxu1 %v13280_v44  ;;  %v13170_v35 = vpack.c.bf16 %v2827_v54, %v2825_v25  ;;  %v13298_v44 = vpack.c.bf16 %v3109_v62, %v3107_v45  ;;  %v3123_v25 = vld [vmem:[%s14728_s13 + $0x320] sm:$0xff]  ;;  %v3125_v54 = vld [vmem:[%s14728_s13 + $0x330] sm:$0xff]  ;;  %v3128_v45 = vld [vmem:[%s14728_s13 + $0x348] sm:$0xff] }
 0x1fa   : > { %2939 = vmatprep.mubr.f32.mxu0 %v2738_v58  ;;  %3221 = vmatprep.mubr.f32.mxu1 %v2738_v58  ;;  %v2836_v58 = vld [vmem:[%s14723_s9 + $0x2f8] sm:$0xff]  ;;  %v13314_v60 = vpack.c.bf16 %v3125_v54, %v3123_v25  ;;  %v2845_v30 = vld [vmem:[%s14723_s9 + $0x340] sm:$0xff]  ;;  %v2847_v32 = vld [vmem:[%s14723_s9 + $0x350] sm:$0xff] }
 0x1fb   : > { %2940 = vmatmul.mubr.f32.gmra.mrb[6].mxu0 %v2737_v15  ;;  %3222 = vmatmul.mubr.f32.gmra.mrb[6].mxu1 %v2737_v15  ;;  %v2833_v15 = vld [vmem:[%s14723_s9 + $0x2e0] sm:$0xff]  ;;  %v3130_v62 = vld [vmem:[%s14728_s13 + $0x358] sm:$0xff]  ;;  %v3144_v14 = vld [vmem:[%s14728_s13 + $0x3c8] sm:$0xff] }
 0x1fc   : > { %13155 = vmatpush1.bf16.msra.mxu0 %v13154_v48  ;;  %13283 = vmatpush1.bf16.msra.mxu1 %v13282_v59  ;;  %v3116_v48 = vld [vmem:[%s14728_s13 + $0x2e8] sm:$0xff]  ;;  %v3118_v59 = vld [vmem:[%s14728_s13 + $0x2f8] sm:$0xff]  ;;  %v2861_v25 = vld [vmem:[%s14723_s9 + $0x3c0] sm:$0xff] }
 0x1fd   : > { %13157 = vmatprep.subr.bf16.mxu0 %v13156_v8  ;;  %13285 = vmatprep.subr.bf16.mxu1 %v13284_v17  ;;  %v13176_v17 = vpack.c.bf16 %v2836_v58, %v2834_v42  ;;  %v13304_v19 = vpack.c.bf16 %v3118_v59, %v3116_v48  ;;  %v13190_v42 = vpack.c.bf16 %v2847_v32, %v2845_v30  ;;  %v2849_v48 = vld [vmem:[%s14723_s9 + $0x360] sm:$0xff]  ;;  %v2851_v59 = vld [vmem:[%s14723_s9 + $0x370] sm:$0xff]  ;;  %v2860_v39 = vld [vmem:[%s14723_s9 + $0x3b8] sm:$0xff] }
 0x1fe   : > { %v13318_v58 = vpack.c.bf16 %v3129_v56, %v3127_v49  ;;  %v3146_v16 = vld [vmem:[%s14728_s13 + $0x3d8] sm:$0xff]  ;;  %v2863_v54 = vld [vmem:[%s14723_s9 + $0x3d0] sm:$0xff]  ;;  %v3148_v30 = vld [vmem:[%s14728_s13 + $0x3e8] sm:$0xff] }
 0x1ff   : > { %v3150_v32 = vld [vmem:[%s14728_s13 + $0x3f8] sm:$0xff]  ;;  %v2865_v49 = vld [vmem:[%s14723_s9 + $0x3e0] sm:$0xff] }
 0x200   : > { %13159 = vmatpush1.bf16.msra.mxu0 %v13158_v21  ;;  %13287 = vmatpush1.bf16.msra.mxu1 %v13286_v40  ;;  %v2840_v21 = vld [vmem:[%s14723_s9 + $0x318] sm:$0xff] }
 0x201   : > { %13161 = vmatprep.subr.bf16.mxu0 %v13160_v50  ;;  %13289 = vmatprep.subr.bf16.mxu1 %v13288_v55  ;;  %v13178_v50 = vpack.c.bf16 %v2835_v34, %v2833_v15  ;;  %v13306_v55 = vpack.c.bf16 %v3117_v12, %v3115_v57  ;;  %v13180_v38 = vpack.c.bf16 %v2840_v21, %v2838_v13  ;;  %v3131_v15 = vld [vmem:[%s14728_s13 + $0x360] sm:$0xff]  ;;  %v2856_v34 = vld [vmem:[%s14723_s9 + $0x398] sm:$0xff]  ;;  %v3136_v57 = vld [vmem:[%s14728_s13 + $0x388] sm:$0xff] }
 0x202   : > { %v3138_v12 = vld [vmem:[%s14728_s13 + $0x398] sm:$0xff]  ;;  %v2853_v21 = vld [vmem:[%s14723_s9 + $0x380] sm:$0xff] }
 0x203   : > { %v13324_v18 = vpack.c.bf16 %v3138_v12, %v3136_v57  ;;  %v15658_v12 = vld [vmem:[#allocation2] sm:$0xff] }
 0x204   : > { %13163 = vmatpush1.bf16.msra.mxu0 %v13162_v31  ;;  %13291 = vmatpush1.bf16.msra.mxu1 %v13290_v37  ;;  %v3121_v31 = vld [vmem:[%s14728_s13 + $0x310] sm:$0xff]  ;;  %v2842_v37 = vld [vmem:[%s14723_s9 + $0x328] sm:$0xff] }
 0x205   : > { %13165 = vmatprep.subr.bf16.mxu0 %v13164_v7  ;;  %13293 = vmatprep.subr.bf16.mxu1 %v13292_v41  ;;  %v2844_v7 = vld [vmem:[%s14723_s9 + $0x338] sm:$0xff]  ;;  %v3124_v41 = vld [vmem:[%s14728_s13 + $0x328] sm:$0xff]  ;;  %v13310_v51 = vpack.c.bf16 %v3121_v31, %v3119_v24 }
 0x208   : > { %13167 = vmatpush1.bf16.msra.mxu0 %v13166_v0  ;;  %13295 = vmatpush1.bf16.msra.mxu1 %v13294_v61  ;;  %v13184_v0 = vpack.c.bf16 %v2844_v7, %v2842_v37  ;;  %v13312_v61 = vpack.c.bf16 %v3126_v36, %v3124_v41  ;;  %v2857_v37 = vld [vmem:[%s14723_s9 + $0x3a0] sm:$0xff]  ;;  %v13200_v7 = vpack.c.bf16 %v2860_v39, %v2858_v20 }
 0x209   : > { %13169 = vmatprep.subr.bf16.mxu0 %v13168_v63  ;;  %13297 = vmatprep.subr.bf16.mxu1 %v13296_v6  ;;  %v2846_v63 = vld [vmem:[%s14723_s9 + $0x348] sm:$0xff]  ;;  %v2848_v6 = vld [vmem:[%s14723_s9 + $0x358] sm:$0xff]  ;;  %v3139_v36 = vld [vmem:[%s14728_s13 + $0x3a0] sm:$0xff] }
 0x20c   : > { %13171 = vmatpush1.bf16.msra.mxu0 %v13170_v35  ;;  %13299 = vmatpush1.bf16.msra.mxu1 %v13298_v44  ;;  %v13188_v35 = vpack.c.bf16 %v2848_v6, %v2846_v63  ;;  %v13316_v44 = vpack.c.bf16 %v3130_v62, %v3128_v45  ;;  %v13332_v6 = vpack.c.bf16 %v3146_v16, %v3144_v14  ;;  %v3143_v45 = vld [vmem:[%s14728_s13 + $0x3c0] sm:$0xff]  ;;  %v3145_v62 = vld [vmem:[%s14728_s13 + $0x3d0] sm:$0xff] }
 0x20d   : > { %v15569_v8 = vpop.f32.mrb[0].mxu1  ;;  %13173 = vmatprep.subr.bf16.mxu0 %v13172_v5  ;;  %13301 = vmatprep.subr.bf16.mxu1 %v13300_v53  ;;  %v2850_v5 = vld [vmem:[%s14723_s9 + $0x368] sm:$0xff]  ;;  %v2852_v53 = vld [vmem:[%s14723_s9 + $0x378] sm:$0xff]  ;;  %v3903_v14 = vld [vmem:[%s14723_s9] sm:$0xff] }
 0x20e   : > { %v2676_v10 = vpop.f32.mrb[1].mxu1  ;;  %v2707_v56 = vmul.f32 %v15498_v46, %v15569_v8 }
 0x20f   : > { %v2708_v40 = vmul.f32 %v15498_v46, %v2676_v10  ;;  %v13194_v10 = vpack.c.bf16 %v2851_v59, %v2849_v48 }
 0x210   : > { %13175 = vmatpush1.bf16.msra.mxu0 %v13174_v11  ;;  %13303 = vmatpush1.bf16.msra.mxu1 %v13302_v52  ;;  %v13192_v11 = vpack.c.bf16 %v2852_v53, %v2850_v5  ;;  %v13320_v52 = vpack.c.bf16 %v3134_v9, %v3132_v29  ;;  %v13336_v53 = vpack.c.bf16 %v3150_v32, %v3148_v30  ;;  %v2867_v29 = vld [vmem:[%s14723_s9 + $0x3f0] sm:$0xff]  ;;  %v3147_v9 = vld [vmem:[%s14728_s13 + $0x3e0] sm:$0xff] }
 0x211   : > { %v2728_v23 = vadd.f32 %v15496_v26, %v2708_v40  ;;  %v15582_v22 = vpop.f32.mrb[2].mxu1  ;;  %13177 = vmatprep.subr.bf16.mxu0 %v13176_v17  ;;  %13305 = vmatprep.subr.bf16.mxu1 %v13304_v19  ;;  %v3133_v17 = vld [vmem:[%s14728_s13 + $0x370] sm:$0xff]  ;;  %v2854_v19 = vld [vmem:[%s14723_s9 + $0x388] sm:$0xff]  ;;  %v13210_v48 = vpack.c.bf16 %v2867_v29, %v2865_v49  ;;  %v3907_v32 = vld [vmem:[%s14723_s9 + $0x40] sm:$0xff] }
 0x212   : > { %v15587_v28 = vpop.f32.mrb[3].mxu1  ;;  %v13322_v13 = vpack.c.bf16 %v3133_v17, %v3131_v15  ;;  %v2855_v40 = vld [vmem:[%s14723_s9 + $0x390] sm:$0xff]  ;;  %v13196_v3 = vpack.c.bf16 %v2856_v34, %v2854_v19 }
 0x213   : > { %v2736_v43 = vmax.f32 %v2728_v23, 0.0  ;;  %v3140_v23 = vld [vmem:[%s14728_s13 + $0x3a8] sm:$0xff]  ;;  %v13198_v24 = vpack.c.bf16 %v2855_v40, %v2853_v21  ;;  %v3926_v49 = vld [vmem:[%s14723_s9 + $0x170] sm:$0xff] }
 0x214   : > { %13179 = vmatpush1.bf16.msra.mxu0 %v13178_v50  ;;  %13307 = vmatpush1.bf16.msra.mxu1 %v13306_v55  ;;  %v3135_v50 = vld [vmem:[%s14728_s13 + $0x380] sm:$0xff]  ;;  %v3137_v55 = vld [vmem:[%s14728_s13 + $0x390] sm:$0xff] }
 0x215   : > { %13181 = vmatprep.subr.bf16.mxu0 %v13180_v38  ;;  %3010 = vmatprep.mubr.f32.mxu0 %v2736_v43  ;;  %v3142_v38 = vld [vmem:[%s14728_s13 + $0x3b8] sm:$0xff]  ;;  %v13326_v31 = vpack.c.bf16 %v3137_v55, %v3135_v50  ;;  %v3910_v29 = vld [vmem:[%s14723_s9 + $0x70] sm:$0xff] }
 0x216   : > { %13309 = vmatprep.subr.bf16.mxu1 %v13308_v1  ;;  %3292 = vmatprep.mubr.f32.mxu1 %v2736_v43  ;;  %v2859_v1 = vld [vmem:[%s14723_s9 + $0x3b0] sm:$0xff]  ;;  %v13328_v41 = vpack.c.bf16 %v3142_v38, %v3140_v23 }
 0x217   : > { %v3141_v43 = vld [vmem:[%s14728_s13 + $0x3b0] sm:$0xff] }
 0x218   : > { %13183 = vmatpush1.bf16.msra.mxu0 %v13182_v47  ;;  %13311 = vmatpush1.bf16.msra.mxu1 %v13310_v51  ;;  %v2862_v47 = vld [vmem:[%s14723_s9 + $0x3c8] sm:$0xff]  ;;  %v2864_v51 = vld [vmem:[%s14723_s9 + $0x3d8] sm:$0xff] }
 0x219   : > { %13185 = vmatprep.subr.bf16.mxu0 %v13184_v0  ;;  %13313 = vmatprep.subr.bf16.mxu1 %v13312_v61  ;;  %v13202_v0 = vpack.c.bf16 %v2859_v1, %v2857_v37  ;;  %v13330_v61 = vpack.c.bf16 %v3141_v43, %v3139_v36  ;;  %v13204_v63 = vpack.c.bf16 %v2864_v51, %v2862_v47  ;;  %v3640_v37 = vld [vmem:[#allocation2 + $0x48] sm:$0xff]  ;;  %v3883_v36 = vld [vmem:[%s14758_s8] sm:$0xff]  ;;  %v3920_v51 = vld [vmem:[%s14723_s9 + $0x110] sm:$0xff] }
 0x21a   : > { %v3884_v43 = vld [vmem:[%s14758_s8 + $0x8] sm:$0xff]  ;;  %v3919_v47 = vld [vmem:[%s14723_s9 + $0x100] sm:$0xff] }
 0x21b   : > { %v13360_v16 = vpack.c.bf16 %v3920_v51, %v3919_v47 }
 0x21c   : > { %13187 = vmatpush1.bf16.msra.mxu0 %v13186_v27  ;;  %13315 = vmatpush1.bf16.msra.mxu1 %v13314_v60  ;;  %v2866_v27 = vld [vmem:[%s14723_s9 + $0x3e8] sm:$0xff]  ;;  %v2868_v60 = vld [vmem:[%s14723_s9 + $0x3f8] sm:$0xff] }
 0x21d   : > { %13189 = vmatprep.subr.bf16.mxu0 %v13188_v35  ;;  %13317 = vmatprep.subr.bf16.mxu1 %v13316_v44  ;;  %v13206_v35 = vpack.c.bf16 %v2863_v54, %v2861_v25  ;;  %v13334_v44 = vpack.c.bf16 %v3145_v62, %v3143_v45  ;;  %v13208_v5 = vpack.c.bf16 %v2868_v60, %v2866_v27  ;;  %v3922_v25 = vld [vmem:[%s14723_s9 + $0x130] sm:$0xff]  ;;  %v3923_v62 = vld [vmem:[%s14723_s9 + $0x140] sm:$0xff] }
 0x21e   : > { %v3906_v45 = vld [vmem:[%s14723_s9 + $0x30] sm:$0xff] }
 0x21f   : > { %v3924_v27 = vld [vmem:[%s14723_s9 + $0x150] sm:$0xff] }
 0x220   : > { %13191 = vmatpush1.bf16.msra.mxu0 %v13190_v42  ;;  %13319 = vmatpush1.bf16.msra.mxu1 %v13318_v58  ;;  %v3149_v42 = vld [vmem:[%s14728_s13 + $0x3f0] sm:$0xff]  ;;  %v2712_v58 = vmul.f32 %v15502_v4, %v15587_v28  ;;  %v13368_v30 = vpack.c.bf16 %v3924_v27, %v3923_v62 }
 0x221   : > { %13193 = vmatprep.subr.bf16.mxu0 %v13192_v11  ;;  %13321 = vmatprep.subr.bf16.mxu1 %v13320_v52  ;;  %v13338_v59 = vpack.c.bf16 %v3149_v42, %v3147_v9  ;;  %v2727_v11 = vadd.f32 %v15496_v26, %v2707_v56  ;;  %v2711_v52 = vmul.f32 %v15502_v4, %v15582_v22  ;;  %v3927_v9 = vld [vmem:[%s14723_s9 + $0x180] sm:$0xff]  ;;  %v3928_v42 = vld [vmem:[%s14723_s9 + $0x190] sm:$0xff] }
 0x222   : > { %v2732_v46 = vadd.f32 %v15515_v33, %v2712_v58 }
 0x223   : > { %v2735_v8 = vmax.f32 %v2727_v11, 0.0  ;;  %v2731_v15 = vadd.f32 %v15515_v33, %v2711_v52  ;;  %v15660_v33 = vld [vmem:[#allocation2 + $0x30] sm:$0xff]  ;;  %v3929_v52 = vld [vmem:[%s14723_s9 + $0x1a0] sm:$0xff] }
 0x224   : > { %13195 = vmatpush1.bf16.msra.mxu0 %v13194_v10  ;;  %13323 = vmatpush1.bf16.msra.mxu1 %v13322_v13  ;;  %v2740_v17 = vmax.f32 %v2732_v46, 0.0  ;;  %v14262_v55 = vpack.i.bf16 %v15660_v33, %v15658_v12  ;;  %v3912_v11 = vld [vmem:[%s14723_s9 + $0x90] sm:$0xff] }
 0x225   : > { %13197 = vmatprep.subr.bf16.mxu0 %v13196_v3  ;;  %13325 = vmatprep.subr.bf16.mxu1 %v13324_v18  ;;  %v2739_v28 = vmax.f32 %v2731_v15, 0.0  ;;  %v3930_v46 = vld [vmem:[%s14723_s9 + $0x1b0] sm:$0xff] }
 0x226   : > { %v13380_v15 = vpack.c.bf16 %v3930_v46, %v3929_v52 }
 0x228   : > { %13199 = vmatpush1.bf16.msra.mxu0 %v13198_v24  ;;  %13327 = vmatpush1.bf16.msra.mxu1 %v13326_v31  ;;  %v3637_v24 = vld [vmem:[#allocation2 + $0x18] sm:$0xff] }
 0x229   : > { %13201 = vmatprep.subr.bf16.mxu0 %v13200_v7  ;;  %13329 = vmatprep.subr.bf16.mxu1 %v13328_v41  ;;  %v3867_v7 = vld [vmem:[%s16916_s3] sm:$0xff]  ;;  %v3868_v41 = vld [vmem:[%s16916_s3 + $0x8] sm:$0xff]  ;;  %s16933_s3 = sld [smem:[#allocation18_spill]] }
 0x22c   : > { %13203 = vmatpush1.bf16.msra.mxu0 %v13202_v0  ;;  %13331 = vmatpush1.bf16.msra.mxu1 %v13330_v61  ;;  %v3904_v0 = vld [vmem:[%s14723_s9 + $0x10] sm:$0xff]  ;;  %v3921_v61 = vld [vmem:[%s14723_s9 + $0x120] sm:$0xff] }
 0x22d   : > { %13205 = vmatprep.subr.bf16.mxu0 %v13204_v63  ;;  %13333 = vmatprep.subr.bf16.mxu1 %v13332_v6  ;;  %v15708_v54 = vpack.c.bf16 %v3904_v0, %v3903_v14  ;;  %v13364_v63 = vpack.c.bf16 %v3922_v25, %v3921_v61  ;;  %v3905_v6 = vld [vmem:[%s14723_s9 + $0x20] sm:$0xff]  ;;  %v11104_v14 = vld [vmem:[%s14748_s29 + $0x10] sm:$0xff] }
 0x22e   : > { %v15715_v60 = vpack.c.bf16 %v3906_v45, %v3905_v6 }
 0x230   : > { %13207 = vmatpush1.bf16.msra.mxu0 %v13206_v35  ;;  %13335 = vmatpush1.bf16.msra.mxu1 %v13334_v44  ;;  %v3908_v35 = vld [vmem:[%s14723_s9 + $0x50] sm:$0xff]  ;;  %v3925_v44 = vld [vmem:[%s14723_s9 + $0x160] sm:$0xff] }
 0x231   : > { %13209 = vmatprep.subr.bf16.mxu0 %v13208_v5  ;;  %13337 = vmatprep.subr.bf16.mxu1 %v13336_v53  ;;  %v15722_v56 = vpack.c.bf16 %v3908_v35, %v3907_v32  ;;  %v13372_v5 = vpack.c.bf16 %v3926_v49, %v3925_v44  ;;  %v3909_v53 = vld [vmem:[%s14723_s9 + $0x60] sm:$0xff]  ;;  %v11105_v35 = vld [vmem:[%s14748_s29 + $0x18] sm:$0xff] }
 0x232   : > { %v15729_v58 = vpack.c.bf16 %v3910_v29, %v3909_v53 }
 0x234   : > { %13211 = vmatpush1.bf16.msra.mxu0 %v13210_v48  ;;  %13339 = vmatpush1.bf16.msra.mxu1 %v13338_v59  ;;  %v13376_v48 = vpack.c.bf16 %v3928_v42, %v3927_v9  ;;  %v3911_v59 = vld [vmem:[%s14723_s9 + $0x80] sm:$0xff] }
 0x235   : > { %13361 = vmatprep.subr.bf16.mxu1 %v13360_v16  ;;  %v3327_v9 = vld [vmem:[%s14748_s29] sm:$0xff] }
 0x237   : > { %3011 = vmatmul.mubr.f32.vlgmr.msra.gmra.mrb[4].mxu0 %v2735_v8  ;;  %3293 = vmatmul.mubr.f32.vlgmr.msra.gmra.mrb[4].mxu1 %v2735_v8  ;;  %v15736_v8 = vpack.c.bf16 %v3912_v11, %v3911_v59 }
 0x238   : > { %3016 = vmatprep.mubr.f32.mxu0 %v2740_v17  ;;  %3298 = vmatprep.mubr.f32.mxu1 %v2740_v17  ;;  %v3913_v17 = vld [vmem:[%s14723_s9 + $0xa0] sm:$0xff] }
 0x239   : > { %13363 = vmatpush3.bf16.msra.mxu1 %v15708_v54 }
 0x23a   : > { %13365 = vmatprep.subr.bf16.mxu1 %v13364_v63 }
 0x23b   : > { %3017 = vmatmul.mubr.f32.gmra.mrb[6].mxu0 %v2739_v28  ;;  %3299 = vmatmul.mubr.f32.gmra.mrb[6].mxu1 %v2739_v28  ;;  %v3914_v28 = vld [vmem:[%s14723_s9 + $0xb0] sm:$0xff] }
 0x23c   : > { %3429 = vmatprep.mubr.f32.mxu0 %v14699_v2 }
 0x23d   : > { %13367 = vmatpush3.bf16.msra.mxu1 %v15715_v60 }
 0x23e   : > { %13369 = vmatprep.subr.bf16.mxu1 %v13368_v30 }
 0x241   : > { %13371 = vmatpush3.bf16.msra.mxu1 %v15722_v56 }
 0x242   : > { %13373 = vmatprep.subr.bf16.mxu1 %v13372_v5 }
 0x245   : > { %13375 = vmatpush3.bf16.msra.mxu1 %v15729_v58 }
 0x246   : > { %13377 = vmatprep.subr.bf16.mxu1 %v13376_v48 }
 0x249   : > { %13379 = vmatpush3.bf16.msra.mxu1 %v15736_v8 }
 0x24a   : > { %13381 = vmatprep.subr.bf16.mxu1 %v13380_v15 }
 0x30a   : > { %v3012_v26 = vpop.f32.mrb[4].mxu0  ;;  %v3294_v4 = vpop.f32.mrb[4].mxu1 }
 0x30b   : > { %v15654_v22 = vmax.f32 %v3012_v26, %v3294_v4  ;;  %v3014_v19 = vpop.f32.mrb[5].mxu0  ;;  %v3296_v34 = vpop.f32.mrb[5].mxu1  ;;  %v15741_v26 = vpack.c.bf16 %v3914_v28, %v3913_v17 }
 0x30c   : > { %v15656_v57 = vmax.f32 %v3014_v19, %v3296_v34 }
 0x30d   : > { %13383 = vmatpush3.bf16.msra.mxu1 %v15741_v26 }
 0x30e   : > { %3318 = vst [vmem:[#allocation2 + $0x10] sm:$0xff] %v15656_v57  ;;  %v3018_v10 = vpop.f32.mrb[6].mxu0  ;;  %v3300_v13 = vpop.f32.mrb[6].mxu1  ;;  %v14252_v21 = vpack.i.bf16 %v15656_v57, %v15654_v22  ;;  %v14282_v31 = vpack.i.bf16 %v3637_v24, %v15656_v57 }
 0x30f   : > { %v15665_v40 = vmax.f32 %v3018_v10, %v3300_v13  ;;  %v3020_v3 = vpop.f32.mrb[7].mxu0  ;;  %v3302_v18 = vpop.f32.mrb[7].mxu1  ;;  %4119 = vst.msk [vmem:[#allocation2 + $0x10] sm:$0xff] %vm1200_vm1, %v14699_v2 }
 0x310   : > { %v15669_v50 = vmax.f32 %v3020_v3, %v3302_v18  ;;  %14253 = vrot.lane.b32.xlu1 %v14252_v21, %s14702_s1 }
 0x311   : > { %v14292_v20 = vpack.i.bf16 %v15665_v40, %v15654_v22  ;;  %v13350_v39 = vpack.c.bf16 %v15665_v40, %v15654_v22 }
 0x312   : > { %3320 = vst [vmem:[#allocation2 + $0x40] sm:$0xff] %v15669_v50  ;;  %v14257_v23 = vpack.i.bf16 %v15669_v50, %v15665_v40  ;;  %v13348_v38 = vpack.c.bf16 %v15669_v50, %v15656_v57  ;;  %v14287_v1 = vpack.i.bf16 %v3640_v37, %v15669_v50  ;;  %v3328_v57 = vld [vmem:[%s14748_s29 + $0x8] sm:$0xff] }
 0x313   : > { %4120 = vst.msk [vmem:[#allocation2 + $0x40] sm:$0xff] %vm1200_vm1, %v14699_v2 }
 0x314   : > { %14263 = vrot.lane.b32.xlu1 %v14262_v55, %s14702_s1  ;;  %14258 = vrot.lane.b32.xlu0 %v14257_v23, %s14702_s1 }
 0x318   : > { %14273 = vrot.lane.b32.xlu1 %v14257_v23, %s14700_s26  ;;  %14268 = vrot.lane.b32.xlu0 %v14252_v21, %s14700_s26 }
 0x31c   : > { %14283 = vrot.lane.b32.xlu1 %v14282_v31, %s16881_s2  ;;  %14278 = vrot.lane.b32.xlu0 %v14262_v55, %s14700_s26 }
 0x320   : > { %14293 = vrot.lane.b32.xlu1 %v14292_v20, %s16881_s2  ;;  %14288 = vrot.lane.b32.xlu0 %v14287_v1, %s16881_s2 }
 0x324   : > { %14303 = vrot.lane.b32.xlu1 %v14287_v1, %s14704_s10  ;;  %14298 = vrot.lane.b32.xlu0 %v14282_v31, %s14704_s10 }
 0x328   : > { %3871 = vperm.xlu1 %14251, %v3867_v7   ;;  %14308 = vrot.lane.b32.xlu0 %v14292_v20, %s14704_s10 }
 0x32c   : > { %3876 = vperm.xlu1 %14251, %v3868_v41   ;;  %3887 = vperm.xlu0 %14250, %v3883_v36  }
 0x330   : > { %3892 = vperm.xlu0 %14250, %v3884_v43  }
 0x382   : > { %v14254_v4 = vpop.permute.xlu1 %14253 }
 0x383   : > { %v14256_v19 = vunpack.i.h.bf16 %v14254_v4  ;;  %v14255_v34 = vunpack.i.l.bf16 %v14254_v4 }
 0x385   : > { %v3351_v24 = vsel %vm1669_vm7, %v14255_v34, %v14256_v19 }
 0x386   : > { %v14264_v10 = vpop.permute.xlu1 %14263  ;;  %v14259_v13 = vpop.permute.xlu0 %14258 }
 0x387   : > { %v14266_v21 = vunpack.i.h.bf16 %v14264_v10  ;;  %v14265_v3 = vunpack.i.l.bf16 %v14264_v10  ;;  %v14261_v18 = vunpack.i.h.bf16 %v14259_v13  ;;  %v14260_v55 = vunpack.i.l.bf16 %v14259_v13  ;;  %v11110_v10 = vld [vmem:[%s14748_s29 + $0x20] sm:$0xff] }
 0x389   : > { %v3350_v20 = vsel %vm1669_vm7, %v14265_v3, %v14255_v34  ;;  %v3352_v23 = vsel %vm1669_vm7, %v14266_v21, %v14260_v55  ;;  %v3353_v31 = vsel %vm1669_vm7, %v14260_v55, %v14261_v18  ;;  %v11111_v18 = vld [vmem:[%s14748_s29 + $0x28] sm:$0xff] }
 0x38a   : > { %v14274_v37 = vpop.permute.xlu1 %14273  ;;  %v14269_v1 = vpop.permute.xlu0 %14268  ;;  %v13340_v7 = vpack.c.bf16 %v3353_v31, %v3351_v24  ;;  %v13342_v41 = vpack.c.bf16 %v3352_v23, %v3350_v20  ;;  %v11114_v23 = vld [vmem:[%s14748_s29 + $0x30] sm:$0xff]  ;;  %v11115_v31 = vld [vmem:[%s14748_s29 + $0x38] sm:$0xff] }
 0x38b   : > { %v14276_v36 = vunpack.i.h.bf16 %v14274_v37  ;;  %v14275_v43 = vunpack.i.l.bf16 %v14274_v37  ;;  %v14271_v47 = vunpack.i.h.bf16 %v14269_v1  ;;  %v14270_v51 = vunpack.i.l.bf16 %v14269_v1  ;;  %v11118_v37 = vld [vmem:[%s14748_s29 + $0x40] sm:$0xff]  ;;  %v11119_v1 = vld [vmem:[%s14748_s29 + $0x48] sm:$0xff] }
 0x38c   : > { %13341 = vmatprep.subr.bf16.mxu0 %v13340_v7  ;;  %v3931_v7 = vld [vmem:[%s14723_s9 + $0x1c0] sm:$0xff] }
 0x38d   : > { %13343 = vmatpush1.bf16.msra.mxu0 %v13342_v41  ;;  %v3455_v16 = vsel %vm1262_vm2, %v14270_v51, %v14271_v47  ;;  %v3457_v0 = vsel %vm1262_vm2, %v14275_v43, %v14276_v36  ;;  %v3932_v41 = vld [vmem:[%s14723_s9 + $0x1d0] sm:$0xff] }
 0x38e   : > { %v14284_v61 = vpop.permute.xlu1 %14283  ;;  %v14279_v25 = vpop.permute.xlu0 %14278  ;;  %v13344_v63 = vpack.c.bf16 %v3457_v0, %v3455_v16  ;;  %v13384_v36 = vpack.c.bf16 %v3932_v41, %v3931_v7  ;;  %v3916_v47 = vld [vmem:[%s14723_s9 + $0xd0] sm:$0xff]  ;;  %v4034_v7 = vld [vmem:[%s14728_s13 + $0x180] sm:$0xff] }
 0x38f   : > { %v14281_v6 = vunpack.i.h.bf16 %v14279_v25  ;;  %v14280_v45 = vunpack.i.l.bf16 %v14279_v25  ;;  %v14286_v62 = vunpack.i.h.bf16 %v14284_v61  ;;  %v14285_v27 = vunpack.i.l.bf16 %v14284_v61  ;;  %v3934_v16 = vld [vmem:[%s14723_s9 + $0x1f0] sm:$0xff]  ;;  %v3917_v61 = vld [vmem:[%s14723_s9 + $0xe0] sm:$0xff] }
 0x390   : > { %11106 = vmatmul.mubr.msk.f32.vlgmr.msra.gmra.mrb[8].mxu0 %vm3358_vm12, %v11104_v14  ;;  %13345 = vmatprep.subr.bf16.mxu0 %v13344_v63  ;;  %v3933_v14 = vld [vmem:[%s14723_s9 + $0x1e0] sm:$0xff]  ;;  %v3918_v25 = vld [vmem:[%s14723_s9 + $0xf0] sm:$0xff] }
 0x391   : > { %v3456_v30 = vsel %vm1262_vm2, %v14281_v6, %v14275_v43  ;;  %v3454_v32 = vsel %vm1262_vm2, %v14280_v45, %v14270_v51  ;;  %3435 = vmatprep.mubr.f32.mxu0 %v14699_v2  ;;  %v3663_v42 = vsel %vm2080_vm9, %v14285_v27, %v14286_v62  ;;  %v3915_v43 = vld [vmem:[%s14723_s9 + $0xc0] sm:$0xff]  ;;  %13385 = vmatprep.subr.bf16.mxu1 %v13384_v36  ;;  %v4027_v45 = vld [vmem:[%s14728_s13 + $0x110] sm:$0xff] }
 0x392   : > { %v14294_v44 = vpop.permute.xlu1 %14293  ;;  %v14289_v49 = vpop.permute.xlu0 %14288  ;;  %v13346_v5 = vpack.c.bf16 %v3456_v30, %v3454_v32  ;;  %v15799_v51 = vpack.c.bf16 %v3916_v47, %v3915_v43  ;;  %v13388_v0 = vpack.c.bf16 %v3934_v16, %v3933_v14  ;;  %v15806_v63 = vpack.c.bf16 %v3918_v25, %v3917_v61  ;;  %v4026_v6 = vld [vmem:[%s14728_s13 + $0x100] sm:$0xff]  ;;  %v4035_v41 = vld [vmem:[%s14728_s13 + $0x190] sm:$0xff] }
 0x393   : > { %v14291_v53 = vunpack.i.h.bf16 %v14289_v49  ;;  %v14290_v29 = vunpack.i.l.bf16 %v14289_v49  ;;  %v14296_v46 = vunpack.i.h.bf16 %v14294_v44  ;;  %v14295_v15 = vunpack.i.l.bf16 %v14294_v44  ;;  %v4018_v47 = vld [vmem:[%s14728_s13 + $0x80] sm:$0xff]  ;;  %v4019_v14 = vld [vmem:[%s14728_s13 + $0x90] sm:$0xff] }
 0x394   : > { %11107 = vmatmul.mubr.msk.f32.gmra.mrb[10].mxu0 %vm3358_vm12, %v11105_v35  ;;  %13387 = vmatpush3.bf16.msra.mxu1 %v15799_v51  ;;  %v13392_v62 = vpack.c.bf16 %v4027_v45, %v4026_v6  ;;  %v13408_v43 = vpack.c.bf16 %v4035_v41, %v4034_v7  ;;  %v4036_v16 = vld [vmem:[%s14728_s13 + $0x1a0] sm:$0xff]  ;;  %v15851_v61 = vpack.c.bf16 %v4019_v14, %v4018_v47  ;;  %v4021_v45 = vld [vmem:[%s14728_s13 + $0xb0] sm:$0xff] }
 0x395   : > { %13347 = vmatpush1.bf16.msra.mxu0 %v13346_v5  ;;  %3532 = vmatprep.mubr.f32.mxu0 %v14699_v2  ;;  %v3665_v48 = vsel %vm2080_vm9, %v14290_v29, %v14291_v53  ;;  %v3662_v50 = vsel %vm2080_vm9, %v14295_v15, %v14285_v27  ;;  %v4010_v53 = vld [vmem:[%s14728_s13] sm:$0xff] }
 0x396   : > { %13349 = vmatprep.subr.bf16.mxu0 %v13348_v38  ;;  %v14304_v59 = vpop.permute.xlu1 %14303  ;;  %v14299_v11 = vpop.permute.xlu0 %14298  ;;  %v13352_v52 = vpack.c.bf16 %v3665_v48, %v3663_v42  ;;  %v3664_v38 = vsel %vm2080_vm9, %v14296_v46, %v14290_v29  ;;  %13389 = vmatprep.subr.bf16.mxu1 %v13388_v0  ;;  %v4011_v29 = vld [vmem:[%s14728_s13 + $0x10] sm:$0xff]  ;;  %v4020_v6 = vld [vmem:[%s14728_s13 + $0xa0] sm:$0xff] }
 0x397   : > { %v14306_v17 = vunpack.i.h.bf16 %v14304_v59  ;;  %v14305_v28 = vunpack.i.l.bf16 %v14304_v59  ;;  %v14301_v4 = vunpack.i.h.bf16 %v14299_v11  ;;  %v14300_v19 = vunpack.i.l.bf16 %v14299_v11  ;;  %v4028_v59 = vld [vmem:[%s14728_s13 + $0x120] sm:$0xff]  ;;  %v4029_v11 = vld [vmem:[%s14728_s13 + $0x130] sm:$0xff] }
 0x398   : > { %11108 = vmatmul.mubr.msk.f32.vlgmr.msra.gmra.mrb[8].mxu0 %vm3358_vm12, %v3327_v9  ;;  %v13354_v40 = vpack.c.bf16 %v3664_v38, %v3662_v50  ;;  %13391 = vmatpush3.bf16.msra.mxu1 %v15806_v63  ;;  %v13396_v50 = vpack.c.bf16 %v4029_v11, %v4028_v59  ;;  %v4012_v38 = vld [vmem:[%s14728_s13 + $0x20] sm:$0xff]  ;;  %v4037_v0 = vld [vmem:[%s14728_s13 + $0x1b0] sm:$0xff] }
 0x399   : > { %13351 = vmatpush1.bf16.msra.mxu0 %v13350_v39  ;;  %3538 = vmatprep.mubr.f32.mxu0 %v14699_v2  ;;  %v3773_v13 = vsel %vm2292_vm10, %v14300_v19, %v14301_v4  ;;  %v3775_v22 = vsel %vm2292_vm10, %v14305_v28, %v14306_v17  ;;  %v15817_v4 = vpack.c.bf16 %v4011_v29, %v4010_v53  ;;  %v4041_v53 = vld [vmem:[%s14728_s13 + $0x1f0] sm:$0xff] }
 0x39a   : > { %13353 = vmatprep.subr.bf16.mxu0 %v13352_v52  ;;  %v14309_v34 = vpop.permute.xlu0 %14308  ;;  %v13356_v3 = vpack.c.bf16 %v3775_v22, %v3773_v13  ;;  %13393 = vmatprep.subr.bf16.mxu1 %v13392_v62  ;;  %v4030_v13 = vld [vmem:[%s14728_s13 + $0x140] sm:$0xff]  ;;  %v4031_v22 = vld [vmem:[%s14728_s13 + $0x150] sm:$0xff]  ;;  %v13412_v25 = vpack.c.bf16 %v4037_v0, %v4036_v16 }
 0x39b   : > { %v14311_v39 = vunpack.i.h.bf16 %v14309_v34  ;;  %v14310_v21 = vunpack.i.l.bf16 %v14309_v34  ;;  %v4013_v34 = vld [vmem:[%s14728_s13 + $0x30] sm:$0xff]  ;;  %v4038_v62 = vld [vmem:[%s14728_s13 + $0x1c0] sm:$0xff] }
 0x39c   : > { %11109 = vmatmul.mubr.msk.f32.gmra.mrb[10].mxu0 %vm3358_vm12, %v3328_v57 }
 0x39d   : > { %3618 = vmatprep.mubr.f32.mxu0 %v14699_v2  ;;  %v3774_v55 = vsel %vm2292_vm10, %v14311_v39, %v14305_v28  ;;  %v3772_v20 = vsel %vm2292_vm10, %v14310_v21, %v14300_v19  ;;  %v15829_v39 = vpack.c.bf16 %v4013_v34, %v4012_v38  ;;  %v4471_v38 = vld [vmem:[#allocation2 + $0x10] sm:$0xff]  ;;  %v4473_v34 = vld [vmem:[#allocation2 + $0x40] sm:$0xff] }
 0x39e   : > { %v13358_v24 = vpack.c.bf16 %v3774_v55, %v3772_v20  ;;  %v4015_v55 = vld [vmem:[%s14728_s13 + $0x50] sm:$0xff]  ;;  %v4032_v20 = vld [vmem:[%s14728_s13 + $0x160] sm:$0xff] }
 0x3a0   : > { %11112 = vmatmul.mubr.msk.f32.vlgmr.msra.gmra.mrb[8].mxu0 %vm3358_vm12, %v11110_v10 }
 0x3a1   : > { %13355 = vmatpush1.bf16.msra.mxu0 %v13354_v40  ;;  %3624 = vmatprep.mubr.f32.mxu0 %v14699_v2 }
 0x3a2   : > { %13357 = vmatprep.subr.bf16.mxu0 %v13356_v3  ;;  %v13400_v3 = vpack.c.bf16 %v4031_v22, %v4030_v13  ;;  %v4742_v13 = vld [vmem:[%s14773_s24] sm:$0xff]  ;;  %v4715_v22 = vld [vmem:[%s14768_s19 + $0x8] sm:$0xff] }
 0x3a4   : > { %11113 = vmatmul.mubr.msk.f32.gmra.mrb[10].mxu0 %vm3358_vm12, %v11111_v18  ;;  %v4014_v18 = vld [vmem:[%s14728_s13 + $0x40] sm:$0xff] }
 0x3a5   : > { %3740 = vmatprep.mubr.f32.mxu0 %v14699_v2 }
 0x3a7   : > { %v3872_v27 = vpop.permute.xlu1 %3871 }
 0x3a8   : > { %11116 = vmatmul.mubr.msk.f32.vlgmr.msra.gmra.mrb[8].mxu0 %vm3358_vm12, %v11114_v23  ;;  %v4033_v23 = vld [vmem:[%s14728_s13 + $0x170] sm:$0xff] }
 0x3a9   : > { %13359 = vmatpush1.bf16.msra.mxu0 %v13358_v24  ;;  %3746 = vmatprep.mubr.f32.mxu0 %v14699_v2  ;;  %v15837_v24 = vpack.c.bf16 %v4015_v55, %v4014_v18  ;;  %v4717_v18 = vld [vmem:[%s14768_s19 + $0x18] sm:$0xff] }
 0x3aa   : > { %v4745_v55 = vld [vmem:[%s14773_s24 + $0x18] sm:$0xff] }
 0x3ab   : > { %v3888_v30 = vpop.permute.xlu0 %3887  ;;  %v3877_v9 = vpop.permute.xlu1 %3876 }
 0x3ac   : > { %11117 = vmatmul.mubr.msk.f32.gmra.mrb[10].mxu0 %vm3358_vm12, %v11115_v31  ;;  %v13404_v31 = vpack.c.bf16 %v4033_v23, %v4032_v20 }
 0x3ad   : > { %3850 = vmatprep.mubr.f32.mxu0 %v14699_v2 }
 0x3af   : > { %v3893_v15 = vpop.permute.xlu0 %3892 }
 0x3b0   : > { %11120 = vmatmul.mubr.msk.f32.vlgmr.msra.gmra.mrb[8].mxu0 %vm3358_vm12, %v11118_v37  ;;  %v4016_v37 = vld [vmem:[%s14728_s13 + $0x60] sm:$0xff] }
 0x3b1   : > { %3856 = vmatprep.mubr.f32.mxu0 %v14699_v2 }
 0x3b4   : > { %11121 = vmatmul.mubr.msk.f32.gmra.mrb[10].mxu0 %vm3358_vm12, %v11119_v1  ;;  %v4017_v1 = vld [vmem:[%s14728_s13 + $0x70] sm:$0xff] }
 0x3b5   : > { %v15844_v36 = vpack.c.bf16 %v4017_v1, %v4016_v37 }
 0x483   : > { %v3852_v32 = vpop.f32.mrb[8].mxu0 }
 0x484   : > { %v3879_v35 = vmul.f32 %v3872_v27, %v3852_v32  ;;  %v3854_v44 = vpop.f32.mrb[9].mxu0 }
 0x485   : > { %v3880_v49 = vmul.f32 %v3872_v27, %v3854_v44  ;;  %v4039_v27 = vld [vmem:[%s14728_s13 + $0x1d0] sm:$0xff] }
 0x486   : > { %v15811_v5 = vadd.f32 %v3888_v30, %v3879_v35  ;;  %v13416_v32 = vpack.c.bf16 %v4039_v27, %v4038_v62  ;;  %v4022_v35 = vld [vmem:[%s14728_s13 + $0xc0] sm:$0xff]  ;;  %v4023_v44 = vld [vmem:[%s14728_s13 + $0xd0] sm:$0xff]  ;;  %v11123_v62 = vld [vmem:[%s14763_s14 + $0x28] sm:$0xff] }
 0x487   : > { %v3896_v42 = vadd.f32 %v3888_v30, %v3880_v49  ;;  %v3858_v48 = vpop.f32.mrb[10].mxu0  ;;  %v15858_v30 = vpack.c.bf16 %v4021_v45, %v4020_v6  ;;  %v4040_v49 = vld [vmem:[%s14728_s13 + $0x1e0] sm:$0xff]  ;;  %v15865_v29 = vpack.c.bf16 %v4023_v44, %v4022_v35 }
 0x488   : > { %v3881_v52 = vmul.f32 %v3877_v9, %v3858_v48  ;;  %v3860_v46 = vpop.f32.mrb[11].mxu0  ;;  %v3899_v19 = vmax.f32 %v15811_v5, 0.0  ;;  %v4025_v48 = vld [vmem:[%s14728_s13 + $0xf0] sm:$0xff] }
 0x489   : > { %v3900_v17 = vmax.f32 %v3896_v42, 0.0  ;;  %v3882_v28 = vmul.f32 %v3877_v9, %v3860_v46  ;;  %v13420_v9 = vpack.c.bf16 %v4041_v53, %v4040_v49  ;;  %v4024_v42 = vld [vmem:[%s14728_s13 + $0xe0] sm:$0xff]  ;;  %v11124_v49 = vld [vmem:[%s14763_s14 + $0x30] sm:$0xff] }
 0x48a   : > { %v15820_v57 = vadd.f32 %v3893_v15, %v3881_v52  ;;  %v15870_v59 = vpack.c.bf16 %v4025_v48, %v4024_v42  ;;  %v11125_v48 = vld [vmem:[%s14763_s14 + $0x38] sm:$0xff] }
 0x48b   : > { %v3898_v10 = vadd.f32 %v3893_v15, %v3882_v28  ;;  %3999 = vmatprep.mubr.f32.mxu1 %v3900_v17 }
 0x48c   : > { %4000 = vmatmul.mubr.f32.vlgmr.msra.gmra.mrb[8].mxu1 %v3899_v19  ;;  %v3901_v21 = vmax.f32 %v15820_v57, 0.0 }
 0x48d   : > { %v3902_v40 = vmax.f32 %v3898_v10, 0.0  ;;  %13395 = vmatpush3.bf16.msra.mxu1 %v15817_v4 }
 0x48e   : > { %13397 = vmatprep.subr.bf16.mxu1 %v13396_v50 }
 0x48f   : > { %4004 = vmatprep.mubr.f32.mxu1 %v3902_v40 }
 0x490   : > { %4005 = vmatmul.mubr.f32.gmra.mrb[10].mxu1 %v3901_v21 }
 0x491   : > { %13399 = vmatpush3.bf16.msra.mxu1 %v15829_v39  ;;  %4106 = vmatprep.mubr.f32.mxu1 %v3900_v17 }
 0x492   : > { %13401 = vmatprep.subr.bf16.mxu1 %v13400_v3  ;;  %v4744_v3 = vld [vmem:[%s14773_s24 + $0x10] sm:$0xff] }
 0x495   : > { %13403 = vmatpush3.bf16.msra.mxu1 %v15837_v24 }
 0x496   : > { %13405 = vmatprep.subr.bf16.mxu1 %v13404_v31 }
 0x499   : > { %13407 = vmatpush3.bf16.msra.mxu1 %v15844_v36 }
 0x49a   : > { %13409 = vmatprep.subr.bf16.mxu1 %v13408_v43 }
 0x49d   : > { %13411 = vmatpush3.bf16.msra.mxu1 %v15851_v61 }
 0x49e   : > { %13413 = vmatprep.subr.bf16.mxu1 %v13412_v25 }
 0x4a1   : > { %13415 = vmatpush3.bf16.msra.mxu1 %v15858_v30 }
 0x4a2   : > { %13417 = vmatprep.subr.bf16.mxu1 %v13416_v32 }
 0x4a5   : > { %13419 = vmatpush3.bf16.msra.mxu1 %v15865_v29 }
 0x4a6   : > { %13421 = vmatprep.subr.bf16.mxu1 %v13420_v9 }
 0x4a9   : > { %13423 = vmatpush3.bf16.msra.mxu1 %v15870_v59 }
 0x4aa   : > { %13445 = vmatprep.subr.bf16.mxu1 %v15708_v54 }
 0x4ac   : > { %4107 = vmatmul.mubr.f32.vlgmr.msra.gmra.mrb[12].mxu1 %v3899_v19  ;;  %v11122_v19 = vld [vmem:[%s14763_s14 + $0x20] sm:$0xff] }
 0x4ad   : > { %4111 = vmatprep.mubr.f32.mxu1 %v3902_v40  ;;  %13447 = vmatpush3.bf16.msra.mxu1 %v15708_v54  ;;  %v4716_v40 = vld [vmem:[%s14768_s19 + $0x10] sm:$0xff] }
 0x4ae   : > { %13449 = vmatprep.subr.bf16.mxu1 %v15715_v60  ;;  %12115 = vmatprep.mubr.msk.f32.mxu0 %vm3358_vm12, %v11122_v19 }
 0x4b0   : > { %4112 = vmatmul.mubr.f32.gmra.mrb[14].mxu1 %v3901_v21  ;;  %v4743_v21 = vld [vmem:[%s14773_s24 + $0x8] sm:$0xff] }
 0x4b1   : > { %13451 = vmatpush3.bf16.msra.mxu1 %v15715_v60 }
 0x4b2   : > { %13453 = vmatprep.subr.bf16.mxu1 %v15722_v56 }
 0x4b5   : > { %13455 = vmatpush3.bf16.msra.mxu1 %v15722_v56 }
 0x4b6   : > { %13457 = vmatprep.subr.bf16.mxu1 %v15729_v58 }
 0x4b9   : > { %13459 = vmatpush3.bf16.msra.mxu1 %v15729_v58 }
 0x4ba   : > { %13461 = vmatprep.subr.bf16.mxu1 %v15736_v8 }
 0x4bd   : > { %13463 = vmatpush3.bf16.msra.mxu1 %v15736_v8 }
 0x4be   : > { %13465 = vmatprep.subr.bf16.mxu1 %v15741_v26 }
 0x4c1   : > { %13467 = vmatpush3.bf16.msra.mxu1 %v15741_v26 }
 0x4c2   : > { %13469 = vmatprep.subr.bf16.mxu1 %v15799_v51 }
 0x4c5   : > { %13471 = vmatpush3.bf16.msra.mxu1 %v15799_v51 }
 0x4c6   : > { %13473 = vmatprep.subr.bf16.mxu1 %v15806_v63 }
 0x4c9   : > { %13475 = vmatpush3.bf16.msra.mxu1 %v15806_v63 }
 0x55f   : > { %v11550_v54 = vpop.f32.mrb[8].mxu1 }
 0x560   : > { %v11551_v60 = vpop.f32.mrb[9].mxu1 }
 0x561   : > { %v11552_v56 = vadd.f32 %v11551_v60, %v11550_v54  ;;  %v4133_v54 = vld [vmem:[%s14763_s14] sm:$0xff] }
 0x563   : > { %v11553_v58 = vpop.f32.mrb[10].mxu1 }
 0x564   : > { %v11554_v5 = vpop.f32.mrb[11].mxu1 }
 0x565   : > { %v11555_v11 = vadd.f32 %v11554_v5, %v11553_v58  ;;  %v4134_v58 = vld [vmem:[%s14763_s14 + $0x8] sm:$0xff] }
 0x57f   : > { %v11588_v8 = vpop.f32.mrb[12].mxu1 }
 0x580   : > { %v11589_v52 = vpop.f32.mrb[13].mxu1 }
 0x581   : > { %v11590_v46 = vadd.f32 %v11589_v52, %v11588_v8  ;;  %v4135_v8 = vld [vmem:[%s14763_s14 + $0x10] sm:$0xff] }
 0x583   : > { %v4117_v15 = vmax.f32 %v11552_v56, %v11590_v46  ;;  %v11591_v26 = vpop.f32.mrb[14].mxu1 }
 0x584   : > { %v11592_v17 = vpop.f32.mrb[15].mxu1 }
 0x585   : > { %4127 = vst [vmem:[#allocation2 + $0x8] sm:$0xff] %v4117_v15  ;;  %v11593_v28 = vadd.f32 %v11592_v17, %v11591_v26  ;;  %v14312_v51 = vpack.i.bf16 %v4117_v15, %v15658_v12  ;;  %v14332_v12 = vpack.i.bf16 %v4471_v38, %v4117_v15 }
 0x586   : > { %4981 = vst.msk [vmem:[#allocation2 + $0x8] sm:$0xff] %vm4980_vm13, %v14699_v2 }
 0x587   : > { %v4118_v63 = vmax.f32 %v11555_v11, %v11593_v28  ;;  %14313 = vrot.lane.b32.xlu1 %v14312_v51, %s14702_s1  ;;  %v4136_v28 = vld [vmem:[%s14763_s14 + $0x18] sm:$0xff] }
 0x589   : > { %4128 = vst [vmem:[#allocation2 + $0x38] sm:$0xff] %v4118_v63  ;;  %v14317_v57 = vpack.i.bf16 %v4118_v63, %v15660_v33  ;;  %v15896_v50 = vpack.c.bf16 %v4118_v63, %v4117_v15  ;;  %v14337_v10 = vpack.i.bf16 %v4473_v34, %v4118_v63  ;;  %v4714_v33 = vld [vmem:[%s14768_s19] sm:$0xff] }
 0x58a   : > { %4982 = vst.msk [vmem:[#allocation2 + $0x38] sm:$0xff] %vm4980_vm13, %v14699_v2 }
 0x58b   : > { %14323 = vrot.lane.b32.xlu1 %v14312_v51, %s14700_s26  ;;  %14318 = vrot.lane.b32.xlu0 %v14317_v57, %s14702_s1  ;;  %v11134_v51 = vld [vmem:[%s14763_s14 + $0x40] sm:$0xff] }
 0x58f   : > { %14333 = vrot.lane.b32.xlu1 %v14332_v12, %s16881_s2  ;;  %14328 = vrot.lane.b32.xlu0 %v14317_v57, %s14700_s26  ;;  %v11135_v57 = vld [vmem:[%s14763_s14 + $0x48] sm:$0xff] }
 0x593   : > { %14343 = vrot.lane.b32.xlu1 %v14332_v12, %s14704_s10  ;;  %14338 = vrot.lane.b32.xlu0 %v14337_v10, %s16881_s2  ;;  %v11136_v12 = vld [vmem:[%s14763_s14 + $0x50] sm:$0xff] }
 0x597   : > { %4720 = vperm.xlu1 %14251, %v4714_v33   ;;  %14348 = vrot.lane.b32.xlu0 %v14337_v10, %s14704_s10  ;;  %v11137_v10 = vld [vmem:[%s14763_s14 + $0x58] sm:$0xff]  ;;  %v11142_v33 = vld [vmem:[%s14763_s14 + $0x60] sm:$0xff] }
 0x59b   : > { %4748 = vperm.xlu1 %14251, %v4742_v13   ;;  %4725 = vperm.xlu0 %14250, %v4715_v22   ;;  %v11143_v13 = vld [vmem:[%s14763_s14 + $0x68] sm:$0xff]  ;;  %v11144_v22 = vld [vmem:[%s14763_s14 + $0x70] sm:$0xff] }
 0x59f   : > { %4730 = vperm.xlu1 %14251, %v4716_v40   ;;  %4753 = vperm.xlu0 %14250, %v4743_v21   ;;  %v11145_v40 = vld [vmem:[%s14763_s14 + $0x78] sm:$0xff]  ;;  %v11150_v21 = vld [vmem:[%s14763_s14 + $0x80] sm:$0xff] }
 0x5a3   : > { %4758 = vperm.xlu1 %14251, %v4744_v3   ;;  %4735 = vperm.xlu0 %14250, %v4717_v18   ;;  %v11151_v3 = vld [vmem:[%s14763_s14 + $0x88] sm:$0xff]  ;;  %v11152_v18 = vld [vmem:[%s14763_s14 + $0x90] sm:$0xff] }
 0x5a7   : > { %4763 = vperm.xlu0 %14250, %v4745_v55   ;;  %v11153_v55 = vld [vmem:[%s14763_s14 + $0x98] sm:$0xff] }
 0x5f9   : > { %v14314_v20 = vpop.permute.xlu1 %14313 }
 0x5fa   : > { %v14316_v23 = vunpack.i.h.bf16 %v14314_v20  ;;  %v14315_v31 = vunpack.i.l.bf16 %v14314_v20 }
 0x5fc   : > { %v4154_v14 = vsel %vm1669_vm7, %v14315_v31, %v14316_v23 }
 0x5fd   : > { %v14324_v37 = vpop.permute.xlu1 %14323  ;;  %v14319_v1 = vpop.permute.xlu0 %14318 }
 0x5fe   : > { %v14321_v7 = vunpack.i.h.bf16 %v14319_v1  ;;  %v14320_v41 = vunpack.i.l.bf16 %v14319_v1  ;;  %v14326_v43 = vunpack.i.h.bf16 %v14324_v37  ;;  %v14325_v47 = vunpack.i.l.bf16 %v14324_v37 }
 0x600   : > { %v4155_v16 = vsel %vm1669_vm7, %v14320_v41, %v14321_v7  ;;  %v4263_v27 = vsel %vm1262_vm2, %v14325_v47, %v14326_v43 }
 0x601   : > { %v14329_v0 = vpop.permute.xlu0 %14328  ;;  %v13424_v25 = vpack.c.bf16 %v4155_v16, %v4154_v14  ;;  %v14334_v53 = vpop.permute.xlu1 %14333 }
 0x602   : > { %v14331_v6 = vunpack.i.h.bf16 %v14329_v0  ;;  %v14330_v45 = vunpack.i.l.bf16 %v14329_v0  ;;  %v14336_v60 = vunpack.i.h.bf16 %v14334_v53  ;;  %v14335_v56 = vunpack.i.l.bf16 %v14334_v53 }
 0x603   : > { %13425 = vmatprep.subr.bf16.mxu0 %v13424_v25 }
 0x604   : > { %13427 = vmatpush3.bf16.msra.mxu0 %v13424_v25  ;;  %v4264_v32 = vsel %vm1262_vm2, %v14330_v45, %v14331_v6  ;;  %v4491_v52 = vsel %vm2080_vm9, %v14335_v56, %v14336_v60 }
 0x605   : > { %v14339_v35 = vpop.permute.xlu0 %14338  ;;  %v13428_v44 = vpack.c.bf16 %v4264_v32, %v4263_v27  ;;  %v14344_v46 = vpop.permute.xlu1 %14343 }
 0x606   : > { %v14341_v9 = vunpack.i.h.bf16 %v14339_v35  ;;  %v14340_v42 = vunpack.i.l.bf16 %v14339_v35  ;;  %v14346_v19 = vunpack.i.h.bf16 %v14344_v46  ;;  %v14345_v63 = vunpack.i.l.bf16 %v14344_v46 }
 0x607   : > { %12116 = vmatmul.mubr.msk.f32.vlgmr.msra.gmra.mrb[12].mxu0 %vm3358_vm12, %v11123_v62  ;;  %13429 = vmatprep.subr.bf16.mxu0 %v13428_v44 }
 0x608   : > { %13431 = vmatpush3.bf16.msra.mxu0 %v13428_v44  ;;  %12118 = vmatprep.mubr.msk.f32.mxu0 %vm3358_vm12, %v11124_v49  ;;  %v4492_v5 = vsel %vm2080_vm9, %v14340_v42, %v14341_v9 }
 0x609   : > { %13433 = vmatprep.subr.bf16.mxu0 %v15896_v50  ;;  %v14349_v11 = vpop.permute.xlu0 %14348  ;;  %v13436_v15 = vpack.c.bf16 %v4492_v5, %v4491_v52  ;;  %v15991_v5 = vld [vmem:[#allocation2] sm:$0xff] }
 0x60a   : > { %v14351_v26 = vunpack.i.h.bf16 %v14349_v11  ;;  %v14350_v17 = vunpack.i.l.bf16 %v14349_v11 }
 0x60b   : > { %12119 = vmatmul.mubr.msk.f32.gmra.mrb[14].mxu0 %vm3358_vm12, %v11125_v48 }
 0x60c   : > { %12125 = vmatprep.mubr.msk.f32.mxu0 %vm3358_vm12, %v4133_v54  ;;  %v4610_v38 = vsel %vm2292_vm10, %v14350_v17, %v14351_v26  ;;  %v16004_v26 = vld [vmem:[#allocation2 + $0x60] sm:$0xff] }
 0x60d   : > { %v11158_v17 = vld [vmem:[%s14778_s30 + $0x20] sm:$0xff] }
 0x60f   : > { %12126 = vmatmul.mubr.msk.f32.vlgmr.msra.gmra.mrb[12].mxu0 %vm3358_vm12, %v4134_v58  ;;  %v15989_v58 = vld [vmem:[#allocation2 + $0x30] sm:$0xff] }
 0x610   : > { %13435 = vmatpush3.bf16.msra.mxu0 %v15896_v50  ;;  %12128 = vmatprep.mubr.msk.f32.mxu0 %vm3358_vm12, %v4135_v8  ;;  %v4609_v50 = vsel %vm2292_vm10, %v14345_v63, %v14346_v19 }
 0x611   : > { %13437 = vmatprep.subr.bf16.mxu0 %v13436_v15  ;;  %v13440_v34 = vpack.c.bf16 %v4610_v38, %v4609_v50  ;;  %v5604_v50 = vld [vmem:[%s14783_s6] sm:$0xff] }
 0x613   : > { %12129 = vmatmul.mubr.msk.f32.gmra.mrb[14].mxu0 %vm3358_vm12, %v4136_v28 }
 0x614   : > { %12135 = vmatprep.mubr.msk.f32.mxu0 %vm3358_vm12, %v11134_v51 }
 0x617   : > { %12136 = vmatmul.mubr.msk.f32.vlgmr.msra.gmra.mrb[12].mxu0 %vm3358_vm12, %v11135_v57 }
 0x618   : > { %13439 = vmatpush3.bf16.msra.mxu0 %v13436_v15  ;;  %12138 = vmatprep.mubr.msk.f32.mxu0 %vm3358_vm12, %v11136_v12  ;;  %v16001_v15 = vld [vmem:[#allocation2 + $0x90] sm:$0xff]  ;;  %v5605_v12 = vld [vmem:[%s14783_s6 + $0x8] sm:$0xff] }
 0x619   : > { %13441 = vmatprep.subr.bf16.mxu0 %v13440_v34 }
 0x61b   : > { %12139 = vmatmul.mubr.msk.f32.gmra.mrb[14].mxu0 %vm3358_vm12, %v11137_v10  ;;  %v5632_v10 = vld [vmem:[%s16920_s11] sm:$0xff] }
 0x61c   : > { %12145 = vmatprep.mubr.msk.f32.mxu0 %vm3358_vm12, %v11142_v33  ;;  %v5607_v33 = vld [vmem:[%s14783_s6 + $0x18] sm:$0xff] }
 0x61f   : > { %12146 = vmatmul.mubr.msk.f32.vlgmr.msra.gmra.mrb[12].mxu0 %vm3358_vm12, %v11143_v13  ;;  %v5606_v13 = vld [vmem:[%s14783_s6 + $0x10] sm:$0xff] }
 0x620   : > { %13443 = vmatpush3.bf16.msra.mxu0 %v13440_v34  ;;  %12148 = vmatprep.mubr.msk.f32.mxu0 %vm3358_vm12, %v11144_v22  ;;  %v5633_v34 = vld [vmem:[%s16920_s11 + $0x8] sm:$0xff]  ;;  %v5635_v22 = vld [vmem:[%s16920_s11 + $0x18] sm:$0xff] }
 0x621   : > { %13477 = vmatprep.subr.bf16.mxu0 %v15817_v4 }
 0x623   : > { %12149 = vmatmul.mubr.msk.f32.gmra.mrb[14].mxu0 %vm3358_vm12, %v11145_v40  ;;  %v5634_v40 = vld [vmem:[%s16920_s11 + $0x10] sm:$0xff] }
 0x624   : > { %12155 = vmatprep.mubr.msk.f32.mxu0 %vm3358_vm12, %v11150_v21  ;;  %v5664_v21 = vld [vmem:[%s14723_s9] sm:$0xff] }
 0x627   : > { %12156 = vmatmul.mubr.msk.f32.vlgmr.msra.gmra.mrb[12].mxu0 %vm3358_vm12, %v11151_v3  ;;  %v5665_v3 = vld [vmem:[%s14723_s9 + $0x10] sm:$0xff] }
 0x628   : > { %12158 = vmatprep.mubr.msk.f32.mxu0 %vm3358_vm12, %v11152_v18  ;;  %13479 = vmatpush3.bf16.msra.mxu0 %v15817_v4  ;;  %v4726_v4 = vpop.permute.xlu0 %4725  ;;  %v5666_v18 = vld [vmem:[%s14723_s9 + $0x20] sm:$0xff] }
 0x629   : > { %13481 = vmatprep.subr.bf16.mxu0 %v15829_v39 }
 0x62b   : > { %12159 = vmatmul.mubr.msk.f32.gmra.mrb[14].mxu0 %vm3358_vm12, %v11153_v55  ;;  %v16042_v55 = vpack.c.bf16 %v5665_v3, %v5664_v21 }
 0x62c   : > { %13483 = vmatpush3.bf16.msra.mxu0 %v15829_v39  ;;  %v4721_v39 = vpop.permute.xlu1 %4720 }
 0x62d   : > { %13485 = vmatprep.subr.bf16.mxu0 %v15837_v24 }
 0x630   : > { %13487 = vmatpush3.bf16.msra.mxu0 %v15837_v24  ;;  %v4754_v24 = vpop.permute.xlu0 %4753 }
 0x631   : > { %13489 = vmatprep.subr.bf16.mxu0 %v15844_v36 }
 0x634   : > { %13491 = vmatpush3.bf16.msra.mxu0 %v15844_v36  ;;  %v4749_v36 = vpop.permute.xlu1 %4748  ;;  %v4736_v20 = vpop.permute.xlu0 %4735 }
 0x635   : > { %13493 = vmatprep.subr.bf16.mxu0 %v15851_v61 }
 0x638   : > { %13495 = vmatpush3.bf16.msra.mxu0 %v15851_v61  ;;  %v4731_v31 = vpop.permute.xlu1 %4730 }
 0x639   : > { %13497 = vmatprep.subr.bf16.mxu0 %v15858_v30 }
 0x63c   : > { %13499 = vmatpush3.bf16.msra.mxu0 %v15858_v30  ;;  %v4759_v0 = vpop.permute.xlu1 %4758 }
 0x63d   : > { %13501 = vmatprep.subr.bf16.mxu0 %v15865_v29 }
 0x640   : > { %13503 = vmatpush3.bf16.msra.mxu0 %v15865_v29  ;;  %v4764_v29 = vpop.permute.xlu0 %4763 }
 0x641   : > { %13505 = vmatprep.subr.bf16.mxu0 %v15870_v59 }
 0x644   : > { %13507 = vmatpush3.bf16.msra.mxu0 %v15870_v59 }
 0x645   : > { %13549 = vmatprep.subr.bf16.mxu0 %v16042_v55 }
 0x6fa   : > { %v12157_v23 = vpop.f32.mrb[12].mxu0 }
 0x6fb   : > { %v4739_v61 = vmul.f32 %v12157_v23, %v4726_v4  ;;  %v4691_v37 = vpop.f32.mrb[13].mxu0  ;;  %v5667_v4 = vld [vmem:[%s14723_s9 + $0x30] sm:$0xff] }
 0x6fc   : > { %v4738_v1 = vmul.f32 %v4721_v39, %v4691_v37  ;;  %v16045_v39 = vpack.c.bf16 %v5667_v4, %v5666_v18 }
 0x6fd   : > { %v4767_v7 = vadd.f32 %v4754_v24, %v4739_v61 }
 0x6fe   : > { %v4766_v30 = vadd.f32 %v4749_v36, %v4738_v1  ;;  %v12160_v41 = vpop.f32.mrb[14].mxu0 }
 0x6ff   : > { %v4741_v43 = vmul.f32 %v12160_v41, %v4736_v20  ;;  %v4701_v47 = vpop.f32.mrb[15].mxu0  ;;  %v4771_v59 = vmax.f32 %v4767_v7, 0.0 }
 0x700   : > { %v4770_v14 = vmax.f32 %v4766_v30, 0.0  ;;  %v4740_v16 = vmul.f32 %v4731_v31, %v4701_v47 }
 0x701   : > { %v4769_v25 = vadd.f32 %v4764_v29, %v4741_v43 }
 0x702   : > { %v4768_v6 = vadd.f32 %v4759_v0, %v4740_v16  ;;  %12193 = vmatprep.mubr.f32.mxu1 %v4770_v14  ;;  %12231 = vmatprep.mubr.f32.mxu0 %v4770_v14 }
 0x703   : > { %12194 = vmatmul.mubr.f32.vlgmr.msra.gmra.mrb[16].mxu1 %v4771_v59  ;;  %12232 = vmatmul.mubr.f32.vlgmr.msra.gmra.mrb[16].mxu0 %v4771_v59  ;;  %v4773_v62 = vmax.f32 %v4769_v25, 0.0 }
 0x704   : > { %v4772_v45 = vmax.f32 %v4768_v6, 0.0  ;;  %13551 = vmatpush3.bf16.msra.mxu0 %v16042_v55 }
 0x705   : > { %13553 = vmatprep.subr.bf16.mxu0 %v16045_v39 }
 0x706   : > { %12196 = vmatprep.mubr.f32.mxu1 %v4772_v45  ;;  %12234 = vmatprep.mubr.f32.mxu0 %v4772_v45 }
 0x707   : > { %12197 = vmatmul.mubr.f32.gmra.mrb[18].mxu1 %v4773_v62  ;;  %12235 = vmatmul.mubr.f32.gmra.mrb[18].mxu0 %v4773_v62 }
 0x708   : > { %12245 = vmatprep.mubr.msk.f32.mxu1 %vm5043_vm15, %v11158_v17  ;;  %13555 = vmatpush3.bf16.msra.mxu0 %v16045_v39  ;;  %v11161_v17 = vld [vmem:[%s14778_s30 + $0x38] sm:$0xff] }
 0x7d6   : > { %v12195_v27 = vpop.f32.mrb[16].mxu1  ;;  %v12233_v32 = vpop.f32.mrb[16].mxu0 }
 0x7d7   : > { %v4977_v35 = vmax.f32 %v12195_v27, %v12233_v32  ;;  %v4856_v44 = vpop.f32.mrb[17].mxu1  ;;  %v4957_v49 = vpop.f32.mrb[17].mxu0 }
 0x7d8   : > { %v4976_v53 = vmax.f32 %v4856_v44, %v4957_v49  ;;  %v11159_v49 = vld [vmem:[%s14778_s30 + $0x28] sm:$0xff] }
 0x7d9   : > { %4991 = vst.msk [vmem:[#allocation2 + $0x38] sm:$0xff] %vm4989_vm14, %v4977_v35 }
 0x7da   : > { %4990 = vst.msk [vmem:[#allocation2 + $0x8] sm:$0xff] %vm4989_vm14, %v4976_v53  ;;  %v12198_v9 = vpop.f32.mrb[18].mxu1  ;;  %v12236_v42 = vpop.f32.mrb[18].mxu0 }
 0x7db   : > { %v4979_v48 = vmax.f32 %v12198_v9, %v12236_v42  ;;  %v4866_v54 = vpop.f32.mrb[19].mxu1  ;;  %v4967_v60 = vpop.f32.mrb[19].mxu0 }
 0x7dc   : > { %v4978_v56 = vmax.f32 %v4866_v54, %v4967_v60  ;;  %v11160_v60 = vld [vmem:[%s14778_s30 + $0x30] sm:$0xff] }
 0x7dd   : > { %4993 = vst.msk [vmem:[#allocation2 + $0x98] sm:$0xff] %vm4989_vm14, %v4979_v48 }
 0x7de   : > { %4992 = vst.msk [vmem:[#allocation2 + $0x68] sm:$0xff] %vm4989_vm14, %v4978_v56 }
 0x7e0   : > { %v15993_v11 = vld [vmem:[#allocation2 + $0x38] sm:$0xff] }
 0x7e1   : > { %v14352_v8 = vpack.i.bf16 %v15993_v11, %v15989_v58  ;;  %v15997_v52 = vld [vmem:[#allocation2 + $0x8] sm:$0xff]  ;;  %5868 = vst.msk [vmem:[#allocation2 + $0x38] sm:$0xff] %vm5866_vm0, %v14699_v2 }
 0x7e2   : > { %v14357_v46 = vpack.i.bf16 %v15997_v52, %v15991_v5  ;;  %v14392_v38 = vpack.i.bf16 %v15993_v11, %v15997_v52  ;;  %5867 = vst.msk [vmem:[#allocation2 + $0x8] sm:$0xff] %vm5866_vm0, %v14699_v2 }
 0x7e3   : > { %14353 = vrot.lane.b32.xlu0 %v14352_v8, %s14702_s1 }
 0x7e4   : > { %14358 = vrot.lane.b32.xlu1 %v14357_v46, %s14702_s1  ;;  %v16008_v28 = vld [vmem:[#allocation2 + $0x98] sm:$0xff] }
 0x7e5   : > { %v14362_v51 = vpack.i.bf16 %v16008_v28, %v16001_v15  ;;  %v16013_v19 = vld [vmem:[#allocation2 + $0x68] sm:$0xff]  ;;  %5870 = vst.msk [vmem:[#allocation2 + $0x98] sm:$0xff] %vm5866_vm0, %v14699_v2 }
 0x7e6   : > { %v14367_v63 = vpack.i.bf16 %v16013_v19, %v16004_v26  ;;  %v14397_v57 = vpack.i.bf16 %v16008_v28, %v16013_v19  ;;  %5869 = vst.msk [vmem:[#allocation2 + $0x68] sm:$0xff] %vm5866_vm0, %v14699_v2 }
 0x7e7   : > { %14363 = vrot.lane.b32.xlu0 %v14362_v51, %s14702_s1 }
 0x7e8   : > { %14368 = vrot.lane.b32.xlu1 %v14367_v63, %s14702_s1 }
 0x7eb   : > { %14378 = vrot.lane.b32.xlu0 %v14352_v8, %s14700_s26 }
 0x7ec   : > { %14373 = vrot.lane.b32.xlu1 %v14357_v46, %s14700_s26 }
 0x7ef   : > { %14388 = vrot.lane.b32.xlu0 %v14362_v51, %s14700_s26 }
 0x7f0   : > { %14383 = vrot.lane.b32.xlu1 %v14367_v63, %s14700_s26 }
 0x7f3   : > { %14398 = vrot.lane.b32.xlu0 %v14397_v57, %s16881_s2 }
 0x7f4   : > { %14393 = vrot.lane.b32.xlu1 %v14392_v38, %s16881_s2 }
 0x7f7   : > { %14408 = vrot.lane.b32.xlu0 %v14397_v57, %s14704_s10  ;;  %v5002_v57 = vld [vmem:[%s14778_s30] sm:$0xff] }
 0x7f8   : > { %14403 = vrot.lane.b32.xlu1 %v14392_v38, %s14704_s10  ;;  %v13524_v38 = vpack.c.bf16 %v15993_v11, %v15997_v52  ;;  %v5005_v11 = vld [vmem:[%s14778_s30 + $0x18] sm:$0xff]  ;;  %v11170_v52 = vld [vmem:[%s14778_s30 + $0x40] sm:$0xff] }
 0x7fb   : > { %5615 = vperm.xlu0 %14250, %v5605_v12  }
 0x7fc   : > { %5610 = vperm.xlu1 %14251, %v5604_v50   ;;  %v5003_v50 = vld [vmem:[%s14778_s30 + $0x8] sm:$0xff] }
 0x7ff   : > { %5643 = vperm.xlu0 %14250, %v5633_v34   ;;  %v5004_v34 = vld [vmem:[%s14778_s30 + $0x10] sm:$0xff] }
 0x800   : > { %5638 = vperm.xlu1 %14251, %v5632_v10  }
 0x803   : > { %5625 = vperm.xlu0 %14250, %v5607_v33  }
 0x804   : > { %5620 = vperm.xlu1 %14251, %v5606_v13   ;;  %v13528_v13 = vpack.c.bf16 %v16008_v28, %v16013_v19  ;;  %v11171_v28 = vld [vmem:[%s14778_s30 + $0x48] sm:$0xff]  ;;  %v11172_v19 = vld [vmem:[%s14778_s30 + $0x50] sm:$0xff] }
 0x807   : > { %5653 = vperm.xlu0 %14250, %v5635_v22  }
 0x808   : > { %5648 = vperm.xlu1 %14251, %v5634_v40  }
 0x855   : > { %v14354_v24 = vpop.permute.xlu0 %14353 }
 0x856   : > { %v14356_v36 = vunpack.i.h.bf16 %v14354_v24  ;;  %v14355_v20 = vunpack.i.l.bf16 %v14354_v24  ;;  %v14359_v23 = vpop.permute.xlu1 %14358 }
 0x857   : > { %v14361_v31 = vunpack.i.h.bf16 %v14359_v23  ;;  %v14360_v61 = vunpack.i.l.bf16 %v14359_v23  ;;  %v11173_v23 = vld [vmem:[%s14778_s30 + $0x58] sm:$0xff] }
 0x858   : > { %v5036_v37 = vsel %vm1669_vm7, %v14355_v20, %v14356_v36 }
 0x859   : > { %v14364_v1 = vpop.permute.xlu0 %14363  ;;  %v5035_v7 = vsel %vm1669_vm7, %v14360_v61, %v14361_v31  ;;  %v11178_v31 = vld [vmem:[%s14778_s30 + $0x60] sm:$0xff] }
 0x85a   : > { %v14366_v30 = vunpack.i.h.bf16 %v14364_v1  ;;  %v14365_v41 = vunpack.i.l.bf16 %v14364_v1  ;;  %v14369_v43 = vpop.permute.xlu1 %14368  ;;  %v13508_v47 = vpack.c.bf16 %v5036_v37, %v5035_v7  ;;  %v11179_v7 = vld [vmem:[%s14778_s30 + $0x68] sm:$0xff] }
 0x85b   : > { %v14371_v29 = vunpack.i.h.bf16 %v14369_v43  ;;  %v14370_v14 = vunpack.i.l.bf16 %v14369_v43  ;;  %v11181_v43 = vld [vmem:[%s14778_s30 + $0x78] sm:$0xff] }
 0x85c   : > { %13509 = vmatprep.subr.bf16.mxu1 %v13508_v47  ;;  %v5038_v16 = vsel %vm1669_vm7, %v14365_v41, %v14366_v30  ;;  %v11180_v30 = vld [vmem:[%s14778_s30 + $0x70] sm:$0xff] }
 0x85d   : > { %13511 = vmatpush3.bf16.msra.mxu1 %v13508_v47  ;;  %v14379_v0 = vpop.permute.xlu0 %14378  ;;  %v5037_v59 = vsel %vm1669_vm7, %v14370_v14, %v14371_v29  ;;  %v11186_v47 = vld [vmem:[%s14778_s30 + $0x80] sm:$0xff]  ;;  %v11187_v29 = vld [vmem:[%s14778_s30 + $0x88] sm:$0xff]  ;;  %v11188_v14 = vld [vmem:[%s14778_s30 + $0x90] sm:$0xff] }
 0x85e   : > { %v14381_v25 = vunpack.i.h.bf16 %v14379_v0  ;;  %v14380_v6 = vunpack.i.l.bf16 %v14379_v0  ;;  %v14374_v45 = vpop.permute.xlu1 %14373  ;;  %v13512_v62 = vpack.c.bf16 %v5038_v16, %v5037_v59  ;;  %v11189_v16 = vld [vmem:[%s14778_s30 + $0x98] sm:$0xff]  ;;  %v5668_v0 = vld [vmem:[%s14723_s9 + $0x40] sm:$0xff]  ;;  %v5669_v59 = vld [vmem:[%s14723_s9 + $0x50] sm:$0xff] }
 0x85f   : > { %v14376_v27 = vunpack.i.h.bf16 %v14374_v45  ;;  %v14375_v32 = vunpack.i.l.bf16 %v14374_v45  ;;  %v5671_v45 = vld [vmem:[%s14723_s9 + $0x70] sm:$0xff] }
 0x860   : > { %13513 = vmatprep.subr.bf16.mxu1 %v13512_v62  ;;  %v5158_v35 = vsel %vm1262_vm2, %v14380_v6, %v14381_v25  ;;  %v13556_v25 = vpack.c.bf16 %v5669_v59, %v5668_v0  ;;  %v5670_v6 = vld [vmem:[%s14723_s9 + $0x60] sm:$0xff] }
 0x861   : > { %v14389_v44 = vpop.permute.xlu0 %14388  ;;  %13515 = vmatpush3.bf16.msra.mxu1 %v13512_v62  ;;  %v5157_v53 = vsel %vm1262_vm2, %v14375_v32, %v14376_v27  ;;  %v13560_v62 = vpack.c.bf16 %v5671_v45, %v5670_v6  ;;  %v5769_v27 = vld [vmem:[%s14728_s13] sm:$0xff]  ;;  %v5770_v32 = vld [vmem:[%s14728_s13 + $0x10] sm:$0xff]  ;;  %v6737_v45 = vld [vmem:[%s16923_s18 + $0x8] sm:$0xff] }
 0x862   : > { %v14391_v9 = vunpack.i.h.bf16 %v14389_v44  ;;  %v14390_v42 = vunpack.i.l.bf16 %v14389_v44  ;;  %v14384_v48 = vpop.permute.xlu1 %14383  ;;  %v13516_v54 = vpack.c.bf16 %v5158_v35, %v5157_v53  ;;  %13557 = vmatprep.subr.bf16.mxu0 %v13556_v25  ;;  %v16107_v35 = vpack.c.bf16 %v5770_v32, %v5769_v27  ;;  %v6680_v6 = vld [vmem:[%s16922_s15] sm:$0xff]  ;;  %v6683_v27 = vld [vmem:[%s16922_s15 + $0x18] sm:$0xff]  ;;  %v6682_v32 = vld [vmem:[%s16922_s15 + $0x10] sm:$0xff] }
 0x863   : > { %v14386_v56 = vunpack.i.h.bf16 %v14384_v48  ;;  %v14385_v8 = vunpack.i.l.bf16 %v14384_v48  ;;  %13559 = vmatpush3.bf16.msra.mxu0 %v13556_v25 }
 0x864   : > { %12246 = vmatmul.mubr.msk.f32.vlgmr.msra.gmra.mrb[20].mxu1 %vm5043_vm15, %v11159_v49  ;;  %13517 = vmatprep.subr.bf16.mxu1 %v13516_v54  ;;  %v5160_v46 = vsel %vm1262_vm2, %v14390_v42, %v14391_v9 }
 0x865   : > { %13519 = vmatpush3.bf16.msra.mxu1 %v13516_v54  ;;  %12248 = vmatprep.mubr.msk.f32.mxu1 %vm5043_vm15, %v11160_v60  ;;  %v5159_v51 = vsel %vm1262_vm2, %v14385_v8, %v14386_v56  ;;  %v14399_v22 = vpop.permute.xlu0 %14398 }
 0x866   : > { %v13520_v63 = vpack.c.bf16 %v5160_v46, %v5159_v51  ;;  %v14394_v12 = vpop.permute.xlu1 %14393  ;;  %v14401_v40 = vunpack.i.h.bf16 %v14399_v22  ;;  %v14400_v21 = vunpack.i.l.bf16 %v14399_v22  ;;  %13561 = vmatprep.subr.bf16.mxu0 %v13560_v62 }
 0x867   : > { %v14396_v10 = vunpack.i.h.bf16 %v14394_v12  ;;  %v14395_v33 = vunpack.i.l.bf16 %v14394_v12  ;;  %13563 = vmatpush3.bf16.msra.mxu0 %v13560_v62  ;;  %v6736_v62 = vld [vmem:[%s16923_s18] sm:$0xff] }
 0x868   : > { %12249 = vmatmul.mubr.msk.f32.gmra.mrb[22].mxu1 %vm5043_vm15, %v11161_v17  ;;  %13521 = vmatprep.subr.bf16.mxu1 %v13520_v63  ;;  %v13536_v36 = vpack.c.bf16 %v14401_v40, %v14400_v21  ;;  %v5773_v40 = vld [vmem:[%s14728_s13 + $0x40] sm:$0xff]  ;;  %v5774_v21 = vld [vmem:[%s14728_s13 + $0x50] sm:$0xff] }
 0x869   : > { %13523 = vmatpush3.bf16.msra.mxu1 %v13520_v63  ;;  %12259 = vmatprep.mubr.msk.f32.mxu1 %vm5043_vm15, %v5002_v57  ;;  %v13532_v3 = vpack.c.bf16 %v14396_v10, %v14395_v33  ;;  %v14409_v20 = vpop.permute.xlu0 %14408  ;;  %v5771_v63 = vld [vmem:[%s14728_s13 + $0x20] sm:$0xff]  ;;  %v5772_v57 = vld [vmem:[%s14728_s13 + $0x30] sm:$0xff] }
 0x86a   : > { %13525 = vmatprep.subr.bf16.mxu1 %v13524_v38  ;;  %v14404_v18 = vpop.permute.xlu1 %14403  ;;  %v14411_v61 = vunpack.i.h.bf16 %v14409_v20  ;;  %v14410_v37 = vunpack.i.l.bf16 %v14409_v20  ;;  %13565 = vmatprep.subr.bf16.mxu0 %v16107_v35 }
 0x86b   : > { %v14406_v4 = vunpack.i.h.bf16 %v14404_v18  ;;  %v14405_v24 = vunpack.i.l.bf16 %v14404_v18 }
 0x86c   : > { %12260 = vmatmul.mubr.msk.f32.vlgmr.msra.gmra.mrb[20].mxu1 %vm5043_vm15, %v5003_v50  ;;  %v13544_v41 = vpack.c.bf16 %v14411_v61, %v14410_v37 }
 0x86d   : > { %13527 = vmatpush3.bf16.msra.mxu1 %v13524_v38  ;;  %12262 = vmatprep.mubr.msk.f32.mxu1 %vm5043_vm15, %v5004_v34  ;;  %v13540_v1 = vpack.c.bf16 %v14406_v4, %v14405_v24  ;;  %v5776_v4 = vld [vmem:[%s14728_s13 + $0x70] sm:$0xff] }
 0x86e   : > { %13529 = vmatprep.subr.bf16.mxu1 %v13528_v13 }
 0x870   : > { %12263 = vmatmul.mubr.msk.f32.gmra.mrb[22].mxu1 %vm5043_vm15, %v5005_v11  ;;  %v16112_v11 = vpack.c.bf16 %v5772_v57, %v5771_v63 }
 0x871   : > { %13531 = vmatpush3.bf16.msra.mxu1 %v13528_v13  ;;  %12273 = vmatprep.mubr.msk.f32.mxu1 %vm5043_vm15, %v11170_v52 }
 0x872   : > { %13533 = vmatprep.subr.bf16.mxu1 %v13532_v3 }
 0x874   : > { %12274 = vmatmul.mubr.msk.f32.vlgmr.msra.gmra.mrb[20].mxu1 %vm5043_vm15, %v11171_v28  ;;  %v13572_v28 = vpack.c.bf16 %v5774_v21, %v5773_v40 }
 0x875   : > { %13535 = vmatpush3.bf16.msra.mxu1 %v13532_v3  ;;  %12276 = vmatprep.mubr.msk.f32.mxu1 %vm5043_vm15, %v11172_v19  ;;  %v5775_v19 = vld [vmem:[%s14728_s13 + $0x60] sm:$0xff] }
 0x876   : > { %13537 = vmatprep.subr.bf16.mxu1 %v13536_v36  ;;  %v13576_v24 = vpack.c.bf16 %v5776_v4, %v5775_v19 }
 0x878   : > { %12277 = vmatmul.mubr.msk.f32.gmra.mrb[22].mxu1 %vm5043_vm15, %v11173_v23 }
 0x879   : > { %13539 = vmatpush3.bf16.msra.mxu1 %v13536_v36  ;;  %12287 = vmatprep.mubr.msk.f32.mxu1 %vm5043_vm15, %v11178_v31 }
 0x87a   : > { %13541 = vmatprep.subr.bf16.mxu1 %v13540_v1  ;;  %v5616_v44 = vpop.permute.xlu0 %5615 }
 0x87b   : > { %v5611_v49 = vpop.permute.xlu1 %5610 }
 0x87c   : > { %12288 = vmatmul.mubr.msk.f32.vlgmr.msra.gmra.mrb[20].mxu1 %vm5043_vm15, %v11179_v7 }
 0x87d   : > { %13543 = vmatpush3.bf16.msra.mxu1 %v13540_v1  ;;  %12290 = vmatprep.mubr.msk.f32.mxu1 %vm5043_vm15, %v11180_v30 }
 0x87e   : > { %13545 = vmatprep.subr.bf16.mxu1 %v13544_v41  ;;  %v5644_v53 = vpop.permute.xlu0 %5643 }
 0x87f   : > { %v5639_v9 = vpop.permute.xlu1 %5638 }
 0x880   : > { %12291 = vmatmul.mubr.msk.f32.gmra.mrb[22].mxu1 %vm5043_vm15, %v11181_v43 }
 0x881   : > { %13547 = vmatpush3.bf16.msra.mxu1 %v13544_v41  ;;  %12301 = vmatprep.mubr.msk.f32.mxu1 %vm5043_vm15, %v11186_v47 }
 0x882   : > { %v5626_v42 = vpop.permute.xlu0 %5625 }
 0x883   : > { %v5621_v54 = vpop.permute.xlu1 %5620 }
 0x884   : > { %12302 = vmatmul.mubr.msk.f32.vlgmr.msra.gmra.mrb[20].mxu1 %vm5043_vm15, %v11187_v29 }
 0x885   : > { %12304 = vmatprep.mubr.msk.f32.mxu1 %vm5043_vm15, %v11188_v14 }
 0x886   : > { %v5654_v50 = vpop.permute.xlu0 %5653 }
 0x887   : > { %v5649_v33 = vpop.permute.xlu1 %5648 }
 0x888   : > { %12305 = vmatmul.mubr.msk.f32.gmra.mrb[22].mxu1 %vm5043_vm15, %v11189_v16  ;;  %v11202_v16 = vld [vmem:[%s16921_s16 + $0x40] sm:$0xff] }
 0x889   : > { %12359 = vmatprep.mubr.msk.f32.mxu1 %vm5043_vm15, %v11202_v16  ;;  %v11205_v16 = vld [vmem:[%s16921_s16 + $0x58] sm:$0xff] }
 0x957   : > { %v12303_v48 = vpop.f32.mrb[20].mxu1 }
 0x958   : > { %v5629_v60 = vmul.f32 %v12303_v48, %v5616_v44  ;;  %v5581_v56 = vpop.f32.mrb[21].mxu1  ;;  %v6739_v44 = vld [vmem:[%s16923_s18 + $0x18] sm:$0xff]  ;;  %v6740_v48 = vld [vmem:[%s16923_s18 + $0x20] sm:$0xff] }
 0x959   : > { %v5628_v8 = vmul.f32 %v5611_v49, %v5581_v56  ;;  %v6738_v49 = vld [vmem:[%s16923_s18 + $0x10] sm:$0xff]  ;;  %v6743_v56 = vld [vmem:[%s16923_s18 + $0x38] sm:$0xff] }
 0x95a   : > { %v5657_v46 = vadd.f32 %v5644_v53, %v5629_v60  ;;  %v6685_v53 = vld [vmem:[%s16922_s15 + $0x28] sm:$0xff]  ;;  %v6686_v60 = vld [vmem:[%s16922_s15 + $0x30] sm:$0xff] }
 0x95b   : > { %v5656_v17 = vadd.f32 %v5639_v9, %v5628_v8  ;;  %v12306_v51 = vpop.f32.mrb[22].mxu1  ;;  %v6684_v9 = vld [vmem:[%s16922_s15 + $0x20] sm:$0xff]  ;;  %v6742_v8 = vld [vmem:[%s16923_s18 + $0x30] sm:$0xff] }
 0x95c   : > { %v5631_v38 = vmul.f32 %v12306_v51, %v5626_v42  ;;  %v5591_v12 = vpop.f32.mrb[23].mxu1  ;;  %v5661_v13 = vmax.f32 %v5657_v46, 0.0  ;;  %v6741_v42 = vld [vmem:[%s16923_s18 + $0x28] sm:$0xff] }
 0x95d   : > { %v5660_v34 = vmax.f32 %v5656_v17, 0.0  ;;  %v5630_v10 = vmul.f32 %v5621_v54, %v5591_v12  ;;  %v6687_v54 = vld [vmem:[%s16922_s15 + $0x38] sm:$0xff] }
 0x95e   : > { %v5659_v22 = vadd.f32 %v5654_v50, %v5631_v38 }
 0x95f   : > { %v5658_v52 = vadd.f32 %v5649_v33, %v5630_v10  ;;  %12323 = vmatprep.mubr.msk.f32.mxu0 %vm4989_vm14, %v5660_v34 }
 0x960   : > { %12324 = vmatmul.mubr.msk.f32.vlgmr.msra.gmra.mrb[20].mxu0 %vm4989_vm14, %v5661_v13  ;;  %v5663_v18 = vmax.f32 %v5659_v22, 0.0 }
 0x961   : > { %v5662_v3 = vmax.f32 %v5658_v52, 0.0  ;;  %13567 = vmatpush3.bf16.msra.mxu0 %v16107_v35 }
 0x962   : > { %13569 = vmatprep.subr.bf16.mxu0 %v16112_v11 }
 0x963   : > { %12326 = vmatprep.mubr.msk.f32.mxu0 %vm4989_vm14, %v5662_v3 }
 0x964   : > { %12327 = vmatmul.mubr.msk.f32.gmra.mrb[22].mxu0 %vm4989_vm14, %v5663_v18 }
 0x965   : > { %13571 = vmatpush3.bf16.msra.mxu0 %v16112_v11  ;;  %12345 = vmatprep.mubr.msk.f32.mxu0 %vm4989_vm14, %v5660_v34 }
 0x966   : > { %13573 = vmatprep.subr.bf16.mxu0 %v13572_v28 }
 0x969   : > { %13575 = vmatpush3.bf16.msra.mxu0 %v13572_v28 }
 0x96a   : > { %13577 = vmatprep.subr.bf16.mxu0 %v13576_v24 }
 0x96d   : > { %13579 = vmatpush3.bf16.msra.mxu0 %v13576_v24 }
 0x96e   : > { %13621 = vmatprep.subr.bf16.mxu0 %v16042_v55 }
 0x970   : > { %12346 = vmatmul.mubr.msk.f32.vlgmr.msra.gmra.mrb[24].mxu0 %vm4989_vm14, %v5661_v13 }
 0x971   : > { %12348 = vmatprep.mubr.msk.f32.mxu0 %vm4989_vm14, %v5662_v3  ;;  %13623 = vmatpush3.bf16.msra.mxu0 %v16042_v55 }
 0x972   : > { %13625 = vmatprep.subr.bf16.mxu0 %v16045_v39 }
 0x974   : > { %12349 = vmatmul.mubr.msk.f32.gmra.mrb[26].mxu0 %vm4989_vm14, %v5663_v18 }
 0x975   : > { %13627 = vmatpush3.bf16.msra.mxu0 %v16045_v39 }
 0x976   : > { %13629 = vmatprep.subr.bf16.mxu0 %v16107_v35 }
 0xa33   : > { %v12325_v55 = vpop.f32.mrb[20].mxu0 }
 0xa34   : > { %v5750_v39 = vpop.f32.mrb[21].mxu0 }
 0xa37   : > { %v12328_v36 = vpop.f32.mrb[22].mxu0 }
 0xa38   : > { %v5760_v20 = vpop.f32.mrb[23].mxu0 }
 0xa43   : > { %v12347_v23 = vpop.f32.mrb[24].mxu0 }
 0xa44   : > { %v5863_v31 = vmax.f32 %v12325_v55, %v12347_v23  ;;  %v5843_v61 = vpop.f32.mrb[25].mxu0  ;;  %v11203_v23 = vld [vmem:[%s16921_s16 + $0x48] sm:$0xff] }
 0xa45   : > { %v5862_v37 = vmax.f32 %v5750_v39, %v5843_v61 }
 0xa46   : > { %5876 = vst.msk [vmem:[#allocation2 + $0x38] sm:$0xff] %vm5043_vm15, %v5863_v31 }
 0xa47   : > { %5875 = vst.msk [vmem:[#allocation2 + $0x8] sm:$0xff] %vm5043_vm15, %v5862_v37  ;;  %v12350_v1 = vpop.f32.mrb[26].mxu0 }
 0xa48   : > { %v5865_v7 = vmax.f32 %v12328_v36, %v12350_v1  ;;  %v5853_v30 = vpop.f32.mrb[27].mxu0 }
 0xa49   : > { %v5864_v41 = vmax.f32 %v5760_v20, %v5853_v30  ;;  %v11204_v30 = vld [vmem:[%s16921_s16 + $0x50] sm:$0xff] }
 0xa4a   : > { %5878 = vst.msk [vmem:[#allocation2 + $0x98] sm:$0xff] %vm5043_vm15, %v5865_v7 }
 0xa4b   : > { %5877 = vst.msk [vmem:[#allocation2 + $0x68] sm:$0xff] %vm5043_vm15, %v5864_v41 }
 0xa4d   : > { %v16146_v43 = vld [vmem:[#allocation2 + $0x38] sm:$0xff] }
 0xa4e   : > { %v14412_v47 = vpack.i.bf16 %v16146_v43, %v15989_v58  ;;  %v16150_v29 = vld [vmem:[#allocation2 + $0x8] sm:$0xff]  ;;  %7052 = vst.msk [vmem:[#allocation2 + $0x38] sm:$0xff] %vm7050_vm4, %v14699_v2 }
 0xa4f   : > { %v14417_v14 = vpack.i.bf16 %v16150_v29, %v15991_v5  ;;  %7051 = vst.msk [vmem:[#allocation2 + $0x8] sm:$0xff] %vm7050_vm4, %v14699_v2 }
 0xa50   : > { %14413 = vrot.lane.b32.xlu0 %v14412_v47, %s14702_s1 }
 0xa51   : > { %14418 = vrot.lane.b32.xlu1 %v14417_v14, %s14702_s1  ;;  %v16158_v0 = vld [vmem:[#allocation2 + $0x98] sm:$0xff] }
 0xa52   : > { %v14427_v59 = vpack.i.bf16 %v16158_v0, %v16001_v15  ;;  %v16162_v58 = vld [vmem:[#allocation2 + $0x68] sm:$0xff]  ;;  %v14452_v15 = vpack.i.bf16 %v16146_v43, %v16150_v29  ;;  %7054 = vst.msk [vmem:[#allocation2 + $0x98] sm:$0xff] %vm7050_vm4, %v14699_v2 }
 0xa53   : > { %v14422_v25 = vpack.i.bf16 %v16162_v58, %v16004_v26  ;;  %v14457_v5 = vpack.i.bf16 %v16158_v0, %v16162_v58  ;;  %v6681_v26 = vld [vmem:[%s16922_s15 + $0x8] sm:$0xff]  ;;  %7053 = vst.msk [vmem:[#allocation2 + $0x68] sm:$0xff] %vm7050_vm4, %v14699_v2 }
 0xa54   : > { %14428 = vrot.lane.b32.xlu0 %v14427_v59, %s14702_s1 }
 0xa55   : > { %14423 = vrot.lane.b32.xlu1 %v14422_v25, %s14702_s1 }
 0xa58   : > { %14438 = vrot.lane.b32.xlu0 %v14412_v47, %s14700_s26 }
 0xa59   : > { %14433 = vrot.lane.b32.xlu1 %v14417_v14, %s14700_s26 }
 0xa5c   : > { %14448 = vrot.lane.b32.xlu0 %v14427_v59, %s14700_s26 }
 0xa5d   : > { %14443 = vrot.lane.b32.xlu1 %v14422_v25, %s14700_s26  ;;  %s16927_s26 = sld [smem:[#allocation13_spill]] }
 0xa60   : > { %14458 = vrot.lane.b32.xlu0 %v14457_v5, %s16881_s2 }
 0xa61   : > { %14453 = vrot.lane.b32.xlu1 %v14452_v15, %s16881_s2 }
 0xa64   : > { %14468 = vrot.lane.b32.xlu0 %v14457_v5, %s14704_s10  ;;  %v11206_v5 = vld [vmem:[%s16921_s16 + $0x60] sm:$0xff] }
 0xa65   : > { %14463 = vrot.lane.b32.xlu1 %v14452_v15, %s14704_s10  ;;  %v13596_v15 = vpack.c.bf16 %v16146_v43, %v16150_v29  ;;  %v5888_v43 = vld [vmem:[%s16921_s16 + $0x8] sm:$0xff]  ;;  %v5889_v29 = vld [vmem:[%s16921_s16 + $0x10] sm:$0xff]  ;;  %s16929_s10 = sld [smem:[#allocation15_spill]] }
 0xa68   : > { %6695 = vperm.xlu0 %14250, %v6681_v26   ;;  %v11207_v26 = vld [vmem:[%s16921_s16 + $0x68] sm:$0xff] }
 0xa69   : > { %6690 = vperm.xlu1 %14251, %v6680_v6   ;;  %v11208_v6 = vld [vmem:[%s16921_s16 + $0x70] sm:$0xff] }
 0xa6c   : > { %6751 = vperm.xlu0 %14250, %v6737_v45   ;;  %v11209_v45 = vld [vmem:[%s16921_s16 + $0x78] sm:$0xff] }
 0xa6d   : > { %6746 = vperm.xlu1 %14251, %v6736_v62   ;;  %v5887_v62 = vld [vmem:[%s16921_s16] sm:$0xff] }
 0xa70   : > { %6705 = vperm.xlu0 %14250, %v6683_v27  }
 0xa71   : > { %6700 = vperm.xlu1 %14251, %v6682_v32  }
 0xa74   : > { %6761 = vperm.xlu0 %14250, %v6739_v44  }
 0xa75   : > { %6756 = vperm.xlu1 %14251, %v6738_v49   ;;  %v13600_v49 = vpack.c.bf16 %v16158_v0, %v16162_v58  ;;  %v5894_v58 = vld [vmem:[%s16921_s16 + $0x38] sm:$0xff] }
 0xa78   : > { %6715 = vperm.xlu0 %14250, %v6685_v53   ;;  %v5890_v53 = vld [vmem:[%s16921_s16 + $0x18] sm:$0xff] }
 0xa79   : > { %6710 = vperm.xlu1 %14251, %v6684_v9   ;;  %v5891_v9 = vld [vmem:[%s16921_s16 + $0x20] sm:$0xff] }
 0xa7c   : > { %6771 = vperm.xlu0 %14250, %v6741_v42  }
 0xa7d   : > { %6766 = vperm.xlu1 %14251, %v6740_v48   ;;  %v5892_v48 = vld [vmem:[%s16921_s16 + $0x28] sm:$0xff] }
 0xa80   : > { %6725 = vperm.xlu0 %14250, %v6687_v54   ;;  %v5893_v54 = vld [vmem:[%s16921_s16 + $0x30] sm:$0xff] }
 0xa81   : > { %6720 = vperm.xlu1 %14251, %v6686_v60   ;;  %v11226_v60 = vld [vmem:[%s16921_s16 + $0x80] sm:$0xff] }
 0xa84   : > { %6781 = vperm.xlu0 %14250, %v6743_v56  }
 0xa85   : > { %6776 = vperm.xlu1 %14251, %v6742_v8  }
 0xac2   : > { %v14414_v46 = vpop.permute.xlu0 %14413 }
 0xac3   : > { %v14416_v17 = vunpack.i.h.bf16 %v14414_v46  ;;  %v14415_v51 = vunpack.i.l.bf16 %v14414_v46  ;;  %v14419_v63 = vpop.permute.xlu1 %14418 }
 0xac4   : > { %v14421_v57 = vunpack.i.h.bf16 %v14419_v63  ;;  %v14420_v38 = vunpack.i.l.bf16 %v14419_v63 }
 0xac5   : > { %v5929_v12 = vsel %vm1669_vm7, %v14415_v51, %v14416_v17  ;;  %v11227_v17 = vld [vmem:[%s16921_s16 + $0x88] sm:$0xff]  ;;  %v11228_v51 = vld [vmem:[%s16921_s16 + $0x90] sm:$0xff] }
 0xac6   : > { %v14429_v50 = vpop.permute.xlu0 %14428  ;;  %v5928_v34 = vsel %vm1669_vm7, %v14420_v38, %v14421_v57 }
 0xac7   : > { %v14431_v10 = vunpack.i.h.bf16 %v14429_v50  ;;  %v14430_v33 = vunpack.i.l.bf16 %v14429_v50  ;;  %v14424_v13 = vpop.permute.xlu1 %14423  ;;  %v13580_v22 = vpack.c.bf16 %v5929_v12, %v5928_v34  ;;  %v11229_v12 = vld [vmem:[%s16921_s16 + $0x98] sm:$0xff]  ;;  %v11230_v50 = vld [vmem:[%s16921_s16 + $0xa0] sm:$0xff] }
 0xac8   : > { %v14426_v52 = vunpack.i.h.bf16 %v14424_v13  ;;  %v14425_v40 = vunpack.i.l.bf16 %v14424_v13 }
 0xac9   : > { %13581 = vmatprep.subr.bf16.mxu1 %v13580_v22  ;;  %v5931_v21 = vsel %vm1669_vm7, %v14430_v33, %v14431_v10  ;;  %v11231_v10 = vld [vmem:[%s16921_s16 + $0xa8] sm:$0xff]  ;;  %v11232_v33 = vld [vmem:[%s16921_s16 + $0xb0] sm:$0xff] }
 0xaca   : > { %13583 = vmatpush3.bf16.msra.mxu1 %v13580_v22  ;;  %v14439_v3 = vpop.permute.xlu0 %14438  ;;  %v5930_v18 = vsel %vm1669_vm7, %v14425_v40, %v14426_v52  ;;  %v11233_v22 = vld [vmem:[%s16921_s16 + $0xb8] sm:$0xff]  ;;  %v11242_v52 = vld [vmem:[%s16921_s16 + $0xc0] sm:$0xff] }
 0xacb   : > { %v14441_v28 = vunpack.i.h.bf16 %v14439_v3  ;;  %v14440_v19 = vunpack.i.l.bf16 %v14439_v3  ;;  %v14434_v4 = vpop.permute.xlu1 %14433  ;;  %v13584_v24 = vpack.c.bf16 %v5931_v21, %v5930_v18  ;;  %v11243_v3 = vld [vmem:[%s16921_s16 + $0xc8] sm:$0xff]  ;;  %v11244_v18 = vld [vmem:[%s16921_s16 + $0xd0] sm:$0xff] }
 0xacc   : > { %v14436_v55 = vunpack.i.h.bf16 %v14434_v4  ;;  %v14435_v39 = vunpack.i.l.bf16 %v14434_v4  ;;  %v11246_v4 = vld [vmem:[%s16921_s16 + $0xe0] sm:$0xff] }
 0xacd   : > { %13585 = vmatprep.subr.bf16.mxu1 %v13584_v24  ;;  %v6082_v36 = vsel %vm1262_vm2, %v14440_v19, %v14441_v28  ;;  %v11245_v19 = vld [vmem:[%s16921_s16 + $0xd8] sm:$0xff] }
 0xace   : > { %v14449_v20 = vpop.permute.xlu0 %14448  ;;  %13587 = vmatpush3.bf16.msra.mxu1 %v13584_v24  ;;  %v6081_v31 = vsel %vm1262_vm2, %v14435_v39, %v14436_v55  ;;  %v11247_v24 = vld [vmem:[%s16921_s16 + $0xe8] sm:$0xff]  ;;  %v11248_v55 = vld [vmem:[%s16921_s16 + $0xf0] sm:$0xff]  ;;  %v11249_v39 = vld [vmem:[%s16921_s16 + $0xf8] sm:$0xff] }
 0xacf   : > { %v14451_v61 = vunpack.i.h.bf16 %v14449_v20  ;;  %v14450_v37 = vunpack.i.l.bf16 %v14449_v20  ;;  %v14444_v1 = vpop.permute.xlu1 %14443  ;;  %v13588_v7 = vpack.c.bf16 %v6082_v36, %v6081_v31  ;;  %v11258_v36 = vld [vmem:[%s16921_s16 + $0x100] sm:$0xff]  ;;  %v11259_v20 = vld [vmem:[%s16921_s16 + $0x108] sm:$0xff]  ;;  %v11261_v31 = vld [vmem:[%s16921_s16 + $0x118] sm:$0xff] }
 0xad0   : > { %v14446_v41 = vunpack.i.h.bf16 %v14444_v1  ;;  %v14445_v47 = vunpack.i.l.bf16 %v14444_v1  ;;  %v11264_v1 = vld [vmem:[%s16921_s16 + $0x130] sm:$0xff] }
 0xad1   : > { %12360 = vmatmul.mubr.msk.f32.vlgmr.msra.gmra.mrb[24].mxu1 %vm5043_vm15, %v11203_v23  ;;  %13589 = vmatprep.subr.bf16.mxu1 %v13588_v7  ;;  %v6084_v14 = vsel %vm1262_vm2, %v14450_v37, %v14451_v61  ;;  %v11260_v23 = vld [vmem:[%s16921_s16 + $0x110] sm:$0xff]  ;;  %v11262_v61 = vld [vmem:[%s16921_s16 + $0x120] sm:$0xff]  ;;  %v11263_v37 = vld [vmem:[%s16921_s16 + $0x128] sm:$0xff] }
 0xad2   : > { %13591 = vmatpush3.bf16.msra.mxu1 %v13588_v7  ;;  %12362 = vmatprep.mubr.msk.f32.mxu1 %vm5043_vm15, %v11204_v30  ;;  %v6083_v59 = vsel %vm1262_vm2, %v14445_v47, %v14446_v41  ;;  %v14459_v0 = vpop.permute.xlu0 %14458  ;;  %v11265_v7 = vld [vmem:[%s16921_s16 + $0x138] sm:$0xff] }
 0xad3   : > { %v13592_v25 = vpack.c.bf16 %v6084_v14, %v6083_v59  ;;  %v14454_v27 = vpop.permute.xlu1 %14453  ;;  %v14461_v56 = vunpack.i.h.bf16 %v14459_v0  ;;  %v14460_v8 = vunpack.i.l.bf16 %v14459_v0 }
 0xad4   : > { %v14456_v32 = vunpack.i.h.bf16 %v14454_v27  ;;  %v14455_v44 = vunpack.i.l.bf16 %v14454_v27 }
 0xad5   : > { %12363 = vmatmul.mubr.msk.f32.gmra.mrb[26].mxu1 %vm5043_vm15, %v11205_v16  ;;  %13593 = vmatprep.subr.bf16.mxu1 %v13592_v25  ;;  %v13608_v38 = vpack.c.bf16 %v14461_v56, %v14460_v8 }
 0xad6   : > { %13595 = vmatpush3.bf16.msra.mxu1 %v13592_v25  ;;  %12365 = vmatprep.mubr.msk.f32.mxu1 %vm5043_vm15, %v11206_v5  ;;  %v13604_v42 = vpack.c.bf16 %v14456_v32, %v14455_v44  ;;  %v14469_v13 = vpop.permute.xlu0 %14468 }
 0xad7   : > { %13597 = vmatprep.subr.bf16.mxu1 %v13596_v15  ;;  %v14464_v46 = vpop.permute.xlu1 %14463  ;;  %v14471_v40 = vunpack.i.h.bf16 %v14469_v13  ;;  %v14470_v21 = vunpack.i.l.bf16 %v14469_v13 }
 0xad8   : > { %v14466_v63 = vunpack.i.h.bf16 %v14464_v46  ;;  %v14465_v57 = vunpack.i.l.bf16 %v14464_v46 }
 0xad9   : > { %12366 = vmatmul.mubr.msk.f32.gmra.mrb[28].mxu1 %vm5043_vm15, %v11207_v26  ;;  %v13616_v28 = vpack.c.bf16 %v14471_v40, %v14470_v21 }
 0xada   : > { %12368 = vmatprep.mubr.msk.f32.mxu1 %vm5043_vm15, %v11208_v6  ;;  %v13612_v34 = vpack.c.bf16 %v14466_v63, %v14465_v57 }
 0xadd   : > { %12369 = vmatmul.mubr.msk.f32.gmra.mrb[30].mxu1 %vm5043_vm15, %v11209_v45 }
 0xade   : > { %12379 = vmatprep.mubr.msk.f32.mxu1 %vm5043_vm15, %v5887_v62 }
 0xae1   : > { %12380 = vmatmul.mubr.msk.f32.vlgmr.msra.gmra.mrb[24].mxu1 %vm5043_vm15, %v5888_v43 }
 0xae2   : > { %13599 = vmatpush3.bf16.msra.mxu1 %v13596_v15  ;;  %12382 = vmatprep.mubr.msk.f32.mxu1 %vm5043_vm15, %v5889_v29 }
 0xae3   : > { %13601 = vmatprep.subr.bf16.mxu1 %v13600_v49 }
 0xae5   : > { %12383 = vmatmul.mubr.msk.f32.gmra.mrb[26].mxu1 %vm5043_vm15, %v5890_v53 }
 0xae6   : > { %13603 = vmatpush3.bf16.msra.mxu1 %v13600_v49  ;;  %12385 = vmatprep.mubr.msk.f32.mxu1 %vm5043_vm15, %v5891_v9 }
 0xae7   : > { %13605 = vmatprep.subr.bf16.mxu1 %v13604_v42  ;;  %v6696_v30 = vpop.permute.xlu0 %6695 }
 0xae8   : > { %v6691_v41 = vpop.permute.xlu1 %6690 }
 0xae9   : > { %12386 = vmatmul.mubr.msk.f32.gmra.mrb[28].mxu1 %vm5043_vm15, %v5892_v48 }
 0xaea   : > { %12388 = vmatprep.mubr.msk.f32.mxu1 %vm5043_vm15, %v5893_v54 }
 0xaeb   : > { %v6752_v47 = vpop.permute.xlu0 %6751 }
 0xaec   : > { %v6747_v14 = vpop.permute.xlu1 %6746 }
 0xaed   : > { %12389 = vmatmul.mubr.msk.f32.gmra.mrb[30].mxu1 %vm5043_vm15, %v5894_v58 }
 0xaee   : > { %12399 = vmatprep.mubr.msk.f32.mxu1 %vm5043_vm15, %v11226_v60 }
 0xaef   : > { %v6706_v16 = vpop.permute.xlu0 %6705 }
 0xaf0   : > { %v6701_v59 = vpop.permute.xlu1 %6700 }
 0xaf1   : > { %12400 = vmatmul.mubr.msk.f32.vlgmr.msra.gmra.mrb[24].mxu1 %vm5043_vm15, %v11227_v17 }
 0xaf2   : > { %13607 = vmatpush3.bf16.msra.mxu1 %v13604_v42  ;;  %12402 = vmatprep.mubr.msk.f32.mxu1 %vm5043_vm15, %v11228_v51 }
 0xaf3   : > { %13609 = vmatprep.subr.bf16.mxu1 %v13608_v38  ;;  %v6762_v25 = vpop.permute.xlu0 %6761 }
 0xaf4   : > { %v6757_v5 = vpop.permute.xlu1 %6756 }
 0xaf5   : > { %12403 = vmatmul.mubr.msk.f32.gmra.mrb[26].mxu1 %vm5043_vm15, %v11229_v12 }
 0xaf6   : > { %13611 = vmatpush3.bf16.msra.mxu1 %v13608_v38  ;;  %12405 = vmatprep.mubr.msk.f32.mxu1 %vm5043_vm15, %v11230_v50 }
 0xaf7   : > { %13613 = vmatprep.subr.bf16.mxu1 %v13612_v34  ;;  %v6716_v15 = vpop.permute.xlu0 %6715 }
 0xaf8   : > { %v6711_v26 = vpop.permute.xlu1 %6710 }
 0xaf9   : > { %12406 = vmatmul.mubr.msk.f32.gmra.mrb[28].mxu1 %vm5043_vm15, %v11231_v10 }
 0xafa   : > { %12408 = vmatprep.mubr.msk.f32.mxu1 %vm5043_vm15, %v11232_v33 }
 0xafb   : > { %v6772_v27 = vpop.permute.xlu0 %6771 }
 0xafc   : > { %v6767_v29 = vpop.permute.xlu1 %6766 }
 0xafd   : > { %12409 = vmatmul.mubr.msk.f32.gmra.mrb[30].mxu1 %vm5043_vm15, %v11233_v22 }
 0xafe   : > { %12419 = vmatprep.mubr.msk.f32.mxu1 %vm5043_vm15, %v11242_v52 }
 0xaff   : > { %v6726_v58 = vpop.permute.xlu0 %6725 }
 0xb00   : > { %v6721_v8 = vpop.permute.xlu1 %6720 }
 0xb01   : > { %12420 = vmatmul.mubr.msk.f32.vlgmr.msra.gmra.mrb[24].mxu1 %vm5043_vm15, %v11243_v3 }
 0xb02   : > { %13615 = vmatpush3.bf16.msra.mxu1 %v13612_v34  ;;  %12422 = vmatprep.mubr.msk.f32.mxu1 %vm5043_vm15, %v11244_v18 }
 0xb03   : > { %13617 = vmatprep.subr.bf16.mxu1 %v13616_v28  ;;  %v6782_v33 = vpop.permute.xlu0 %6781 }
 0xb04   : > { %v6777_v52 = vpop.permute.xlu1 %6776 }
 0xb05   : > { %12423 = vmatmul.mubr.msk.f32.gmra.mrb[26].mxu1 %vm5043_vm15, %v11245_v19 }
 0xb06   : > { %13619 = vmatpush3.bf16.msra.mxu1 %v13616_v28  ;;  %12425 = vmatprep.mubr.msk.f32.mxu1 %vm5043_vm15, %v11246_v4 }
 0xb09   : > { %12426 = vmatmul.mubr.msk.f32.gmra.mrb[28].mxu1 %vm5043_vm15, %v11247_v24 }
 0xb0a   : > { %12428 = vmatprep.mubr.msk.f32.mxu1 %vm5043_vm15, %v11248_v55 }
 0xb0d   : > { %12429 = vmatmul.mubr.msk.f32.gmra.mrb[30].mxu1 %vm5043_vm15, %v11249_v39 }
 0xb0e   : > { %12439 = vmatprep.mubr.msk.f32.mxu1 %vm5043_vm15, %v11258_v36 }
 0xb11   : > { %12440 = vmatmul.mubr.msk.f32.vlgmr.msra.gmra.mrb[24].mxu1 %vm5043_vm15, %v11259_v20 }
 0xb12   : > { %12442 = vmatprep.mubr.msk.f32.mxu1 %vm5043_vm15, %v11260_v23 }
 0xb15   : > { %12443 = vmatmul.mubr.msk.f32.gmra.mrb[26].mxu1 %vm5043_vm15, %v11261_v31 }
 0xb16   : > { %12445 = vmatprep.mubr.msk.f32.mxu1 %vm5043_vm15, %v11262_v61 }
 0xb19   : > { %12446 = vmatmul.mubr.msk.f32.gmra.mrb[28].mxu1 %vm5043_vm15, %v11263_v37 }
 0xb1a   : > { %12448 = vmatprep.mubr.msk.f32.mxu1 %vm5043_vm15, %v11264_v1 }
 0xb1d   : > { %12449 = vmatmul.mubr.msk.f32.gmra.mrb[30].mxu1 %vm5043_vm15, %v11265_v7 }
 0xbe4   : > { %v12441_v6 = vpop.f32.mrb[24].mxu1 }
 0xbe5   : > { %v6729_v45 = vmul.f32 %v12441_v6, %v6696_v30  ;;  %v6633_v62 = vpop.f32.mrb[25].mxu1  ;;  %v11290_v30 = vld [vmem:[%s16924_s0 + $0x40] sm:$0xff] }
 0xbe6   : > { %v6728_v43 = vmul.f32 %v6691_v41, %v6633_v62 }
 0xbe7   : > { %v6785_v32 = vadd.f32 %v6752_v47, %v6729_v45 }
 0xbe8   : > { %v6784_v44 = vadd.f32 %v6747_v14, %v6728_v43  ;;  %v12444_v49 = vpop.f32.mrb[26].mxu1  ;;  %v16319_v14 = vld [vmem:[#allocation2 + $0x30] sm:$0xff] }
 0xbe9   : > { %v6731_v53 = vmul.f32 %v12444_v49, %v6706_v16  ;;  %v6643_v9 = vpop.f32.mrb[27].mxu1  ;;  %v6793_v54 = vmax.f32 %v6785_v32, 0.0  ;;  %v16327_v43 = vld [vmem:[#allocation2 + $0x90] sm:$0xff] }
 0xbea   : > { %v6792_v42 = vmax.f32 %v6784_v44, 0.0  ;;  %v6730_v48 = vmul.f32 %v6701_v59, %v6643_v9  ;;  %v16330_v44 = vld [vmem:[#allocation2 + $0x60] sm:$0xff] }
 0xbeb   : > { %v6787_v0 = vadd.f32 %v6762_v25, %v6731_v53  ;;  %v16321_v25 = vld [vmem:[#allocation2] sm:$0xff] }
 0xbec   : > { %v6786_v60 = vadd.f32 %v6757_v5, %v6730_v48  ;;  %v12447_v56 = vpop.f32.mrb[28].mxu1  ;;  %12459 = vmatprep.mubr.msk.f32.mxu0 %vm5043_vm15, %v6792_v42 }
 0xbed   : > { %v6733_v46 = vmul.f32 %v12447_v56, %v6716_v15  ;;  %v6653_v17 = vpop.f32.mrb[29].mxu1  ;;  %12460 = vmatmul.mubr.msk.f32.vlgmr.msra.gmra.mrb[28].mxu0 %vm5043_vm15, %v6793_v54  ;;  %v6795_v57 = vmax.f32 %v6787_v0, 0.0  ;;  %v16337_v0 = vld [vmem:[#allocation2 + $0xf0] sm:$0xff] }
 0xbee   : > { %v6794_v51 = vmax.f32 %v6786_v60, 0.0  ;;  %v6732_v63 = vmul.f32 %v6711_v26, %v6653_v17  ;;  %13631 = vmatpush3.bf16.msra.mxu0 %v16107_v35 }
 0xbef   : > { %v6789_v38 = vadd.f32 %v6772_v27, %v6733_v46  ;;  %13633 = vmatprep.subr.bf16.mxu0 %v16112_v11 }
 0xbf0   : > { %v6788_v12 = vadd.f32 %v6767_v29, %v6732_v63  ;;  %v12450_v50 = vpop.f32.mrb[30].mxu1  ;;  %12462 = vmatprep.mubr.msk.f32.mxu0 %vm5043_vm15, %v6794_v51  ;;  %v16348_v63 = vld [vmem:[#allocation2 + $0x120] sm:$0xff] }
 0xbf1   : > { %v6735_v34 = vmul.f32 %v12450_v50, %v6726_v58  ;;  %v6663_v10 = vpop.f32.mrb[31].mxu1  ;;  %12463 = vmatmul.mubr.msk.f32.gmra.mrb[30].mxu0 %vm5043_vm15, %v6795_v57  ;;  %v6797_v40 = vmax.f32 %v6789_v38, 0.0  ;;  %v16340_v58 = vld [vmem:[#allocation2 + $0xc0] sm:$0xff] }
 0xbf2   : > { %v6796_v13 = vmax.f32 %v6788_v12, 0.0  ;;  %v6734_v22 = vmul.f32 %v6721_v8, %v6663_v10  ;;  %13635 = vmatpush3.bf16.msra.mxu0 %v16112_v11 }
 0xbf3   : > { %v6791_v35 = vadd.f32 %v6782_v33, %v6735_v34  ;;  %v11291_v33 = vld [vmem:[%s16924_s0 + $0x48] sm:$0xff] }
 0xbf4   : > { %v6790_v21 = vadd.f32 %v6777_v52, %v6734_v22  ;;  %12465 = vmatprep.mubr.msk.f32.mxu0 %vm5043_vm15, %v6796_v13  ;;  %v11292_v22 = vld [vmem:[%s16924_s0 + $0x50] sm:$0xff] }
 0xbf5   : > { %12466 = vmatmul.mubr.msk.f32.gmra.mrb[32].mxu0 %vm5043_vm15, %v6797_v40  ;;  %v6799_v18 = vmax.f32 %v6791_v35, 0.0 }
 0xbf6   : > { %v6798_v3 = vmax.f32 %v6790_v21, 0.0  ;;  %v11294_v21 = vld [vmem:[%s16924_s0 + $0x60] sm:$0xff] }
 0xbf8   : > { %12468 = vmatprep.mubr.msk.f32.mxu0 %vm5043_vm15, %v6798_v3 }
 0xbf9   : > { %12469 = vmatmul.mubr.msk.f32.gmra.mrb[34].mxu0 %vm5043_vm15, %v6799_v18 }
 0xbfa   : > { %12479 = vmatprep.mubr.msk.f32.mxu0 %vm5043_vm15, %v6792_v42 }
 0xbfd   : > { %12480 = vmatmul.mubr.msk.f32.vlgmr.msra.gmra.mrb[36].mxu0 %vm5043_vm15, %v6793_v54 }
 0xbfe   : > { %12482 = vmatprep.mubr.msk.f32.mxu0 %vm5043_vm15, %v6794_v51  ;;  %v16345_v51 = vld [vmem:[#allocation2 + $0x150] sm:$0xff] }
 0xc01   : > { %12483 = vmatmul.mubr.msk.f32.gmra.mrb[38].mxu0 %vm5043_vm15, %v6795_v57 }
 0xc02   : > { %12485 = vmatprep.mubr.msk.f32.mxu0 %vm5043_vm15, %v6796_v13 }
 0xc05   : > { %12486 = vmatmul.mubr.msk.f32.gmra.mrb[40].mxu0 %vm5043_vm15, %v6797_v40  ;;  %v11293_v40 = vld [vmem:[%s16924_s0 + $0x58] sm:$0xff] }
 0xc06   : > { %12488 = vmatprep.mubr.msk.f32.mxu0 %vm5043_vm15, %v6798_v3  ;;  %v7593_v3 = vld [vmem:[%s16925_s20 + $0x8] sm:$0xff] }
 0xc09   : > { %12489 = vmatmul.mubr.msk.f32.gmra.mrb[42].mxu0 %vm5043_vm15, %v6799_v18  ;;  %v7592_v18 = vld [vmem:[%s16925_s20] sm:$0xff] }
 0xc0a   : > { %12507 = vmatprep.mubr.msk.f32.mxu0 %vm4989_vm14, %v11290_v30  ;;  %v7598_v30 = vld [vmem:[%s16925_s20 + $0x30] sm:$0xff] }
 0xcc0   : > { %v12461_v11 = vpop.f32.mrb[28].mxu0 }
 0xcc1   : > { %v6894_v28 = vpop.f32.mrb[29].mxu0 }
 0xcc4   : > { %v12464_v19 = vpop.f32.mrb[30].mxu0 }
 0xcc5   : > { %v6904_v4 = vpop.f32.mrb[31].mxu0 }
 0xcc8   : > { %v12467_v24 = vpop.f32.mrb[32].mxu0 }
 0xcc9   : > { %v6914_v55 = vpop.f32.mrb[33].mxu0 }
 0xccc   : > { %v12470_v39 = vpop.f32.mrb[34].mxu0 }
 0xccd   : > { %v6924_v36 = vpop.f32.mrb[35].mxu0 }
 0xcd0   : > { %v12481_v20 = vpop.f32.mrb[36].mxu0 }
 0xcd1   : > { %v7043_v23 = vmax.f32 %v12461_v11, %v12481_v20  ;;  %v7003_v31 = vpop.f32.mrb[37].mxu0  ;;  %v11295_v11 = vld [vmem:[%s16924_s0 + $0x68] sm:$0xff]  ;;  %v7651_v20 = vld [vmem:[%s16926_s4 + $0x18] sm:$0xff] }
 0xcd2   : > { %v7042_v61 = vmax.f32 %v6894_v28, %v7003_v31  ;;  %v11296_v28 = vld [vmem:[%s16924_s0 + $0x70] sm:$0xff]  ;;  %v7597_v31 = vld [vmem:[%s16925_s20 + $0x28] sm:$0xff] }
 0xcd3   : > { %7060 = vst.msk [vmem:[#allocation2 + $0x38] sm:$0xff] %vm3358_vm12, %v7043_v23  ;;  %v7650_v23 = vld [vmem:[%s16926_s4 + $0x10] sm:$0xff] }
 0xcd4   : > { %7059 = vst.msk [vmem:[#allocation2 + $0x8] sm:$0xff] %vm3358_vm12, %v7042_v61  ;;  %v12484_v37 = vpop.f32.mrb[38].mxu0  ;;  %v7596_v61 = vld [vmem:[%s16925_s20 + $0x20] sm:$0xff] }
 0xcd5   : > { %v7045_v1 = vmax.f32 %v12464_v19, %v12484_v37  ;;  %v7013_v7 = vpop.f32.mrb[39].mxu0  ;;  %v7649_v19 = vld [vmem:[%s16926_s4 + $0x8] sm:$0xff] }
 0xcd6   : > { %v7044_v41 = vmax.f32 %v6904_v4, %v7013_v7  ;;  %v7648_v4 = vld [vmem:[%s16926_s4] sm:$0xff]  ;;  %v7653_v37 = vld [vmem:[%s16926_s4 + $0x28] sm:$0xff]  ;;  %v7599_v7 = vld [vmem:[%s16925_s20 + $0x38] sm:$0xff] }
 0xcd7   : > { %7062 = vst.msk [vmem:[#allocation2 + $0x98] sm:$0xff] %vm3358_vm12, %v7045_v1  ;;  %v7652_v1 = vld [vmem:[%s16926_s4 + $0x20] sm:$0xff] }
 0xcd8   : > { %7061 = vst.msk [vmem:[#allocation2 + $0x68] sm:$0xff] %vm3358_vm12, %v7044_v41  ;;  %v12487_v47 = vpop.f32.mrb[40].mxu0  ;;  %v7655_v41 = vld [vmem:[%s16926_s4 + $0x38] sm:$0xff] }
 0xcd9   : > { %v7047_v16 = vmax.f32 %v12467_v24, %v12487_v47  ;;  %v7023_v59 = vpop.f32.mrb[41].mxu0  ;;  %v11297_v24 = vld [vmem:[%s16924_s0 + $0x78] sm:$0xff]  ;;  %v7654_v47 = vld [vmem:[%s16926_s4 + $0x30] sm:$0xff] }
 0xcda   : > { %v7046_v5 = vmax.f32 %v6914_v55, %v7023_v59  ;;  %v7070_v15 = vld [vmem:[#allocation2 + $0x38] sm:$0xff]  ;;  %v7083_v55 = vld [vmem:[%s16924_s0] sm:$0xff]  ;;  %v7713_v59 = vld [vmem:[%s14723_s9 + $0x10] sm:$0xff] }
 0xcdb   : > { %7064 = vst.msk [vmem:[#allocation2 + $0xf8] sm:$0xff] %vm3358_vm12, %v7047_v16  ;;  %v14472_v26 = vpack.i.bf16 %v7070_v15, %v16319_v14  ;;  %v7068_v6 = vld [vmem:[#allocation2 + $0x8] sm:$0xff]  ;;  %v16392_v16 = vld [vmem:[%s14723_s9] sm:$0xff] }
 0xcdc   : > { %7063 = vst.msk [vmem:[#allocation2 + $0xc8] sm:$0xff] %vm3358_vm12, %v7046_v5  ;;  %v12490_v45 = vpop.f32.mrb[42].mxu0  ;;  %v14477_v62 = vpack.i.bf16 %v7068_v6, %v16321_v25  ;;  %v13636_v27 = vpack.c.bf16 %v7070_v15, %v7068_v6  ;;  %v14512_v13 = vpack.i.bf16 %v7070_v15, %v7068_v6  ;;  %v13684_v5 = vpack.c.bf16 %v7713_v59, %v16392_v16 }
 0xcdd   : > { %v7049_v29 = vmax.f32 %v12470_v39, %v12490_v45  ;;  %14473 = vrot.lane.b32.xlu0 %v14472_v26, %s14702_s1  ;;  %v7033_v32 = vpop.f32.mrb[43].mxu0  ;;  %v7595_v39 = vld [vmem:[%s16925_s20 + $0x18] sm:$0xff]  ;;  %7960 = vst.msk [vmem:[#allocation2 + $0x38] sm:$0xff] %vm7958_vm5, %v14699_v2  ;;  %7959 = vst.msk [vmem:[#allocation2 + $0x8] sm:$0xff] %vm7958_vm5, %v14699_v2 }
 0xcde   : > { %v7048_v49 = vmax.f32 %v6924_v36, %v7033_v32  ;;  %14478 = vrot.lane.b32.xlu1 %v14477_v62, %s14702_s1  ;;  %13637 = vmatprep.subr.bf16.mxu0 %v13636_v27  ;;  %v7074_v53 = vld [vmem:[#allocation2 + $0x98] sm:$0xff]  ;;  %v7594_v36 = vld [vmem:[%s16925_s20 + $0x10] sm:$0xff] }
 0xcdf   : > { %7066 = vst.msk [vmem:[#allocation2 + $0x158] sm:$0xff] %vm3358_vm12, %v7049_v29  ;;  %13639 = vmatpush3.bf16.msra.mxu0 %v13636_v27  ;;  %v14482_v9 = vpack.i.bf16 %v7074_v53, %v16327_v43  ;;  %v7072_v42 = vld [vmem:[#allocation2 + $0x68] sm:$0xff]  ;;  %13685 = vmatprep.subr.bf16.mxu1 %v13684_v5 }
 0xce0   : > { %7065 = vst.msk [vmem:[#allocation2 + $0x128] sm:$0xff] %vm3358_vm12, %v7048_v49  ;;  %v14487_v48 = vpack.i.bf16 %v7072_v42, %v16330_v44  ;;  %v13640_v54 = vpack.c.bf16 %v7074_v53, %v7072_v42  ;;  %v14517_v10 = vpack.i.bf16 %v7074_v53, %v7072_v42  ;;  %13687 = vmatpush3.bf16.msra.mxu1 %v13684_v5 }
 0xce1   : > { %14483 = vrot.lane.b32.xlu0 %v14482_v9, %s14702_s1  ;;  %7961 = vst.msk [vmem:[#allocation2 + $0x68] sm:$0xff] %vm7958_vm5, %v14699_v2  ;;  %7962 = vst.msk [vmem:[#allocation2 + $0x98] sm:$0xff] %vm7958_vm5, %v14699_v2 }
 0xce2   : > { %14488 = vrot.lane.b32.xlu1 %v14487_v48, %s14702_s1  ;;  %13641 = vmatprep.subr.bf16.mxu0 %v13640_v54  ;;  %v7078_v60 = vld [vmem:[#allocation2 + $0xf8] sm:$0xff] }
 0xce3   : > { %13643 = vmatpush3.bf16.msra.mxu0 %v13640_v54  ;;  %v14492_v56 = vpack.i.bf16 %v7078_v60, %v16337_v0  ;;  %v7076_v8 = vld [vmem:[#allocation2 + $0xc8] sm:$0xff]  ;;  %7964 = vst.msk [vmem:[#allocation2 + $0xf8] sm:$0xff] %vm7958_vm5, %v14699_v2 }
 0xce4   : > { %v14497_v46 = vpack.i.bf16 %v7076_v8, %v16340_v58  ;;  %v13644_v17 = vpack.c.bf16 %v7078_v60, %v7076_v8  ;;  %v14522_v35 = vpack.i.bf16 %v7078_v60, %v7076_v8  ;;  %7963 = vst.msk [vmem:[#allocation2 + $0xc8] sm:$0xff] %vm7958_vm5, %v14699_v2 }
 0xce5   : > { %14493 = vrot.lane.b32.xlu0 %v14492_v56, %s14702_s1 }
 0xce6   : > { %14498 = vrot.lane.b32.xlu1 %v14497_v46, %s14702_s1  ;;  %13645 = vmatprep.subr.bf16.mxu0 %v13644_v17  ;;  %v7082_v57 = vld [vmem:[#allocation2 + $0x158] sm:$0xff] }
 0xce7   : > { %13647 = vmatpush3.bf16.msra.mxu0 %v13644_v17  ;;  %v14507_v38 = vpack.i.bf16 %v7082_v57, %v16345_v51  ;;  %v7080_v12 = vld [vmem:[#allocation2 + $0x128] sm:$0xff]  ;;  %7966 = vst.msk [vmem:[#allocation2 + $0x158] sm:$0xff] %vm7958_vm5, %v14699_v2 }
 0xce8   : > { %v14502_v50 = vpack.i.bf16 %v7080_v12, %v16348_v63  ;;  %v13648_v34 = vpack.c.bf16 %v7082_v57, %v7080_v12  ;;  %v14527_v52 = vpack.i.bf16 %v7082_v57, %v7080_v12  ;;  %7965 = vst.msk [vmem:[#allocation2 + $0x128] sm:$0xff] %vm7958_vm5, %v14699_v2 }
 0xce9   : > { %14508 = vrot.lane.b32.xlu0 %v14507_v38, %s14702_s1 }
 0xcea   : > { %14503 = vrot.lane.b32.xlu1 %v14502_v50, %s14702_s1  ;;  %13649 = vmatprep.subr.bf16.mxu0 %v13648_v34 }
 0xceb   : > { %13651 = vmatpush3.bf16.msra.mxu0 %v13648_v34 }
 0xced   : > { %14518 = vrot.lane.b32.xlu0 %v14517_v10, %s16881_s2 }
 0xcee   : > { %14513 = vrot.lane.b32.xlu1 %v14512_v13, %s16881_s2  ;;  %12508 = vmatmul.mubr.msk.f32.vlgmr.msra.gmra.mrb[44].mxu0 %vm4989_vm14, %v11291_v33 }
 0xcef   : > { %12510 = vmatprep.mubr.msk.f32.mxu0 %vm4989_vm14, %v11292_v22 }
 0xcf1   : > { %14528 = vrot.lane.b32.xlu0 %v14527_v52, %s16881_s2 }
 0xcf2   : > { %14523 = vrot.lane.b32.xlu1 %v14522_v35, %s16881_s2  ;;  %12511 = vmatmul.mubr.msk.f32.gmra.mrb[46].mxu0 %vm4989_vm14, %v11293_v40 }
 0xcf3   : > { %12513 = vmatprep.mubr.msk.f32.mxu0 %vm4989_vm14, %v11294_v21 }
 0xcf5   : > { %7607 = vperm.xlu0 %14250, %v7593_v3  }
 0xcf6   : > { %7602 = vperm.xlu1 %14251, %v7592_v18   ;;  %12514 = vmatmul.mubr.msk.f32.gmra.mrb[48].mxu0 %vm4989_vm14, %v11295_v11 }
 0xcf7   : > { %12516 = vmatprep.mubr.msk.f32.mxu0 %vm4989_vm14, %v11296_v28 }
 0xcf9   : > { %7663 = vperm.xlu0 %14250, %v7649_v19  }
 0xcfa   : > { %7658 = vperm.xlu1 %14251, %v7648_v4   ;;  %12517 = vmatmul.mubr.msk.f32.gmra.mrb[50].mxu0 %vm4989_vm14, %v11297_v24 }
 0xcfb   : > { %12535 = vmatprep.mubr.msk.f32.mxu0 %vm4989_vm14, %v7083_v55 }
 0xcfd   : > { %7617 = vperm.xlu0 %14250, %v7595_v39  }
 0xcfe   : > { %7612 = vperm.xlu1 %14251, %v7594_v36  }
 0xd01   : > { %7673 = vperm.xlu0 %14250, %v7651_v20  }
 0xd02   : > { %7668 = vperm.xlu1 %14251, %v7650_v23   ;;  %v7084_v23 = vld [vmem:[%s16924_s0 + $0x8] sm:$0xff] }
 0xd05   : > { %7627 = vperm.xlu0 %14250, %v7597_v31  }
 0xd06   : > { %7622 = vperm.xlu1 %14251, %v7596_v61   ;;  %v7085_v61 = vld [vmem:[%s16924_s0 + $0x10] sm:$0xff] }
 0xd09   : > { %7683 = vperm.xlu0 %14250, %v7653_v37  }
 0xd0a   : > { %7678 = vperm.xlu1 %14251, %v7652_v1  }
 0xd0d   : > { %7637 = vperm.xlu0 %14250, %v7599_v7  }
 0xd0e   : > { %7632 = vperm.xlu1 %14251, %v7598_v30  }
 0xd11   : > { %7693 = vperm.xlu0 %14250, %v7655_v41   ;;  %v7086_v41 = vld [vmem:[%s16924_s0 + $0x18] sm:$0xff] }
 0xd12   : > { %7688 = vperm.xlu1 %14251, %v7654_v47   ;;  %v7087_v47 = vld [vmem:[%s16924_s0 + $0x20] sm:$0xff] }
 0xd4f   : > { %v14474_v15 = vpop.permute.xlu0 %14473 }
 0xd50   : > { %v14476_v26 = vunpack.i.h.bf16 %v14474_v15  ;;  %v14475_v6 = vunpack.i.l.bf16 %v14474_v15  ;;  %v14479_v45 = vpop.permute.xlu1 %14478 }
 0xd51   : > { %v14481_v62 = vunpack.i.h.bf16 %v14479_v45  ;;  %v14480_v27 = vunpack.i.l.bf16 %v14479_v45  ;;  %v16415_v45 = vld [vmem:[%s14728_s13] sm:$0xff] }
 0xd52   : > { %v7278_v29 = vsel %vm1669_vm7, %v14475_v6, %v14476_v26  ;;  %v7088_v26 = vld [vmem:[%s16924_s0 + $0x28] sm:$0xff]  ;;  %v7089_v6 = vld [vmem:[%s16924_s0 + $0x30] sm:$0xff] }
 0xd53   : > { %v14484_v32 = vpop.permute.xlu0 %14483  ;;  %v7277_v49 = vsel %vm1669_vm7, %v14480_v27, %v14481_v62  ;;  %v7844_v62 = vld [vmem:[%s14728_s13 + $0x10] sm:$0xff] }
 0xd54   : > { %v14486_v53 = vunpack.i.h.bf16 %v14484_v32  ;;  %v14485_v9 = vunpack.i.l.bf16 %v14484_v32  ;;  %v14489_v42 = vpop.permute.xlu1 %14488  ;;  %v13652_v48 = vpack.c.bf16 %v7278_v29, %v7277_v49  ;;  %v7090_v29 = vld [vmem:[%s16924_s0 + $0x38] sm:$0xff]  ;;  %v11314_v32 = vld [vmem:[%s16924_s0 + $0x80] sm:$0xff]  ;;  %v13688_v49 = vpack.c.bf16 %v7844_v62, %v16415_v45 }
 0xd55   : > { %v14491_v54 = vunpack.i.h.bf16 %v14489_v42  ;;  %v14490_v60 = vunpack.i.l.bf16 %v14489_v42  ;;  %v11317_v42 = vld [vmem:[%s16924_s0 + $0x98] sm:$0xff] }
 0xd56   : > { %13653 = vmatprep.subr.bf16.mxu0 %v13652_v48  ;;  %v7280_v56 = vsel %vm1669_vm7, %v14485_v9, %v14486_v53  ;;  %v11315_v53 = vld [vmem:[%s16924_s0 + $0x88] sm:$0xff]  ;;  %v11316_v9 = vld [vmem:[%s16924_s0 + $0x90] sm:$0xff] }
 0xd57   : > { %v14494_v8 = vpop.permute.xlu0 %14493  ;;  %13655 = vmatpush3.bf16.msra.mxu0 %v13652_v48  ;;  %v7279_v46 = vsel %vm1669_vm7, %v14490_v60, %v14491_v54  ;;  %v11318_v48 = vld [vmem:[%s16924_s0 + $0xa0] sm:$0xff]  ;;  %v11319_v54 = vld [vmem:[%s16924_s0 + $0xa8] sm:$0xff]  ;;  %v11320_v60 = vld [vmem:[%s16924_s0 + $0xb0] sm:$0xff] }
 0xd58   : > { %v14496_v17 = vunpack.i.h.bf16 %v14494_v8  ;;  %v14495_v57 = vunpack.i.l.bf16 %v14494_v8  ;;  %v14499_v38 = vpop.permute.xlu1 %14498  ;;  %v13656_v12 = vpack.c.bf16 %v7280_v56, %v7279_v46  ;;  %v11321_v56 = vld [vmem:[%s16924_s0 + $0xb8] sm:$0xff]  ;;  %s16932_s0 = smov 127  }
 0xd59   : > { %v14501_v50 = vunpack.i.h.bf16 %v14499_v38  ;;  %v14500_v34 = vunpack.i.l.bf16 %v14499_v38 }
 0xd5a   : > { %13657 = vmatprep.subr.bf16.mxu0 %v13656_v12  ;;  %v7282_v10 = vsel %vm1669_vm7, %v14495_v57, %v14496_v17 }
 0xd5b   : > { %v14509_v33 = vpop.permute.xlu0 %14508  ;;  %13659 = vmatpush3.bf16.msra.mxu0 %v13656_v12  ;;  %v7281_v13 = vsel %vm1669_vm7, %v14500_v34, %v14501_v50 }
 0xd5c   : > { %v14511_v22 = vunpack.i.h.bf16 %v14509_v33  ;;  %v14510_v52 = vunpack.i.l.bf16 %v14509_v33  ;;  %v14504_v40 = vpop.permute.xlu1 %14503  ;;  %v13660_v35 = vpack.c.bf16 %v7282_v10, %v7281_v13 }
 0xd5d   : > { %v14506_v21 = vunpack.i.h.bf16 %v14504_v40  ;;  %v14505_v3 = vunpack.i.l.bf16 %v14504_v40 }
 0xd5e   : > { %13661 = vmatprep.subr.bf16.mxu0 %v13660_v35  ;;  %v7284_v18 = vsel %vm1669_vm7, %v14510_v52, %v14511_v22 }
 0xd5f   : > { %v14519_v11 = vpop.permute.xlu0 %14518  ;;  %13663 = vmatpush3.bf16.msra.mxu0 %v13660_v35  ;;  %v7283_v28 = vsel %vm1669_vm7, %v14505_v3, %v14506_v21 }
 0xd60   : > { %v14514_v19 = vpop.permute.xlu1 %14513  ;;  %v13664_v4 = vpack.c.bf16 %v7284_v18, %v7283_v28  ;;  %v14521_v39 = vunpack.i.h.bf16 %v14519_v11  ;;  %v14520_v36 = vunpack.i.l.bf16 %v14519_v11 }
 0xd61   : > { %v14516_v24 = vunpack.i.h.bf16 %v14514_v19  ;;  %v14515_v55 = vunpack.i.l.bf16 %v14514_v19 }
 0xd62   : > { %13665 = vmatprep.subr.bf16.mxu0 %v13664_v4  ;;  %v13672_v7 = vpack.c.bf16 %v14521_v39, %v14520_v36 }
 0xd63   : > { %13667 = vmatpush3.bf16.msra.mxu0 %v13664_v4  ;;  %v13668_v20 = vpack.c.bf16 %v14516_v24, %v14515_v55  ;;  %v14529_v30 = vpop.permute.xlu0 %14528 }
 0xd64   : > { %v14524_v31 = vpop.permute.xlu1 %14523  ;;  %v14531_v59 = vunpack.i.h.bf16 %v14529_v30  ;;  %v14530_v5 = vunpack.i.l.bf16 %v14529_v30 }
 0xd65   : > { %13669 = vmatprep.subr.bf16.mxu0 %v13668_v20  ;;  %v14526_v37 = vunpack.i.h.bf16 %v14524_v31  ;;  %v14525_v1 = vunpack.i.l.bf16 %v14524_v31 }
 0xd66   : > { %12536 = vmatmul.mubr.msk.f32.vlgmr.msra.gmra.mrb[44].mxu0 %vm4989_vm14, %v7084_v23  ;;  %v13680_v27 = vpack.c.bf16 %v14531_v59, %v14530_v5 }
 0xd67   : > { %13671 = vmatpush3.bf16.msra.mxu0 %v13668_v20  ;;  %12538 = vmatprep.mubr.msk.f32.mxu0 %vm4989_vm14, %v7085_v61  ;;  %v13676_v15 = vpack.c.bf16 %v14526_v37, %v14525_v1 }
 0xd68   : > { %13673 = vmatprep.subr.bf16.mxu0 %v13672_v7 }
 0xd6a   : > { %12539 = vmatmul.mubr.msk.f32.gmra.mrb[46].mxu0 %vm4989_vm14, %v7086_v41 }
 0xd6b   : > { %13675 = vmatpush3.bf16.msra.mxu0 %v13672_v7  ;;  %12541 = vmatprep.mubr.msk.f32.mxu0 %vm4989_vm14, %v7087_v47 }
 0xd6c   : > { %13677 = vmatprep.subr.bf16.mxu0 %v13676_v15 }
 0xd6e   : > { %12542 = vmatmul.mubr.msk.f32.gmra.mrb[48].mxu0 %vm4989_vm14, %v7088_v26 }
 0xd6f   : > { %13679 = vmatpush3.bf16.msra.mxu0 %v13676_v15  ;;  %12544 = vmatprep.mubr.msk.f32.mxu0 %vm4989_vm14, %v7089_v6 }
 0xd70   : > { %13681 = vmatprep.subr.bf16.mxu0 %v13680_v27 }
 0xd72   : > { %12545 = vmatmul.mubr.msk.f32.gmra.mrb[50].mxu0 %vm4989_vm14, %v7090_v29 }
 0xd73   : > { %13683 = vmatpush3.bf16.msra.mxu0 %v13680_v27  ;;  %12563 = vmatprep.mubr.msk.f32.mxu0 %vm4989_vm14, %v11314_v32 }
 0xd74   : > { %13689 = vmatprep.subr.bf16.mxu0 %v13688_v49  ;;  %v7608_v8 = vpop.permute.xlu0 %7607 }
 0xd75   : > { %v7603_v46 = vpop.permute.xlu1 %7602 }
 0xd76   : > { %12564 = vmatmul.mubr.msk.f32.vlgmr.msra.gmra.mrb[44].mxu0 %vm4989_vm14, %v11315_v53 }
 0xd77   : > { %12566 = vmatprep.mubr.msk.f32.mxu0 %vm4989_vm14, %v11316_v9  ;;  %13691 = vmatpush3.bf16.msra.mxu0 %v13688_v49 }
 0xd78   : > { %12691 = vmatprep.subr.mxu0 %v16392_v16  ;;  %v7664_v17 = vpop.permute.xlu0 %7663 }
 0xd79   : > { %v7659_v57 = vpop.permute.xlu1 %7658 }
 0xd7a   : > { %12567 = vmatmul.mubr.msk.f32.gmra.mrb[46].mxu0 %vm4989_vm14, %v11317_v42 }
 0xd7b   : > { %12569 = vmatprep.mubr.msk.f32.mxu0 %vm4989_vm14, %v11318_v48 }
 0xd7c   : > { %v7618_v38 = vpop.permute.xlu0 %7617 }
 0xd7d   : > { %v7613_v12 = vpop.permute.xlu1 %7612 }
 0xd7e   : > { %12570 = vmatmul.mubr.msk.f32.gmra.mrb[48].mxu0 %vm4989_vm14, %v11319_v54 }
 0xd7f   : > { %12572 = vmatprep.mubr.msk.f32.mxu0 %vm4989_vm14, %v11320_v60 }
 0xd80   : > { %v7674_v50 = vpop.permute.xlu0 %7673 }
 0xd81   : > { %v7669_v34 = vpop.permute.xlu1 %7668 }
 0xd82   : > { %12573 = vmatmul.mubr.msk.f32.gmra.mrb[50].mxu0 %vm4989_vm14, %v11321_v56 }
 0xd84   : > { %v7628_v10 = vpop.permute.xlu0 %7627 }
 0xd85   : > { %v7623_v33 = vpop.permute.xlu1 %7622 }
 0xd88   : > { %v7684_v40 = vpop.permute.xlu0 %7683 }
 0xd89   : > { %v7679_v21 = vpop.permute.xlu1 %7678 }
 0xd8c   : > { %v7638_v36 = vpop.permute.xlu0 %7637 }
 0xd8d   : > { %v7633_v31 = vpop.permute.xlu1 %7632 }
 0xd90   : > { %v7694_v26 = vpop.permute.xlu0 %7693 }
 0xe49   : > { %v12565_v13 = vpop.f32.mrb[44].mxu0 }
 0xe4a   : > { %v7641_v22 = vmul.f32 %v12565_v13, %v7608_v8  ;;  %v7545_v52 = vpop.f32.mrb[45].mxu0 }
 0xe4b   : > { %v7640_v35 = vmul.f32 %v7603_v46, %v7545_v52 }
 0xe4c   : > { %v7697_v3 = vadd.f32 %v7664_v17, %v7641_v22 }
 0xe4d   : > { %v7696_v18 = vadd.f32 %v7659_v57, %v7640_v35  ;;  %v12568_v11 = vpop.f32.mrb[46].mxu0 }
 0xe4e   : > { %v7643_v28 = vmul.f32 %v12568_v11, %v7618_v38  ;;  %v7555_v19 = vpop.f32.mrb[47].mxu0  ;;  %v7705_v55 = vmax.f32 %v7697_v3, 0.0 }
 0xe4f   : > { %v7704_v4 = vmax.f32 %v7696_v18, 0.0  ;;  %v7642_v24 = vmul.f32 %v7613_v12, %v7555_v19  ;;  %v11346_v12 = vld [vmem:[%s16927_s26 + $0x40] sm:$0xff] }
 0xe50   : > { %v7699_v39 = vadd.f32 %v7674_v50, %v7643_v28 }
 0xe51   : > { %v7698_v20 = vadd.f32 %v7669_v34, %v7642_v24  ;;  %v12571_v23 = vpop.f32.mrb[48].mxu0  ;;  %12579 = vmatprep.mubr.msk.f32.mxu1 %vm3358_vm12, %v7704_v4  ;;  %12595 = vmatprep.mubr.msk.f32.mxu0 %vm3358_vm12, %v7704_v4 }
 0xe52   : > { %v7645_v61 = vmul.f32 %v12571_v23, %v7628_v10  ;;  %v7565_v37 = vpop.f32.mrb[49].mxu0  ;;  %12580 = vmatmul.mubr.msk.f32.vlgmr.msra.gmra.mrb[32].mxu1 %vm3358_vm12, %v7705_v55  ;;  %12596 = vmatmul.mubr.msk.f32.vlgmr.msra.gmra.mrb[52].mxu0 %vm3358_vm12, %v7705_v55  ;;  %v7707_v30 = vmax.f32 %v7699_v39, 0.0 }
 0xe53   : > { %v7706_v1 = vmax.f32 %v7698_v20, 0.0  ;;  %v7644_v7 = vmul.f32 %v7623_v33, %v7565_v37  ;;  %12692 = vmatpush3.msra.mxu0 %v16392_v16  ;;  %v7689_v16 = vpop.permute.xlu1 %7688 }
 0xe54   : > { %v7701_v41 = vadd.f32 %v7684_v40, %v7645_v61  ;;  %12705 = vmatprep.subr.mxu0 %v16415_v45 }
 0xe55   : > { %v7700_v47 = vadd.f32 %v7679_v21, %v7644_v7  ;;  %v12574_v59 = vpop.f32.mrb[50].mxu0  ;;  %12582 = vmatprep.mubr.msk.f32.mxu1 %vm3358_vm12, %v7706_v1  ;;  %12598 = vmatprep.mubr.msk.f32.mxu0 %vm3358_vm12, %v7706_v1 }
 0xe56   : > { %v7647_v5 = vmul.f32 %v12574_v59, %v7638_v36  ;;  %v7575_v15 = vpop.f32.mrb[51].mxu0  ;;  %12583 = vmatmul.mubr.msk.f32.gmra.mrb[34].mxu1 %vm3358_vm12, %v7707_v30  ;;  %12599 = vmatmul.mubr.msk.f32.gmra.mrb[54].mxu0 %vm3358_vm12, %v7707_v30  ;;  %v7709_v27 = vmax.f32 %v7701_v41, 0.0  ;;  %v11347_v41 = vld [vmem:[%s16927_s26 + $0x48] sm:$0xff]  ;;  %v11348_v59 = vld [vmem:[%s16927_s26 + $0x50] sm:$0xff] }
 0xe57   : > { %v7708_v6 = vmax.f32 %v7700_v47, 0.0  ;;  %v7646_v62 = vmul.f32 %v7633_v31, %v7575_v15  ;;  %v11350_v15 = vld [vmem:[%s16927_s26 + $0x60] sm:$0xff] }
 0xe58   : > { %v7703_v29 = vadd.f32 %v7694_v26, %v7647_v5  ;;  %v8501_v26 = vld [vmem:[%s16928_s28 + $0x8] sm:$0xff] }
 0xe59   : > { %v7702_v32 = vadd.f32 %v7689_v16, %v7646_v62  ;;  %12585 = vmatprep.mubr.msk.f32.mxu1 %vm3358_vm12, %v7708_v6  ;;  %12601 = vmatprep.mubr.msk.f32.mxu0 %vm3358_vm12, %v7708_v6  ;;  %v8500_v6 = vld [vmem:[%s16928_s28] sm:$0xff]  ;;  %v11351_v62 = vld [vmem:[%s16927_s26 + $0x68] sm:$0xff]  ;;  %v11352_v16 = vld [vmem:[%s16927_s26 + $0x70] sm:$0xff] }
 0xe5a   : > { %12586 = vmatmul.mubr.msk.f32.gmra.mrb[36].mxu1 %vm3358_vm12, %v7709_v27  ;;  %12602 = vmatmul.mubr.msk.f32.gmra.mrb[56].mxu0 %vm3358_vm12, %v7709_v27  ;;  %v7711_v53 = vmax.f32 %v7703_v29, 0.0  ;;  %v8557_v27 = vld [vmem:[%s16929_s10 + $0x8] sm:$0xff]  ;;  %v8556_v29 = vld [vmem:[%s16929_s10] sm:$0xff] }
 0xe5b   : > { %v7710_v49 = vmax.f32 %v7702_v32, 0.0  ;;  %v11353_v32 = vld [vmem:[%s16927_s26 + $0x78] sm:$0xff] }
 0xe5d   : > { %12588 = vmatprep.mubr.msk.f32.mxu1 %vm3358_vm12, %v7710_v49  ;;  %12604 = vmatprep.mubr.msk.f32.mxu0 %vm3358_vm12, %v7710_v49  ;;  %v7991_v49 = vld [vmem:[%s16927_s26] sm:$0xff] }
 0xe5e   : > { %12589 = vmatmul.mubr.msk.f32.gmra.mrb[38].mxu1 %vm3358_vm12, %v7711_v53  ;;  %12605 = vmatmul.mubr.msk.f32.gmra.mrb[58].mxu0 %vm3358_vm12, %v7711_v53  ;;  %v8503_v53 = vld [vmem:[%s16928_s28 + $0x18] sm:$0xff] }
 0xe5f   : > { %12623 = vmatprep.mubr.msk.f32.mxu1 %vm4989_vm14, %v11346_v12 }
 0xf25   : > { %v12581_v9 = vpop.f32.mrb[32].mxu1  ;;  %v12597_v42 = vpop.f32.mrb[52].mxu0 }
 0xf26   : > { %v7951_v48 = vmax.f32 %v12581_v9, %v12597_v42  ;;  %v7804_v54 = vpop.f32.mrb[33].mxu1  ;;  %v7911_v60 = vpop.f32.mrb[53].mxu0  ;;  %v8502_v9 = vld [vmem:[%s16928_s28 + $0x10] sm:$0xff]  ;;  %v8559_v42 = vld [vmem:[%s16929_s10 + $0x18] sm:$0xff] }
 0xf27   : > { %v7950_v56 = vmax.f32 %v7804_v54, %v7911_v60  ;;  %v8505_v54 = vld [vmem:[%s16928_s28 + $0x28] sm:$0xff]  ;;  %v8504_v60 = vld [vmem:[%s16928_s28 + $0x20] sm:$0xff] }
 0xf28   : > { %7968 = vst.msk [vmem:[#allocation2 + $0x38] sm:$0xff] %vm1200_vm1, %v7951_v48  ;;  %v8558_v48 = vld [vmem:[%s16929_s10 + $0x10] sm:$0xff] }
 0xf29   : > { %7967 = vst.msk [vmem:[#allocation2 + $0x8] sm:$0xff] %vm1200_vm1, %v7950_v56  ;;  %v12584_v8 = vpop.f32.mrb[34].mxu1  ;;  %v12600_v46 = vpop.f32.mrb[54].mxu0  ;;  %v8561_v56 = vld [vmem:[%s16929_s10 + $0x28] sm:$0xff] }
 0xf2a   : > { %v7953_v17 = vmax.f32 %v12584_v8, %v12600_v46  ;;  %v7814_v57 = vpop.f32.mrb[35].mxu1  ;;  %v7921_v38 = vpop.f32.mrb[55].mxu0  ;;  %v8560_v8 = vld [vmem:[%s16929_s10 + $0x20] sm:$0xff]  ;;  %v8507_v46 = vld [vmem:[%s16928_s28 + $0x38] sm:$0xff] }
 0xf2b   : > { %v7952_v50 = vmax.f32 %v7814_v57, %v7921_v38  ;;  %v8563_v57 = vld [vmem:[%s16929_s10 + $0x38] sm:$0xff]  ;;  %v8562_v38 = vld [vmem:[%s16929_s10 + $0x30] sm:$0xff] }
 0xf2c   : > { %7970 = vst.msk [vmem:[#allocation2 + $0x98] sm:$0xff] %vm1200_vm1, %v7953_v17  ;;  %v8506_v17 = vld [vmem:[%s16928_s28 + $0x30] sm:$0xff] }
 0xf2d   : > { %7969 = vst.msk [vmem:[#allocation2 + $0x68] sm:$0xff] %vm1200_vm1, %v7952_v50  ;;  %v12587_v34 = vpop.f32.mrb[36].mxu1  ;;  %v12603_v10 = vpop.f32.mrb[56].mxu0 }
 0xf2e   : > { %v7955_v33 = vmax.f32 %v12587_v34, %v12603_v10  ;;  %v7824_v13 = vpop.f32.mrb[37].mxu1  ;;  %v7931_v22 = vpop.f32.mrb[57].mxu0 }
 0xf2f   : > { %v7954_v52 = vmax.f32 %v7824_v13, %v7931_v22  ;;  %v7978_v40 = vld [vmem:[#allocation2 + $0x38] sm:$0xff] }
 0xf30   : > { %7972 = vst.msk [vmem:[#allocation2 + $0xf8] sm:$0xff] %vm1200_vm1, %v7955_v33  ;;  %v14532_v35 = vpack.i.bf16 %v7978_v40, %v16319_v14  ;;  %v7976_v21 = vld [vmem:[#allocation2 + $0x8] sm:$0xff] }
 0xf31   : > { %7971 = vst.msk [vmem:[#allocation2 + $0xc8] sm:$0xff] %vm1200_vm1, %v7954_v52  ;;  %v12590_v3 = vpop.f32.mrb[38].mxu1  ;;  %v12606_v18 = vpop.f32.mrb[58].mxu0  ;;  %v14537_v11 = vpack.i.bf16 %v7976_v21, %v16321_v25  ;;  %v13692_v28 = vpack.c.bf16 %v7978_v40, %v7976_v21  ;;  %v14572_v47 = vpack.i.bf16 %v7978_v40, %v7976_v21 }
 0xf32   : > { %v7957_v19 = vmax.f32 %v12590_v3, %v12606_v18  ;;  %14533 = vrot.lane.b32.xlu0 %v14532_v35, %s14702_s1  ;;  %v7834_v4 = vpop.f32.mrb[39].mxu1  ;;  %v7941_v24 = vpop.f32.mrb[59].mxu0  ;;  %8866 = vst.msk [vmem:[#allocation2 + $0x38] sm:$0xff] %vm8864_vm6, %v14699_v2  ;;  %8865 = vst.msk [vmem:[#allocation2 + $0x8] sm:$0xff] %vm8864_vm6, %v14699_v2 }
 0xf33   : > { %v7956_v55 = vmax.f32 %v7834_v4, %v7941_v24  ;;  %14538 = vrot.lane.b32.xlu1 %v14537_v11, %s14702_s1  ;;  %13693 = vmatprep.subr.bf16.mxu1 %v13692_v28  ;;  %v7982_v39 = vld [vmem:[#allocation2 + $0x98] sm:$0xff] }
 0xf34   : > { %7974 = vst.msk [vmem:[#allocation2 + $0x158] sm:$0xff] %vm1200_vm1, %v7957_v19  ;;  %13695 = vmatpush3.bf16.msra.mxu1 %v13692_v28  ;;  %v14542_v14 = vpack.i.bf16 %v7982_v39, %v16327_v43  ;;  %v7980_v36 = vld [vmem:[#allocation2 + $0x68] sm:$0xff] }
 0xf35   : > { %7973 = vst.msk [vmem:[#allocation2 + $0x128] sm:$0xff] %vm1200_vm1, %v7956_v55  ;;  %v14547_v25 = vpack.i.bf16 %v7980_v36, %v16330_v44  ;;  %v13696_v20 = vpack.c.bf16 %v7982_v39, %v7980_v36 }
 0xf36   : > { %14543 = vrot.lane.b32.xlu0 %v14542_v14, %s14702_s1  ;;  %8867 = vst.msk [vmem:[#allocation2 + $0x68] sm:$0xff] %vm8864_vm6, %v14699_v2  ;;  %8868 = vst.msk [vmem:[#allocation2 + $0x98] sm:$0xff] %vm8864_vm6, %v14699_v2 }
 0xf37   : > { %14548 = vrot.lane.b32.xlu1 %v14547_v25, %s14702_s1  ;;  %13697 = vmatprep.subr.bf16.mxu1 %v13696_v20  ;;  %v7986_v23 = vld [vmem:[#allocation2 + $0xf8] sm:$0xff] }
 0xf38   : > { %13699 = vmatpush3.bf16.msra.mxu1 %v13696_v20  ;;  %v14552_v31 = vpack.i.bf16 %v7986_v23, %v16337_v0  ;;  %v7984_v61 = vld [vmem:[#allocation2 + $0xc8] sm:$0xff]  ;;  %8870 = vst.msk [vmem:[#allocation2 + $0xf8] sm:$0xff] %vm8864_vm6, %v14699_v2 }
 0xf39   : > { %v14557_v37 = vpack.i.bf16 %v7984_v61, %v16340_v58  ;;  %v13700_v43 = vpack.c.bf16 %v7986_v23, %v7984_v61  ;;  %v14577_v58 = vpack.i.bf16 %v7982_v39, %v7980_v36  ;;  %v14582_v5 = vpack.i.bf16 %v7986_v23, %v7984_v61  ;;  %8869 = vst.msk [vmem:[#allocation2 + $0xc8] sm:$0xff] %vm8864_vm6, %v14699_v2 }
 0xf3a   : > { %14553 = vrot.lane.b32.xlu0 %v14552_v31, %s14702_s1 }
 0xf3b   : > { %14558 = vrot.lane.b32.xlu1 %v14557_v37, %s14702_s1  ;;  %13701 = vmatprep.subr.bf16.mxu1 %v13700_v43  ;;  %v7990_v44 = vld [vmem:[#allocation2 + $0x158] sm:$0xff] }
 0xf3c   : > { %13703 = vmatpush3.bf16.msra.mxu1 %v13700_v43  ;;  %v14567_v1 = vpack.i.bf16 %v7990_v44, %v16345_v51  ;;  %v7988_v7 = vld [vmem:[#allocation2 + $0x128] sm:$0xff]  ;;  %8872 = vst.msk [vmem:[#allocation2 + $0x158] sm:$0xff] %vm8864_vm6, %v14699_v2 }
 0xf3d   : > { %v14562_v30 = vpack.i.bf16 %v7988_v7, %v16348_v63  ;;  %v13704_v0 = vpack.c.bf16 %v7990_v44, %v7988_v7  ;;  %v14587_v51 = vpack.i.bf16 %v7990_v44, %v7988_v7  ;;  %v11349_v63 = vld [vmem:[%s16927_s26 + $0x58] sm:$0xff]  ;;  %8871 = vst.msk [vmem:[#allocation2 + $0x128] sm:$0xff] %vm8864_vm6, %v14699_v2 }
 0xf3e   : > { %14568 = vrot.lane.b32.xlu0 %v14567_v1, %s14702_s1 }
 0xf3f   : > { %14563 = vrot.lane.b32.xlu1 %v14562_v30, %s14702_s1  ;;  %13705 = vmatprep.subr.bf16.mxu1 %v13704_v0 }
 0xf40   : > { %13707 = vmatpush3.bf16.msra.mxu1 %v13704_v0 }
 0xf42   : > { %14578 = vrot.lane.b32.xlu0 %v14577_v58, %s16881_s2 }
 0xf43   : > { %14573 = vrot.lane.b32.xlu1 %v14572_v47, %s16881_s2  ;;  %12624 = vmatmul.mubr.msk.f32.vlgmr.msra.gmra.mrb[40].mxu1 %vm4989_vm14, %v11347_v41 }
 0xf44   : > { %12626 = vmatprep.mubr.msk.f32.mxu1 %vm4989_vm14, %v11348_v59 }
 0xf46   : > { %14588 = vrot.lane.b32.xlu0 %v14587_v51, %s16881_s2 }
 0xf47   : > { %14583 = vrot.lane.b32.xlu1 %v14582_v5, %s16881_s2  ;;  %12627 = vmatmul.mubr.msk.f32.gmra.mrb[42].mxu1 %vm4989_vm14, %v11349_v63  ;;  %s16931_s2 = sld [smem:[#allocation17_spill]] }
 0xf48   : > { %12629 = vmatprep.mubr.msk.f32.mxu1 %vm4989_vm14, %v11350_v15 }
 0xf4a   : > { %8515 = vperm.xlu0 %14250, %v8501_v26  }
 0xf4b   : > { %8510 = vperm.xlu1 %14251, %v8500_v6   ;;  %12630 = vmatmul.mubr.msk.f32.gmra.mrb[44].mxu1 %vm4989_vm14, %v11351_v62  ;;  %v7992_v6 = vld [vmem:[%s16927_s26 + $0x8] sm:$0xff] }
 0xf4c   : > { %12632 = vmatprep.mubr.msk.f32.mxu1 %vm4989_vm14, %v11352_v16  ;;  %v7993_v16 = vld [vmem:[%s16927_s26 + $0x10] sm:$0xff] }
 0xf4e   : > { %8571 = vperm.xlu0 %14250, %v8557_v27  }
 0xf4f   : > { %8566 = vperm.xlu1 %14251, %v8556_v29   ;;  %12633 = vmatmul.mubr.msk.f32.gmra.mrb[46].mxu1 %vm4989_vm14, %v11353_v32 }
 0xf50   : > { %12651 = vmatprep.mubr.msk.f32.mxu1 %vm4989_vm14, %v7991_v49 }
 0xf52   : > { %8525 = vperm.xlu0 %14250, %v8503_v53   ;;  %v7994_v53 = vld [vmem:[%s16927_s26 + $0x18] sm:$0xff] }
 0xf53   : > { %8520 = vperm.xlu1 %14251, %v8502_v9   ;;  %v7995_v9 = vld [vmem:[%s16927_s26 + $0x20] sm:$0xff] }
 0xf56   : > { %8581 = vperm.xlu0 %14250, %v8559_v42  }
 0xf57   : > { %8576 = vperm.xlu1 %14251, %v8558_v48  }
 0xf5a   : > { %8535 = vperm.xlu0 %14250, %v8505_v54  }
 0xf5b   : > { %8530 = vperm.xlu1 %14251, %v8504_v60   ;;  %v7996_v60 = vld [vmem:[%s16927_s26 + $0x28] sm:$0xff] }
 0xf5e   : > { %8591 = vperm.xlu0 %14250, %v8561_v56   ;;  %v7997_v56 = vld [vmem:[%s16927_s26 + $0x30] sm:$0xff] }
 0xf5f   : > { %8586 = vperm.xlu1 %14251, %v8560_v8  }
 0xf62   : > { %8545 = vperm.xlu0 %14250, %v8507_v46   ;;  %v7998_v46 = vld [vmem:[%s16927_s26 + $0x38] sm:$0xff] }
 0xf63   : > { %8540 = vperm.xlu1 %14251, %v8506_v17   ;;  %v11370_v17 = vld [vmem:[%s16927_s26 + $0x80] sm:$0xff] }
 0xf66   : > { %8601 = vperm.xlu0 %14250, %v8563_v57   ;;  %v11371_v57 = vld [vmem:[%s16927_s26 + $0x88] sm:$0xff] }
 0xf67   : > { %8596 = vperm.xlu1 %14251, %v8562_v38   ;;  %v11372_v38 = vld [vmem:[%s16927_s26 + $0x90] sm:$0xff] }
 0xfa4   : > { %v14534_v12 = vpop.permute.xlu0 %14533 }
 0xfa5   : > { %v14536_v50 = vunpack.i.h.bf16 %v14534_v12  ;;  %v14535_v34 = vunpack.i.l.bf16 %v14534_v12  ;;  %v14539_v10 = vpop.permute.xlu1 %14538  ;;  %v11373_v12 = vld [vmem:[%s16927_s26 + $0x98] sm:$0xff] }
 0xfa6   : > { %v14541_v33 = vunpack.i.h.bf16 %v14539_v10  ;;  %v14540_v13 = vunpack.i.l.bf16 %v14539_v10  ;;  %v11376_v10 = vld [vmem:[%s16927_s26 + $0xb0] sm:$0xff] }
 0xfa7   : > { %v8186_v22 = vsel %vm1669_vm7, %v14535_v34, %v14536_v50  ;;  %v11374_v50 = vld [vmem:[%s16927_s26 + $0xa0] sm:$0xff]  ;;  %v11375_v34 = vld [vmem:[%s16927_s26 + $0xa8] sm:$0xff] }
 0xfa8   : > { %v14544_v52 = vpop.permute.xlu0 %14543  ;;  %v8185_v40 = vsel %vm1669_vm7, %v14540_v13, %v14541_v33  ;;  %v11377_v33 = vld [vmem:[%s16927_s26 + $0xb8] sm:$0xff] }
 0xfa9   : > { %v14546_v35 = vunpack.i.h.bf16 %v14544_v52  ;;  %v14545_v21 = vunpack.i.l.bf16 %v14544_v52  ;;  %v14549_v3 = vpop.permute.xlu1 %14548  ;;  %v13708_v18 = vpack.c.bf16 %v8186_v22, %v8185_v40 }
 0xfaa   : > { %v14551_v11 = vunpack.i.h.bf16 %v14549_v3  ;;  %v14550_v28 = vunpack.i.l.bf16 %v14549_v3 }
 0xfab   : > { %13709 = vmatprep.subr.bf16.mxu1 %v13708_v18  ;;  %v8188_v19 = vsel %vm1669_vm7, %v14545_v21, %v14546_v35 }
 0xfac   : > { %v14554_v4 = vpop.permute.xlu0 %14553  ;;  %13711 = vmatpush3.bf16.msra.mxu1 %v13708_v18  ;;  %v8187_v24 = vsel %vm1669_vm7, %v14550_v28, %v14551_v11 }
 0xfad   : > { %v14556_v55 = vunpack.i.h.bf16 %v14554_v4  ;;  %v14555_v39 = vunpack.i.l.bf16 %v14554_v4  ;;  %v14559_v14 = vpop.permute.xlu1 %14558  ;;  %v13712_v36 = vpack.c.bf16 %v8188_v19, %v8187_v24 }
 0xfae   : > { %v14561_v25 = vunpack.i.h.bf16 %v14559_v14  ;;  %v14560_v20 = vunpack.i.l.bf16 %v14559_v14 }
 0xfaf   : > { %13713 = vmatprep.subr.bf16.mxu1 %v13712_v36  ;;  %v8190_v23 = vsel %vm1669_vm7, %v14555_v39, %v14556_v55 }
 0xfb0   : > { %v14569_v31 = vpop.permute.xlu0 %14568  ;;  %13715 = vmatpush3.bf16.msra.mxu1 %v13712_v36  ;;  %v8189_v61 = vsel %vm1669_vm7, %v14560_v20, %v14561_v25 }
 0xfb1   : > { %v14571_v37 = vunpack.i.h.bf16 %v14569_v31  ;;  %v14570_v43 = vunpack.i.l.bf16 %v14569_v31  ;;  %v14564_v44 = vpop.permute.xlu1 %14563  ;;  %v13716_v1 = vpack.c.bf16 %v8190_v23, %v8189_v61 }
 0xfb2   : > { %v14566_v7 = vunpack.i.h.bf16 %v14564_v44  ;;  %v14565_v30 = vunpack.i.l.bf16 %v14564_v44 }
 0xfb3   : > { %13717 = vmatprep.subr.bf16.mxu1 %v13716_v1  ;;  %v8192_v0 = vsel %vm1669_vm7, %v14570_v43, %v14571_v37 }
 0xfb4   : > { %v14579_v58 = vpop.permute.xlu0 %14578  ;;  %13719 = vmatpush3.bf16.msra.mxu1 %v13716_v1  ;;  %v8191_v41 = vsel %vm1669_vm7, %v14565_v30, %v14566_v7 }
 0xfb5   : > { %v14574_v47 = vpop.permute.xlu1 %14573  ;;  %v13720_v59 = vpack.c.bf16 %v8192_v0, %v8191_v41  ;;  %v14581_v5 = vunpack.i.h.bf16 %v14579_v58  ;;  %v14580_v15 = vunpack.i.l.bf16 %v14579_v58 }
 0xfb6   : > { %v14576_v51 = vunpack.i.h.bf16 %v14574_v47  ;;  %v14575_v63 = vunpack.i.l.bf16 %v14574_v47 }
 0xfb7   : > { %13721 = vmatprep.subr.bf16.mxu1 %v13720_v59  ;;  %v13728_v27 = vpack.c.bf16 %v14581_v5, %v14580_v15 }
 0xfb8   : > { %v13724_v26 = vpack.c.bf16 %v14576_v51, %v14575_v63  ;;  %13723 = vmatpush3.bf16.msra.mxu1 %v13720_v59  ;;  %v14589_v49 = vpop.permute.xlu0 %14588 }
 0xfb9   : > { %v14584_v62 = vpop.permute.xlu1 %14583  ;;  %v14591_v42 = vunpack.i.h.bf16 %v14589_v49  ;;  %v14590_v48 = vunpack.i.l.bf16 %v14589_v49 }
 0xfba   : > { %13725 = vmatprep.subr.bf16.mxu1 %v13724_v26  ;;  %v14586_v29 = vunpack.i.h.bf16 %v14584_v62  ;;  %v14585_v32 = vunpack.i.l.bf16 %v14584_v62 }
 0xfbb   : > { %12652 = vmatmul.mubr.msk.f32.vlgmr.msra.gmra.mrb[40].mxu1 %vm4989_vm14, %v7992_v6  ;;  %v13736_v8 = vpack.c.bf16 %v14591_v42, %v14590_v48 }
 0xfbc   : > { %13727 = vmatpush3.bf16.msra.mxu1 %v13724_v26  ;;  %12654 = vmatprep.mubr.msk.f32.mxu1 %vm4989_vm14, %v7993_v16  ;;  %v13732_v54 = vpack.c.bf16 %v14586_v29, %v14585_v32 }
 0xfbd   : > { %13729 = vmatprep.subr.bf16.mxu1 %v13728_v27 }
 0xfbf   : > { %12655 = vmatmul.mubr.msk.f32.gmra.mrb[42].mxu1 %vm4989_vm14, %v7994_v53 }
 0xfc0   : > { %13731 = vmatpush3.bf16.msra.mxu1 %v13728_v27  ;;  %12657 = vmatprep.mubr.msk.f32.mxu1 %vm4989_vm14, %v7995_v9 }
 0xfc1   : > { %13733 = vmatprep.subr.bf16.mxu1 %v13732_v54 }
 0xfc3   : > { %12658 = vmatmul.mubr.msk.f32.gmra.mrb[44].mxu1 %vm4989_vm14, %v7996_v60 }
 0xfc4   : > { %13735 = vmatpush3.bf16.msra.mxu1 %v13732_v54  ;;  %12660 = vmatprep.mubr.msk.f32.mxu1 %vm4989_vm14, %v7997_v56 }
 0xfc5   : > { %13737 = vmatprep.subr.bf16.mxu1 %v13736_v8 }
 0xfc7   : > { %12661 = vmatmul.mubr.msk.f32.gmra.mrb[46].mxu1 %vm4989_vm14, %v7998_v46 }
 0xfc8   : > { %13739 = vmatpush3.bf16.msra.mxu1 %v13736_v8  ;;  %12679 = vmatprep.mubr.msk.f32.mxu1 %vm4989_vm14, %v11370_v17 }
 0xfc9   : > { %v8516_v13 = vpop.permute.xlu0 %8515 }
 0xfca   : > { %v8511_v22 = vpop.permute.xlu1 %8510 }
 0xfcb   : > { %12680 = vmatmul.mubr.msk.f32.vlgmr.msra.gmra.mrb[40].mxu1 %vm4989_vm14, %v11371_v57 }
 0xfcc   : > { %12682 = vmatprep.mubr.msk.f32.mxu1 %vm4989_vm14, %v11372_v38 }
 0xfcd   : > { %v8572_v52 = vpop.permute.xlu0 %8571 }
 0xfce   : > { %v8567_v40 = vpop.permute.xlu1 %8566 }
 0xfcf   : > { %12683 = vmatmul.mubr.msk.f32.gmra.mrb[42].mxu1 %vm4989_vm14, %v11373_v12 }
 0xfd0   : > { %12685 = vmatprep.mubr.msk.f32.mxu1 %vm4989_vm14, %v11374_v50 }
 0xfd1   : > { %v8526_v35 = vpop.permute.xlu0 %8525 }
 0xfd2   : > { %v8521_v21 = vpop.permute.xlu1 %8520 }
 0xfd3   : > { %12686 = vmatmul.mubr.msk.f32.gmra.mrb[44].mxu1 %vm4989_vm14, %v11375_v34 }
 0xfd4   : > { %12688 = vmatprep.mubr.msk.f32.mxu1 %vm4989_vm14, %v11376_v10 }
 0xfd5   : > { %v8582_v3 = vpop.permute.xlu0 %8581 }
 0xfd6   : > { %v8577_v18 = vpop.permute.xlu1 %8576 }
 0xfd7   : > { %12689 = vmatmul.mubr.msk.f32.gmra.mrb[46].mxu1 %vm4989_vm14, %v11377_v33 }
 0xfd9   : > { %v8536_v11 = vpop.permute.xlu0 %8535 }
 0xfda   : > { %v8531_v28 = vpop.permute.xlu1 %8530 }
 0xfdd   : > { %v8592_v55 = vpop.permute.xlu0 %8591 }
 0xfde   : > { %v8587_v14 = vpop.permute.xlu1 %8586 }
 0xfe1   : > { %v8546_v1 = vpop.permute.xlu0 %8545 }
 0xfe2   : > { %v8541_v0 = vpop.permute.xlu1 %8540 }
 0xfe5   : > { %v8602_v62 = vpop.permute.xlu0 %8601 }
 0xfe6   : > { %v8597_v29 = vpop.permute.xlu1 %8596 }
0x109e   : > { %v12681_v19 = vpop.f32.mrb[40].mxu1 }
0x109f   : > { %v8549_v4 = vmul.f32 %v12681_v19, %v8516_v13  ;;  %v8453_v24 = vpop.f32.mrb[41].mxu1  ;;  %v11402_v13 = vld [vmem:[%s16930_s7 + $0x40] sm:$0xff] }
0x10a0   : > { %v8548_v39 = vmul.f32 %v8511_v22, %v8453_v24 }
0x10a1   : > { %v8605_v36 = vadd.f32 %v8572_v52, %v8549_v4 }
0x10a2   : > { %v8604_v25 = vadd.f32 %v8567_v40, %v8548_v39  ;;  %v12684_v20 = vpop.f32.mrb[42].mxu1  ;;  %v8884_v40 = vld [vmem:[#allocation2 + $0x30] sm:$0xff] }
0x10a3   : > { %v8551_v23 = vmul.f32 %v12684_v20, %v8526_v35  ;;  %v8463_v31 = vpop.f32.mrb[43].mxu1  ;;  %v8613_v43 = vmax.f32 %v8605_v36, 0.0  ;;  %v8888_v39 = vld [vmem:[#allocation2 + $0x90] sm:$0xff] }
0x10a4   : > { %v8612_v61 = vmax.f32 %v8604_v25, 0.0  ;;  %v8550_v37 = vmul.f32 %v8521_v21, %v8463_v31  ;;  %v8886_v25 = vld [vmem:[#allocation2 + $0x60] sm:$0xff] }
0x10a5   : > { %v8607_v44 = vadd.f32 %v8582_v3, %v8551_v23  ;;  %v8882_v3 = vld [vmem:[#allocation2] sm:$0xff] }
0x10a6   : > { %v8606_v7 = vadd.f32 %v8577_v18, %v8550_v37  ;;  %v12687_v30 = vpop.f32.mrb[44].mxu1  ;;  %12693 = vmatprep.mubr.msk.f32.mxu0 %vm1200_vm1, %v8612_v61 }
0x10a7   : > { %v8553_v58 = vmul.f32 %v12687_v30, %v8536_v11  ;;  %v8473_v41 = vpop.f32.mrb[45].mxu1  ;;  %12694 = vmatmul.mubr.msk.f32.vlgmr.msra.gmra.mrb[60].mxu0 %vm1200_vm1, %v8613_v43  ;;  %v8615_v51 = vmax.f32 %v8607_v44, 0.0  ;;  %v8892_v44 = vld [vmem:[#allocation2 + $0xf0] sm:$0xff] }
0x10a8   : > { %v8614_v47 = vmax.f32 %v8606_v7, 0.0  ;;  %v8552_v59 = vmul.f32 %v8531_v28, %v8473_v41  ;;  %12706 = vmatpush3.msra.mxu0 %v16415_v45 }
0x10a9   : > { %v8609_v63 = vadd.f32 %v8592_v55, %v8553_v58 }
0x10aa   : > { %v8608_v5 = vadd.f32 %v8587_v14, %v8552_v59  ;;  %v12690_v15 = vpop.f32.mrb[46].mxu1  ;;  %12696 = vmatprep.mubr.msk.f32.mxu0 %vm1200_vm1, %v8614_v47  ;;  %v8894_v59 = vld [vmem:[#allocation2 + $0x120] sm:$0xff] }
0x10ab   : > { %v8555_v26 = vmul.f32 %v12690_v15, %v8546_v1  ;;  %v8483_v6 = vpop.f32.mrb[47].mxu1  ;;  %12697 = vmatmul.mubr.msk.f32.gmra.mrb[62].mxu0 %vm1200_vm1, %v8615_v51  ;;  %v8617_v32 = vmax.f32 %v8609_v63, 0.0  ;;  %v8890_v1 = vld [vmem:[#allocation2 + $0xc0] sm:$0xff] }
0x10ac   : > { %v8616_v16 = vmax.f32 %v8608_v5, 0.0  ;;  %v8554_v27 = vmul.f32 %v8541_v0, %v8483_v6 }
0x10ad   : > { %v8611_v49 = vadd.f32 %v8602_v62, %v8555_v26  ;;  %v11403_v62 = vld [vmem:[%s16930_s7 + $0x48] sm:$0xff] }
0x10ae   : > { %v8610_v53 = vadd.f32 %v8597_v29, %v8554_v27  ;;  %12699 = vmatprep.mubr.msk.f32.mxu0 %vm1200_vm1, %v8616_v16  ;;  %v11404_v27 = vld [vmem:[%s16930_s7 + $0x50] sm:$0xff] }
0x10af   : > { %12700 = vmatmul.mubr.msk.f32.gmra.mrb[64].mxu0 %vm1200_vm1, %v8617_v32  ;;  %v8619_v9 = vmax.f32 %v8611_v49, 0.0 }
0x10b0   : > { %v8618_v45 = vmax.f32 %v8610_v53, 0.0  ;;  %v11406_v53 = vld [vmem:[%s16930_s7 + $0x60] sm:$0xff] }
0x10b2   : > { %12702 = vmatprep.mubr.msk.f32.mxu0 %vm1200_vm1, %v8618_v45 }
0x10b3   : > { %12703 = vmatmul.mubr.msk.f32.gmra.mrb[66].mxu0 %vm1200_vm1, %v8619_v9 }
0x10b4   : > { %12707 = vmatprep.mubr.msk.f32.mxu0 %vm1200_vm1, %v8612_v61 }
0x10b7   : > { %12708 = vmatmul.mubr.msk.f32.vlgmr.msra.gmra.mrb[68].mxu0 %vm1200_vm1, %v8613_v43 }
0x10b8   : > { %12710 = vmatprep.mubr.msk.f32.mxu0 %vm1200_vm1, %v8614_v47  ;;  %v8896_v47 = vld [vmem:[#allocation2 + $0x150] sm:$0xff] }
0x10bb   : > { %12711 = vmatmul.mubr.msk.f32.gmra.mrb[70].mxu0 %vm1200_vm1, %v8615_v51 }
0x10bc   : > { %12713 = vmatprep.mubr.msk.f32.mxu0 %vm1200_vm1, %v8616_v16 }
0x10bf   : > { %12714 = vmatmul.mubr.msk.f32.gmra.mrb[72].mxu0 %vm1200_vm1, %v8617_v32  ;;  %v11405_v32 = vld [vmem:[%s16930_s7 + $0x58] sm:$0xff] }
0x10c0   : > { %12716 = vmatprep.mubr.msk.f32.mxu0 %vm1200_vm1, %v8618_v45  ;;  %v9408_v45 = vld [vmem:[%s16931_s2 + $0x8] sm:$0xff] }
0x10c3   : > { %12717 = vmatmul.mubr.msk.f32.gmra.mrb[74].mxu0 %vm1200_vm1, %v8619_v9  ;;  %vm8873_vm1 = vcmask 31744   ;;  %v9407_v9 = vld [vmem:[%s16931_s2] sm:$0xff] }
0x10c4   : > { %12735 = vmatprep.mubr.msk.f32.mxu0 %vm4989_vm14, %v11402_v13  ;;  %v9413_v13 = vld [vmem:[%s16931_s2 + $0x30] sm:$0xff] }
0x117a   : > { %v12695_v42 = vpop.f32.mrb[60].mxu0 }
0x117b   : > { %v8711_v48 = vpop.f32.mrb[61].mxu0 }
0x117e   : > { %v12698_v54 = vpop.f32.mrb[62].mxu0 }
0x117f   : > { %v8721_v60 = vpop.f32.mrb[63].mxu0 }
0x1182   : > { %v12701_v56 = vpop.f32.mrb[64].mxu0 }
0x1183   : > { %v8731_v8 = vpop.f32.mrb[65].mxu0 }
0x1186   : > { %v12704_v46 = vpop.f32.mrb[66].mxu0 }
0x1187   : > { %v8741_v17 = vpop.f32.mrb[67].mxu0 }
0x118a   : > { %v12709_v57 = vpop.f32.mrb[68].mxu0 }
0x118b   : > { %v8857_v38 = vmax.f32 %v12695_v42, %v12709_v57  ;;  %v8817_v12 = vpop.f32.mrb[69].mxu0  ;;  %v11407_v42 = vld [vmem:[%s16930_s7 + $0x68] sm:$0xff]  ;;  %v9466_v57 = vld [vmem:[%s16933_s3 + $0x18] sm:$0xff] }
0x118c   : > { %v8856_v50 = vmax.f32 %v8711_v48, %v8817_v12  ;;  %v11408_v48 = vld [vmem:[%s16930_s7 + $0x70] sm:$0xff]  ;;  %v9412_v12 = vld [vmem:[%s16931_s2 + $0x28] sm:$0xff] }
0x118d   : > { %8875 = vst.msk [vmem:[#allocation2 + $0x38] sm:$0xff] %vm8873_vm1, %v8857_v38  ;;  %v9465_v38 = vld [vmem:[%s16933_s3 + $0x10] sm:$0xff] }
0x118e   : > { %8874 = vst.msk [vmem:[#allocation2 + $0x8] sm:$0xff] %vm8873_vm1, %v8856_v50  ;;  %v12712_v34 = vpop.f32.mrb[70].mxu0  ;;  %v9411_v50 = vld [vmem:[%s16931_s2 + $0x20] sm:$0xff] }
0x118f   : > { %v8859_v10 = vmax.f32 %v12698_v54, %v12712_v34  ;;  %v8827_v33 = vpop.f32.mrb[71].mxu0  ;;  %v9464_v54 = vld [vmem:[%s16933_s3 + $0x8] sm:$0xff] }
0x1190   : > { %v8858_v22 = vmax.f32 %v8721_v60, %v8827_v33  ;;  %v9463_v60 = vld [vmem:[%s16933_s3] sm:$0xff]  ;;  %v9468_v34 = vld [vmem:[%s16933_s3 + $0x28] sm:$0xff]  ;;  %v9414_v33 = vld [vmem:[%s16931_s2 + $0x38] sm:$0xff] }
0x1191   : > { %8877 = vst.msk [vmem:[#allocation2 + $0x98] sm:$0xff] %vm8873_vm1, %v8859_v10  ;;  %v9467_v10 = vld [vmem:[%s16933_s3 + $0x20] sm:$0xff] }
0x1192   : > { %8876 = vst.msk [vmem:[#allocation2 + $0x68] sm:$0xff] %vm8873_vm1, %v8858_v22  ;;  %v12715_v52 = vpop.f32.mrb[72].mxu0  ;;  %v9470_v22 = vld [vmem:[%s16933_s3 + $0x38] sm:$0xff] }
0x1193   : > { %v8861_v35 = vmax.f32 %v12701_v56, %v12715_v52  ;;  %v8837_v21 = vpop.f32.mrb[73].mxu0  ;;  %v11409_v56 = vld [vmem:[%s16930_s7 + $0x78] sm:$0xff]  ;;  %v9469_v52 = vld [vmem:[%s16933_s3 + $0x30] sm:$0xff]  ;;  %s16940_s3 = sld [smem:[#allocation24_spill]] }
0x1194   : > { %v8860_v18 = vmax.f32 %v8731_v8, %v8837_v21  ;;  %v8885_v11 = vld [vmem:[#allocation2 + $0x38] sm:$0xff]  ;;  %v8898_v8 = vld [vmem:[%s16930_s7] sm:$0xff] }
0x1195   : > { %8879 = vst.msk [vmem:[#allocation2 + $0xf8] sm:$0xff] %vm8873_vm1, %v8861_v35  ;;  %v14592_v28 = vpack.i.bf16 %v8885_v11, %v8884_v40  ;;  %v8883_v19 = vld [vmem:[#allocation2 + $0x8] sm:$0xff] }
0x1196   : > { %8878 = vst.msk [vmem:[#allocation2 + $0xc8] sm:$0xff] %vm8873_vm1, %v8860_v18  ;;  %v12718_v4 = vpop.f32.mrb[74].mxu0  ;;  %v14597_v24 = vpack.i.bf16 %v8883_v19, %v8882_v3  ;;  %v13740_v55 = vpack.c.bf16 %v8885_v11, %v8883_v19  ;;  %v14632_v16 = vpack.i.bf16 %v8885_v11, %v8883_v19 }
0x1197   : > { %v8863_v14 = vmax.f32 %v12704_v46, %v12718_v4  ;;  %14593 = vrot.lane.b32.xlu0 %v14592_v28, %s14702_s1  ;;  %v8847_v36 = vpop.f32.mrb[75].mxu0  ;;  %v9410_v46 = vld [vmem:[%s16931_s2 + $0x18] sm:$0xff] }
0x1198   : > { %v8862_v20 = vmax.f32 %v8741_v17, %v8847_v36  ;;  %14598 = vrot.lane.b32.xlu1 %v14597_v24, %s14702_s1  ;;  %13741 = vmatprep.subr.bf16.mxu0 %v13740_v55  ;;  %v8889_v23 = vld [vmem:[#allocation2 + $0x98] sm:$0xff]  ;;  %v9409_v17 = vld [vmem:[%s16931_s2 + $0x10] sm:$0xff]  ;;  %s16939_s2 = sld [smem:[#allocation23_spill]] }
0x1199   : > { %8881 = vst.msk [vmem:[#allocation2 + $0x158] sm:$0xff] %vm8873_vm1, %v8863_v14  ;;  %13743 = vmatpush3.bf16.msra.mxu0 %v13740_v55  ;;  %v14602_v31 = vpack.i.bf16 %v8889_v23, %v8888_v39  ;;  %v8887_v61 = vld [vmem:[#allocation2 + $0x68] sm:$0xff] }
0x119a   : > { %8880 = vst.msk [vmem:[#allocation2 + $0x128] sm:$0xff] %vm8873_vm1, %v8862_v20  ;;  %v14607_v37 = vpack.i.bf16 %v8887_v61, %v8886_v25  ;;  %v13744_v43 = vpack.c.bf16 %v8889_v23, %v8887_v61  ;;  %v14637_v6 = vpack.i.bf16 %v8889_v23, %v8887_v61 }
0x119b   : > { %14603 = vrot.lane.b32.xlu0 %v14602_v31, %s14702_s1 }
0x119c   : > { %14608 = vrot.lane.b32.xlu1 %v14607_v37, %s14702_s1  ;;  %13745 = vmatprep.subr.bf16.mxu0 %v13744_v43  ;;  %v8893_v7 = vld [vmem:[#allocation2 + $0xf8] sm:$0xff] }
0x119d   : > { %13747 = vmatpush3.bf16.msra.mxu0 %v13744_v43  ;;  %v14612_v30 = vpack.i.bf16 %v8893_v7, %v8892_v44  ;;  %v8891_v0 = vld [vmem:[#allocation2 + $0xc8] sm:$0xff] }
0x119e   : > { %v14617_v58 = vpack.i.bf16 %v8891_v0, %v8890_v1  ;;  %v13748_v41 = vpack.c.bf16 %v8893_v7, %v8891_v0  ;;  %v14642_v49 = vpack.i.bf16 %v8893_v7, %v8891_v0 }
0x119f   : > { %14613 = vrot.lane.b32.xlu0 %v14612_v30, %s14702_s1 }
0x11a0   : > { %14618 = vrot.lane.b32.xlu1 %v14617_v58, %s14702_s1  ;;  %13749 = vmatprep.subr.bf16.mxu0 %v13748_v41  ;;  %v8897_v51 = vld [vmem:[#allocation2 + $0x158] sm:$0xff] }
0x11a1   : > { %13751 = vmatpush3.bf16.msra.mxu0 %v13748_v41  ;;  %v14627_v63 = vpack.i.bf16 %v8897_v51, %v8896_v47  ;;  %v8895_v5 = vld [vmem:[#allocation2 + $0x128] sm:$0xff] }
0x11a2   : > { %v14622_v15 = vpack.i.bf16 %v8895_v5, %v8894_v59  ;;  %v13752_v26 = vpack.c.bf16 %v8897_v51, %v8895_v5  ;;  %v14647_v29 = vpack.i.bf16 %v8897_v51, %v8895_v5 }
0x11a3   : > { %14628 = vrot.lane.b32.xlu0 %v14627_v63, %s14702_s1 }
0x11a4   : > { %14623 = vrot.lane.b32.xlu1 %v14622_v15, %s14702_s1  ;;  %13753 = vmatprep.subr.bf16.mxu0 %v13752_v26  ;;  %s16934_s1 = sld [smem:[#allocation20_spill]] }
0x11a5   : > { %13755 = vmatpush3.bf16.msra.mxu0 %v13752_v26 }
0x11a7   : > { %14638 = vrot.lane.b32.xlu0 %v14637_v6, %s16932_s0 }
0x11a8   : > { %14633 = vrot.lane.b32.xlu1 %v14632_v16, %s16932_s0  ;;  %12736 = vmatmul.mubr.msk.f32.vlgmr.msra.gmra.mrb[76].mxu0 %vm4989_vm14, %v11403_v62 }
0x11a9   : > { %12738 = vmatprep.mubr.msk.f32.mxu0 %vm4989_vm14, %v11404_v27  ;;  %v9527_v27 = vld [vmem:[%s14723_s9] sm:$0xf] }
0x11aa   : > { %v9987_v40 = vld [vmem:[%s16934_s1 + $0x8] sm:$0xff]  ;;  %v9986_v35 = vld [vmem:[%s16934_s1] sm:$0xff]  ;;  %v9989_v18 = vld [vmem:[%s16934_s1 + $0x18] sm:$0xff]  ;;  %12803 = vmatprep.subr.msk.mxu1 %vm1282_vm3, %v9527_v27 }
0x11ab   : > { %14648 = vrot.lane.b32.xlu0 %v14647_v29, %s16932_s0  ;;  %v9988_v11 = vld [vmem:[%s16934_s1 + $0x10] sm:$0xff]  ;;  %v9991_v4 = vld [vmem:[%s16934_s1 + $0x28] sm:$0xff]  ;;  %v9990_v24 = vld [vmem:[%s16934_s1 + $0x20] sm:$0xff]  ;;  %12804 = vmatpush3.msk.msra.mxu1 %vm1282_vm3, %v9527_v27 }
0x11ac   : > { %14643 = vrot.lane.b32.xlu1 %v14642_v49, %s16932_s0  ;;  %12739 = vmatmul.mubr.msk.f32.gmra.mrb[78].mxu0 %vm4989_vm14, %v11405_v32  ;;  %s16935_s0 = sld [smem:[#allocation21_spill]]  ;;  %v9993_v14 = vld [vmem:[%s16934_s1 + $0x38] sm:$0xff]  ;;  %v9992_v36 = vld [vmem:[%s16934_s1 + $0x30] sm:$0xff]  ;;  %v9995_v23 = vld [vmem:[%s16934_s1 + $0x48] sm:$0xff] }
0x11ad   : > { %12741 = vmatprep.mubr.msk.f32.mxu0 %vm4989_vm14, %v11406_v53  ;;  %v9994_v31 = vld [vmem:[%s16934_s1 + $0x40] sm:$0xff]  ;;  %v9997_v43 = vld [vmem:[%s16934_s1 + $0x58] sm:$0xff]  ;;  %v9996_v44 = vld [vmem:[%s16934_s1 + $0x50] sm:$0xff] }
0x11ae   : > { %v9999_v30 = vld [vmem:[%s16934_s1 + $0x68] sm:$0xff]  ;;  %v9998_v0 = vld [vmem:[%s16934_s1 + $0x60] sm:$0xff]  ;;  %v10001_v47 = vld [vmem:[%s16934_s1 + $0x78] sm:$0xff] }
0x11af   : > { %9422 = vperm.xlu0 %14250, %v9408_v45   ;;  %v10000_v59 = vld [vmem:[%s16934_s1 + $0x70] sm:$0xff]  ;;  %s16938_s1 = sld [smem:[#allocation25_spill]] }
0x11b0   : > { %9417 = vperm.xlu1 %14251, %v9407_v9   ;;  %12742 = vmatmul.mubr.msk.f32.gmra.mrb[80].mxu0 %vm4989_vm14, %v11407_v42 }
0x11b1   : > { %12744 = vmatprep.mubr.msk.f32.mxu0 %vm4989_vm14, %v11408_v48 }
0x11b2   : > { %v10099_v21 = vld [vmem:[%s16935_s0 + $0x8] sm:$0xff]  ;;  %v10098_v3 = vld [vmem:[%s16935_s0] sm:$0xff]  ;;  %v10101_v28 = vld [vmem:[%s16935_s0 + $0x18] sm:$0xff] }
0x11b3   : > { %9478 = vperm.xlu0 %14250, %v9464_v54   ;;  %v10100_v19 = vld [vmem:[%s16935_s0 + $0x10] sm:$0xff]  ;;  %v10103_v55 = vld [vmem:[%s16935_s0 + $0x28] sm:$0xff]  ;;  %v10102_v39 = vld [vmem:[%s16935_s0 + $0x20] sm:$0xff] }
0x11b4   : > { %9473 = vperm.xlu1 %14251, %v9463_v60   ;;  %12745 = vmatmul.mubr.msk.f32.gmra.mrb[82].mxu0 %vm4989_vm14, %v11409_v56  ;;  %v10105_v25 = vld [vmem:[%s16935_s0 + $0x38] sm:$0xff]  ;;  %v10104_v20 = vld [vmem:[%s16935_s0 + $0x30] sm:$0xff]  ;;  %v10107_v61 = vld [vmem:[%s16935_s0 + $0x48] sm:$0xff] }
0x11b5   : > { %12763 = vmatprep.mubr.msk.f32.mxu0 %vm4989_vm14, %v8898_v8  ;;  %v10106_v37 = vld [vmem:[%s16935_s0 + $0x40] sm:$0xff]  ;;  %v10109_v1 = vld [vmem:[%s16935_s0 + $0x58] sm:$0xff]  ;;  %v10108_v7 = vld [vmem:[%s16935_s0 + $0x50] sm:$0xff] }
0x11b6   : > { %v10111_v58 = vld [vmem:[%s16935_s0 + $0x68] sm:$0xff]  ;;  %v10110_v41 = vld [vmem:[%s16935_s0 + $0x60] sm:$0xff]  ;;  %v10113_v51 = vld [vmem:[%s16935_s0 + $0x78] sm:$0xff] }
0x11b7   : > { %9432 = vperm.xlu0 %14250, %v9410_v46   ;;  %v10112_v5 = vld [vmem:[%s16935_s0 + $0x70] sm:$0xff]  ;;  %s16936_s0 = sld [smem:[#allocation19_spill]] }
0x11b8   : > { %9427 = vperm.xlu1 %14251, %v9409_v17  }
0x11bb   : > { %9488 = vperm.xlu0 %14250, %v9466_v57  }
0x11bc   : > { %9483 = vperm.xlu1 %14251, %v9465_v38  }
0x11bf   : > { %9442 = vperm.xlu0 %14250, %v9412_v12  }
0x11c0   : > { %9437 = vperm.xlu1 %14251, %v9411_v50  }
0x11c3   : > { %9498 = vperm.xlu0 %14250, %v9468_v34  }
0x11c4   : > { %9493 = vperm.xlu1 %14251, %v9467_v10  }
0x11c7   : > { %9452 = vperm.xlu0 %14250, %v9414_v33  }
0x11c8   : > { %9447 = vperm.xlu1 %14251, %v9413_v13  }
0x11cb   : > { %9508 = vperm.xlu0 %14250, %v9470_v22  }
0x11cc   : > { %9503 = vperm.xlu1 %14251, %v9469_v52  }
0x11cf   : > { %10009 = vperm.xlu0 %14250, %v9987_v40  }
0x11d0   : > { %10004 = vperm.xlu1 %14251, %v9986_v35  }
0x11d3   : > { %10121 = vperm.xlu0 %14250, %v10099_v21  }
0x11d4   : > { %10116 = vperm.xlu1 %14251, %v10098_v3  }
0x11d7   : > { %10019 = vperm.xlu0 %14250, %v9989_v18  }
0x11d8   : > { %10014 = vperm.xlu1 %14251, %v9988_v11  }
0x11db   : > { %10131 = vperm.xlu0 %14250, %v10101_v28  }
0x11dc   : > { %10126 = vperm.xlu1 %14251, %v10100_v19  }
0x11df   : > { %10029 = vperm.xlu0 %14250, %v9991_v4  }
0x11e0   : > { %10024 = vperm.xlu1 %14251, %v9990_v24  }
0x11e3   : > { %10141 = vperm.xlu0 %14250, %v10103_v55  }
0x11e4   : > { %10136 = vperm.xlu1 %14251, %v10102_v39  }
0x11e7   : > { %10039 = vperm.xlu0 %14250, %v9993_v14  }
0x11e8   : > { %10034 = vperm.xlu1 %14251, %v9992_v36   ;;  %v8899_v36 = vld [vmem:[%s16930_s7 + $0x8] sm:$0xff] }
0x11eb   : > { %10151 = vperm.xlu0 %14250, %v10105_v25  }
0x11ec   : > { %10146 = vperm.xlu1 %14251, %v10104_v20   ;;  %v8900_v20 = vld [vmem:[%s16930_s7 + $0x10] sm:$0xff] }
0x11ef   : > { %10049 = vperm.xlu0 %14250, %v9995_v23  }
0x11f0   : > { %10044 = vperm.xlu1 %14251, %v9994_v31  }
0x11f3   : > { %10161 = vperm.xlu0 %14250, %v10107_v61  }
0x11f4   : > { %10156 = vperm.xlu1 %14251, %v10106_v37  }
0x11f7   : > { %10059 = vperm.xlu0 %14250, %v9997_v43   ;;  %v8901_v43 = vld [vmem:[%s16930_s7 + $0x18] sm:$0xff] }
0x11f8   : > { %10054 = vperm.xlu1 %14251, %v9996_v44   ;;  %v8902_v44 = vld [vmem:[%s16930_s7 + $0x20] sm:$0xff] }
0x11fb   : > { %10171 = vperm.xlu0 %14250, %v10109_v1  }
0x11fc   : > { %10166 = vperm.xlu1 %14251, %v10108_v7  }
0x11ff   : > { %10069 = vperm.xlu0 %14250, %v9999_v30  }
0x1200   : > { %10064 = vperm.xlu1 %14251, %v9998_v0   ;;  %v8903_v0 = vld [vmem:[%s16930_s7 + $0x28] sm:$0xff] }
0x1203   : > { %10181 = vperm.xlu0 %14250, %v10111_v58   ;;  %v8904_v58 = vld [vmem:[%s16930_s7 + $0x30] sm:$0xff] }
0x1204   : > { %10176 = vperm.xlu1 %14251, %v10110_v41  }
0x1207   : > { %10079 = vperm.xlu0 %14250, %v10001_v47   ;;  %v8905_v47 = vld [vmem:[%s16930_s7 + $0x38] sm:$0xff] }
0x1208   : > { %10074 = vperm.xlu1 %14251, %v10000_v59   ;;  %v11426_v59 = vld [vmem:[%s16930_s7 + $0x80] sm:$0xff] }
0x1209   : > { %v14594_v63 = vpop.permute.xlu0 %14593 }
0x120a   : > { %v14596_v15 = vunpack.i.h.bf16 %v14594_v63  ;;  %v14595_v26 = vunpack.i.l.bf16 %v14594_v63  ;;  %v14599_v6 = vpop.permute.xlu1 %14598  ;;  %v11428_v63 = vld [vmem:[%s16930_s7 + $0x90] sm:$0xff] }
0x120b   : > { %v14601_v62 = vunpack.i.h.bf16 %v14599_v6  ;;  %v14600_v16 = vunpack.i.l.bf16 %v14599_v6  ;;  %10191 = vperm.xlu0 %14250, %v10113_v51   ;;  %v11427_v51 = vld [vmem:[%s16930_s7 + $0x88] sm:$0xff]  ;;  %v11432_v6 = vld [vmem:[%s16930_s7 + $0xb0] sm:$0xff] }
0x120c   : > { %10186 = vperm.xlu1 %14251, %v10112_v5   ;;  %v9093_v29 = vsel %vm1669_vm7, %v14595_v26, %v14596_v15  ;;  %v11429_v5 = vld [vmem:[%s16930_s7 + $0x98] sm:$0xff]  ;;  %v11430_v15 = vld [vmem:[%s16930_s7 + $0xa0] sm:$0xff]  ;;  %v11431_v26 = vld [vmem:[%s16930_s7 + $0xa8] sm:$0xff] }
0x120d   : > { %v14604_v32 = vpop.permute.xlu0 %14603  ;;  %v9092_v49 = vsel %vm1669_vm7, %v14600_v16, %v14601_v62  ;;  %v11433_v62 = vld [vmem:[%s16930_s7 + $0xb8] sm:$0xff]  ;;  %v9660_v16 = vld [vmem:[%s14728_s13] sm:$0xf] }
0x120e   : > { %v14606_v53 = vunpack.i.h.bf16 %v14604_v32  ;;  %v14605_v45 = vunpack.i.l.bf16 %v14604_v32  ;;  %v14609_v9 = vpop.permute.xlu1 %14608  ;;  %v13756_v42 = vpack.c.bf16 %v9093_v29, %v9092_v49  ;;  %12817 = vmatprep.subr.msk.mxu1 %vm1282_vm3, %v9660_v16 }
0x120f   : > { %v14611_v48 = vunpack.i.h.bf16 %v14609_v9  ;;  %v14610_v54 = vunpack.i.l.bf16 %v14609_v9 }
0x1210   : > { %13757 = vmatprep.subr.bf16.mxu0 %v13756_v42  ;;  %v9095_v60 = vsel %vm1669_vm7, %v14605_v45, %v14606_v53 }
0x1211   : > { %v14614_v56 = vpop.permute.xlu0 %14613  ;;  %13759 = vmatpush3.bf16.msra.mxu0 %v13756_v42  ;;  %v9094_v8 = vsel %vm1669_vm7, %v14610_v54, %v14611_v48 }
0x1212   : > { %v14616_v46 = vunpack.i.h.bf16 %v14614_v56  ;;  %v14615_v17 = vunpack.i.l.bf16 %v14614_v56  ;;  %v14619_v57 = vpop.permute.xlu1 %14618  ;;  %v13760_v38 = vpack.c.bf16 %v9095_v60, %v9094_v8 }
0x1213   : > { %v14621_v12 = vunpack.i.h.bf16 %v14619_v57  ;;  %v14620_v50 = vunpack.i.l.bf16 %v14619_v57 }
0x1214   : > { %13761 = vmatprep.subr.bf16.mxu0 %v13760_v38  ;;  %v9097_v34 = vsel %vm1669_vm7, %v14615_v17, %v14616_v46 }
0x1215   : > { %v14629_v10 = vpop.permute.xlu0 %14628  ;;  %13763 = vmatpush3.bf16.msra.mxu0 %v13760_v38  ;;  %v9096_v33 = vsel %vm1669_vm7, %v14620_v50, %v14621_v12 }
0x1216   : > { %v14631_v13 = vunpack.i.h.bf16 %v14629_v10  ;;  %v14630_v22 = vunpack.i.l.bf16 %v14629_v10  ;;  %v14624_v52 = vpop.permute.xlu1 %14623  ;;  %v13764_v40 = vpack.c.bf16 %v9097_v34, %v9096_v33 }
0x1217   : > { %v14626_v35 = vunpack.i.h.bf16 %v14624_v52  ;;  %v14625_v21 = vunpack.i.l.bf16 %v14624_v52 }
0x1218   : > { %13765 = vmatprep.subr.bf16.mxu0 %v13764_v40  ;;  %v9099_v3 = vsel %vm1669_vm7, %v14630_v22, %v14631_v13 }
0x1219   : > { %v14639_v18 = vpop.permute.xlu0 %14638  ;;  %13767 = vmatpush3.bf16.msra.mxu0 %v13764_v40  ;;  %v9098_v11 = vsel %vm1669_vm7, %v14625_v21, %v14626_v35  ;;  %vm10941_vm7 = vcmask 0  }
0x121a   : > { %v14634_v28 = vpop.permute.xlu1 %14633  ;;  %v13768_v19 = vpack.c.bf16 %v9099_v3, %v9098_v11  ;;  %v14641_v55 = vunpack.i.h.bf16 %v14639_v18  ;;  %v14640_v39 = vunpack.i.l.bf16 %v14639_v18 }
0x121b   : > { %v14636_v4 = vunpack.i.h.bf16 %v14634_v28  ;;  %v14635_v24 = vunpack.i.l.bf16 %v14634_v28 }
0x121c   : > { %13769 = vmatprep.subr.bf16.mxu0 %v13768_v19  ;;  %v13776_v23 = vpack.c.bf16 %v14641_v55, %v14640_v39 }
0x121d   : > { %v13772_v14 = vpack.c.bf16 %v14636_v4, %v14635_v24  ;;  %13771 = vmatpush3.bf16.msra.mxu0 %v13768_v19  ;;  %v14649_v37 = vpop.permute.xlu0 %14648 }
0x121e   : > { %v14644_v25 = vpop.permute.xlu1 %14643  ;;  %v14651_v1 = vunpack.i.h.bf16 %v14649_v37  ;;  %v14650_v7 = vunpack.i.l.bf16 %v14649_v37 }
0x121f   : > { %13773 = vmatprep.subr.bf16.mxu0 %v13772_v14  ;;  %v14646_v31 = vunpack.i.h.bf16 %v14644_v25  ;;  %v14645_v61 = vunpack.i.l.bf16 %v14644_v25 }
0x1220   : > { %12764 = vmatmul.mubr.msk.f32.vlgmr.msra.gmra.mrb[76].mxu0 %vm4989_vm14, %v8899_v36  ;;  %v13784_v41 = vpack.c.bf16 %v14651_v1, %v14650_v7  ;;  %v9777_v7 = vld [vmem:[%s16936_s0] sm:$0xff] }
0x1221   : > { %13775 = vmatpush3.bf16.msra.mxu0 %v13772_v14  ;;  %12766 = vmatprep.mubr.msk.f32.mxu0 %vm4989_vm14, %v8900_v20  ;;  %v13780_v30 = vpack.c.bf16 %v14646_v31, %v14645_v61 }
0x1222   : > { %13777 = vmatprep.subr.bf16.mxu0 %v13776_v23 }
0x1224   : > { %12767 = vmatmul.mubr.msk.f32.gmra.mrb[78].mxu0 %vm4989_vm14, %v8901_v43 }
0x1225   : > { %13779 = vmatpush3.bf16.msra.mxu0 %v13776_v23  ;;  %12769 = vmatprep.mubr.msk.f32.mxu0 %vm4989_vm14, %v8902_v44 }
0x1226   : > { %13781 = vmatprep.subr.bf16.mxu0 %v13780_v30 }
0x1228   : > { %12770 = vmatmul.mubr.msk.f32.gmra.mrb[80].mxu0 %vm4989_vm14, %v8903_v0 }
0x1229   : > { %13783 = vmatpush3.bf16.msra.mxu0 %v13780_v30  ;;  %12772 = vmatprep.mubr.msk.f32.mxu0 %vm4989_vm14, %v8904_v58  ;;  %v10226_v30 = vld [vmem:[%s14723_s9] sm:$0x3] }
0x122a   : > { %13785 = vmatprep.subr.bf16.mxu0 %v13784_v41 }
0x122c   : > { %12773 = vmatmul.mubr.msk.f32.gmra.mrb[82].mxu0 %vm4989_vm14, %v8905_v47 }
0x122d   : > { %13787 = vmatpush3.bf16.msra.mxu0 %v13784_v41  ;;  %12791 = vmatprep.mubr.msk.f32.mxu0 %vm4989_vm14, %v11426_v59 }
0x122e   : > { %v9423_v27 = vpop.permute.xlu0 %9422 }
0x122f   : > { %v9418_v29 = vpop.permute.xlu1 %9417 }
0x1230   : > { %12792 = vmatmul.mubr.msk.f32.vlgmr.msra.gmra.mrb[76].mxu0 %vm4989_vm14, %v11427_v51 }
0x1231   : > { %12794 = vmatprep.mubr.msk.f32.mxu0 %vm4989_vm14, %v11428_v63 }
0x1232   : > { %v9479_v32 = vpop.permute.xlu0 %9478 }
0x1233   : > { %v9474_v49 = vpop.permute.xlu1 %9473 }
0x1234   : > { %12795 = vmatmul.mubr.msk.f32.gmra.mrb[78].mxu0 %vm4989_vm14, %v11429_v5 }
0x1235   : > { %12797 = vmatprep.mubr.msk.f32.mxu0 %vm4989_vm14, %v11430_v15 }
0x1236   : > { %v9433_v53 = vpop.permute.xlu0 %9432 }
0x1237   : > { %v9428_v45 = vpop.permute.xlu1 %9427 }
0x1238   : > { %12798 = vmatmul.mubr.msk.f32.gmra.mrb[80].mxu0 %vm4989_vm14, %v11431_v26 }
0x1239   : > { %12800 = vmatprep.mubr.msk.f32.mxu0 %vm4989_vm14, %v11432_v6 }
0x123a   : > { %v9489_v9 = vpop.permute.xlu0 %9488 }
0x123b   : > { %v9484_v42 = vpop.permute.xlu1 %9483 }
0x123c   : > { %12801 = vmatmul.mubr.msk.f32.gmra.mrb[82].mxu0 %vm4989_vm14, %v11433_v62 }
0x123e   : > { %v9443_v48 = vpop.permute.xlu0 %9442 }
0x123f   : > { %v9438_v54 = vpop.permute.xlu1 %9437 }
0x1242   : > { %v9499_v46 = vpop.permute.xlu0 %9498 }
0x1243   : > { %v9494_v57 = vpop.permute.xlu1 %9493 }
0x1246   : > { %v9453_v40 = vpop.permute.xlu0 %9452 }
0x1247   : > { %v9448_v3 = vpop.permute.xlu1 %9447 }
0x124a   : > { %v9509_v25 = vpop.permute.xlu0 %9508 }
0x124b   : > { %v9504_v31 = vpop.permute.xlu1 %9503 }
0x1303   : > { %v12793_v60 = vpop.f32.mrb[76].mxu0 }
0x1304   : > { %v9456_v56 = vmul.f32 %v12793_v60, %v9423_v27  ;;  %v9360_v8 = vpop.f32.mrb[77].mxu0 }
0x1305   : > { %v9455_v17 = vmul.f32 %v9418_v29, %v9360_v8 }
0x1306   : > { %v9512_v38 = vadd.f32 %v9479_v32, %v9456_v56 }
0x1307   : > { %v9511_v12 = vadd.f32 %v9474_v49, %v9455_v17  ;;  %v12796_v50 = vpop.f32.mrb[78].mxu0 }
0x1308   : > { %v9458_v34 = vmul.f32 %v12796_v50, %v9433_v53  ;;  %v9370_v10 = vpop.f32.mrb[79].mxu0  ;;  %v9520_v22 = vmax.f32 %v9512_v38, 0.0  ;;  %v9778_v38 = vld [vmem:[%s16936_s0 + $0x8] sm:$0xff]  ;;  %v9780_v50 = vld [vmem:[%s16936_s0 + $0x18] sm:$0xff] }
0x1309   : > { %v9519_v33 = vmax.f32 %v9511_v12, 0.0  ;;  %v9457_v13 = vmul.f32 %v9428_v45, %v9370_v10  ;;  %v9779_v12 = vld [vmem:[%s16936_s0 + $0x10] sm:$0xff]  ;;  %v9782_v10 = vld [vmem:[%s16936_s0 + $0x28] sm:$0xff] }
0x130a   : > { %v9514_v52 = vadd.f32 %v9489_v9, %v9458_v34  ;;  %v9781_v34 = vld [vmem:[%s16936_s0 + $0x20] sm:$0xff] }
0x130b   : > { %v9513_v35 = vadd.f32 %v9484_v42, %v9457_v13  ;;  %v12799_v21 = vpop.f32.mrb[80].mxu0  ;;  %12805 = vmatprep.mubr.msk.f32.mxu1 %vm8873_vm1, %v9519_v33  ;;  %v9784_v13 = vld [vmem:[%s16936_s0 + $0x38] sm:$0xff] }
0x130c   : > { %v9460_v18 = vmul.f32 %v12799_v21, %v9443_v48  ;;  %v9380_v11 = vpop.f32.mrb[81].mxu0  ;;  %12806 = vmatmul.mubr.msk.f32.vlgmr.msra.gmra.mrb[48].mxu1 %vm8873_vm1, %v9520_v22  ;;  %v9522_v4 = vmax.f32 %v9514_v52, 0.0  ;;  %v9786_v52 = vld [vmem:[%s16936_s0 + $0x48] sm:$0xff]  ;;  %v9789_v21 = vld [vmem:[%s16936_s0 + $0x60] sm:$0xff] }
0x130d   : > { %v9521_v28 = vmax.f32 %v9513_v35, 0.0  ;;  %v9459_v19 = vmul.f32 %v9438_v54, %v9380_v11  ;;  %12818 = vmatpush3.msk.msra.mxu1 %vm1282_vm3, %v9660_v16  ;;  %vm10275_vm3 = vcmask 1041408   ;;  %v9788_v35 = vld [vmem:[%s16936_s0 + $0x58] sm:$0xff] }
0x130e   : > { %v9516_v24 = vadd.f32 %v9499_v46, %v9460_v18  ;;  %12871 = vmatprep.subr.msk.mxu0 %vm10275_vm3, %v10226_v30  ;;  %v9791_v18 = vld [vmem:[%s16936_s0 + $0x70] sm:$0xff]  ;;  %v9792_v11 = vld [vmem:[%s16936_s0 + $0x78] sm:$0xff] }
0x130f   : > { %v9515_v55 = vadd.f32 %v9494_v57, %v9459_v19  ;;  %v12802_v39 = vpop.f32.mrb[82].mxu0  ;;  %12808 = vmatprep.mubr.msk.f32.mxu1 %vm8873_vm1, %v9521_v28  ;;  %12872 = vmatpush3.msk.msra.mxu0 %vm10275_vm3, %v10226_v30  ;;  %v10424_v57 = vld [vmem:[%s14728_s13] sm:$0x3]  ;;  %v10005_v19 = vpop.permute.xlu1 %10004 }
0x1310   : > { %v9462_v14 = vmul.f32 %v12802_v39, %v9453_v40  ;;  %v9390_v36 = vpop.f32.mrb[83].mxu0  ;;  %12809 = vmatmul.mubr.msk.f32.gmra.mrb[50].mxu1 %vm8873_vm1, %v9522_v4  ;;  %v9524_v61 = vmax.f32 %v9516_v24, 0.0  ;;  %v9787_v40 = vld [vmem:[%s16936_s0 + $0x50] sm:$0xff] }
0x1311   : > { %v9523_v20 = vmax.f32 %v9515_v55, 0.0  ;;  %v9461_v23 = vmul.f32 %v9448_v3, %v9390_v36  ;;  %v9790_v3 = vld [vmem:[%s16936_s0 + $0x68] sm:$0xff] }
0x1312   : > { %v9518_v37 = vadd.f32 %v9509_v25, %v9462_v14 }
0x1313   : > { %v9517_v43 = vadd.f32 %v9504_v31, %v9461_v23  ;;  %12811 = vmatprep.mubr.msk.f32.mxu1 %vm8873_vm1, %v9523_v20  ;;  %v10117_v24 = vpop.permute.xlu1 %10116 }
0x1314   : > { %12812 = vmatmul.mubr.msk.f32.gmra.mrb[52].mxu1 %vm8873_vm1, %v9524_v61  ;;  %v9526_v1 = vmax.f32 %v9518_v37, 0.0 }
0x1315   : > { %v9525_v44 = vmax.f32 %v9517_v43, 0.0 }
0x1317   : > { %12814 = vmatprep.mubr.msk.f32.mxu1 %vm8873_vm1, %v9525_v44  ;;  %v10015_v39 = vpop.permute.xlu1 %10014 }
0x1318   : > { %12815 = vmatmul.mubr.msk.f32.gmra.mrb[54].mxu1 %vm8873_vm1, %v9526_v1 }
0x1319   : > { %12819 = vmatprep.mubr.msk.f32.mxu1 %vm8873_vm1, %v9519_v33  ;;  %v9783_v33 = vld [vmem:[%s16936_s0 + $0x30] sm:$0xff] }
0x131b   : > { %v10127_v36 = vpop.permute.xlu1 %10126 }
0x131c   : > { %12820 = vmatmul.mubr.msk.f32.vlgmr.msra.gmra.mrb[56].mxu1 %vm8873_vm1, %v9520_v22  ;;  %v9785_v22 = vld [vmem:[%s16936_s0 + $0x40] sm:$0xff]  ;;  %s16937_s0 = sld [smem:[#allocation22_spill]] }
0x131d   : > { %12822 = vmatprep.mubr.msk.f32.mxu1 %vm8873_vm1, %v9521_v28  ;;  %v10010_v28 = vpop.permute.xlu0 %10009 }
0x1320   : > { %12823 = vmatmul.mubr.msk.f32.gmra.mrb[58].mxu1 %vm8873_vm1, %v9522_v4 }
0x1321   : > { %12825 = vmatprep.mubr.msk.f32.mxu1 %vm8873_vm1, %v9523_v20  ;;  %v10122_v4 = vpop.permute.xlu0 %10121  ;;  %v10025_v20 = vpop.permute.xlu1 %10024 }
0x1324   : > { %12826 = vmatmul.mubr.msk.f32.gmra.mrb[60].mxu1 %vm8873_vm1, %v9524_v61 }
0x1325   : > { %12828 = vmatprep.mubr.msk.f32.mxu1 %vm8873_vm1, %v9525_v44  ;;  %v10020_v55 = vpop.permute.xlu0 %10019  ;;  %v10137_v31 = vpop.permute.xlu1 %10136 }
0x1328   : > { %12829 = vmatmul.mubr.msk.f32.gmra.mrb[62].mxu1 %vm8873_vm1, %v9526_v1 }
0x1329   : > { %12847 = vmatprep.mubr.msk.f32.mxu1 %vm4989_vm14, %v9777_v7  ;;  %v10132_v14 = vpop.permute.xlu0 %10131  ;;  %v10035_v37 = vpop.permute.xlu1 %10034 }
0x132d   : > { %v10030_v25 = vpop.permute.xlu0 %10029  ;;  %v10147_v44 = vpop.permute.xlu1 %10146 }
0x1331   : > { %v10142_v23 = vpop.permute.xlu0 %10141  ;;  %v10045_v7 = vpop.permute.xlu1 %10044 }
0x1335   : > { %v10040_v61 = vpop.permute.xlu0 %10039 }
0x1339   : > { %v10152_v43 = vpop.permute.xlu0 %10151 }
0x133d   : > { %v10050_v1 = vpop.permute.xlu0 %10049 }
0x1341   : > { %v10162_v30 = vpop.permute.xlu0 %10161 }
0x13df   : > { %v12807_v0 = vpop.f32.mrb[48].mxu1 }
0x13e0   : > { %v9621_v58 = vpop.f32.mrb[49].mxu1 }
0x13e3   : > { %v12810_v41 = vpop.f32.mrb[50].mxu1 }
0x13e4   : > { %v9631_v47 = vpop.f32.mrb[51].mxu1 }
0x13e7   : > { %v12813_v59 = vpop.f32.mrb[52].mxu1 }
0x13e8   : > { %v9641_v51 = vpop.f32.mrb[53].mxu1 }
0x13eb   : > { %v12816_v63 = vpop.f32.mrb[54].mxu1 }
0x13ec   : > { %v9651_v5 = vpop.f32.mrb[55].mxu1 }
0x13ef   : > { %v12821_v15 = vpop.f32.mrb[56].mxu1 }
0x13f0   : > { %v9770_v26 = vmax.f32 %v12807_v0, %v12821_v15  ;;  %v9730_v6 = vpop.f32.mrb[57].mxu1  ;;  %v10157_v0 = vpop.permute.xlu1 %10156 }
0x13f1   : > { %v9769_v62 = vmax.f32 %v9621_v58, %v9730_v6  ;;  %v10060_v58 = vpop.permute.xlu0 %10059 }
0x13f3   : > { %v13788_v16 = vpack.c.bf16 %v9770_v26, %v9769_v62  ;;  %v12824_v27 = vpop.f32.mrb[58].mxu1 }
0x13f4   : > { %v9772_v29 = vmax.f32 %v12810_v41, %v12824_v27  ;;  %v9740_v32 = vpop.f32.mrb[59].mxu1 }
0x13f5   : > { %v9771_v49 = vmax.f32 %v9631_v47, %v9740_v32  ;;  %13789 = vmatprep.subr.bf16.mxu1 %v13788_v16  ;;  %v16775_v47 = vpop.permute.xlu1 %10054 }
0x13f6   : > { %13791 = vmatpush3.bf16.msra.mxu1 %v13788_v16  ;;  %v10172_v16 = vpop.permute.xlu0 %10171 }
0x13f7   : > { %v13792_v53 = vpack.c.bf16 %v9772_v29, %v9771_v49  ;;  %v12827_v45 = vpop.f32.mrb[60].mxu1 }
0x13f8   : > { %v9774_v9 = vmax.f32 %v12813_v59, %v12827_v45  ;;  %v9750_v42 = vpop.f32.mrb[61].mxu1 }
0x13f9   : > { %v9773_v48 = vmax.f32 %v9641_v51, %v9750_v42  ;;  %13793 = vmatprep.subr.bf16.mxu1 %v13792_v53  ;;  %v10167_v32 = vpop.permute.xlu1 %10166 }
0x13fa   : > { %13795 = vmatpush3.bf16.msra.mxu1 %v13792_v53 }
0x13fb   : > { %v13796_v54 = vpack.c.bf16 %v9774_v9, %v9773_v48  ;;  %v12830_v60 = vpop.f32.mrb[62].mxu1 }
0x13fc   : > { %v9776_v56 = vmax.f32 %v12816_v63, %v12830_v60  ;;  %v9760_v8 = vpop.f32.mrb[63].mxu1 }
0x13fd   : > { %v9775_v46 = vmax.f32 %v9651_v5, %v9760_v8  ;;  %13797 = vmatprep.subr.bf16.mxu1 %v13796_v54 }
0x13fe   : > { %13799 = vmatpush3.bf16.msra.mxu1 %v13796_v54 }
0x13ff   : > { %v13800_v17 = vpack.c.bf16 %v9776_v56, %v9775_v46  ;;  %v10070_v46 = vpop.permute.xlu0 %10069 }
0x1401   : > { %13801 = vmatprep.subr.bf16.mxu1 %v13800_v17 }
0x1402   : > { %13803 = vmatpush3.bf16.msra.mxu1 %v13800_v17 }
0x1403   : > { %12897 = vmatprep.subr.msk.mxu1 %vm10275_vm3, %v10424_v57 }
0x1405   : > { %12848 = vmatmul.mubr.msk.f32.vlgmr.msra.gmra.mrb[64].mxu1 %vm4989_vm14, %v9778_v38  ;;  %v10065_v38 = vpop.permute.xlu1 %10064 }
0x1406   : > { %12850 = vmatprep.mubr.msk.f32.mxu1 %vm4989_vm14, %v9779_v12  ;;  %12898 = vmatpush3.msk.msra.mxu1 %vm10275_vm3, %v10424_v57 }
0x1409   : > { %12851 = vmatmul.mubr.msk.f32.gmra.mrb[66].mxu1 %vm4989_vm14, %v9780_v50 }
0x140a   : > { %12853 = vmatprep.mubr.msk.f32.mxu1 %vm4989_vm14, %v9781_v34 }
0x140d   : > { %12854 = vmatmul.mubr.msk.f32.gmra.mrb[68].mxu1 %vm4989_vm14, %v9782_v10 }
0x140e   : > { %12856 = vmatprep.mubr.msk.f32.mxu1 %vm4989_vm14, %v9783_v33 }
0x1411   : > { %12857 = vmatmul.mubr.msk.f32.gmra.mrb[70].mxu1 %vm4989_vm14, %v9784_v13 }
0x1412   : > { %12859 = vmatprep.mubr.msk.f32.mxu1 %vm4989_vm14, %v9785_v22 }
0x1415   : > { %12860 = vmatmul.mubr.msk.f32.gmra.mrb[72].mxu1 %vm4989_vm14, %v9786_v52 }
0x1416   : > { %12862 = vmatprep.mubr.msk.f32.mxu1 %vm4989_vm14, %v9787_v40 }
0x1419   : > { %12863 = vmatmul.mubr.msk.f32.gmra.mrb[74].mxu1 %vm4989_vm14, %v9788_v35 }
0x141a   : > { %12865 = vmatprep.mubr.msk.f32.mxu1 %vm4989_vm14, %v9789_v21  ;;  %v10182_v21 = vpop.permute.xlu0 %10181 }
0x141d   : > { %12866 = vmatmul.mubr.msk.f32.gmra.mrb[76].mxu1 %vm4989_vm14, %v9790_v3 }
0x141e   : > { %12868 = vmatprep.mubr.msk.f32.mxu1 %vm4989_vm14, %v9791_v18 }
0x1421   : > { %12869 = vmatmul.mubr.msk.f32.gmra.mrb[78].mxu1 %vm4989_vm14, %v9792_v11  ;;  %v10177_v11 = vpop.permute.xlu1 %10176 }
0x14d8   : > { %v12849_v41 = vpop.f32.mrb[64].mxu1 }
0x14d9   : > { %v10083_v59 = vmul.f32 %v12849_v41, %v10010_v28  ;;  %v9907_v51 = vpop.f32.mrb[65].mxu1 }
0x14da   : > { %v10082_v63 = vmul.f32 %v10005_v19, %v9907_v51 }
0x14db   : > { %v10195_v5 = vadd.f32 %v10122_v4, %v10083_v59 }
0x14dc   : > { %v10194_v15 = vadd.f32 %v10117_v24, %v10082_v63  ;;  %v12852_v26 = vpop.f32.mrb[66].mxu1 }
0x14dd   : > { %v10085_v6 = vmul.f32 %v12852_v26, %v10020_v55  ;;  %v9917_v62 = vpop.f32.mrb[67].mxu1  ;;  %v10211_v49 = vmax.f32 %v10195_v5, 0.0 }
0x14de   : > { %v10210_v27 = vmax.f32 %v10194_v15, 0.0  ;;  %v10084_v29 = vmul.f32 %v10015_v39, %v9917_v62 }
0x14df   : > { %v10197_v53 = vadd.f32 %v10132_v14, %v10085_v6 }
0x14e0   : > { %v10196_v45 = vadd.f32 %v10127_v36, %v10084_v29  ;;  %v12855_v9 = vpop.f32.mrb[68].mxu1  ;;  %12873 = vmatprep.mubr.msk.f32.mxu0 %vm1262_vm2, %v10210_v27  ;;  %12899 = vmatprep.mubr.msk.f32.mxu1 %vm1262_vm2, %v10210_v27  ;;  %v10589_v29 = vld [vmem:[%s16937_s0] sm:$0xff] }
0x14e1   : > { %v10087_v42 = vmul.f32 %v12855_v9, %v10030_v25  ;;  %v9927_v48 = vpop.f32.mrb[69].mxu1  ;;  %12874 = vmatmul.mubr.msk.f32.vlgmr.msra.gmra.mrb[84].mxu0 %vm1262_vm2, %v10211_v49  ;;  %12900 = vmatmul.mubr.msk.f32.vlgmr.msra.gmra.mrb[80].mxu1 %vm1262_vm2, %v10211_v49  ;;  %v10213_v56 = vmax.f32 %v10197_v53, 0.0 }
0x14e2   : > { %v10212_v54 = vmax.f32 %v10196_v45, 0.0  ;;  %v10086_v60 = vmul.f32 %v10025_v20, %v9927_v48 }
0x14e3   : > { %v10199_v8 = vadd.f32 %v10142_v23, %v10087_v42  ;;  %v10080_v23 = vpop.permute.xlu0 %10079 }
0x14e4   : > { %v10198_v17 = vadd.f32 %v10137_v31, %v10086_v60  ;;  %v12858_v57 = vpop.f32.mrb[70].mxu1  ;;  %12876 = vmatprep.mubr.msk.f32.mxu0 %vm1262_vm2, %v10212_v54  ;;  %12902 = vmatprep.mubr.msk.f32.mxu1 %vm1262_vm2, %v10212_v54 }
0x14e5   : > { %v10089_v12 = vmul.f32 %v12858_v57, %v10040_v61  ;;  %v9937_v50 = vpop.f32.mrb[71].mxu1  ;;  %12877 = vmatmul.mubr.msk.f32.gmra.mrb[86].mxu0 %vm1262_vm2, %v10213_v56  ;;  %12903 = vmatmul.mubr.msk.f32.gmra.mrb[82].mxu1 %vm1262_vm2, %v10213_v56  ;;  %v10215_v33 = vmax.f32 %v10199_v8, 0.0 }
0x14e6   : > { %v10214_v34 = vmax.f32 %v10198_v17, 0.0  ;;  %v10088_v10 = vmul.f32 %v10035_v37, %v9937_v50  ;;  %v10075_v37 = vpop.permute.xlu1 %10074 }
0x14e7   : > { %v10201_v13 = vadd.f32 %v10152_v43, %v10089_v12  ;;  %v10192_v51 = vpop.permute.xlu0 %10191 }
0x14e8   : > { %v10200_v22 = vadd.f32 %v10147_v44, %v10088_v10  ;;  %v12861_v52 = vpop.f32.mrb[72].mxu1  ;;  %12879 = vmatprep.mubr.msk.f32.mxu0 %vm1262_vm2, %v10214_v34  ;;  %12905 = vmatprep.mubr.msk.f32.mxu1 %vm1262_vm2, %v10214_v34 }
0x14e9   : > { %v10091_v40 = vmul.f32 %v12861_v52, %v10050_v1  ;;  %v9947_v35 = vpop.f32.mrb[73].mxu1  ;;  %12880 = vmatmul.mubr.msk.f32.gmra.mrb[88].mxu0 %vm1262_vm2, %v10215_v33  ;;  %12906 = vmatmul.mubr.msk.f32.gmra.mrb[84].mxu1 %vm1262_vm2, %v10215_v33  ;;  %v10217_v28 = vmax.f32 %v10201_v13, 0.0 }
0x14ea   : > { %v10216_v3 = vmax.f32 %v10200_v22, 0.0  ;;  %v10090_v18 = vmul.f32 %v10045_v7, %v9947_v35  ;;  %v10187_v15 = vpop.permute.xlu1 %10186 }
0x14eb   : > { %v10203_v19 = vadd.f32 %v10162_v30, %v10091_v40 }
0x14ec   : > { %v10202_v4 = vadd.f32 %v10157_v0, %v10090_v18  ;;  %v12864_v24 = vpop.f32.mrb[74].mxu1  ;;  %12882 = vmatprep.mubr.msk.f32.mxu0 %vm1262_vm2, %v10216_v3  ;;  %12908 = vmatprep.mubr.msk.f32.mxu1 %vm1262_vm2, %v10216_v3 }
0x14ed   : > { %v10093_v55 = vmul.f32 %v12864_v24, %v10060_v58  ;;  %v9957_v39 = vpop.f32.mrb[75].mxu1  ;;  %12883 = vmatmul.mubr.msk.f32.gmra.mrb[90].mxu0 %vm1262_vm2, %v10217_v28  ;;  %12909 = vmatmul.mubr.msk.f32.gmra.mrb[86].mxu1 %vm1262_vm2, %v10217_v28  ;;  %v10219_v25 = vmax.f32 %v10203_v19, 0.0 }
0x14ee   : > { %v10218_v14 = vmax.f32 %v10202_v4, 0.0  ;;  %v10092_v36 = vmul.f32 %v16775_v47, %v9957_v39 }
0x14ef   : > { %v10205_v20 = vadd.f32 %v10172_v16, %v10093_v55 }
0x14f0   : > { %v10204_v31 = vadd.f32 %v10167_v32, %v10092_v36  ;;  %v12867_v61 = vpop.f32.mrb[76].mxu1  ;;  %12885 = vmatprep.mubr.msk.f32.mxu0 %vm1262_vm2, %v10218_v14  ;;  %12911 = vmatprep.mubr.msk.f32.mxu1 %vm1262_vm2, %v10218_v14 }
0x14f1   : > { %v10095_v43 = vmul.f32 %v12867_v61, %v10070_v46  ;;  %v9967_v44 = vpop.f32.mrb[77].mxu1  ;;  %12886 = vmatmul.mubr.msk.f32.gmra.mrb[92].mxu0 %vm1262_vm2, %v10219_v25  ;;  %12912 = vmatmul.mubr.msk.f32.gmra.mrb[88].mxu1 %vm1262_vm2, %v10219_v25  ;;  %v10221_v30 = vmax.f32 %v10205_v20, 0.0 }
0x14f2   : > { %v10220_v1 = vmax.f32 %v10204_v31, 0.0  ;;  %v10094_v7 = vmul.f32 %v10065_v38, %v9967_v44 }
0x14f3   : > { %v10207_v0 = vadd.f32 %v10182_v21, %v10095_v43 }
0x14f4   : > { %v10206_v58 = vadd.f32 %v10177_v11, %v10094_v7  ;;  %v12870_v41 = vpop.f32.mrb[78].mxu1  ;;  %12888 = vmatprep.mubr.msk.f32.mxu0 %vm1262_vm2, %v10220_v1  ;;  %12914 = vmatprep.mubr.msk.f32.mxu1 %vm1262_vm2, %v10220_v1 }
0x14f5   : > { %v10097_v47 = vmul.f32 %v12870_v41, %v10080_v23  ;;  %v9977_v59 = vpop.f32.mrb[79].mxu1  ;;  %12889 = vmatmul.mubr.msk.f32.gmra.mrb[94].mxu0 %vm1262_vm2, %v10221_v30  ;;  %12915 = vmatmul.mubr.msk.f32.gmra.mrb[90].mxu1 %vm1262_vm2, %v10221_v30  ;;  %v10223_v26 = vmax.f32 %v10207_v0, 0.0 }
0x14f6   : > { %v10222_v63 = vmax.f32 %v10206_v58, 0.0  ;;  %v10096_v5 = vmul.f32 %v10075_v37, %v9977_v59 }
0x14f7   : > { %v10209_v6 = vadd.f32 %v10192_v51, %v10097_v47 }
0x14f8   : > { %v10208_v62 = vadd.f32 %v10187_v15, %v10096_v5  ;;  %12891 = vmatprep.mubr.msk.f32.mxu0 %vm1262_vm2, %v10222_v63  ;;  %12917 = vmatprep.mubr.msk.f32.mxu1 %vm1262_vm2, %v10222_v63  ;;  %v10590_v15 = vld [vmem:[%s16937_s0 + $0x8] sm:$0xff] }
0x14f9   : > { %12892 = vmatmul.mubr.msk.f32.gmra.mrb[96].mxu0 %vm1262_vm2, %v10223_v26  ;;  %12918 = vmatmul.mubr.msk.f32.gmra.mrb[92].mxu1 %vm1262_vm2, %v10223_v26  ;;  %v10225_v27 = vmax.f32 %v10209_v6, 0.0  ;;  %v10591_v26 = vld [vmem:[%s16937_s0 + $0x10] sm:$0xff]  ;;  %v10592_v6 = vld [vmem:[%s16937_s0 + $0x18] sm:$0xff] }
0x14fa   : > { %v10224_v16 = vmax.f32 %v10208_v62, 0.0  ;;  %v10593_v62 = vld [vmem:[%s16937_s0 + $0x20] sm:$0xff] }
0x14fc   : > { %12894 = vmatprep.mubr.msk.f32.mxu0 %vm1262_vm2, %v10224_v16  ;;  %12920 = vmatprep.mubr.msk.f32.mxu1 %vm1262_vm2, %v10224_v16  ;;  %v10594_v16 = vld [vmem:[%s16937_s0 + $0x28] sm:$0xff] }
0x14fd   : > { %12895 = vmatmul.mubr.msk.f32.gmra.mrb[98].mxu0 %vm1262_vm2, %v10225_v27  ;;  %12921 = vmatmul.mubr.msk.f32.gmra.mrb[94].mxu1 %vm1262_vm2, %v10225_v27  ;;  %v10595_v27 = vld [vmem:[%s16937_s0 + $0x30] sm:$0xff]  ;;  %vm14709_vm2 = vmmov 0  }
0x14fe   : > { %12955 = vmatprep.mubr.f32.mxu0 %v10589_v29  ;;  %v10596_v29 = vld [vmem:[%s16937_s0 + $0x38] sm:$0xff]  ;;  %s16941_s0 = sld [smem:[#allocation26_spill]] }
0x15b4   : > { %v12875_v32 = vpop.f32.mrb[84].mxu0  ;;  %v12901_v49 = vpop.f32.mrb[80].mxu1 }
0x15b5   : > { %v10574_v53 = vmax.f32 %v12875_v32, %v12901_v49  ;;  %v10345_v45 = vpop.f32.mrb[85].mxu0  ;;  %v10494_v9 = vpop.f32.mrb[81].mxu1  ;;  %v10742_v32 = vld [vmem:[%s16938_s1] sm:$0xff]  ;;  %v10703_v49 = vld [vmem:[%s16939_s2 + $0x8] sm:$0xff] }
0x15b6   : > { %v10573_v42 = vmax.f32 %v10345_v45, %v10494_v9  ;;  %v10719_v9 = vld [vmem:[%s16940_s3 + $0x8] sm:$0xff] }
0x15b8   : > { %v13804_v48 = vpack.c.bf16 %v10574_v53, %v10573_v42  ;;  %v12878_v54 = vpop.f32.mrb[86].mxu0  ;;  %v12904_v60 = vpop.f32.mrb[82].mxu1  ;;  %v10702_v53 = vld [vmem:[%s16939_s2] sm:$0xff] }
0x15b9   : > { %v10576_v56 = vmax.f32 %v12878_v54, %v12904_v60  ;;  %v10355_v8 = vpop.f32.mrb[87].mxu0  ;;  %v10504_v46 = vpop.f32.mrb[83].mxu1  ;;  %v10718_v54 = vld [vmem:[%s16940_s3] sm:$0xff] }
0x15ba   : > { %v10575_v17 = vmax.f32 %v10355_v8, %v10504_v46  ;;  %13805 = vmatprep.subr.bf16.mxu0 %v13804_v48  ;;  %v10704_v46 = vld [vmem:[%s16939_s2 + $0x10] sm:$0xff] }
0x15bb   : > { %13807 = vmatpush3.bf16.msra.mxu0 %v13804_v48 }
0x15bc   : > { %v13808_v57 = vpack.c.bf16 %v10576_v56, %v10575_v17  ;;  %v12881_v38 = vpop.f32.mrb[88].mxu0  ;;  %v12907_v12 = vpop.f32.mrb[84].mxu1  ;;  %v10705_v56 = vld [vmem:[%s16939_s2 + $0x18] sm:$0xff] }
0x15bd   : > { %v10578_v50 = vmax.f32 %v12881_v38, %v12907_v12  ;;  %v10365_v34 = vpop.f32.mrb[89].mxu0  ;;  %v10514_v10 = vpop.f32.mrb[85].mxu1  ;;  %v10721_v38 = vld [vmem:[%s16940_s3 + $0x18] sm:$0xff] }
0x15be   : > { %v10577_v33 = vmax.f32 %v10365_v34, %v10514_v10  ;;  %13809 = vmatprep.subr.bf16.mxu0 %v13808_v57  ;;  %v10720_v10 = vld [vmem:[%s16940_s3 + $0x10] sm:$0xff] }
0x15bf   : > { %13811 = vmatpush3.bf16.msra.mxu0 %v13808_v57 }
0x15c0   : > { %v13812_v13 = vpack.c.bf16 %v10578_v50, %v10577_v33  ;;  %v12884_v22 = vpop.f32.mrb[90].mxu0  ;;  %v12910_v52 = vpop.f32.mrb[86].mxu1 }
0x15c1   : > { %v10580_v40 = vmax.f32 %v12884_v22, %v12910_v52  ;;  %v10375_v35 = vpop.f32.mrb[91].mxu0  ;;  %v10524_v21 = vpop.f32.mrb[87].mxu1  ;;  %v10707_v22 = vld [vmem:[%s16939_s2 + $0x28] sm:$0xff] }
0x15c2   : > { %v10579_v3 = vmax.f32 %v10375_v35, %v10524_v21  ;;  %13813 = vmatprep.subr.bf16.mxu0 %v13812_v13 }
0x15c3   : > { %13815 = vmatpush3.bf16.msra.mxu0 %v13812_v13 }
0x15c4   : > { %v13816_v18 = vpack.c.bf16 %v10580_v40, %v10579_v3  ;;  %v12887_v11 = vpop.f32.mrb[92].mxu0  ;;  %v12913_v28 = vpop.f32.mrb[88].mxu1  ;;  %v10706_v40 = vld [vmem:[%s16939_s2 + $0x20] sm:$0xff]  ;;  %v10723_v3 = vld [vmem:[%s16940_s3 + $0x28] sm:$0xff] }
0x15c5   : > { %v10582_v19 = vmax.f32 %v12887_v11, %v12913_v28  ;;  %v10385_v4 = vpop.f32.mrb[93].mxu0  ;;  %v10534_v24 = vpop.f32.mrb[89].mxu1 }
0x15c6   : > { %v10581_v55 = vmax.f32 %v10385_v4, %v10534_v24  ;;  %13817 = vmatprep.subr.bf16.mxu0 %v13816_v18  ;;  %v10722_v4 = vld [vmem:[%s16940_s3 + $0x20] sm:$0xff] }
0x15c7   : > { %13819 = vmatpush3.bf16.msra.mxu0 %v13816_v18 }
0x15c8   : > { %v13820_v39 = vpack.c.bf16 %v10582_v19, %v10581_v55  ;;  %v12890_v14 = vpop.f32.mrb[94].mxu0  ;;  %v12916_v36 = vpop.f32.mrb[90].mxu1 }
0x15c9   : > { %v10584_v25 = vmax.f32 %v12890_v14, %v12916_v36  ;;  %v10395_v20 = vpop.f32.mrb[95].mxu0  ;;  %v10544_v23 = vpop.f32.mrb[91].mxu1  ;;  %v10708_v36 = vld [vmem:[%s16939_s2 + $0x30] sm:$0xff] }
0x15ca   : > { %v10583_v31 = vmax.f32 %v10395_v20, %v10544_v23  ;;  %13821 = vmatprep.subr.bf16.mxu0 %v13820_v39  ;;  %v10725_v23 = vld [vmem:[%s16940_s3 + $0x38] sm:$0xff] }
0x15cb   : > { %13823 = vmatpush3.bf16.msra.mxu0 %v13820_v39  ;;  %v10709_v39 = vld [vmem:[%s16939_s2 + $0x38] sm:$0xff]  ;;  %s16942_s2 = sld [smem:[#allocation27_spill]] }
0x15cc   : > { %v13824_v61 = vpack.c.bf16 %v10584_v25, %v10583_v31  ;;  %v12893_v37 = vpop.f32.mrb[96].mxu0  ;;  %v12919_v43 = vpop.f32.mrb[92].mxu1 }
0x15cd   : > { %v10586_v44 = vmax.f32 %v12893_v37, %v12919_v43  ;;  %v10405_v1 = vpop.f32.mrb[97].mxu0  ;;  %v10554_v7 = vpop.f32.mrb[93].mxu1 }
0x15ce   : > { %v10585_v30 = vmax.f32 %v10405_v1, %v10554_v7  ;;  %13825 = vmatprep.subr.bf16.mxu0 %v13824_v61 }
0x15cf   : > { %13827 = vmatpush3.bf16.msra.mxu0 %v13824_v61 }
0x15d0   : > { %v13828_v0 = vpack.c.bf16 %v10586_v44, %v10585_v30  ;;  %v12896_v58 = vpop.f32.mrb[98].mxu0  ;;  %v12922_v41 = vpop.f32.mrb[94].mxu1  ;;  %v10724_v44 = vld [vmem:[%s16940_s3 + $0x30] sm:$0xff] }
0x15d1   : > { %v10588_v47 = vmax.f32 %v12896_v58, %v12922_v41  ;;  %v10415_v59 = vpop.f32.mrb[99].mxu0  ;;  %v10564_v51 = vpop.f32.mrb[95].mxu1 }
0x15d2   : > { %v10587_v63 = vmax.f32 %v10415_v59, %v10564_v51  ;;  %13829 = vmatprep.subr.bf16.mxu0 %v13828_v0  ;;  %v10743_v51 = vld [vmem:[%s16938_s1 + $0x8] sm:$0xff] }
0x15d3   : > { %13831 = vmatpush3.bf16.msra.mxu0 %v13828_v0 }
0x15d4   : > { %v13832_v5 = vpack.c.bf16 %v10588_v47, %v10587_v63  ;;  %v10744_v63 = vld [vmem:[%s16938_s1 + $0x10] sm:$0xff] }
0x15d6   : > { %13833 = vmatprep.subr.bf16.mxu0 %v13832_v5 }
0x15d7   : > { %13835 = vmatpush3.bf16.msra.mxu0 %v13832_v5  ;;  %v10745_v5 = vld [vmem:[%s16938_s1 + $0x18] sm:$0xff] }
0x15da   : > { %12956 = vmatmul.mubr.f32.vlgmr.msra.gmra.mrb[100].mxu0 %v10590_v15  ;;  %v14708_v15 = vmov 0.0|0.0  }
0x15db   : > { %12958 = vmatprep.mubr.f32.mxu0 %v10591_v26  ;;  %v10844_v26 = vld [vmem:[%s16941_s0 + $0x8] sm:$0xff] }
0x15de   : > { %12959 = vmatmul.mubr.f32.gmra.mrb[102].mxu0 %v10592_v6  ;;  %v10843_v6 = vld [vmem:[%s16941_s0] sm:$0xff] }
0x15df   : > { %12961 = vmatprep.mubr.f32.mxu0 %v10593_v62 }
0x15e2   : > { %12962 = vmatmul.mubr.f32.gmra.mrb[104].mxu0 %v10594_v16  ;;  %v10852_v16 = vld [vmem:[%s16942_s2 + $0x8] sm:$0xff] }
0x15e3   : > { %12964 = vmatprep.mubr.f32.mxu0 %v10595_v27 }
0x15e6   : > { %12965 = vmatmul.mubr.f32.gmra.mrb[106].mxu0 %v10596_v29 }
0x15e7   : > { %12983 = vmatprep.mubr.msk.f32.mxu0 %vm4989_vm14, %v10742_v32  ;;  %v10851_v32 = vld [vmem:[%s16942_s2] sm:$0xff] }
0x16ad   : > { %v12957_v45 = vpop.f32.mrb[100].mxu0 }
0x16ae   : > { %v10711_v42 = vmul.f32 %v12957_v45, %v10703_v49  ;;  %v10663_v48 = vpop.f32.mrb[101].mxu0 }
0x16af   : > { %v10710_v60 = vmul.f32 %v10702_v53, %v10663_v48  ;;  %v10846_v53 = vld [vmem:[%s16941_s0 + $0x18] sm:$0xff] }
0x16b0   : > { %v10727_v8 = vadd.f32 %v10719_v9, %v10711_v42  ;;  %v10845_v9 = vld [vmem:[%s16941_s0 + $0x10] sm:$0xff]  ;;  %s1182_s0 = scalar_lea.vmem %s14906_s12, %s16944_s23 }
0x16b1   : > { %v10726_v17 = vadd.f32 %v10718_v54, %v10710_v60  ;;  %v12960_v57 = vpop.f32.mrb[102].mxu0  ;;  %v10854_v54 = vld [vmem:[%s16942_s2 + $0x18] sm:$0xff] }
0x16b2   : > { %v10735_v12 = vmax.f32 %v10727_v8, 0.0  ;;  %v10713_v50 = vmul.f32 %v12960_v57, %v10705_v56  ;;  %v10673_v34 = vpop.f32.mrb[103].mxu0 }
0x16b3   : > { %v10734_v33 = vmax.f32 %v10726_v17, 0.0  ;;  %v10712_v13 = vmul.f32 %v10704_v46, %v10673_v34 }
0x16b4   : > { %v10729_v52 = vadd.f32 %v10721_v38, %v10713_v50 }
0x16b5   : > { %v10728_v35 = vadd.f32 %v10720_v10, %v10712_v13  ;;  %v12963_v21 = vpop.f32.mrb[104].mxu0  ;;  %v13836_v18 = vpack.c.bf16 %v10735_v12, %v10734_v33  ;;  %v10863_v33 = vld [vmem:[%s14898_s27] sm:$0x1] }
0x16b6   : > { %v10737_v11 = vmax.f32 %v10729_v52, 0.0  ;;  %v10715_v28 = vmul.f32 %v12963_v21, %v10707_v22  ;;  %v10683_v19 = vpop.f32.mrb[105].mxu0  ;;  %v10937_v13 = vld [vmem:[#allocation3] sm:$0x1]  ;;  %v10939_v52 = vld [vmem:[#allocation4] sm:$0x1] }
0x16b7   : > { %v10736_v24 = vmax.f32 %v10728_v35, 0.0  ;;  %v10714_v55 = vmul.f32 %v10706_v40, %v10683_v19  ;;  %13837 = vmatprep.subr.bf16.mxu0 %v13836_v18 }
0x16b8   : > { %v10731_v14 = vadd.f32 %v10723_v3, %v10715_v28  ;;  %13839 = vmatpush3.bf16.msra.mxu0 %v13836_v18 }
0x16b9   : > { %v10730_v25 = vadd.f32 %v10722_v4, %v10714_v55  ;;  %v12966_v20 = vpop.f32.mrb[106].mxu0  ;;  %v13840_v31 = vpack.c.bf16 %v10737_v11, %v10736_v24 }
0x16ba   : > { %v10739_v61 = vmax.f32 %v10731_v14, 0.0  ;;  %v10717_v37 = vmul.f32 %v12966_v20, %v10709_v39  ;;  %v10693_v43 = vpop.f32.mrb[107].mxu0 }
0x16bb   : > { %v10738_v1 = vmax.f32 %v10730_v25, 0.0  ;;  %v10716_v7 = vmul.f32 %v10708_v36, %v10693_v43  ;;  %13841 = vmatprep.subr.bf16.mxu0 %v13840_v31 }
0x16bc   : > { %v10733_v30 = vadd.f32 %v10725_v23, %v10717_v37  ;;  %13843 = vmatpush3.bf16.msra.mxu0 %v13840_v31 }
0x16bd   : > { %v10732_v0 = vadd.f32 %v10724_v44, %v10716_v7  ;;  %v13844_v58 = vpack.c.bf16 %v10739_v61, %v10738_v1 }
0x16be   : > { %v10741_v41 = vmax.f32 %v10733_v30, 0.0 }
0x16bf   : > { %v10740_v47 = vmax.f32 %v10732_v0, 0.0  ;;  %13845 = vmatprep.subr.bf16.mxu0 %v13844_v58 }
0x16c0   : > { %13847 = vmatpush3.bf16.msra.mxu0 %v13844_v58 }
0x16c1   : > { %v13848_v59 = vpack.c.bf16 %v10741_v41, %v10740_v47 }
0x16c3   : > { %13849 = vmatprep.subr.bf16.mxu0 %v13848_v59 }
0x16c4   : > { %13851 = vmatpush3.bf16.msra.mxu0 %v13848_v59 }
0x16c5   : > { %13852 = vmatprep.subr.bf16.mxu0 %v14708_v15 }
0x16c7   : > { %12984 = vmatmul.mubr.msk.f32.vlgmr.msra.gmra.mrb[108].mxu0 %vm4989_vm14, %v10743_v51 }
0x16c8   : > { %12986 = vmatprep.mubr.msk.f32.mxu0 %vm4989_vm14, %v10744_v63 }
0x16cb   : > { %12987 = vmatmul.mubr.msk.f32.gmra.mrb[110].mxu0 %vm4989_vm14, %v10745_v5 }
0x16cc   : > { %12997 = vmatprep.mubr.msk.f32.mxu0 %vm14709_vm2, %v14699_v2  ;;  %v10853_v2 = vld [vmem:[%s16942_s2 + $0x10] sm:$0xff] }
0x179a   : > { %v12985_v62 = vpop.f32.mrb[108].mxu0 }
0x179b   : > { %v10848_v27 = vmul.f32 %v12985_v62, %v10844_v26  ;;  %v10824_v29 = vpop.f32.mrb[109].mxu0 }
0x179c   : > { %v10847_v49 = vmul.f32 %v10843_v6, %v10824_v29 }
0x179d   : > { %v10856_v45 = vadd.f32 %v10852_v16, %v10848_v27 }
0x179e   : > { %v10855_v42 = vadd.f32 %v10851_v32, %v10847_v49  ;;  %v12988_v48 = vpop.f32.mrb[110].mxu0 }
0x179f   : > { %v10860_v60 = vmax.f32 %v10856_v45, 0.0  ;;  %v10850_v56 = vmul.f32 %v12988_v48, %v10846_v53  ;;  %v10834_v8 = vpop.f32.mrb[111].mxu0 }
0x17a0   : > { %v10859_v46 = vmax.f32 %v10855_v42, 0.0  ;;  %v10849_v17 = vmul.f32 %v10845_v9, %v10834_v8 }
0x17a1   : > { %v10858_v57 = vadd.f32 %v10854_v54, %v10850_v56 }
0x17a2   : > { %v13853_v38 = vpack.c.bf16 %v10860_v60, %v10859_v46  ;;  %v10857_v12 = vadd.f32 %v10853_v2, %v10849_v17 }
0x17a3   : > { %v10862_v50 = vmax.f32 %v10858_v57, 0.0 }
0x17a4   : > { %v10861_v34 = vmax.f32 %v10857_v12, 0.0  ;;  %13854 = vmatpush3.bf16.msra.mxu0 %v13853_v38 }
0x17a5   : > { %13855 = vmatprep.subr.bf16.mxu0 %v14708_v15 }
0x17a6   : > { %v13856_v10 = vpack.c.bf16 %v10862_v50, %v10861_v34 }
0x17a8   : > { %13857 = vmatpush3.bf16.msra.mxu0 %v13856_v10 }
0x17ab   : > { %12998 = vmatmul.mubr.msk.f32.vlgmr.msra.gmra.mrb[112].mxu0 %vm5043_vm15, %v10863_v33 }
0x187e   : > { %v10933_v22 = vpop.f32.mrb[112].mxu0 }
0x187f   : > { %v10938_v40 = vmul.f32 %v10937_v13, %v10933_v22  ;;  %v12999_v35 = vpop.f32.mrb[113].mxu0 }
0x1881   : > { %v10940_v21 = vadd.f32 %v10939_v52, %v10938_v40 }
0x1883   : > { %10942 = vst.msk [vmem:[%s1182_s0] sm:$0x1] %vm10941_vm7, %v10940_v21 }
0x1884 PF: > { %s93_s22 = sadd.s32 1, %s14658_s22  }
0x1885   : > { %p90_p4 = scmp.ge.s32.totalorder %s93_s22, 4  }
0x1887   :  { %92 = sbr.rel (!%p90_p4) target bundleno = 83 (0x53), region = 273 }

</bundles_post_ra>
